<compile_context>
chip_gen: v6e
topology: v6e:2x2x1
jax: 0.10.0
libtpu: 0.0.40
codegen_flags: <defaults>
</compile_context>

<pallas_src>
import functools

import jax
import jax.numpy as jnp
from jax.experimental import pallas as pl
from jax.experimental.pallas import tpu as pltpu

EPS = 1e-5  # PyTorch BatchNorm default eps


# ----------------------------------------------------------------------------
# Fused DenseBlock kernel (one grid step == one image of the batch)
# ----------------------------------------------------------------------------
def _dense_block_kernel(x_ref, *refs, num_layers, c_in, growth, hidden, H, W):
    """refs = [s1, t1, w1, s2, t2, w2] * num_layers, out_ref, apad_scratch."""
    o_ref = refs[6 * num_layers]
    apad_ref = refs[6 * num_layers + 1]
    HW = H * W

    # Zero the padded 3x3-conv staging buffer once per grid step; the interior is
    # overwritten every layer, the 1-pixel border stays zero (== conv padding=1).
    apad_ref[...] = jnp.zeros_like(apad_ref)

    # Running DenseNet concat state, kept on-chip for the whole block.
    feat = x_ref[0].astype(jnp.float32)                      # (H, W, c_in)

    for i in range(num_layers):
        s1_ref, t1_ref, w1_ref, s2_ref, t2_ref, w2_ref = refs[6 * i: 6 * i + 6]
        cin = c_in + i * growth

        # ---- BN1 (folded) + ReLU, 1x1 conv on the MXU, fused BN2 + ReLU epilogue ----
        xm = feat.reshape(HW, cin)
        a1 = jnp.maximum(xm * s1_ref[...] + t1_ref[...], 0.0)          # f32 (VPU)
        h = jnp.dot(a1.astype(jnp.bfloat16), w1_ref[...],
                    preferred_element_type=jnp.float32)                # (HW, hidden)
        a2 = jnp.maximum(h * s2_ref[...] + t2_ref[...], 0.0)           # f32

        # ---- 3x3 conv (padding=1) via the padded VMEM buffer + 9 tap matmuls ----
        apad_ref[1:H + 1, 1:W + 1, :] = a2.reshape(H, W, hidden)
        ap = apad_ref[...]                                             # (H+2, W+2, hidden)
        g = jnp.zeros((HW, growth), jnp.float32)
        for dh in range(3):
            for dw in range(3):
                patch = ap[dh:dh + H, dw:dw + W, :].reshape(HW, hidden)
                g = g + jnp.dot(patch.astype(jnp.bfloat16),
                                w2_ref[dh * 3 + dw],
                                preferred_element_type=jnp.float32)

        # torch.cat([out, x], dim=1): new features in front, previous ones behind.
        feat = jnp.concatenate([g.reshape(H, W, growth), feat], axis=-1)

    o_ref[0] = feat.astype(o_ref.dtype)


# ----------------------------------------------------------------------------
# Wrapper
# ----------------------------------------------------------------------------
def _bn_fold(bn):
    """Fold inference-mode BatchNorm into per-channel (scale, shift)."""
    s = bn["gamma"] / jnp.sqrt(bn["var"] + EPS)
    t = bn["beta"] - bn["mean"] * s
    return s.astype(jnp.float32), t.astype(jnp.float32)


_map2 = lambda n: (0, 0)
_map3 = lambda n: (0, 0, 0)


def dense_block_forward(x_nchw, layers):
    """x_nchw: (N, C_in, H, W).  layers: list of per-DenseLayer params.  Returns NCHW."""
    x = jnp.transpose(x_nchw, (0, 2, 3, 1)).astype(jnp.float32)        # NHWC
    N, H, W, c_in = x.shape
    L = len(layers)
    hidden = layers[0]["w1"].shape[1]                                  # bn_size * growth
    growth = layers[0]["w2"].shape[2]
    c_total = c_in + L * growth

    inputs = [x]
    in_specs = [pl.BlockSpec((1, H, W, c_in), lambda n: (n, 0, 0, 0))]

    def _bcast_spec(arr):
        return pl.BlockSpec(arr.shape, _map2 if arr.ndim == 2 else _map3)

    for lp in layers:
        s1, t1 = _bn_fold(lp["bn1"])
        s2, t2 = _bn_fold(lp["bn2"])
        cin = lp["w1"].shape[0]
        per_layer = [
            s1.reshape(1, cin), t1.reshape(1, cin),
            lp["w1"].astype(jnp.bfloat16),                 # (cin, hidden)  1x1 conv
            s2.reshape(1, hidden), t2.reshape(1, hidden),
            lp["w2"].astype(jnp.bfloat16),                 # (9, hidden, growth) 3x3 conv taps
        ]
        inputs += per_layer
        in_specs += [_bcast_spec(a) for a in per_layer]

    kernel = functools.partial(_dense_block_kernel, num_layers=L, c_in=c_in,
                               growth=growth, hidden=hidden, H=H, W=W)
    out = pl.pallas_call(
        kernel,
        out_shape=jax.ShapeDtypeStruct((N, H, W, c_total), jnp.float32),
        grid=(N,),
        in_specs=in_specs,
        out_specs=pl.BlockSpec((1, H, W, c_total), lambda n: (n, 0, 0, 0)),
        scratch_shapes=[pltpu.VMEM((H + 2, W + 2, hidden), jnp.float32)],
        compiler_params=pltpu.CompilerParams(dimension_semantics=("parallel",)),
    )(*inputs)
    return jnp.transpose(out, (0, 3, 1, 2))                            # back to NCHW


# ----------------------------------------------------------------------------
# Pure-JAX reference (same math, same bf16 matmul operands) for validation
# ----------------------------------------------------------------------------
def dense_block_reference(x_nchw, layers):
    x = jnp.transpose(x_nchw, (0, 2, 3, 1)).astype(jnp.float32)
    for lp in layers:
        N, H, W, cin = x.shape
        hidden = lp["w1"].shape[1]
        growth = lp["w2"].shape[2]
        s1, t1 = _bn_fold(lp["bn1"])
        s2, t2 = _bn_fold(lp["bn2"])
        a1 = jnp.maximum(x.reshape(-1, cin) * s1 + t1, 0.0)
        h = jnp.dot(a1.astype(jnp.bfloat16), lp["w1"].astype(jnp.bfloat16),
                    preferred_element_type=jnp.float32)
        a2 = jnp.maximum(h * s2 + t2, 0.0).reshape(N, H, W, hidden)
        a2p = jnp.pad(a2, ((0, 0), (1, 1), (1, 1), (0, 0)))
        g = jnp.zeros((N * H * W, growth), jnp.float32)
        for dh in range(3):
            for dw in range(3):
                patch = a2p[:, dh:dh + H, dw:dw + W, :].reshape(-1, hidden)
                g = g + jnp.dot(patch.astype(jnp.bfloat16),
                                lp["w2"][dh * 3 + dw].astype(jnp.bfloat16),
                                preferred_element_type=jnp.float32)
        x = jnp.concatenate([g.reshape(N, H, W, growth), x], axis=-1)
    return jnp.transpose(x, (0, 3, 1, 2))


# ----------------------------------------------------------------------------
# Deterministic parameter initialization (shapes follow DenseLayer.__init__)
# ----------------------------------------------------------------------------
def _init_bn(key, c):
    kg, kb, km, kv = jax.random.split(key, 4)
    return dict(
        gamma=jax.random.uniform(kg, (c,), jnp.float32, 0.5, 1.5),
        beta=0.1 * jax.random.normal(kb, (c,), jnp.float32),
        mean=0.1 * jax.random.normal(km, (c,), jnp.float32),
        var=jax.random.uniform(kv, (c,), jnp.float32, 0.5, 1.5),
    )


def init_dense_block_params(key, c_in, num_layers, bn_size, growth_rate):
    hidden = bn_size * growth_rate
    layers = []
    for i in range(num_layers):
        cin = c_in + i * growth_rate
        key, kw1, kw2, kbn1, kbn2 = jax.random.split(key, 5)
        # kaiming_normal (relu) init; weights stored as matmul matrices:
        #   w1: (cin, hidden) for the 1x1 conv, w2: (9, hidden, growth) taps (dh, dw).
        w1 = (2.0 / cin) ** 0.5 * jax.random.normal(kw1, (cin, hidden), jnp.float32)
        w2 = (2.0 / (9 * hidden)) ** 0.5 * jax.random.normal(
            kw2, (9, hidden, growth_rate), jnp.float32)
        layers.append(dict(w1=w1, w2=w2, bn1=_init_bn(kbn1, cin), bn2=_init_bn(kbn2, hidden)))
    return layers


# ----------------------------------------------------------------------------
if __name__ == "__main__":
    key = jax.random.PRNGKey(0)
    kx, kp = jax.random.split(key)

    N, C_IN, H, W = 2, 16, 16, 16
    NUM_LAYERS, BN_SIZE, GROWTH = 4, 2, 8          # DenseBlock(c_in=16, num_layers=4, bn_size=2, growth_rate=8, act_fn=ReLU)

    layers = init_dense_block_params(kp, C_IN, NUM_LAYERS, BN_SIZE, GROWTH)
    x = jax.random.normal(kx, (N, C_IN, H, W), jnp.float32)

    out = jax.jit(dense_block_forward)(x, layers)
    out = jax.block_until_ready(out)

    assert out.shape == (N, C_IN + NUM_LAYERS * GROWTH, H, W)
    assert bool(jnp.all(jnp.isfinite(out)))

    ref = dense_block_reference(x, layers)
    err = float(jnp.max(jnp.abs(out - ref)))
    assert err < 1e-2, f"mismatch vs reference: max abs err {err}"

    print("KERNEL_OK")
</pallas_src>

<mosaic_0001>
module attributes {stable_mosaic.version = 11 : i64} {
  func.func @_dense_block_kernel(%arg0: i32, %arg1: memref<1x16x16x16xf32, #tpu.memory_space<vmem>>, %arg2: memref<1x16xf32, #tpu.memory_space<vmem>>, %arg3: memref<1x16xf32, #tpu.memory_space<vmem>>, %arg4: memref<16x16xbf16, #tpu.memory_space<vmem>>, %arg5: memref<1x16xf32, #tpu.memory_space<vmem>>, %arg6: memref<1x16xf32, #tpu.memory_space<vmem>>, %arg7: memref<9x16x8xbf16, #tpu.memory_space<vmem>>, %arg8: memref<1x24xf32, #tpu.memory_space<vmem>>, %arg9: memref<1x24xf32, #tpu.memory_space<vmem>>, %arg10: memref<24x16xbf16, #tpu.memory_space<vmem>>, %arg11: memref<1x16xf32, #tpu.memory_space<vmem>>, %arg12: memref<1x16xf32, #tpu.memory_space<vmem>>, %arg13: memref<9x16x8xbf16, #tpu.memory_space<vmem>>, %arg14: memref<1x32xf32, #tpu.memory_space<vmem>>, %arg15: memref<1x32xf32, #tpu.memory_space<vmem>>, %arg16: memref<32x16xbf16, #tpu.memory_space<vmem>>, %arg17: memref<1x16xf32, #tpu.memory_space<vmem>>, %arg18: memref<1x16xf32, #tpu.memory_space<vmem>>, %arg19: memref<9x16x8xbf16, #tpu.memory_space<vmem>>, %arg20: memref<1x40xf32, #tpu.memory_space<vmem>>, %arg21: memref<1x40xf32, #tpu.memory_space<vmem>>, %arg22: memref<40x16xbf16, #tpu.memory_space<vmem>>, %arg23: memref<1x16xf32, #tpu.memory_space<vmem>>, %arg24: memref<1x16xf32, #tpu.memory_space<vmem>>, %arg25: memref<9x16x8xbf16, #tpu.memory_space<vmem>>, %arg26: memref<1x16x16x48xf32, #tpu.memory_space<vmem>>, %arg27: memref<18x18x16xf32, #tpu.memory_space<vmem>>) attributes {dimension_semantics = [#tpu.dimension_semantics<parallel>], iteration_bounds = array<i64: 2>, scalar_prefetch = 0 : i64, scratch_operands = 1 : i64, tpu.core_type = #tpu.core_type<tc>, window_params = [{transform_indices = @transform_0, window_bounds = array<i64: 1, 16, 16, 16>}, {pipeline_mode = #tpu.pipeline_mode<synchronous>, transform_indices = @transform_1, window_bounds = array<i64: 1, 16>}, {pipeline_mode = #tpu.pipeline_mode<synchronous>, transform_indices = @transform_2, window_bounds = array<i64: 1, 16>}, {pipeline_mode = #tpu.pipeline_mode<synchronous>, transform_indices = @transform_3, window_bounds = array<i64: 16, 16>}, {pipeline_mode = #tpu.pipeline_mode<synchronous>, transform_indices = @transform_4, window_bounds = array<i64: 1, 16>}, {pipeline_mode = #tpu.pipeline_mode<synchronous>, transform_indices = @transform_5, window_bounds = array<i64: 1, 16>}, {pipeline_mode = #tpu.pipeline_mode<synchronous>, transform_indices = @transform_6, window_bounds = array<i64: 9, 16, 8>}, {pipeline_mode = #tpu.pipeline_mode<synchronous>, transform_indices = @transform_7, window_bounds = array<i64: 1, 24>}, {pipeline_mode = #tpu.pipeline_mode<synchronous>, transform_indices = @transform_8, window_bounds = array<i64: 1, 24>}, {pipeline_mode = #tpu.pipeline_mode<synchronous>, transform_indices = @transform_9, window_bounds = array<i64: 24, 16>}, {pipeline_mode = #tpu.pipeline_mode<synchronous>, transform_indices = @transform_10, window_bounds = array<i64: 1, 16>}, {pipeline_mode = #tpu.pipeline_mode<synchronous>, transform_indices = @transform_11, window_bounds = array<i64: 1, 16>}, {pipeline_mode = #tpu.pipeline_mode<synchronous>, transform_indices = @transform_12, window_bounds = array<i64: 9, 16, 8>}, {pipeline_mode = #tpu.pipeline_mode<synchronous>, transform_indices = @transform_13, window_bounds = array<i64: 1, 32>}, {pipeline_mode = #tpu.pipeline_mode<synchronous>, transform_indices = @transform_14, window_bounds = array<i64: 1, 32>}, {pipeline_mode = #tpu.pipeline_mode<synchronous>, transform_indices = @transform_15, window_bounds = array<i64: 32, 16>}, {pipeline_mode = #tpu.pipeline_mode<synchronous>, transform_indices = @transform_16, window_bounds = array<i64: 1, 16>}, {pipeline_mode = #tpu.pipeline_mode<synchronous>, transform_indices = @transform_17, window_bounds = array<i64: 1, 16>}, {pipeline_mode = #tpu.pipeline_mode<synchronous>, transform_indices = @transform_18, window_bounds = array<i64: 9, 16, 8>}, {pipeline_mode = #tpu.pipeline_mode<synchronous>, transform_indices = @transform_19, window_bounds = array<i64: 1, 40>}, {pipeline_mode = #tpu.pipeline_mode<synchronous>, transform_indices = @transform_20, window_bounds = array<i64: 1, 40>}, {pipeline_mode = #tpu.pipeline_mode<synchronous>, transform_indices = @transform_21, window_bounds = array<i64: 40, 16>}, {pipeline_mode = #tpu.pipeline_mode<synchronous>, transform_indices = @transform_22, window_bounds = array<i64: 1, 16>}, {pipeline_mode = #tpu.pipeline_mode<synchronous>, transform_indices = @transform_23, window_bounds = array<i64: 1, 16>}, {pipeline_mode = #tpu.pipeline_mode<synchronous>, transform_indices = @transform_24, window_bounds = array<i64: 9, 16, 8>}, {transform_indices = @transform_25, window_bounds = array<i64: 1, 16, 16, 48>}]} {
    %cst = arith.constant 0.000000e+00 : f32
    %0 = vector.broadcast %cst : f32 to vector<18x18x16xf32>
    %c0 = arith.constant 0 : index
    %c0_0 = arith.constant 0 : index
    %c0_1 = arith.constant 0 : index
    %1 = vector.load %arg27[%c0, %c0_0, %c0_1] : memref<18x18x16xf32, #tpu.memory_space<vmem>>, vector<18x18x16xf32>
    tpu.vector_store %arg27[%c0, %c0_0, %c0_1], %0 {strides = array<i32>} : memref<18x18x16xf32, #tpu.memory_space<vmem>>, vector<18x18x16xf32>,
    %c0_2 = arith.constant 0 : index
    %c0_3 = arith.constant 0 : index
    %c0_4 = arith.constant 0 : index
    %c0_5 = arith.constant 0 : index
    %2 = vector.load %arg1[%c0_2, %c0_3, %c0_4, %c0_5] : memref<1x16x16x16xf32, #tpu.memory_space<vmem>>, vector<1x16x16x16xf32>
    %3 = vector.shape_cast %2 : vector<1x16x16x16xf32> to vector<16x16x16xf32>
    %4 = vector.shape_cast %3 : vector<16x16x16xf32> to vector<256x16xf32>
    %c0_6 = arith.constant 0 : index
    %c0_7 = arith.constant 0 : index
    %5 = vector.load %arg2[%c0_6, %c0_7] : memref<1x16xf32, #tpu.memory_space<vmem>>, vector<1x16xf32>
    %6 = vector.broadcast %5 : vector<1x16xf32> to vector<256x16xf32>
    %7 = arith.mulf %4, %6 : vector<256x16xf32>
    %c0_8 = arith.constant 0 : index
    %c0_9 = arith.constant 0 : index
    %8 = vector.load %arg3[%c0_8, %c0_9] : memref<1x16xf32, #tpu.memory_space<vmem>>, vector<1x16xf32>
    %9 = vector.broadcast %8 : vector<1x16xf32> to vector<256x16xf32>
    %10 = arith.addf %7, %9 : vector<256x16xf32>
    %cst_10 = arith.constant 0.000000e+00 : f32
    %11 = vector.broadcast %cst_10 : f32 to vector<256x16xf32>
    %12 = arith.maximumf %10, %11 : vector<256x16xf32>
    %13 = arith.truncf %12 : vector<256x16xf32> to vector<256x16xbf16>
    %c0_11 = arith.constant 0 : index
    %c0_12 = arith.constant 0 : index
    %14 = vector.load %arg4[%c0_11, %c0_12] : memref<16x16xbf16, #tpu.memory_space<vmem>>, vector<16x16xbf16>
    %cst_13 = arith.constant dense<0.000000e+00> : vector<256x16xf32>
    %15 = tpu.matmul %13, %14, %cst_13 {dimension_numbers = #tpu.dot_dimension_numbers<[1], [0], [0], [1], [0, 0, 1, 1], [], []>} : vector<256x16xbf16>, vector<16x16xbf16>, vector<256x16xf32> -> vector<256x16xf32>
    %c0_14 = arith.constant 0 : index
    %c0_15 = arith.constant 0 : index
    %16 = vector.load %arg5[%c0_14, %c0_15] : memref<1x16xf32, #tpu.memory_space<vmem>>, vector<1x16xf32>
    %17 = vector.broadcast %16 : vector<1x16xf32> to vector<256x16xf32>
    %18 = arith.mulf %15, %17 : vector<256x16xf32>
    %c0_16 = arith.constant 0 : index
    %c0_17 = arith.constant 0 : index
    %19 = vector.load %arg6[%c0_16, %c0_17] : memref<1x16xf32, #tpu.memory_space<vmem>>, vector<1x16xf32>
    %20 = vector.broadcast %19 : vector<1x16xf32> to vector<256x16xf32>
    %21 = arith.addf %18, %20 : vector<256x16xf32>
    %cst_18 = arith.constant 0.000000e+00 : f32
    %22 = vector.broadcast %cst_18 : f32 to vector<256x16xf32>
    %23 = arith.maximumf %21, %22 : vector<256x16xf32>
    %24 = vector.shape_cast %23 : vector<256x16xf32> to vector<16x16x16xf32>
    %c1 = arith.constant 1 : index
    %c1_19 = arith.constant 1 : index
    %c0_20 = arith.constant 0 : index
    %25 = vector.load %arg27[%c1, %c1_19, %c0_20] : memref<18x18x16xf32, #tpu.memory_space<vmem>>, vector<16x16x16xf32>
    tpu.vector_store %arg27[%c1, %c1_19, %c0_20], %24 {strides = array<i32>} : memref<18x18x16xf32, #tpu.memory_space<vmem>>, vector<16x16x16xf32>,
    %c0_21 = arith.constant 0 : index
    %c0_22 = arith.constant 0 : index
    %c0_23 = arith.constant 0 : index
    %26 = vector.load %arg27[%c0_21, %c0_22, %c0_23] : memref<18x18x16xf32, #tpu.memory_space<vmem>>, vector<18x18x16xf32>
    %cst_24 = arith.constant 0.000000e+00 : f32
    %27 = vector.broadcast %cst_24 : f32 to vector<256x8xf32>
    %28 = vector.extract_strided_slice %26 {offsets = [0, 0, 0], sizes = [16, 16, 16], strides = [1, 1, 1]} : vector<18x18x16xf32> to vector<16x16x16xf32>
    %29 = vector.shape_cast %28 : vector<16x16x16xf32> to vector<256x16xf32>
    %30 = arith.truncf %29 : vector<256x16xf32> to vector<256x16xbf16>
    %c0_25 = arith.constant 0 : index
    %c0_26 = arith.constant 0 : index
    %c0_27 = arith.constant 0 : index
    %31 = vector.load %arg7[%c0_25, %c0_26, %c0_27] : memref<9x16x8xbf16, #tpu.memory_space<vmem>>, vector<1x16x8xbf16>
    %32 = vector.shape_cast %31 : vector<1x16x8xbf16> to vector<16x8xbf16>
    %cst_28 = arith.constant dense<0.000000e+00> : vector<256x8xf32>
    %33 = tpu.matmul %30, %32, %cst_28 {dimension_numbers = #tpu.dot_dimension_numbers<[1], [0], [0], [1], [0, 0, 1, 1], [], []>} : vector<256x16xbf16>, vector<16x8xbf16>, vector<256x8xf32> -> vector<256x8xf32>
    %34 = arith.addf %27, %33 : vector<256x8xf32>
    %35 = vector.extract_strided_slice %26 {offsets = [0, 1, 0], sizes = [16, 16, 16], strides = [1, 1, 1]} : vector<18x18x16xf32> to vector<16x16x16xf32>
    %36 = vector.shape_cast %35 : vector<16x16x16xf32> to vector<256x16xf32>
    %37 = arith.truncf %36 : vector<256x16xf32> to vector<256x16xbf16>
    %c1_29 = arith.constant 1 : index
    %c0_30 = arith.constant 0 : index
    %c0_31 = arith.constant 0 : index
    %38 = vector.load %arg7[%c1_29, %c0_30, %c0_31] : memref<9x16x8xbf16, #tpu.memory_space<vmem>>, vector<1x16x8xbf16>
    %39 = vector.shape_cast %38 : vector<1x16x8xbf16> to vector<16x8xbf16>
    %cst_32 = arith.constant dense<0.000000e+00> : vector<256x8xf32>
    %40 = tpu.matmul %37, %39, %cst_32 {dimension_numbers = #tpu.dot_dimension_numbers<[1], [0], [0], [1], [0, 0, 1, 1], [], []>} : vector<256x16xbf16>, vector<16x8xbf16>, vector<256x8xf32> -> vector<256x8xf32>
    %41 = arith.addf %34, %40 : vector<256x8xf32>
    %42 = vector.extract_strided_slice %26 {offsets = [0, 2, 0], sizes = [16, 16, 16], strides = [1, 1, 1]} : vector<18x18x16xf32> to vector<16x16x16xf32>
    %43 = vector.shape_cast %42 : vector<16x16x16xf32> to vector<256x16xf32>
    %44 = arith.truncf %43 : vector<256x16xf32> to vector<256x16xbf16>
    %c2 = arith.constant 2 : index
    %c0_33 = arith.constant 0 : index
    %c0_34 = arith.constant 0 : index
    %45 = vector.load %arg7[%c2, %c0_33, %c0_34] : memref<9x16x8xbf16, #tpu.memory_space<vmem>>, vector<1x16x8xbf16>
    %46 = vector.shape_cast %45 : vector<1x16x8xbf16> to vector<16x8xbf16>
    %cst_35 = arith.constant dense<0.000000e+00> : vector<256x8xf32>
    %47 = tpu.matmul %44, %46, %cst_35 {dimension_numbers = #tpu.dot_dimension_numbers<[1], [0], [0], [1], [0, 0, 1, 1], [], []>} : vector<256x16xbf16>, vector<16x8xbf16>, vector<256x8xf32> -> vector<256x8xf32>
    %48 = arith.addf %41, %47 : vector<256x8xf32>
    %49 = vector.extract_strided_slice %26 {offsets = [1, 0, 0], sizes = [16, 16, 16], strides = [1, 1, 1]} : vector<18x18x16xf32> to vector<16x16x16xf32>
    %50 = vector.shape_cast %49 : vector<16x16x16xf32> to vector<256x16xf32>
    %51 = arith.truncf %50 : vector<256x16xf32> to vector<256x16xbf16>
    %c3 = arith.constant 3 : index
    %c0_36 = arith.constant 0 : index
    %c0_37 = arith.constant 0 : index
    %52 = vector.load %arg7[%c3, %c0_36, %c0_37] : memref<9x16x8xbf16, #tpu.memory_space<vmem>>, vector<1x16x8xbf16>
    %53 = vector.shape_cast %52 : vector<1x16x8xbf16> to vector<16x8xbf16>
    %cst_38 = arith.constant dense<0.000000e+00> : vector<256x8xf32>
    %54 = tpu.matmul %51, %53, %cst_38 {dimension_numbers = #tpu.dot_dimension_numbers<[1], [0], [0], [1], [0, 0, 1, 1], [], []>} : vector<256x16xbf16>, vector<16x8xbf16>, vector<256x8xf32> -> vector<256x8xf32>
    %55 = arith.addf %48, %54 : vector<256x8xf32>
    %56 = vector.extract_strided_slice %26 {offsets = [1, 1, 0], sizes = [16, 16, 16], strides = [1, 1, 1]} : vector<18x18x16xf32> to vector<16x16x16xf32>
    %57 = vector.shape_cast %56 : vector<16x16x16xf32> to vector<256x16xf32>
    %58 = arith.truncf %57 : vector<256x16xf32> to vector<256x16xbf16>
    %c4 = arith.constant 4 : index
    %c0_39 = arith.constant 0 : index
    %c0_40 = arith.constant 0 : index
    %59 = vector.load %arg7[%c4, %c0_39, %c0_40] : memref<9x16x8xbf16, #tpu.memory_space<vmem>>, vector<1x16x8xbf16>
    %60 = vector.shape_cast %59 : vector<1x16x8xbf16> to vector<16x8xbf16>
    %cst_41 = arith.constant dense<0.000000e+00> : vector<256x8xf32>
    %61 = tpu.matmul %58, %60, %cst_41 {dimension_numbers = #tpu.dot_dimension_numbers<[1], [0], [0], [1], [0, 0, 1, 1], [], []>} : vector<256x16xbf16>, vector<16x8xbf16>, vector<256x8xf32> -> vector<256x8xf32>
    %62 = arith.addf %55, %61 : vector<256x8xf32>
    %63 = vector.extract_strided_slice %26 {offsets = [1, 2, 0], sizes = [16, 16, 16], strides = [1, 1, 1]} : vector<18x18x16xf32> to vector<16x16x16xf32>
    %64 = vector.shape_cast %63 : vector<16x16x16xf32> to vector<256x16xf32>
    %65 = arith.truncf %64 : vector<256x16xf32> to vector<256x16xbf16>
    %c5 = arith.constant 5 : index
    %c0_42 = arith.constant 0 : index
    %c0_43 = arith.constant 0 : index
    %66 = vector.load %arg7[%c5, %c0_42, %c0_43] : memref<9x16x8xbf16, #tpu.memory_space<vmem>>, vector<1x16x8xbf16>
    %67 = vector.shape_cast %66 : vector<1x16x8xbf16> to vector<16x8xbf16>
    %cst_44 = arith.constant dense<0.000000e+00> : vector<256x8xf32>
    %68 = tpu.matmul %65, %67, %cst_44 {dimension_numbers = #tpu.dot_dimension_numbers<[1], [0], [0], [1], [0, 0, 1, 1], [], []>} : vector<256x16xbf16>, vector<16x8xbf16>, vector<256x8xf32> -> vector<256x8xf32>
    %69 = arith.addf %62, %68 : vector<256x8xf32>
    %70 = vector.extract_strided_slice %26 {offsets = [2, 0, 0], sizes = [16, 16, 16], strides = [1, 1, 1]} : vector<18x18x16xf32> to vector<16x16x16xf32>
    %71 = vector.shape_cast %70 : vector<16x16x16xf32> to vector<256x16xf32>
    %72 = arith.truncf %71 : vector<256x16xf32> to vector<256x16xbf16>
    %c6 = arith.constant 6 : index
    %c0_45 = arith.constant 0 : index
    %c0_46 = arith.constant 0 : index
    %73 = vector.load %arg7[%c6, %c0_45, %c0_46] : memref<9x16x8xbf16, #tpu.memory_space<vmem>>, vector<1x16x8xbf16>
    %74 = vector.shape_cast %73 : vector<1x16x8xbf16> to vector<16x8xbf16>
    %cst_47 = arith.constant dense<0.000000e+00> : vector<256x8xf32>
    %75 = tpu.matmul %72, %74, %cst_47 {dimension_numbers = #tpu.dot_dimension_numbers<[1], [0], [0], [1], [0, 0, 1, 1], [], []>} : vector<256x16xbf16>, vector<16x8xbf16>, vector<256x8xf32> -> vector<256x8xf32>
    %76 = arith.addf %69, %75 : vector<256x8xf32>
    %77 = vector.extract_strided_slice %26 {offsets = [2, 1, 0], sizes = [16, 16, 16], strides = [1, 1, 1]} : vector<18x18x16xf32> to vector<16x16x16xf32>
    %78 = vector.shape_cast %77 : vector<16x16x16xf32> to vector<256x16xf32>
    %79 = arith.truncf %78 : vector<256x16xf32> to vector<256x16xbf16>
    %c7 = arith.constant 7 : index
    %c0_48 = arith.constant 0 : index
    %c0_49 = arith.constant 0 : index
    %80 = vector.load %arg7[%c7, %c0_48, %c0_49] : memref<9x16x8xbf16, #tpu.memory_space<vmem>>, vector<1x16x8xbf16>
    %81 = vector.shape_cast %80 : vector<1x16x8xbf16> to vector<16x8xbf16>
    %cst_50 = arith.constant dense<0.000000e+00> : vector<256x8xf32>
    %82 = tpu.matmul %79, %81, %cst_50 {dimension_numbers = #tpu.dot_dimension_numbers<[1], [0], [0], [1], [0, 0, 1, 1], [], []>} : vector<256x16xbf16>, vector<16x8xbf16>, vector<256x8xf32> -> vector<256x8xf32>
    %83 = arith.addf %76, %82 : vector<256x8xf32>
    %84 = vector.extract_strided_slice %26 {offsets = [2, 2, 0], sizes = [16, 16, 16], strides = [1, 1, 1]} : vector<18x18x16xf32> to vector<16x16x16xf32>
    %85 = vector.shape_cast %84 : vector<16x16x16xf32> to vector<256x16xf32>
    %86 = arith.truncf %85 : vector<256x16xf32> to vector<256x16xbf16>
    %c8 = arith.constant 8 : index
    %c0_51 = arith.constant 0 : index
    %c0_52 = arith.constant 0 : index
    %87 = vector.load %arg7[%c8, %c0_51, %c0_52] : memref<9x16x8xbf16, #tpu.memory_space<vmem>>, vector<1x16x8xbf16>
    %88 = vector.shape_cast %87 : vector<1x16x8xbf16> to vector<16x8xbf16>
    %cst_53 = arith.constant dense<0.000000e+00> : vector<256x8xf32>
    %89 = tpu.matmul %86, %88, %cst_53 {dimension_numbers = #tpu.dot_dimension_numbers<[1], [0], [0], [1], [0, 0, 1, 1], [], []>} : vector<256x16xbf16>, vector<16x8xbf16>, vector<256x8xf32> -> vector<256x8xf32>
    %90 = arith.addf %83, %89 : vector<256x8xf32>
    %91 = vector.shape_cast %90 : vector<256x8xf32> to vector<16x16x8xf32>
    %92 = tpu.concatenate %91, %3 in 2 : vector<16x16x8xf32>, vector<16x16x16xf32> -> vector<16x16x24xf32>
    %93 = vector.shape_cast %92 : vector<16x16x24xf32> to vector<256x24xf32>
    %c0_54 = arith.constant 0 : index
    %c0_55 = arith.constant 0 : index
    %94 = vector.load %arg8[%c0_54, %c0_55] : memref<1x24xf32, #tpu.memory_space<vmem>>, vector<1x24xf32>
    %95 = vector.broadcast %94 : vector<1x24xf32> to vector<256x24xf32>
    %96 = arith.mulf %93, %95 : vector<256x24xf32>
    %c0_56 = arith.constant 0 : index
    %c0_57 = arith.constant 0 : index
    %97 = vector.load %arg9[%c0_56, %c0_57] : memref<1x24xf32, #tpu.memory_space<vmem>>, vector<1x24xf32>
    %98 = vector.broadcast %97 : vector<1x24xf32> to vector<256x24xf32>
    %99 = arith.addf %96, %98 : vector<256x24xf32>
    %cst_58 = arith.constant 0.000000e+00 : f32
    %100 = vector.broadcast %cst_58 : f32 to vector<256x24xf32>
    %101 = arith.maximumf %99, %100 : vector<256x24xf32>
    %102 = arith.truncf %101 : vector<256x24xf32> to vector<256x24xbf16>
    %c0_59 = arith.constant 0 : index
    %c0_60 = arith.constant 0 : index
    %103 = vector.load %arg10[%c0_59, %c0_60] : memref<24x16xbf16, #tpu.memory_space<vmem>>, vector<24x16xbf16>
    %cst_61 = arith.constant dense<0.000000e+00> : vector<256x16xf32>
    %104 = tpu.matmul %102, %103, %cst_61 {dimension_numbers = #tpu.dot_dimension_numbers<[1], [0], [0], [1], [0, 0, 1, 1], [], []>} : vector<256x24xbf16>, vector<24x16xbf16>, vector<256x16xf32> -> vector<256x16xf32>
    %c0_62 = arith.constant 0 : index
    %c0_63 = arith.constant 0 : index
    %105 = vector.load %arg11[%c0_62, %c0_63] : memref<1x16xf32, #tpu.memory_space<vmem>>, vector<1x16xf32>
    %106 = vector.broadcast %105 : vector<1x16xf32> to vector<256x16xf32>
    %107 = arith.mulf %104, %106 : vector<256x16xf32>
    %c0_64 = arith.constant 0 : index
    %c0_65 = arith.constant 0 : index
    %108 = vector.load %arg12[%c0_64, %c0_65] : memref<1x16xf32, #tpu.memory_space<vmem>>, vector<1x16xf32>
    %109 = vector.broadcast %108 : vector<1x16xf32> to vector<256x16xf32>
    %110 = arith.addf %107, %109 : vector<256x16xf32>
    %cst_66 = arith.constant 0.000000e+00 : f32
    %111 = vector.broadcast %cst_66 : f32 to vector<256x16xf32>
    %112 = arith.maximumf %110, %111 : vector<256x16xf32>
    %113 = vector.shape_cast %112 : vector<256x16xf32> to vector<16x16x16xf32>
    %c1_67 = arith.constant 1 : index
    %c1_68 = arith.constant 1 : index
    %c0_69 = arith.constant 0 : index
    %114 = vector.load %arg27[%c1_67, %c1_68, %c0_69] : memref<18x18x16xf32, #tpu.memory_space<vmem>>, vector<16x16x16xf32>
    tpu.vector_store %arg27[%c1_67, %c1_68, %c0_69], %113 {strides = array<i32>} : memref<18x18x16xf32, #tpu.memory_space<vmem>>, vector<16x16x16xf32>,
    %c0_70 = arith.constant 0 : index
    %c0_71 = arith.constant 0 : index
    %c0_72 = arith.constant 0 : index
    %115 = vector.load %arg27[%c0_70, %c0_71, %c0_72] : memref<18x18x16xf32, #tpu.memory_space<vmem>>, vector<18x18x16xf32>
    %cst_73 = arith.constant 0.000000e+00 : f32
    %116 = vector.broadcast %cst_73 : f32 to vector<256x8xf32>
    %117 = vector.extract_strided_slice %115 {offsets = [0, 0, 0], sizes = [16, 16, 16], strides = [1, 1, 1]} : vector<18x18x16xf32> to vector<16x16x16xf32>
    %118 = vector.shape_cast %117 : vector<16x16x16xf32> to vector<256x16xf32>
    %119 = arith.truncf %118 : vector<256x16xf32> to vector<256x16xbf16>
    %c0_74 = arith.constant 0 : index
    %c0_75 = arith.constant 0 : index
    %c0_76 = arith.constant 0 : index
    %120 = vector.load %arg13[%c0_74, %c0_75, %c0_76] : memref<9x16x8xbf16, #tpu.memory_space<vmem>>, vector<1x16x8xbf16>
    %121 = vector.shape_cast %120 : vector<1x16x8xbf16> to vector<16x8xbf16>
    %cst_77 = arith.constant dense<0.000000e+00> : vector<256x8xf32>
    %122 = tpu.matmul %119, %121, %cst_77 {dimension_numbers = #tpu.dot_dimension_numbers<[1], [0], [0], [1], [0, 0, 1, 1], [], []>} : vector<256x16xbf16>, vector<16x8xbf16>, vector<256x8xf32> -> vector<256x8xf32>
    %123 = arith.addf %116, %122 : vector<256x8xf32>
    %124 = vector.extract_strided_slice %115 {offsets = [0, 1, 0], sizes = [16, 16, 16], strides = [1, 1, 1]} : vector<18x18x16xf32> to vector<16x16x16xf32>
    %125 = vector.shape_cast %124 : vector<16x16x16xf32> to vector<256x16xf32>
    %126 = arith.truncf %125 : vector<256x16xf32> to vector<256x16xbf16>
    %c1_78 = arith.constant 1 : index
    %c0_79 = arith.constant 0 : index
    %c0_80 = arith.constant 0 : index
    %127 = vector.load %arg13[%c1_78, %c0_79, %c0_80] : memref<9x16x8xbf16, #tpu.memory_space<vmem>>, vector<1x16x8xbf16>
    %128 = vector.shape_cast %127 : vector<1x16x8xbf16> to vector<16x8xbf16>
    %cst_81 = arith.constant dense<0.000000e+00> : vector<256x8xf32>
    %129 = tpu.matmul %126, %128, %cst_81 {dimension_numbers = #tpu.dot_dimension_numbers<[1], [0], [0], [1], [0, 0, 1, 1], [], []>} : vector<256x16xbf16>, vector<16x8xbf16>, vector<256x8xf32> -> vector<256x8xf32>
    %130 = arith.addf %123, %129 : vector<256x8xf32>
    %131 = vector.extract_strided_slice %115 {offsets = [0, 2, 0], sizes = [16, 16, 16], strides = [1, 1, 1]} : vector<18x18x16xf32> to vector<16x16x16xf32>
    %132 = vector.shape_cast %131 : vector<16x16x16xf32> to vector<256x16xf32>
    %133 = arith.truncf %132 : vector<256x16xf32> to vector<256x16xbf16>
    %c2_82 = arith.constant 2 : index
    %c0_83 = arith.constant 0 : index
    %c0_84 = arith.constant 0 : index
    %134 = vector.load %arg13[%c2_82, %c0_83, %c0_84] : memref<9x16x8xbf16, #tpu.memory_space<vmem>>, vector<1x16x8xbf16>
    %135 = vector.shape_cast %134 : vector<1x16x8xbf16> to vector<16x8xbf16>
    %cst_85 = arith.constant dense<0.000000e+00> : vector<256x8xf32>
    %136 = tpu.matmul %133, %135, %cst_85 {dimension_numbers = #tpu.dot_dimension_numbers<[1], [0], [0], [1], [0, 0, 1, 1], [], []>} : vector<256x16xbf16>, vector<16x8xbf16>, vector<256x8xf32> -> vector<256x8xf32>
    %137 = arith.addf %130, %136 : vector<256x8xf32>
    %138 = vector.extract_strided_slice %115 {offsets = [1, 0, 0], sizes = [16, 16, 16], strides = [1, 1, 1]} : vector<18x18x16xf32> to vector<16x16x16xf32>
    %139 = vector.shape_cast %138 : vector<16x16x16xf32> to vector<256x16xf32>
    %140 = arith.truncf %139 : vector<256x16xf32> to vector<256x16xbf16>
    %c3_86 = arith.constant 3 : index
    %c0_87 = arith.constant 0 : index
    %c0_88 = arith.constant 0 : index
    %141 = vector.load %arg13[%c3_86, %c0_87, %c0_88] : memref<9x16x8xbf16, #tpu.memory_space<vmem>>, vector<1x16x8xbf16>
    %142 = vector.shape_cast %141 : vector<1x16x8xbf16> to vector<16x8xbf16>
    %cst_89 = arith.constant dense<0.000000e+00> : vector<256x8xf32>
    %143 = tpu.matmul %140, %142, %cst_89 {dimension_numbers = #tpu.dot_dimension_numbers<[1], [0], [0], [1], [0, 0, 1, 1], [], []>} : vector<256x16xbf16>, vector<16x8xbf16>, vector<256x8xf32> -> vector<256x8xf32>
    %144 = arith.addf %137, %143 : vector<256x8xf32>
    %145 = vector.extract_strided_slice %115 {offsets = [1, 1, 0], sizes = [16, 16, 16], strides = [1, 1, 1]} : vector<18x18x16xf32> to vector<16x16x16xf32>
    %146 = vector.shape_cast %145 : vector<16x16x16xf32> to vector<256x16xf32>
    %147 = arith.truncf %146 : vector<256x16xf32> to vector<256x16xbf16>
    %c4_90 = arith.constant 4 : index
    %c0_91 = arith.constant 0 : index
    %c0_92 = arith.constant 0 : index
    %148 = vector.load %arg13[%c4_90, %c0_91, %c0_92] : memref<9x16x8xbf16, #tpu.memory_space<vmem>>, vector<1x16x8xbf16>
    %149 = vector.shape_cast %148 : vector<1x16x8xbf16> to vector<16x8xbf16>
    %cst_93 = arith.constant dense<0.000000e+00> : vector<256x8xf32>
    %150 = tpu.matmul %147, %149, %cst_93 {dimension_numbers = #tpu.dot_dimension_numbers<[1], [0], [0], [1], [0, 0, 1, 1], [], []>} : vector<256x16xbf16>, vector<16x8xbf16>, vector<256x8xf32> -> vector<256x8xf32>
    %151 = arith.addf %144, %150 : vector<256x8xf32>
    %152 = vector.extract_strided_slice %115 {offsets = [1, 2, 0], sizes = [16, 16, 16], strides = [1, 1, 1]} : vector<18x18x16xf32> to vector<16x16x16xf32>
    %153 = vector.shape_cast %152 : vector<16x16x16xf32> to vector<256x16xf32>
    %154 = arith.truncf %153 : vector<256x16xf32> to vector<256x16xbf16>
    %c5_94 = arith.constant 5 : index
    %c0_95 = arith.constant 0 : index
    %c0_96 = arith.constant 0 : index
    %155 = vector.load %arg13[%c5_94, %c0_95, %c0_96] : memref<9x16x8xbf16, #tpu.memory_space<vmem>>, vector<1x16x8xbf16>
    %156 = vector.shape_cast %155 : vector<1x16x8xbf16> to vector<16x8xbf16>
    %cst_97 = arith.constant dense<0.000000e+00> : vector<256x8xf32>
    %157 = tpu.matmul %154, %156, %cst_97 {dimension_numbers = #tpu.dot_dimension_numbers<[1], [0], [0], [1], [0, 0, 1, 1], [], []>} : vector<256x16xbf16>, vector<16x8xbf16>, vector<256x8xf32> -> vector<256x8xf32>
    %158 = arith.addf %151, %157 : vector<256x8xf32>
    %159 = vector.extract_strided_slice %115 {offsets = [2, 0, 0], sizes = [16, 16, 16], strides = [1, 1, 1]} : vector<18x18x16xf32> to vector<16x16x16xf32>
    %160 = vector.shape_cast %159 : vector<16x16x16xf32> to vector<256x16xf32>
    %161 = arith.truncf %160 : vector<256x16xf32> to vector<256x16xbf16>
    %c6_98 = arith.constant 6 : index
    %c0_99 = arith.constant 0 : index
    %c0_100 = arith.constant 0 : index
    %162 = vector.load %arg13[%c6_98, %c0_99, %c0_100] : memref<9x16x8xbf16, #tpu.memory_space<vmem>>, vector<1x16x8xbf16>
    %163 = vector.shape_cast %162 : vector<1x16x8xbf16> to vector<16x8xbf16>
    %cst_101 = arith.constant dense<0.000000e+00> : vector<256x8xf32>
    %164 = tpu.matmul %161, %163, %cst_101 {dimension_numbers = #tpu.dot_dimension_numbers<[1], [0], [0], [1], [0, 0, 1, 1], [], []>} : vector<256x16xbf16>, vector<16x8xbf16>, vector<256x8xf32> -> vector<256x8xf32>
    %165 = arith.addf %158, %164 : vector<256x8xf32>
    %166 = vector.extract_strided_slice %115 {offsets = [2, 1, 0], sizes = [16, 16, 16], strides = [1, 1, 1]} : vector<18x18x16xf32> to vector<16x16x16xf32>
    %167 = vector.shape_cast %166 : vector<16x16x16xf32> to vector<256x16xf32>
    %168 = arith.truncf %167 : vector<256x16xf32> to vector<256x16xbf16>
    %c7_102 = arith.constant 7 : index
    %c0_103 = arith.constant 0 : index
    %c0_104 = arith.constant 0 : index
    %169 = vector.load %arg13[%c7_102, %c0_103, %c0_104] : memref<9x16x8xbf16, #tpu.memory_space<vmem>>, vector<1x16x8xbf16>
    %170 = vector.shape_cast %169 : vector<1x16x8xbf16> to vector<16x8xbf16>
    %cst_105 = arith.constant dense<0.000000e+00> : vector<256x8xf32>
    %171 = tpu.matmul %168, %170, %cst_105 {dimension_numbers = #tpu.dot_dimension_numbers<[1], [0], [0], [1], [0, 0, 1, 1], [], []>} : vector<256x16xbf16>, vector<16x8xbf16>, vector<256x8xf32> -> vector<256x8xf32>
    %172 = arith.addf %165, %171 : vector<256x8xf32>
    %173 = vector.extract_strided_slice %115 {offsets = [2, 2, 0], sizes = [16, 16, 16], strides = [1, 1, 1]} : vector<18x18x16xf32> to vector<16x16x16xf32>
    %174 = vector.shape_cast %173 : vector<16x16x16xf32> to vector<256x16xf32>
    %175 = arith.truncf %174 : vector<256x16xf32> to vector<256x16xbf16>
    %c8_106 = arith.constant 8 : index
    %c0_107 = arith.constant 0 : index
    %c0_108 = arith.constant 0 : index
    %176 = vector.load %arg13[%c8_106, %c0_107, %c0_108] : memref<9x16x8xbf16, #tpu.memory_space<vmem>>, vector<1x16x8xbf16>
    %177 = vector.shape_cast %176 : vector<1x16x8xbf16> to vector<16x8xbf16>
    %cst_109 = arith.constant dense<0.000000e+00> : vector<256x8xf32>
    %178 = tpu.matmul %175, %177, %cst_109 {dimension_numbers = #tpu.dot_dimension_numbers<[1], [0], [0], [1], [0, 0, 1, 1], [], []>} : vector<256x16xbf16>, vector<16x8xbf16>, vector<256x8xf32> -> vector<256x8xf32>
    %179 = arith.addf %172, %178 : vector<256x8xf32>
    %180 = vector.shape_cast %179 : vector<256x8xf32> to vector<16x16x8xf32>
    %181 = tpu.concatenate %180, %92 in 2 : vector<16x16x8xf32>, vector<16x16x24xf32> -> vector<16x16x32xf32>
    %182 = vector.shape_cast %181 : vector<16x16x32xf32> to vector<256x32xf32>
    %c0_110 = arith.constant 0 : index
    %c0_111 = arith.constant 0 : index
    %183 = vector.load %arg14[%c0_110, %c0_111] : memref<1x32xf32, #tpu.memory_space<vmem>>, vector<1x32xf32>
    %184 = vector.broadcast %183 : vector<1x32xf32> to vector<256x32xf32>
    %185 = arith.mulf %182, %184 : vector<256x32xf32>
    %c0_112 = arith.constant 0 : index
    %c0_113 = arith.constant 0 : index
    %186 = vector.load %arg15[%c0_112, %c0_113] : memref<1x32xf32, #tpu.memory_space<vmem>>, vector<1x32xf32>
    %187 = vector.broadcast %186 : vector<1x32xf32> to vector<256x32xf32>
    %188 = arith.addf %185, %187 : vector<256x32xf32>
    %cst_114 = arith.constant 0.000000e+00 : f32
    %189 = vector.broadcast %cst_114 : f32 to vector<256x32xf32>
    %190 = arith.maximumf %188, %189 : vector<256x32xf32>
    %191 = arith.truncf %190 : vector<256x32xf32> to vector<256x32xbf16>
    %c0_115 = arith.constant 0 : index
    %c0_116 = arith.constant 0 : index
    %192 = vector.load %arg16[%c0_115, %c0_116] : memref<32x16xbf16, #tpu.memory_space<vmem>>, vector<32x16xbf16>
    %cst_117 = arith.constant dense<0.000000e+00> : vector<256x16xf32>
    %193 = tpu.matmul %191, %192, %cst_117 {dimension_numbers = #tpu.dot_dimension_numbers<[1], [0], [0], [1], [0, 0, 1, 1], [], []>} : vector<256x32xbf16>, vector<32x16xbf16>, vector<256x16xf32> -> vector<256x16xf32>
    %c0_118 = arith.constant 0 : index
    %c0_119 = arith.constant 0 : index
    %194 = vector.load %arg17[%c0_118, %c0_119] : memref<1x16xf32, #tpu.memory_space<vmem>>, vector<1x16xf32>
    %195 = vector.broadcast %194 : vector<1x16xf32> to vector<256x16xf32>
    %196 = arith.mulf %193, %195 : vector<256x16xf32>
    %c0_120 = arith.constant 0 : index
    %c0_121 = arith.constant 0 : index
    %197 = vector.load %arg18[%c0_120, %c0_121] : memref<1x16xf32, #tpu.memory_space<vmem>>, vector<1x16xf32>
    %198 = vector.broadcast %197 : vector<1x16xf32> to vector<256x16xf32>
    %199 = arith.addf %196, %198 : vector<256x16xf32>
    %cst_122 = arith.constant 0.000000e+00 : f32
    %200 = vector.broadcast %cst_122 : f32 to vector<256x16xf32>
    %201 = arith.maximumf %199, %200 : vector<256x16xf32>
    %202 = vector.shape_cast %201 : vector<256x16xf32> to vector<16x16x16xf32>
    %c1_123 = arith.constant 1 : index
    %c1_124 = arith.constant 1 : index
    %c0_125 = arith.constant 0 : index
    %203 = vector.load %arg27[%c1_123, %c1_124, %c0_125] : memref<18x18x16xf32, #tpu.memory_space<vmem>>, vector<16x16x16xf32>
    tpu.vector_store %arg27[%c1_123, %c1_124, %c0_125], %202 {strides = array<i32>} : memref<18x18x16xf32, #tpu.memory_space<vmem>>, vector<16x16x16xf32>,
    %c0_126 = arith.constant 0 : index
    %c0_127 = arith.constant 0 : index
    %c0_128 = arith.constant 0 : index
    %204 = vector.load %arg27[%c0_126, %c0_127, %c0_128] : memref<18x18x16xf32, #tpu.memory_space<vmem>>, vector<18x18x16xf32>
    %cst_129 = arith.constant 0.000000e+00 : f32
    %205 = vector.broadcast %cst_129 : f32 to vector<256x8xf32>
    %206 = vector.extract_strided_slice %204 {offsets = [0, 0, 0], sizes = [16, 16, 16], strides = [1, 1, 1]} : vector<18x18x16xf32> to vector<16x16x16xf32>
    %207 = vector.shape_cast %206 : vector<16x16x16xf32> to vector<256x16xf32>
    %208 = arith.truncf %207 : vector<256x16xf32> to vector<256x16xbf16>
    %c0_130 = arith.constant 0 : index
    %c0_131 = arith.constant 0 : index
    %c0_132 = arith.constant 0 : index
    %209 = vector.load %arg19[%c0_130, %c0_131, %c0_132] : memref<9x16x8xbf16, #tpu.memory_space<vmem>>, vector<1x16x8xbf16>
    %210 = vector.shape_cast %209 : vector<1x16x8xbf16> to vector<16x8xbf16>
    %cst_133 = arith.constant dense<0.000000e+00> : vector<256x8xf32>
    %211 = tpu.matmul %208, %210, %cst_133 {dimension_numbers = #tpu.dot_dimension_numbers<[1], [0], [0], [1], [0, 0, 1, 1], [], []>} : vector<256x16xbf16>, vector<16x8xbf16>, vector<256x8xf32> -> vector<256x8xf32>
    %212 = arith.addf %205, %211 : vector<256x8xf32>
    %213 = vector.extract_strided_slice %204 {offsets = [0, 1, 0], sizes = [16, 16, 16], strides = [1, 1, 1]} : vector<18x18x16xf32> to vector<16x16x16xf32>
    %214 = vector.shape_cast %213 : vector<16x16x16xf32> to vector<256x16xf32>
    %215 = arith.truncf %214 : vector<256x16xf32> to vector<256x16xbf16>
    %c1_134 = arith.constant 1 : index
    %c0_135 = arith.constant 0 : index
    %c0_136 = arith.constant 0 : index
    %216 = vector.load %arg19[%c1_134, %c0_135, %c0_136] : memref<9x16x8xbf16, #tpu.memory_space<vmem>>, vector<1x16x8xbf16>
    %217 = vector.shape_cast %216 : vector<1x16x8xbf16> to vector<16x8xbf16>
    %cst_137 = arith.constant dense<0.000000e+00> : vector<256x8xf32>
    %218 = tpu.matmul %215, %217, %cst_137 {dimension_numbers = #tpu.dot_dimension_numbers<[1], [0], [0], [1], [0, 0, 1, 1], [], []>} : vector<256x16xbf16>, vector<16x8xbf16>, vector<256x8xf32> -> vector<256x8xf32>
    %219 = arith.addf %212, %218 : vector<256x8xf32>
    %220 = vector.extract_strided_slice %204 {offsets = [0, 2, 0], sizes = [16, 16, 16], strides = [1, 1, 1]} : vector<18x18x16xf32> to vector<16x16x16xf32>
    %221 = vector.shape_cast %220 : vector<16x16x16xf32> to vector<256x16xf32>
    %222 = arith.truncf %221 : vector<256x16xf32> to vector<256x16xbf16>
    %c2_138 = arith.constant 2 : index
    %c0_139 = arith.constant 0 : index
    %c0_140 = arith.constant 0 : index
    %223 = vector.load %arg19[%c2_138, %c0_139, %c0_140] : memref<9x16x8xbf16, #tpu.memory_space<vmem>>, vector<1x16x8xbf16>
    %224 = vector.shape_cast %223 : vector<1x16x8xbf16> to vector<16x8xbf16>
    %cst_141 = arith.constant dense<0.000000e+00> : vector<256x8xf32>
    %225 = tpu.matmul %222, %224, %cst_141 {dimension_numbers = #tpu.dot_dimension_numbers<[1], [0], [0], [1], [0, 0, 1, 1], [], []>} : vector<256x16xbf16>, vector<16x8xbf16>, vector<256x8xf32> -> vector<256x8xf32>
    %226 = arith.addf %219, %225 : vector<256x8xf32>
    %227 = vector.extract_strided_slice %204 {offsets = [1, 0, 0], sizes = [16, 16, 16], strides = [1, 1, 1]} : vector<18x18x16xf32> to vector<16x16x16xf32>
    %228 = vector.shape_cast %227 : vector<16x16x16xf32> to vector<256x16xf32>
    %229 = arith.truncf %228 : vector<256x16xf32> to vector<256x16xbf16>
    %c3_142 = arith.constant 3 : index
    %c0_143 = arith.constant 0 : index
    %c0_144 = arith.constant 0 : index
    %230 = vector.load %arg19[%c3_142, %c0_143, %c0_144] : memref<9x16x8xbf16, #tpu.memory_space<vmem>>, vector<1x16x8xbf16>
    %231 = vector.shape_cast %230 : vector<1x16x8xbf16> to vector<16x8xbf16>
    %cst_145 = arith.constant dense<0.000000e+00> : vector<256x8xf32>
    %232 = tpu.matmul %229, %231, %cst_145 {dimension_numbers = #tpu.dot_dimension_numbers<[1], [0], [0], [1], [0, 0, 1, 1], [], []>} : vector<256x16xbf16>, vector<16x8xbf16>, vector<256x8xf32> -> vector<256x8xf32>
    %233 = arith.addf %226, %232 : vector<256x8xf32>
    %234 = vector.extract_strided_slice %204 {offsets = [1, 1, 0], sizes = [16, 16, 16], strides = [1, 1, 1]} : vector<18x18x16xf32> to vector<16x16x16xf32>
    %235 = vector.shape_cast %234 : vector<16x16x16xf32> to vector<256x16xf32>
    %236 = arith.truncf %235 : vector<256x16xf32> to vector<256x16xbf16>
    %c4_146 = arith.constant 4 : index
    %c0_147 = arith.constant 0 : index
    %c0_148 = arith.constant 0 : index
    %237 = vector.load %arg19[%c4_146, %c0_147, %c0_148] : memref<9x16x8xbf16, #tpu.memory_space<vmem>>, vector<1x16x8xbf16>
    %238 = vector.shape_cast %237 : vector<1x16x8xbf16> to vector<16x8xbf16>
    %cst_149 = arith.constant dense<0.000000e+00> : vector<256x8xf32>
    %239 = tpu.matmul %236, %238, %cst_149 {dimension_numbers = #tpu.dot_dimension_numbers<[1], [0], [0], [1], [0, 0, 1, 1], [], []>} : vector<256x16xbf16>, vector<16x8xbf16>, vector<256x8xf32> -> vector<256x8xf32>
    %240 = arith.addf %233, %239 : vector<256x8xf32>
    %241 = vector.extract_strided_slice %204 {offsets = [1, 2, 0], sizes = [16, 16, 16], strides = [1, 1, 1]} : vector<18x18x16xf32> to vector<16x16x16xf32>
    %242 = vector.shape_cast %241 : vector<16x16x16xf32> to vector<256x16xf32>
    %243 = arith.truncf %242 : vector<256x16xf32> to vector<256x16xbf16>
    %c5_150 = arith.constant 5 : index
    %c0_151 = arith.constant 0 : index
    %c0_152 = arith.constant 0 : index
    %244 = vector.load %arg19[%c5_150, %c0_151, %c0_152] : memref<9x16x8xbf16, #tpu.memory_space<vmem>>, vector<1x16x8xbf16>
    %245 = vector.shape_cast %244 : vector<1x16x8xbf16> to vector<16x8xbf16>
    %cst_153 = arith.constant dense<0.000000e+00> : vector<256x8xf32>
    %246 = tpu.matmul %243, %245, %cst_153 {dimension_numbers = #tpu.dot_dimension_numbers<[1], [0], [0], [1], [0, 0, 1, 1], [], []>} : vector<256x16xbf16>, vector<16x8xbf16>, vector<256x8xf32> -> vector<256x8xf32>
    %247 = arith.addf %240, %246 : vector<256x8xf32>
    %248 = vector.extract_strided_slice %204 {offsets = [2, 0, 0], sizes = [16, 16, 16], strides = [1, 1, 1]} : vector<18x18x16xf32> to vector<16x16x16xf32>
    %249 = vector.shape_cast %248 : vector<16x16x16xf32> to vector<256x16xf32>
    %250 = arith.truncf %249 : vector<256x16xf32> to vector<256x16xbf16>
    %c6_154 = arith.constant 6 : index
    %c0_155 = arith.constant 0 : index
    %c0_156 = arith.constant 0 : index
    %251 = vector.load %arg19[%c6_154, %c0_155, %c0_156] : memref<9x16x8xbf16, #tpu.memory_space<vmem>>, vector<1x16x8xbf16>
    %252 = vector.shape_cast %251 : vector<1x16x8xbf16> to vector<16x8xbf16>
    %cst_157 = arith.constant dense<0.000000e+00> : vector<256x8xf32>
    %253 = tpu.matmul %250, %252, %cst_157 {dimension_numbers = #tpu.dot_dimension_numbers<[1], [0], [0], [1], [0, 0, 1, 1], [], []>} : vector<256x16xbf16>, vector<16x8xbf16>, vector<256x8xf32> -> vector<256x8xf32>
    %254 = arith.addf %247, %253 : vector<256x8xf32>
    %255 = vector.extract_strided_slice %204 {offsets = [2, 1, 0], sizes = [16, 16, 16], strides = [1, 1, 1]} : vector<18x18x16xf32> to vector<16x16x16xf32>
    %256 = vector.shape_cast %255 : vector<16x16x16xf32> to vector<256x16xf32>
    %257 = arith.truncf %256 : vector<256x16xf32> to vector<256x16xbf16>
    %c7_158 = arith.constant 7 : index
    %c0_159 = arith.constant 0 : index
    %c0_160 = arith.constant 0 : index
    %258 = vector.load %arg19[%c7_158, %c0_159, %c0_160] : memref<9x16x8xbf16, #tpu.memory_space<vmem>>, vector<1x16x8xbf16>
    %259 = vector.shape_cast %258 : vector<1x16x8xbf16> to vector<16x8xbf16>
    %cst_161 = arith.constant dense<0.000000e+00> : vector<256x8xf32>
    %260 = tpu.matmul %257, %259, %cst_161 {dimension_numbers = #tpu.dot_dimension_numbers<[1], [0], [0], [1], [0, 0, 1, 1], [], []>} : vector<256x16xbf16>, vector<16x8xbf16>, vector<256x8xf32> -> vector<256x8xf32>
    %261 = arith.addf %254, %260 : vector<256x8xf32>
    %262 = vector.extract_strided_slice %204 {offsets = [2, 2, 0], sizes = [16, 16, 16], strides = [1, 1, 1]} : vector<18x18x16xf32> to vector<16x16x16xf32>
    %263 = vector.shape_cast %262 : vector<16x16x16xf32> to vector<256x16xf32>
    %264 = arith.truncf %263 : vector<256x16xf32> to vector<256x16xbf16>
    %c8_162 = arith.constant 8 : index
    %c0_163 = arith.constant 0 : index
    %c0_164 = arith.constant 0 : index
    %265 = vector.load %arg19[%c8_162, %c0_163, %c0_164] : memref<9x16x8xbf16, #tpu.memory_space<vmem>>, vector<1x16x8xbf16>
    %266 = vector.shape_cast %265 : vector<1x16x8xbf16> to vector<16x8xbf16>
    %cst_165 = arith.constant dense<0.000000e+00> : vector<256x8xf32>
    %267 = tpu.matmul %264, %266, %cst_165 {dimension_numbers = #tpu.dot_dimension_numbers<[1], [0], [0], [1], [0, 0, 1, 1], [], []>} : vector<256x16xbf16>, vector<16x8xbf16>, vector<256x8xf32> -> vector<256x8xf32>
    %268 = arith.addf %261, %267 : vector<256x8xf32>
    %269 = vector.shape_cast %268 : vector<256x8xf32> to vector<16x16x8xf32>
    %270 = tpu.concatenate %269, %181 in 2 : vector<16x16x8xf32>, vector<16x16x32xf32> -> vector<16x16x40xf32>
    %271 = vector.shape_cast %270 : vector<16x16x40xf32> to vector<256x40xf32>
    %c0_166 = arith.constant 0 : index
    %c0_167 = arith.constant 0 : index
    %272 = vector.load %arg20[%c0_166, %c0_167] : memref<1x40xf32, #tpu.memory_space<vmem>>, vector<1x40xf32>
    %273 = vector.broadcast %272 : vector<1x40xf32> to vector<256x40xf32>
    %274 = arith.mulf %271, %273 : vector<256x40xf32>
    %c0_168 = arith.constant 0 : index
    %c0_169 = arith.constant 0 : index
    %275 = vector.load %arg21[%c0_168, %c0_169] : memref<1x40xf32, #tpu.memory_space<vmem>>, vector<1x40xf32>
    %276 = vector.broadcast %275 : vector<1x40xf32> to vector<256x40xf32>
    %277 = arith.addf %274, %276 : vector<256x40xf32>
    %cst_170 = arith.constant 0.000000e+00 : f32
    %278 = vector.broadcast %cst_170 : f32 to vector<256x40xf32>
    %279 = arith.maximumf %277, %278 : vector<256x40xf32>
    %280 = arith.truncf %279 : vector<256x40xf32> to vector<256x40xbf16>
    %c0_171 = arith.constant 0 : index
    %c0_172 = arith.constant 0 : index
    %281 = vector.load %arg22[%c0_171, %c0_172] : memref<40x16xbf16, #tpu.memory_space<vmem>>, vector<40x16xbf16>
    %cst_173 = arith.constant dense<0.000000e+00> : vector<256x16xf32>
    %282 = tpu.matmul %280, %281, %cst_173 {dimension_numbers = #tpu.dot_dimension_numbers<[1], [0], [0], [1], [0, 0, 1, 1], [], []>} : vector<256x40xbf16>, vector<40x16xbf16>, vector<256x16xf32> -> vector<256x16xf32>
    %c0_174 = arith.constant 0 : index
    %c0_175 = arith.constant 0 : index
    %283 = vector.load %arg23[%c0_174, %c0_175] : memref<1x16xf32, #tpu.memory_space<vmem>>, vector<1x16xf32>
    %284 = vector.broadcast %283 : vector<1x16xf32> to vector<256x16xf32>
    %285 = arith.mulf %282, %284 : vector<256x16xf32>
    %c0_176 = arith.constant 0 : index
    %c0_177 = arith.constant 0 : index
    %286 = vector.load %arg24[%c0_176, %c0_177] : memref<1x16xf32, #tpu.memory_space<vmem>>, vector<1x16xf32>
    %287 = vector.broadcast %286 : vector<1x16xf32> to vector<256x16xf32>
    %288 = arith.addf %285, %287 : vector<256x16xf32>
    %cst_178 = arith.constant 0.000000e+00 : f32
    %289 = vector.broadcast %cst_178 : f32 to vector<256x16xf32>
    %290 = arith.maximumf %288, %289 : vector<256x16xf32>
    %291 = vector.shape_cast %290 : vector<256x16xf32> to vector<16x16x16xf32>
    %c1_179 = arith.constant 1 : index
    %c1_180 = arith.constant 1 : index
    %c0_181 = arith.constant 0 : index
    %292 = vector.load %arg27[%c1_179, %c1_180, %c0_181] : memref<18x18x16xf32, #tpu.memory_space<vmem>>, vector<16x16x16xf32>
    tpu.vector_store %arg27[%c1_179, %c1_180, %c0_181], %291 {strides = array<i32>} : memref<18x18x16xf32, #tpu.memory_space<vmem>>, vector<16x16x16xf32>,
    %c0_182 = arith.constant 0 : index
    %c0_183 = arith.constant 0 : index
    %c0_184 = arith.constant 0 : index
    %293 = vector.load %arg27[%c0_182, %c0_183, %c0_184] : memref<18x18x16xf32, #tpu.memory_space<vmem>>, vector<18x18x16xf32>
    %cst_185 = arith.constant 0.000000e+00 : f32
    %294 = vector.broadcast %cst_185 : f32 to vector<256x8xf32>
    %295 = vector.extract_strided_slice %293 {offsets = [0, 0, 0], sizes = [16, 16, 16], strides = [1, 1, 1]} : vector<18x18x16xf32> to vector<16x16x16xf32>
    %296 = vector.shape_cast %295 : vector<16x16x16xf32> to vector<256x16xf32>
    %297 = arith.truncf %296 : vector<256x16xf32> to vector<256x16xbf16>
    %c0_186 = arith.constant 0 : index
    %c0_187 = arith.constant 0 : index
    %c0_188 = arith.constant 0 : index
    %298 = vector.load %arg25[%c0_186, %c0_187, %c0_188] : memref<9x16x8xbf16, #tpu.memory_space<vmem>>, vector<1x16x8xbf16>
    %299 = vector.shape_cast %298 : vector<1x16x8xbf16> to vector<16x8xbf16>
    %cst_189 = arith.constant dense<0.000000e+00> : vector<256x8xf32>
    %300 = tpu.matmul %297, %299, %cst_189 {dimension_numbers = #tpu.dot_dimension_numbers<[1], [0], [0], [1], [0, 0, 1, 1], [], []>} : vector<256x16xbf16>, vector<16x8xbf16>, vector<256x8xf32> -> vector<256x8xf32>
    %301 = arith.addf %294, %300 : vector<256x8xf32>
    %302 = vector.extract_strided_slice %293 {offsets = [0, 1, 0], sizes = [16, 16, 16], strides = [1, 1, 1]} : vector<18x18x16xf32> to vector<16x16x16xf32>
    %303 = vector.shape_cast %302 : vector<16x16x16xf32> to vector<256x16xf32>
    %304 = arith.truncf %303 : vector<256x16xf32> to vector<256x16xbf16>
    %c1_190 = arith.constant 1 : index
    %c0_191 = arith.constant 0 : index
    %c0_192 = arith.constant 0 : index
    %305 = vector.load %arg25[%c1_190, %c0_191, %c0_192] : memref<9x16x8xbf16, #tpu.memory_space<vmem>>, vector<1x16x8xbf16>
    %306 = vector.shape_cast %305 : vector<1x16x8xbf16> to vector<16x8xbf16>
    %cst_193 = arith.constant dense<0.000000e+00> : vector<256x8xf32>
    %307 = tpu.matmul %304, %306, %cst_193 {dimension_numbers = #tpu.dot_dimension_numbers<[1], [0], [0], [1], [0, 0, 1, 1], [], []>} : vector<256x16xbf16>, vector<16x8xbf16>, vector<256x8xf32> -> vector<256x8xf32>
    %308 = arith.addf %301, %307 : vector<256x8xf32>
    %309 = vector.extract_strided_slice %293 {offsets = [0, 2, 0], sizes = [16, 16, 16], strides = [1, 1, 1]} : vector<18x18x16xf32> to vector<16x16x16xf32>
    %310 = vector.shape_cast %309 : vector<16x16x16xf32> to vector<256x16xf32>
    %311 = arith.truncf %310 : vector<256x16xf32> to vector<256x16xbf16>
    %c2_194 = arith.constant 2 : index
    %c0_195 = arith.constant 0 : index
    %c0_196 = arith.constant 0 : index
    %312 = vector.load %arg25[%c2_194, %c0_195, %c0_196] : memref<9x16x8xbf16, #tpu.memory_space<vmem>>, vector<1x16x8xbf16>
    %313 = vector.shape_cast %312 : vector<1x16x8xbf16> to vector<16x8xbf16>
    %cst_197 = arith.constant dense<0.000000e+00> : vector<256x8xf32>
    %314 = tpu.matmul %311, %313, %cst_197 {dimension_numbers = #tpu.dot_dimension_numbers<[1], [0], [0], [1], [0, 0, 1, 1], [], []>} : vector<256x16xbf16>, vector<16x8xbf16>, vector<256x8xf32> -> vector<256x8xf32>
    %315 = arith.addf %308, %314 : vector<256x8xf32>
    %316 = vector.extract_strided_slice %293 {offsets = [1, 0, 0], sizes = [16, 16, 16], strides = [1, 1, 1]} : vector<18x18x16xf32> to vector<16x16x16xf32>
    %317 = vector.shape_cast %316 : vector<16x16x16xf32> to vector<256x16xf32>
    %318 = arith.truncf %317 : vector<256x16xf32> to vector<256x16xbf16>
    %c3_198 = arith.constant 3 : index
    %c0_199 = arith.constant 0 : index
    %c0_200 = arith.constant 0 : index
    %319 = vector.load %arg25[%c3_198, %c0_199, %c0_200] : memref<9x16x8xbf16, #tpu.memory_space<vmem>>, vector<1x16x8xbf16>
    %320 = vector.shape_cast %319 : vector<1x16x8xbf16> to vector<16x8xbf16>
    %cst_201 = arith.constant dense<0.000000e+00> : vector<256x8xf32>
    %321 = tpu.matmul %318, %320, %cst_201 {dimension_numbers = #tpu.dot_dimension_numbers<[1], [0], [0], [1], [0, 0, 1, 1], [], []>} : vector<256x16xbf16>, vector<16x8xbf16>, vector<256x8xf32> -> vector<256x8xf32>
    %322 = arith.addf %315, %321 : vector<256x8xf32>
    %323 = vector.extract_strided_slice %293 {offsets = [1, 1, 0], sizes = [16, 16, 16], strides = [1, 1, 1]} : vector<18x18x16xf32> to vector<16x16x16xf32>
    %324 = vector.shape_cast %323 : vector<16x16x16xf32> to vector<256x16xf32>
    %325 = arith.truncf %324 : vector<256x16xf32> to vector<256x16xbf16>
    %c4_202 = arith.constant 4 : index
    %c0_203 = arith.constant 0 : index
    %c0_204 = arith.constant 0 : index
    %326 = vector.load %arg25[%c4_202, %c0_203, %c0_204] : memref<9x16x8xbf16, #tpu.memory_space<vmem>>, vector<1x16x8xbf16>
    %327 = vector.shape_cast %326 : vector<1x16x8xbf16> to vector<16x8xbf16>
    %cst_205 = arith.constant dense<0.000000e+00> : vector<256x8xf32>
    %328 = tpu.matmul %325, %327, %cst_205 {dimension_numbers = #tpu.dot_dimension_numbers<[1], [0], [0], [1], [0, 0, 1, 1], [], []>} : vector<256x16xbf16>, vector<16x8xbf16>, vector<256x8xf32> -> vector<256x8xf32>
    %329 = arith.addf %322, %328 : vector<256x8xf32>
    %330 = vector.extract_strided_slice %293 {offsets = [1, 2, 0], sizes = [16, 16, 16], strides = [1, 1, 1]} : vector<18x18x16xf32> to vector<16x16x16xf32>
    %331 = vector.shape_cast %330 : vector<16x16x16xf32> to vector<256x16xf32>
    %332 = arith.truncf %331 : vector<256x16xf32> to vector<256x16xbf16>
    %c5_206 = arith.constant 5 : index
    %c0_207 = arith.constant 0 : index
    %c0_208 = arith.constant 0 : index
    %333 = vector.load %arg25[%c5_206, %c0_207, %c0_208] : memref<9x16x8xbf16, #tpu.memory_space<vmem>>, vector<1x16x8xbf16>
    %334 = vector.shape_cast %333 : vector<1x16x8xbf16> to vector<16x8xbf16>
    %cst_209 = arith.constant dense<0.000000e+00> : vector<256x8xf32>
    %335 = tpu.matmul %332, %334, %cst_209 {dimension_numbers = #tpu.dot_dimension_numbers<[1], [0], [0], [1], [0, 0, 1, 1], [], []>} : vector<256x16xbf16>, vector<16x8xbf16>, vector<256x8xf32> -> vector<256x8xf32>
    %336 = arith.addf %329, %335 : vector<256x8xf32>
    %337 = vector.extract_strided_slice %293 {offsets = [2, 0, 0], sizes = [16, 16, 16], strides = [1, 1, 1]} : vector<18x18x16xf32> to vector<16x16x16xf32>
    %338 = vector.shape_cast %337 : vector<16x16x16xf32> to vector<256x16xf32>
    %339 = arith.truncf %338 : vector<256x16xf32> to vector<256x16xbf16>
    %c6_210 = arith.constant 6 : index
    %c0_211 = arith.constant 0 : index
    %c0_212 = arith.constant 0 : index
    %340 = vector.load %arg25[%c6_210, %c0_211, %c0_212] : memref<9x16x8xbf16, #tpu.memory_space<vmem>>, vector<1x16x8xbf16>
    %341 = vector.shape_cast %340 : vector<1x16x8xbf16> to vector<16x8xbf16>
    %cst_213 = arith.constant dense<0.000000e+00> : vector<256x8xf32>
    %342 = tpu.matmul %339, %341, %cst_213 {dimension_numbers = #tpu.dot_dimension_numbers<[1], [0], [0], [1], [0, 0, 1, 1], [], []>} : vector<256x16xbf16>, vector<16x8xbf16>, vector<256x8xf32> -> vector<256x8xf32>
    %343 = arith.addf %336, %342 : vector<256x8xf32>
    %344 = vector.extract_strided_slice %293 {offsets = [2, 1, 0], sizes = [16, 16, 16], strides = [1, 1, 1]} : vector<18x18x16xf32> to vector<16x16x16xf32>
    %345 = vector.shape_cast %344 : vector<16x16x16xf32> to vector<256x16xf32>
    %346 = arith.truncf %345 : vector<256x16xf32> to vector<256x16xbf16>
    %c7_214 = arith.constant 7 : index
    %c0_215 = arith.constant 0 : index
    %c0_216 = arith.constant 0 : index
    %347 = vector.load %arg25[%c7_214, %c0_215, %c0_216] : memref<9x16x8xbf16, #tpu.memory_space<vmem>>, vector<1x16x8xbf16>
    %348 = vector.shape_cast %347 : vector<1x16x8xbf16> to vector<16x8xbf16>
    %cst_217 = arith.constant dense<0.000000e+00> : vector<256x8xf32>
    %349 = tpu.matmul %346, %348, %cst_217 {dimension_numbers = #tpu.dot_dimension_numbers<[1], [0], [0], [1], [0, 0, 1, 1], [], []>} : vector<256x16xbf16>, vector<16x8xbf16>, vector<256x8xf32> -> vector<256x8xf32>
    %350 = arith.addf %343, %349 : vector<256x8xf32>
    %351 = vector.extract_strided_slice %293 {offsets = [2, 2, 0], sizes = [16, 16, 16], strides = [1, 1, 1]} : vector<18x18x16xf32> to vector<16x16x16xf32>
    %352 = vector.shape_cast %351 : vector<16x16x16xf32> to vector<256x16xf32>
    %353 = arith.truncf %352 : vector<256x16xf32> to vector<256x16xbf16>
    %c8_218 = arith.constant 8 : index
    %c0_219 = arith.constant 0 : index
    %c0_220 = arith.constant 0 : index
    %354 = vector.load %arg25[%c8_218, %c0_219, %c0_220] : memref<9x16x8xbf16, #tpu.memory_space<vmem>>, vector<1x16x8xbf16>
    %355 = vector.shape_cast %354 : vector<1x16x8xbf16> to vector<16x8xbf16>
    %cst_221 = arith.constant dense<0.000000e+00> : vector<256x8xf32>
    %356 = tpu.matmul %353, %355, %cst_221 {dimension_numbers = #tpu.dot_dimension_numbers<[1], [0], [0], [1], [0, 0, 1, 1], [], []>} : vector<256x16xbf16>, vector<16x8xbf16>, vector<256x8xf32> -> vector<256x8xf32>
    %357 = arith.addf %350, %356 : vector<256x8xf32>
    %358 = vector.shape_cast %357 : vector<256x8xf32> to vector<16x16x8xf32>
    %359 = tpu.concatenate %358, %270 in 2 : vector<16x16x8xf32>, vector<16x16x40xf32> -> vector<16x16x48xf32>
    %c0_222 = arith.constant 0 : index
    %c0_223 = arith.constant 0 : index
    %c0_224 = arith.constant 0 : index
    %c0_225 = arith.constant 0 : index
    %360 = vector.load %arg26[%c0_222, %c0_223, %c0_224, %c0_225] : memref<1x16x16x48xf32, #tpu.memory_space<vmem>>, vector<1x16x16x48xf32>
    %361 = vector.shape_cast %360 : vector<1x16x16x48xf32> to vector<16x16x48xf32>
    %362 = vector.shape_cast %359 : vector<16x16x48xf32> to vector<1x16x16x48xf32>
    tpu.vector_store %arg26[%c0_222, %c0_223, %c0_224, %c0_225], %362 {strides = array<i32>} : memref<1x16x16x48xf32, #tpu.memory_space<vmem>>, vector<1x16x16x48xf32>,
    return
  }
  func.func @transform_0(%arg0: i32) -> (i32, i32, i32, i32) {
    %c0_i32 = arith.constant 0 : i32
    %c0_i32_0 = arith.constant 0 : i32
    %c0_i32_1 = arith.constant 0 : i32
    %c0_i32_2 = arith.constant 0 : i32
    return %arg0, %c0_i32, %c0_i32_0, %c0_i32_1 : i32, i32, i32, i32
  }
  func.func @transform_1(%arg0: i32) -> (i32, i32) {
    %c0_i32 = arith.constant 0 : i32
    %c0_i32_0 = arith.constant 0 : i32
    %c0_i32_1 = arith.constant 0 : i32
    return %c0_i32, %c0_i32_0 : i32, i32
  }
  func.func @transform_2(%arg0: i32) -> (i32, i32) {
    %c0_i32 = arith.constant 0 : i32
    %c0_i32_0 = arith.constant 0 : i32
    %c0_i32_1 = arith.constant 0 : i32
    return %c0_i32, %c0_i32_0 : i32, i32
  }
  func.func @transform_3(%arg0: i32) -> (i32, i32) {
    %c0_i32 = arith.constant 0 : i32
    %c0_i32_0 = arith.constant 0 : i32
    %c0_i32_1 = arith.constant 0 : i32
    return %c0_i32, %c0_i32_0 : i32, i32
  }
  func.func @transform_4(%arg0: i32) -> (i32, i32) {
    %c0_i32 = arith.constant 0 : i32
    %c0_i32_0 = arith.constant 0 : i32
    %c0_i32_1 = arith.constant 0 : i32
    return %c0_i32, %c0_i32_0 : i32, i32
  }
  func.func @transform_5(%arg0: i32) -> (i32, i32) {
    %c0_i32 = arith.constant 0 : i32
    %c0_i32_0 = arith.constant 0 : i32
    %c0_i32_1 = arith.constant 0 : i32
    return %c0_i32, %c0_i32_0 : i32, i32
  }
  func.func @transform_6(%arg0: i32) -> (i32, i32, i32) {
    %c0_i32 = arith.constant 0 : i32
    %c0_i32_0 = arith.constant 0 : i32
    %c0_i32_1 = arith.constant 0 : i32
    %c0_i32_2 = arith.constant 0 : i32
    return %c0_i32, %c0_i32_0, %c0_i32_1 : i32, i32, i32
  }
  func.func @transform_7(%arg0: i32) -> (i32, i32) {
    %c0_i32 = arith.constant 0 : i32
    %c0_i32_0 = arith.constant 0 : i32
    %c0_i32_1 = arith.constant 0 : i32
    return %c0_i32, %c0_i32_0 : i32, i32
  }
  func.func @transform_8(%arg0: i32) -> (i32, i32) {
    %c0_i32 = arith.constant 0 : i32
    %c0_i32_0 = arith.constant 0 : i32
    %c0_i32_1 = arith.constant 0 : i32
    return %c0_i32, %c0_i32_0 : i32, i32
  }
  func.func @transform_9(%arg0: i32) -> (i32, i32) {
    %c0_i32 = arith.constant 0 : i32
    %c0_i32_0 = arith.constant 0 : i32
    %c0_i32_1 = arith.constant 0 : i32
    return %c0_i32, %c0_i32_0 : i32, i32
  }
  func.func @transform_10(%arg0: i32) -> (i32, i32) {
    %c0_i32 = arith.constant 0 : i32
    %c0_i32_0 = arith.constant 0 : i32
    %c0_i32_1 = arith.constant 0 : i32
    return %c0_i32, %c0_i32_0 : i32, i32
  }
  func.func @transform_11(%arg0: i32) -> (i32, i32) {
    %c0_i32 = arith.constant 0 : i32
    %c0_i32_0 = arith.constant 0 : i32
    %c0_i32_1 = arith.constant 0 : i32
    return %c0_i32, %c0_i32_0 : i32, i32
  }
  func.func @transform_12(%arg0: i32) -> (i32, i32, i32) {
    %c0_i32 = arith.constant 0 : i32
    %c0_i32_0 = arith.constant 0 : i32
    %c0_i32_1 = arith.constant 0 : i32
    %c0_i32_2 = arith.constant 0 : i32
    return %c0_i32, %c0_i32_0, %c0_i32_1 : i32, i32, i32
  }
  func.func @transform_13(%arg0: i32) -> (i32, i32) {
    %c0_i32 = arith.constant 0 : i32
    %c0_i32_0 = arith.constant 0 : i32
    %c0_i32_1 = arith.constant 0 : i32
    return %c0_i32, %c0_i32_0 : i32, i32
  }
  func.func @transform_14(%arg0: i32) -> (i32, i32) {
    %c0_i32 = arith.constant 0 : i32
    %c0_i32_0 = arith.constant 0 : i32
    %c0_i32_1 = arith.constant 0 : i32
    return %c0_i32, %c0_i32_0 : i32, i32
  }
  func.func @transform_15(%arg0: i32) -> (i32, i32) {
    %c0_i32 = arith.constant 0 : i32
    %c0_i32_0 = arith.constant 0 : i32
    %c0_i32_1 = arith.constant 0 : i32
    return %c0_i32, %c0_i32_0 : i32, i32
  }
  func.func @transform_16(%arg0: i32) -> (i32, i32) {
    %c0_i32 = arith.constant 0 : i32
    %c0_i32_0 = arith.constant 0 : i32
    %c0_i32_1 = arith.constant 0 : i32
    return %c0_i32, %c0_i32_0 : i32, i32
  }
  func.func @transform_17(%arg0: i32) -> (i32, i32) {
    %c0_i32 = arith.constant 0 : i32
    %c0_i32_0 = arith.constant 0 : i32
    %c0_i32_1 = arith.constant 0 : i32
    return %c0_i32, %c0_i32_0 : i32, i32
  }
  func.func @transform_18(%arg0: i32) -> (i32, i32, i32) {
    %c0_i32 = arith.constant 0 : i32
    %c0_i32_0 = arith.constant 0 : i32
    %c0_i32_1 = arith.constant 0 : i32
    %c0_i32_2 = arith.constant 0 : i32
    return %c0_i32, %c0_i32_0, %c0_i32_1 : i32, i32, i32
  }
  func.func @transform_19(%arg0: i32) -> (i32, i32) {
    %c0_i32 = arith.constant 0 : i32
    %c0_i32_0 = arith.constant 0 : i32
    %c0_i32_1 = arith.constant 0 : i32
    return %c0_i32, %c0_i32_0 : i32, i32
  }
  func.func @transform_20(%arg0: i32) -> (i32, i32) {
    %c0_i32 = arith.constant 0 : i32
    %c0_i32_0 = arith.constant 0 : i32
    %c0_i32_1 = arith.constant 0 : i32
    return %c0_i32, %c0_i32_0 : i32, i32
  }
  func.func @transform_21(%arg0: i32) -> (i32, i32) {
    %c0_i32 = arith.constant 0 : i32
    %c0_i32_0 = arith.constant 0 : i32
    %c0_i32_1 = arith.constant 0 : i32
    return %c0_i32, %c0_i32_0 : i32, i32
  }
  func.func @transform_22(%arg0: i32) -> (i32, i32) {
    %c0_i32 = arith.constant 0 : i32
    %c0_i32_0 = arith.constant 0 : i32
    %c0_i32_1 = arith.constant 0 : i32
    return %c0_i32, %c0_i32_0 : i32, i32
  }
  func.func @transform_23(%arg0: i32) -> (i32, i32) {
    %c0_i32 = arith.constant 0 : i32
    %c0_i32_0 = arith.constant 0 : i32
    %c0_i32_1 = arith.constant 0 : i32
    return %c0_i32, %c0_i32_0 : i32, i32
  }
  func.func @transform_24(%arg0: i32) -> (i32, i32, i32) {
    %c0_i32 = arith.constant 0 : i32
    %c0_i32_0 = arith.constant 0 : i32
    %c0_i32_1 = arith.constant 0 : i32
    %c0_i32_2 = arith.constant 0 : i32
    return %c0_i32, %c0_i32_0, %c0_i32_1 : i32, i32, i32
  }
  func.func @transform_25(%arg0: i32) -> (i32, i32, i32, i32) {
    %c0_i32 = arith.constant 0 : i32
    %c0_i32_0 = arith.constant 0 : i32
    %c0_i32_1 = arith.constant 0 : i32
    %c0_i32_2 = arith.constant 0 : i32
    return %arg0, %c0_i32, %c0_i32_0, %c0_i32_1 : i32, i32, i32, i32
  }
}

</mosaic_0001>

<bundles_post_ra>
// kernel: dense_block_forward.1
= control target key start
LH: loop header
LB: loop body
LE: loop exit
PB: predicated region body
PF: predicated region fallthrough
CT: control target
= control target key end

     0   :  { %s23283_s0 = inlined_call_operand.vmem [shape: f32[2,16,16,16], index: 0, kind: input, shape index: {}]   ;;  %s23284_s1 = inlined_call_operand.vmem [shape: f32[1,16], index: 1, kind: input, shape index: {}]   ;;  %s23285_s2 = inlined_call_operand.vmem [shape: f32[1,16], index: 2, kind: input, shape index: {}]   ;;  %s23286_s3 = inlined_call_operand.vmem [shape: bf16[16,16], index: 3, kind: input, shape index: {}]   ;;  %s23287_s4 = inlined_call_operand.vmem [shape: f32[1,16], index: 4, kind: input, shape index: {}]   ;;  %s23288_s5 = inlined_call_operand.vmem [shape: f32[1,16], index: 5, kind: input, shape index: {}]   ;;  %s23289_s6 = inlined_call_operand.vmem [shape: bf16[9,16,8], index: 6, kind: input, shape index: {}]   ;;  %s23290_s7 = inlined_call_operand.vmem [shape: f32[1,24], index: 7, kind: input, shape index: {}]   ;;  %s23291_s8 = inlined_call_operand.vmem [shape: f32[1,24], index: 8, kind: input, shape index: {}]   ;;  %s23292_s9 = inlined_call_operand.vmem [shape: bf16[24,16], index: 9, kind: input, shape index: {}]   ;;  %s23293_s10 = inlined_call_operand.vmem [shape: f32[1,16], index: 10, kind: input, shape index: {}]   ;;  %s23294_s11 = inlined_call_operand.vmem [shape: f32[1,16], index: 11, kind: input, shape index: {}]   ;;  %s23295_s12 = inlined_call_operand.vmem [shape: bf16[9,16,8], index: 12, kind: input, shape index: {}]   ;;  %s23296_s13 = inlined_call_operand.vmem [shape: f32[1,32], index: 13, kind: input, shape index: {}]   ;;  %s23297_s14 = inlined_call_operand.vmem [shape: f32[1,32], index: 14, kind: input, shape index: {}]   ;;  %s23298_s15 = inlined_call_operand.vmem [shape: bf16[32,16], index: 15, kind: input, shape index: {}]   ;;  %s23299_s16 = inlined_call_operand.vmem [shape: f32[1,16], index: 16, kind: input, shape index: {}]   ;;  %s23300_s17 = inlined_call_operand.vmem [shape: f32[1,16], index: 17, kind: input, shape index: {}]   ;;  %s23301_s18 = inlined_call_operand.vmem [shape: bf16[9,16,8], index: 18, kind: input, shape index: {}]   ;;  %s23302_s19 = inlined_call_operand.vmem [shape: f32[1,40], index: 19, kind: input, shape index: {}]   ;;  %s23303_s20 = inlined_call_operand.vmem [shape: f32[1,40], index: 20, kind: input, shape index: {}]   ;;  %s23304_s21 = inlined_call_operand.vmem [shape: bf16[40,16], index: 21, kind: input, shape index: {}]   ;;  %s23305_s22 = inlined_call_operand.vmem [shape: f32[1,16], index: 22, kind: input, shape index: {}]   ;;  %s23306_s23 = inlined_call_operand.vmem [shape: f32[1,16], index: 23, kind: input, shape index: {}]   ;;  %s23307_s24 = inlined_call_operand.vmem [shape: bf16[9,16,8], index: 24, kind: input, shape index: {}]   ;;  %s23308_s25 = inlined_call_operand.hbm [shape: f32[2,16,16,48], index: 25, kind: output, shape index: {}]  }
   0x1   :  { %23476 = sst [smem:[#allocation91_spill]] %s23283_s0 }
   0x2   :  { %23477 = sst [smem:[#allocation92_spill]] %s23284_s1 }
   0x3   :  { %23478 = sst [smem:[#allocation93_spill]] %s23285_s2 }
   0x4   :  { %23479 = sst [smem:[#allocation94_spill]] %s23286_s3 }
   0x5   :  { %23480 = sst [smem:[#allocation95_spill]] %s23287_s4 }
   0x6   :  { %23481 = sst [smem:[#allocation96_spill]] %s23288_s5 }
   0x7   :  { %23482 = sst [smem:[#allocation97_spill]] %s23289_s6 }
   0x8   :  { %23483 = sst [smem:[#allocation98_spill]] %s23290_s7 }
   0x9   :  { %23484 = sst [smem:[#allocation99_spill]] %s23291_s8 }
   0xa   :  { %23485 = sst [smem:[#allocation100_spill]] %s23292_s9 }
   0xb   :  { %23486 = sst [smem:[#allocation101_spill]] %s23293_s10 }
   0xc   :  { %23487 = sst [smem:[#allocation102_spill]] %s23294_s11 }
   0xd   :  { %23488 = sst [smem:[#allocation103_spill]] %s23295_s12 }
   0xe   :  { %30 = vsyncpa [#allocation4], 0 }
   0xf   :  { %32 = vsyncpa [#allocation4 + $0x1], 0  ;;  %s16041_s29 = smov 0   ;;  %s16043_s2 = smov 0  }
  0x10   :  { %s16045_s6 = smov 0   ;;  %s16047_s30 = smov 0  }
  0x11 LB: > { %23489 = sst [smem:[#allocation6_spill]] %s15901_s6  ;;  %s16062_s7 = sadd.s32 4294967295, %s15905_s30   ;;  %s15905_s30 = sphi %s16047_s30, %s24302_s30   ;;  %s15901_s6 = sphi %s16045_s6, %s24304_s6   ;;  %s15897_s2 = sphi %s16043_s2, %s24306_s2   ;;  %s15893_s29 = sphi %s16041_s29, %s24305_s29  }
  0x12   : > { %s12895_s3 = sadd.s32 4294967294, %s15905_s30   ;;  %s16066_s26 = sadd.s32 1, %s15905_s30  }
  0x13   : > { %23490 = sst [smem:[#allocation7_spill]] %s16066_s26  ;;  %s575_s1 = sadd.s32 1, %s15901_s6 }
  0x14   : > { %s572_s8 = ssub.s32 %s15905_s30, %s16066_s26  ;;  %p585_p0 = scmp.ne.s32.totalorder %s15901_s6, %s15897_s2 }
  0x15   : > { %p573_p1 = scmp.eq.s32.totalorder %s572_s8, 0  ;;  %p586_p2 = scmp.eq.s32.totalorder %s16062_s7, 1 }
  0x16   : > { %p591_p3 = scmp.ne.s32.totalorder %s15897_s2, %s15893_s29  ;;  %p592_p4 = scmp.eq.s32.totalorder %s12895_s3, 1 }
  0x17   : > { %s16077_s27 = scalar_select %p573_p1, %s15901_s6, %s575_s1  }
  0x18   : > { %p16079_p5 = por %p586_p2, %p585_p0  ;;  %p16083_p6 = por %p592_p4, %p591_p3 }
  0x19   : > { %23491 = sst [smem:[#allocation8_spill]] %s16077_s27  ;;  %p12898_p7 = scmp.ge.s32.totalorder %s15905_s30, 1 }
  0x1a   : > { %p690_p8 = scmp.lt.s32.totalorder %s15905_s30, 3 }
  0x1c   : > { %p691_p9 = pnand %p12898_p7, %p690_p8 }
  0x1e   : > { %694 = sbr.rel (%p691_p9) target bundleno = 2863 (0xb2f), region = 120 }
  0x23   : > { %s23494_s0 = sld [smem:[#allocation94_spill]]  ;;  %p758_p10 = scmp.lt.s32.totalorder %s16062_s7, 1  ;;  %vm764_vm0 = vcmask 130048   ;;  %v15907_v2 = vmov 0.0   ;;  %vm767_vm1 = vcmask 123904   ;;  %vm1458_vm2 = vcmask 1046528  }
  0x24   : > { %s23495_s27 = sld [smem:[#allocation92_spill]]  ;;  %772 = vst.msk [vmem:[#allocation2 + $0x30] sm:$0xff] %vm764_vm0, %v15907_v2  ;;  %773 = vst.msk [vmem:[#allocation2 + $0x38] sm:$0xff] %vm764_vm0, %v15907_v2  ;;  %vm2020_vm3 = vcmask 1045504   ;;  %vm4017_vm4 = vcmask 1043456   ;;  %vm3797_vm5 = vcmask 64512  }
  0x25   : > { %s16094_s3 = scalar_select %p758_p10, %s16062_s7, 1  ;;  %765 = vst.msk [vmem:[#allocation2] sm:$0xff] %vm764_vm0, %v15907_v2  ;;  %766 = vst.msk [vmem:[#allocation2 + $0x8] sm:$0xff] %vm764_vm0, %v15907_v2  ;;  %vm3968_vm6 = vcmask 195584   ;;  %vm6955_vm7 = vcmask 261120   ;;  %vm9942_vm8 = vcmask 326656  }
  0x26   : > { %769 = vst.msk [vmem:[#allocation2 + $0x18] sm:$0xff] %vm764_vm0, %v15907_v2  ;;  %770 = vst.msk [vmem:[#allocation2 + $0x20] sm:$0xff] %vm764_vm0, %v15907_v2  ;;  %s23497_s6 = sld [smem:[#allocation91_spill]]  ;;  %vm12786_vm9 = vcmask 392192  }
  0x27   : > { %775 = vst.msk [vmem:[#allocation2 + $0x48] sm:$0xff] %vm764_vm0, %v15907_v2  ;;  %776 = vst.msk [vmem:[#allocation2 + $0x50] sm:$0xff] %vm764_vm0, %v15907_v2  ;;  %s23499_s5 = sld [smem:[#allocation95_spill]] }
  0x28   : > { %778 = vst.msk [vmem:[#allocation2 + $0x60] sm:$0xff] %vm764_vm0, %v15907_v2  ;;  %779 = vst.msk [vmem:[#allocation2 + $0x68] sm:$0xff] %vm764_vm0, %v15907_v2  ;;  %s23500_s8 = sld [smem:[#allocation96_spill]] }
  0x29   : > { %v15769_v0 = vld [vmem:[%s23494_s0] sm:$0xff]   ;;  %781 = vst.msk [vmem:[#allocation2 + $0x78] sm:$0xff] %vm764_vm0, %v15907_v2  ;;  %782 = vst.msk [vmem:[#allocation2 + $0x80] sm:$0xff] %vm764_vm0, %v15907_v2  ;;  %s23496_s0 = sld [smem:[#allocation93_spill]] }
  0x2a   : > { %14357 = vmatprep.subr.bf16.mxu0 %v15769_v0  ;;  %v16099_v1 = vld [vmem:[%s23495_s27] ss:$0 sm:$0xff]  ;;  %784 = vst.msk [vmem:[#allocation2 + $0x90] sm:$0xff] %vm764_vm0, %v15907_v2  ;;  %785 = vst.msk [vmem:[#allocation2 + $0x98] sm:$0xff] %vm764_vm0, %v15907_v2  ;;  %s13671_s27 = sshll.u32 %s16094_s3, 8  ;;  %s23551_s1 = sld [smem:[#allocation100_spill]] }
  0x2b   : > { %787 = vst.msk [vmem:[#allocation2 + $0xa8] sm:$0xff] %vm764_vm0, %v15907_v2  ;;  %788 = vst.msk [vmem:[#allocation2 + $0xb0] sm:$0xff] %vm764_vm0, %v15907_v2  ;;  %14358 = vmatpush3.bf16.msra.mxu0 %v15769_v0  ;;  %s23688_s12 = sld [smem:[#allocation103_spill]]  ;;  %s755_s3 = sand.u32 1, %s15897_s2  }
  0x2c   : > { %790 = vst.msk [vmem:[#allocation2 + $0xc0] sm:$0xff] %vm764_vm0, %v15907_v2  ;;  %791 = vst.msk [vmem:[#allocation2 + $0xc8] sm:$0xff] %vm764_vm0, %v15907_v2  ;;  %s16182_s26 = scalar_lea.vmem %s23497_s6, %s13671_s27  ;;  %s23498_s27 = sld [smem:[#allocation97_spill]] }
  0x2d   : > { %793 = vst.msk [vmem:[#allocation2 + $0xd8] sm:$0xff] %vm764_vm0, %v15907_v2  ;;  %794 = vst.msk [vmem:[#allocation2 + $0xe0] sm:$0xff] %vm764_vm0, %v15907_v2  ;;  %v820_v4 = vld [vmem:[%s16182_s26] sm:$0xff]  ;;  %v821_v5 = vld [vmem:[%s16182_s26 + $0x8] sm:$0xff]  ;;  %s23640_s6 = sld [smem:[#allocation99_spill]]  ;;  %s12899_s9 = sshll.u32 %s755_s3, 8 }
  0x2e   : > { %796 = vst.msk [vmem:[#allocation2 + $0xf0] sm:$0xff] %vm764_vm0, %v15907_v2  ;;  %797 = vst.msk [vmem:[#allocation2 + $0xf8] sm:$0xff] %vm764_vm0, %v15907_v2  ;;  %v822_v6 = vld [vmem:[%s16182_s26 + $0x10] sm:$0xff]  ;;  %v859_v7 = vmul.f32 %v16099_v1, %v820_v4  ;;  %v860_v8 = vmul.f32 %v16099_v1, %v821_v5  ;;  %v823_v9 = vld [vmem:[%s16182_s26 + $0x18] sm:$0xff]  ;;  %s23693_s10 = sld [smem:[#allocation101_spill]] }
  0x2f   : > { %799 = vst.msk [vmem:[#allocation2 + $0x108] sm:$0xff] %vm764_vm0, %v15907_v2  ;;  %800 = vst.msk [vmem:[#allocation2 + $0x110] sm:$0xff] %vm764_vm0, %v15907_v2  ;;  %v16177_v3 = vld [vmem:[%s23496_s0] ss:$0 sm:$0xff]  ;;  %v861_v10 = vmul.f32 %v16099_v1, %v822_v6  ;;  %v825_v12 = vld [vmem:[%s16182_s26 + $0x28] sm:$0xff]  ;;  %v862_v13 = vmul.f32 %v16099_v1, %v823_v9  ;;  %s23694_s11 = sld [smem:[#allocation102_spill]] }
  0x30   : > { %802 = vst.msk [vmem:[#allocation2 + $0x120] sm:$0xff] %vm764_vm0, %v15907_v2  ;;  %803 = vst.msk [vmem:[#allocation2 + $0x128] sm:$0xff] %vm764_vm0, %v15907_v2  ;;  %v824_v11 = vld [vmem:[%s16182_s26 + $0x20] sm:$0xff]  ;;  %v864_v15 = vmul.f32 %v16099_v1, %v825_v12  ;;  %v826_v16 = vld [vmem:[%s16182_s26 + $0x30] sm:$0xff]  ;;  %v898_v18 = vadd.f32 %v16177_v3, %v859_v7  ;;  %v899_v19 = vadd.f32 %v16177_v3, %v860_v8  ;;  %s13672_s0 = sshll.u32 %s16062_s7, 12  ;;  %s23242_s7 = scalar_lea.sflag [#allocation4], %s755_s3 }
  0x31   : > { %805 = vst.msk [vmem:[#allocation2 + $0x138] sm:$0xff] %vm764_vm0, %v15907_v2  ;;  %806 = vst.msk [vmem:[#allocation2 + $0x140] sm:$0xff] %vm764_vm0, %v15907_v2  ;;  %v863_v14 = vmul.f32 %v16099_v1, %v824_v11  ;;  %v827_v17 = vld [vmem:[%s16182_s26 + $0x38] sm:$0xff]  ;;  %v900_v20 = vadd.f32 %v16177_v3, %v861_v10  ;;  %v865_v21 = vmul.f32 %v16099_v1, %v826_v16  ;;  %v828_v26 = vld [vmem:[%s16182_s26 + $0x40] sm:$0xff] }
  0x32   : > { %808 = vst.msk [vmem:[#allocation2 + $0x150] sm:$0xff] %vm764_vm0, %v15907_v2  ;;  %809 = vst.msk [vmem:[#allocation2 + $0x158] sm:$0xff] %vm764_vm0, %v15907_v2  ;;  %v901_v22 = vadd.f32 %v16177_v3, %v862_v13  ;;  %v903_v24 = vadd.f32 %v16177_v3, %v864_v15  ;;  %v866_v25 = vmul.f32 %v16099_v1, %v827_v17  ;;  %v829_v27 = vld [vmem:[%s16182_s26 + $0x48] sm:$0xff]  ;;  %v930_v28 = vmax.f32 %v898_v18, 0.0  ;;  %v830_v39 = vld [vmem:[%s16182_s26 + $0x50] sm:$0xff] }
  0x33   : > { %811 = vst.msk [vmem:[#allocation2 + $0x168] sm:$0xff] %vm764_vm0, %v15907_v2  ;;  %812 = vst.msk [vmem:[#allocation2 + $0x170] sm:$0xff] %vm764_vm0, %v15907_v2  ;;  %v902_v23 = vadd.f32 %v16177_v3, %v863_v14  ;;  %v931_v29 = vmax.f32 %v899_v19, 0.0  ;;  %v932_v30 = vmax.f32 %v900_v20, 0.0  ;;  %v904_v31 = vadd.f32 %v16177_v3, %v865_v21  ;;  %v831_v40 = vld [vmem:[%s16182_s26 + $0x58] sm:$0xff]  ;;  %v832_v43 = vld [vmem:[%s16182_s26 + $0x60] sm:$0xff] }
  0x34   : > { %814 = vst.msk [vmem:[#allocation2 + $0x180] sm:$0xff] %vm764_vm0, %v15907_v2  ;;  %815 = vst.msk [vmem:[#allocation2 + $0x188] sm:$0xff] %vm764_vm0, %v15907_v2  ;;  %v933_v32 = vmax.f32 %v901_v22, 0.0  ;;  %v935_v34 = vmax.f32 %v903_v24, 0.0  ;;  %v905_v35 = vadd.f32 %v16177_v3, %v866_v25  ;;  %v867_v37 = vmul.f32 %v16099_v1, %v828_v26  ;;  %v833_v44 = vld [vmem:[%s16182_s26 + $0x68] sm:$0xff]  ;;  %v834_v55 = vld [vmem:[%s16182_s26 + $0x70] sm:$0xff] }
  0x35   : > { %817 = vst.msk [vmem:[#allocation2 + $0x198] sm:$0xff] %vm764_vm0, %v15907_v2  ;;  %818 = vst.msk [vmem:[#allocation2 + $0x1a0] sm:$0xff] %vm764_vm0, %v15907_v2  ;;  %v934_v33 = vmax.f32 %v902_v23, 0.0  ;;  %v962_v36 = vpack.c.bf16 %v931_v29, %v930_v28  ;;  %v868_v38 = vmul.f32 %v16099_v1, %v829_v27  ;;  %v936_v47 = vmax.f32 %v904_v31, 0.0  ;;  %v835_v56 = vld [vmem:[%s16182_s26 + $0x78] sm:$0xff]  ;;  %v836_v60 = vld [vmem:[%s16182_s26 + $0x80] sm:$0xff] }
  0x36   : > { %v963_v41 = vpack.c.bf16 %v933_v32, %v932_v30  ;;  %v906_v45 = vadd.f32 %v16177_v3, %v867_v37  ;;  %v937_v48 = vmax.f32 %v905_v35, 0.0  ;;  %v869_v49 = vmul.f32 %v16099_v1, %v830_v39  ;;  %v837_v61 = vld [vmem:[%s16182_s26 + $0x88] sm:$0xff]  ;;  %v838_v4 = vld [vmem:[%s16182_s26 + $0x90] sm:$0xff]  ;;  %v839_v5 = vld [vmem:[%s16182_s26 + $0x98] sm:$0xff]  ;;  %774 = vst.msk [vmem:[#allocation2 + $0x40] sm:$0x3] %vm767_vm1, %v15907_v2 }
  0x37   : > { %v964_v42 = vpack.c.bf16 %v935_v34, %v934_v33  ;;  %14359 = vmatprep.mubr.msk.bf16.mxu0 %vm764_vm0, %v962_v36  ;;  %v907_v46 = vadd.f32 %v16177_v3, %v868_v38  ;;  %v870_v50 = vmul.f32 %v16099_v1, %v831_v40  ;;  %v871_v53 = vmul.f32 %v16099_v1, %v832_v43  ;;  %v840_v7 = vld [vmem:[%s16182_s26 + $0xa0] sm:$0xff]  ;;  %v841_v8 = vld [vmem:[%s16182_s26 + $0xa8] sm:$0xff]  ;;  %v842_v36 = vld [vmem:[%s16182_s26 + $0xb0] sm:$0xff] }
  0x38   : > { %14360 = vmatmul.mubr.msk.bf16.vlgmr.msra.gmra.mxu0 %vm764_vm0, %v963_v41  ;;  %v938_v51 = vmax.f32 %v906_v45, 0.0  ;;  %v872_v54 = vmul.f32 %v16099_v1, %v833_v44  ;;  %v965_v57 = vpack.c.bf16 %v937_v48, %v936_v47  ;;  %v908_v58 = vadd.f32 %v16177_v3, %v869_v49  ;;  %v843_v37 = vld [vmem:[%s16182_s26 + $0xb8] sm:$0xff]  ;;  %v844_v41 = vld [vmem:[%s16182_s26 + $0xc0] sm:$0xff]  ;;  %v846_v48 = vld [vmem:[%s16182_s26 + $0xd0] sm:$0xff]  ;;  %768 = vst.msk [vmem:[#allocation2 + $0x10] sm:$0x3] %vm767_vm1, %v15907_v2 }
  0x39   : > { %14363 = vmatprep.mubr.msk.bf16.mxu0 %vm764_vm0, %v964_v42  ;;  %v939_v52 = vmax.f32 %v907_v46, 0.0  ;;  %v909_v59 = vadd.f32 %v16177_v3, %v870_v50  ;;  %v910_v63 = vadd.f32 %v16177_v3, %v871_v53  ;;  %v873_v6 = vmul.f32 %v16099_v1, %v834_v55  ;;  %v845_v42 = vld [vmem:[%s16182_s26 + $0xc8] sm:$0xff]  ;;  %v847_v49 = vld [vmem:[%s16182_s26 + $0xd8] sm:$0xff]  ;;  %v848_v53 = vld [vmem:[%s16182_s26 + $0xe0] sm:$0xff]  ;;  %771 = vst.msk [vmem:[#allocation2 + $0x28] sm:$0x3] %vm767_vm1, %v15907_v2 }
  0x3a   : > { %v911_v0 = vadd.f32 %v16177_v3, %v872_v54  ;;  %v940_v9 = vmax.f32 %v908_v58, 0.0  ;;  %v874_v11 = vmul.f32 %v16099_v1, %v835_v56  ;;  %v875_v14 = vmul.f32 %v16099_v1, %v836_v60  ;;  %v849_v54 = vld [vmem:[%s16182_s26 + $0xe8] sm:$0xff]  ;;  %777 = vst.msk [vmem:[#allocation2 + $0x58] sm:$0x3] %vm767_vm1, %v15907_v2  ;;  %780 = vst.msk [vmem:[#allocation2 + $0x70] sm:$0x3] %vm767_vm1, %v15907_v2 }
  0x3b   : > { %v966_v62 = vpack.c.bf16 %v939_v52, %v938_v51  ;;  %v941_v10 = vmax.f32 %v909_v59, 0.0  ;;  %v942_v12 = vmax.f32 %v910_v63, 0.0  ;;  %v876_v15 = vmul.f32 %v16099_v1, %v837_v61  ;;  %783 = vst.msk [vmem:[#allocation2 + $0x88] sm:$0x3] %vm767_vm1, %v15907_v2  ;;  %786 = vst.msk [vmem:[#allocation2 + $0xa0] sm:$0x3] %vm767_vm1, %v15907_v2 }
  0x3c   : > { %v943_v13 = vmax.f32 %v911_v0, 0.0  ;;  %v912_v16 = vadd.f32 %v16177_v3, %v873_v6  ;;  %v877_v17 = vmul.f32 %v16099_v1, %v838_v4  ;;  %v878_v18 = vmul.f32 %v16099_v1, %v839_v5  ;;  %789 = vst.msk [vmem:[#allocation2 + $0xb8] sm:$0x3] %vm767_vm1, %v15907_v2  ;;  %792 = vst.msk [vmem:[#allocation2 + $0xd0] sm:$0x3] %vm767_vm1, %v15907_v2 }
  0x3d   : > { %v967_v19 = vpack.c.bf16 %v941_v10, %v940_v9  ;;  %v913_v20 = vadd.f32 %v16177_v3, %v874_v11  ;;  %v879_v21 = vmul.f32 %v16099_v1, %v840_v7  ;;  %v880_v22 = vmul.f32 %v16099_v1, %v841_v8  ;;  %v850_v11 = vld [vmem:[%s16182_s26 + $0xf0] sm:$0xff]  ;;  %795 = vst.msk [vmem:[#allocation2 + $0xe8] sm:$0x3] %vm767_vm1, %v15907_v2 }
  0x3e   : > { %v968_v23 = vpack.c.bf16 %v943_v13, %v942_v12  ;;  %v914_v24 = vadd.f32 %v16177_v3, %v875_v14  ;;  %v915_v25 = vadd.f32 %v16177_v3, %v876_v15  ;;  %v916_v26 = vadd.f32 %v16177_v3, %v877_v17  ;;  %v851_v12 = vld [vmem:[%s16182_s26 + $0xf8] sm:$0xff]  ;;  %798 = vst.msk [vmem:[#allocation2 + $0x100] sm:$0x3] %vm767_vm1, %v15907_v2 }
  0x3f   : > { %v917_v27 = vadd.f32 %v16177_v3, %v878_v18  ;;  %v944_v28 = vmax.f32 %v912_v16, 0.0  ;;  %v945_v29 = vmax.f32 %v913_v20, 0.0  ;;  %v918_v30 = vadd.f32 %v16177_v3, %v879_v21  ;;  %801 = vst.msk [vmem:[#allocation2 + $0x118] sm:$0x3] %vm767_vm1, %v15907_v2  ;;  %804 = vst.msk [vmem:[#allocation2 + $0x130] sm:$0x3] %vm767_vm1, %v15907_v2 }
  0x40   : > { %14364 = vmatmul.mubr.msk.bf16.gmra.mxu0 %vm764_vm0, %v965_v57  ;;  %v919_v31 = vadd.f32 %v16177_v3, %v880_v22  ;;  %v946_v32 = vmax.f32 %v914_v24, 0.0  ;;  %v947_v33 = vmax.f32 %v915_v25, 0.0  ;;  %v948_v34 = vmax.f32 %v916_v26, 0.0  ;;  %807 = vst.msk [vmem:[#allocation2 + $0x148] sm:$0x3] %vm767_vm1, %v15907_v2  ;;  %v1339_v26 = vld [vmem:[#allocation2 + $0x8] sm:$0xff] }
  0x41   : > { %14367 = vmatprep.mubr.msk.bf16.mxu0 %vm764_vm0, %v966_v62  ;;  %v949_v35 = vmax.f32 %v917_v27, 0.0  ;;  %v969_v38 = vpack.c.bf16 %v945_v29, %v944_v28  ;;  %v950_v39 = vmax.f32 %v918_v30, 0.0  ;;  %v881_v44 = vmul.f32 %v16099_v1, %v842_v36  ;;  %810 = vst.msk [vmem:[#allocation2 + $0x160] sm:$0x3] %vm767_vm1, %v15907_v2  ;;  %813 = vst.msk [vmem:[#allocation2 + $0x178] sm:$0x3] %vm767_vm1, %v15907_v2 }
  0x42   : > { %v951_v40 = vmax.f32 %v919_v31, 0.0  ;;  %v970_v43 = vpack.c.bf16 %v947_v33, %v946_v32  ;;  %v882_v45 = vmul.f32 %v16099_v1, %v843_v37  ;;  %v883_v46 = vmul.f32 %v16099_v1, %v844_v41  ;;  %816 = vst.msk [vmem:[#allocation2 + $0x190] sm:$0x3] %vm767_vm1, %v15907_v2  ;;  %819 = vst.msk [vmem:[#allocation2 + $0x1a8] sm:$0x3] %vm767_vm1, %v15907_v2  ;;  %v15771_v28 = vld [vmem:[%s23498_s27 + $0x8] sm:$0xff]  }
  0x43   : > { %v884_v47 = vmul.f32 %v16099_v1, %v845_v42  ;;  %v971_v50 = vpack.c.bf16 %v949_v35, %v948_v34  ;;  %v920_v51 = vadd.f32 %v16177_v3, %v881_v44  ;;  %v885_v60 = vmul.f32 %v16099_v1, %v846_v48  ;;  %v1340_v27 = vld [vmem:[#allocation2 + $0x10] sm:$0x3]  ;;  %14391 = vmatprep.subr.bf16.mxu1 %v15771_v28  ;;  %v16351_v36 = vld [vmem:[%s23498_s27 + $0x18] sm:$0xff]  }
  0x44   : > { %v921_v52 = vadd.f32 %v16177_v3, %v882_v45  ;;  %v972_v55 = vpack.c.bf16 %v951_v40, %v950_v39  ;;  %v922_v56 = vadd.f32 %v16177_v3, %v883_v46  ;;  %v886_v61 = vmul.f32 %v16099_v1, %v847_v49  ;;  %14392 = vmatpush3.bf16.msra.mxu1 %v15771_v28  ;;  %v16345_v35 = vld [vmem:[%s23498_s27 + $0x10] sm:$0xff]   ;;  %v16370_v45 = vld [vmem:[%s23500_s8] ss:$0 sm:$0xff] }
  0x45   : > { %v923_v57 = vadd.f32 %v16177_v3, %v884_v47  ;;  %v952_v58 = vmax.f32 %v920_v51, 0.0  ;;  %v887_v0 = vmul.f32 %v16099_v1, %v848_v53  ;;  %v888_v4 = vmul.f32 %v16099_v1, %v849_v54  ;;  %14459 = vmatprep.subr.bf16.mxu1 %v16345_v35 }
  0x46   : > { %v953_v59 = vmax.f32 %v921_v52, 0.0  ;;  %v954_v62 = vmax.f32 %v922_v56, 0.0  ;;  %v924_v6 = vadd.f32 %v16177_v3, %v885_v60  ;;  %v925_v7 = vadd.f32 %v16177_v3, %v886_v61 }
  0x47   : > { %v955_v63 = vmax.f32 %v923_v57, 0.0  ;;  %v926_v9 = vadd.f32 %v16177_v3, %v887_v0  ;;  %v927_v10 = vadd.f32 %v16177_v3, %v888_v4  ;;  %v889_v15 = vmul.f32 %v16099_v1, %v850_v11 }
  0x48   : > { %14368 = vmatmul.mubr.msk.bf16.gmra.mxu0 %vm764_vm0, %v967_v19  ;;  %v973_v5 = vpack.c.bf16 %v953_v59, %v952_v58  ;;  %v956_v13 = vmax.f32 %v924_v6, 0.0  ;;  %v957_v14 = vmax.f32 %v925_v7, 0.0  ;;  %v890_v16 = vmul.f32 %v16099_v1, %v851_v12  ;;  %v15770_v1 = vld [vmem:[%s23498_s27] sm:$0xff]  }
  0x49   : > { %14371 = vmatprep.mubr.msk.bf16.mxu0 %vm764_vm0, %v968_v23  ;;  %v974_v8 = vpack.c.bf16 %v955_v63, %v954_v62  ;;  %v958_v17 = vmax.f32 %v926_v9, 0.0  ;;  %v959_v18 = vmax.f32 %v927_v10, 0.0  ;;  %v928_v20 = vadd.f32 %v16177_v3, %v889_v15  ;;  %14425 = vmatprep.subr.bf16.mxu0 %v15770_v1 }
  0x4a   : > { %v975_v19 = vpack.c.bf16 %v957_v14, %v956_v13  ;;  %v929_v21 = vadd.f32 %v16177_v3, %v890_v16  ;;  %v1338_v3 = vld [vmem:[#allocation2] sm:$0xff]  ;;  %14426 = vmatpush3.bf16.msra.mxu0 %v15770_v1  ;;  %v1460_v31 = vrot.slane %v1339_v26, 1  ;;  %v1462_v32 = vrot.slane %v1340_v27, 1 }
  0x4b   : > { %v976_v22 = vpack.c.bf16 %v959_v18, %v958_v17  ;;  %v960_v23 = vmax.f32 %v928_v20, 0.0  ;;  %v1392_v29 = vpack.c.bf16 %v1339_v26, %v1338_v3  ;;  %v1459_v30 = vrot.slane %v1338_v3, 1  ;;  %14493 = vmatprep.subr.bf16.mxu0 %v16351_v36 }
  0x4c   : > { %v961_v24 = vmax.f32 %v929_v21, 0.0  ;;  %v1463_v33 = vsel %vm1458_vm2, %v1460_v31, %v1462_v32  ;;  %v2021_v37 = vrot.slane %v1338_v3, 2  ;;  %v2024_v39 = vrot.slane %v1340_v27, 2 }
  0x4d   : > { %v1461_v2 = vsel %vm1458_vm2, %v1459_v30, %v1460_v31 }
  0x4e   : > { %v977_v25 = vpack.c.bf16 %v961_v24, %v960_v23  ;;  %v1571_v34 = vpack.c.bf16 %v1463_v33, %v1461_v2  ;;  %v16424_v33 = vld [vmem:[%s23498_s27 + $0x28] sm:$0xff]  }
  0x50   : > { %14372 = vmatmul.mubr.msk.bf16.gmra.mxu0 %vm764_vm0, %v969_v38  ;;  %14393 = vmatprep.mubr.msk.bf16.mxu1 %vm764_vm0, %v1571_v34  ;;  %v2022_v38 = vrot.slane %v1339_v26, 2 }
  0x51   : > { %14375 = vmatprep.mubr.msk.bf16.mxu0 %vm764_vm0, %v970_v43  ;;  %v16365_v43 = vld [vmem:[%s23499_s5] ss:$0 sm:$0xff]  ;;  %s23474_s5 = smov 8  }
  0x52   : > { %v16355_v40 = vsel %vm2020_vm3, %v2021_v37, %v2022_v38  ;;  %v16358_v41 = vsel %vm2020_vm3, %v2022_v38, %v2024_v39 }
  0x58   : > { %14376 = vmatmul.mubr.msk.bf16.gmra.mxu0 %vm764_vm0, %v971_v50 }
  0x59   : > { %14379 = vmatprep.mubr.msk.bf16.mxu0 %vm764_vm0, %v972_v55 }
  0x60   : > { %14380 = vmatmul.mubr.msk.bf16.gmra.mxu0 %vm764_vm0, %v973_v5 }
  0x61   : > { %14383 = vmatprep.mubr.msk.bf16.mxu0 %vm764_vm0, %v974_v8 }
  0x68   : > { %14384 = vmatmul.mubr.msk.bf16.gmra.mxu0 %vm764_vm0, %v975_v19 }
  0x69   : > { %14387 = vmatprep.mubr.msk.bf16.mxu0 %vm764_vm0, %v976_v22 }
  0x70   : > { %14388 = vmatmul.mubr.msk.bf16.gmra.mxu0 %vm764_vm0, %v977_v25 }
  0x71   : > { %14427 = vmatprep.mubr.msk.bf16.mxu0 %vm764_vm0, %v1392_v29 }
  0xf8   : > { %v14361_v44 = vpop.f32.mrf.mxu0 }
  0xf9   : > { %v1204_v46 = vmul.f32 %v14361_v44, %v16365_v43 }
  0xfa   : > { %v1068_v47 = vpop.f32.mrf.mxu0 }
  0xfb   : > { %v1243_v48 = vadd.f32 %v16370_v45, %v1204_v46  ;;  %v1202_v49 = vmul.f32 %v16365_v43, %v1068_v47 }
  0xfc   : > { %v14362_v50 = vpop.f32.mrf.mxu0 }
  0xfd   : > { %v1275_v51 = vmax.f32 %v1243_v48, 0.0  ;;  %v1241_v52 = vadd.f32 %v16370_v45, %v1202_v49  ;;  %v1205_v53 = vmul.f32 %v14362_v50, %v16365_v43 }
  0xfe   : > { %v1071_v54 = vpop.f32.mrf.mxu0 }
  0xff   : > { %1308 = vst.msk [vmem:[#allocation2 + $0x31] sm:$0xff] %vm764_vm0, %v1275_v51  ;;  %v1273_v55 = vmax.f32 %v1241_v52, 0.0  ;;  %v1244_v56 = vadd.f32 %v16370_v45, %v1205_v53  ;;  %v1203_v57 = vmul.f32 %v16365_v43, %v1071_v54 }
 0x100   : > { %v14365_v58 = vpop.f32.mrf.mxu0 }
 0x101   : > { %1306 = vst.msk [vmem:[#allocation2 + $0x19] sm:$0xff] %vm764_vm0, %v1273_v55  ;;  %v1276_v59 = vmax.f32 %v1244_v56, 0.0  ;;  %v1242_v60 = vadd.f32 %v16370_v45, %v1203_v57  ;;  %v1208_v61 = vmul.f32 %v14365_v58, %v16365_v43 }
 0x102   : > { %v1084_v62 = vpop.f32.mrf.mxu0 }
 0x103   : > { %1309 = vst.msk [vmem:[#allocation2 + $0x39] sm:$0xff] %vm764_vm0, %v1276_v59  ;;  %v1274_v63 = vmax.f32 %v1242_v60, 0.0  ;;  %v1247_v0 = vadd.f32 %v16370_v45, %v1208_v61  ;;  %v1206_v4 = vmul.f32 %v16365_v43, %v1084_v62  ;;  %v16456_v59 = vld [vmem:[%s23498_s27 + $0x20] sm:$0xff]  }
 0x104   : > { %v14366_v5 = vpop.f32.mrf.mxu0 }
 0x105   : > { %1307 = vst.msk [vmem:[#allocation2 + $0x21] sm:$0xff] %vm764_vm0, %v1274_v63  ;;  %v1279_v6 = vmax.f32 %v1247_v0, 0.0  ;;  %v1245_v7 = vadd.f32 %v16370_v45, %v1206_v4  ;;  %v1209_v8 = vmul.f32 %v14366_v5, %v16365_v43 }
 0x106   : > { %v1087_v9 = vpop.f32.mrf.mxu0  ;;  %v16392_v14 = vld [vmem:[#allocation2 + $0x30] sm:$0xff] }
 0x107   : > { %1312 = vst.msk [vmem:[#allocation2 + $0x61] sm:$0xff] %vm764_vm0, %v1279_v6  ;;  %v1277_v10 = vmax.f32 %v1245_v7, 0.0  ;;  %v1248_v11 = vadd.f32 %v16370_v45, %v1209_v8  ;;  %v1207_v12 = vmul.f32 %v16365_v43, %v1087_v9  ;;  %v1469_v25 = vrot.slane %v16392_v14, 1 }
 0x108   : > { %v14369_v13 = vpop.f32.mrf.mxu0  ;;  %v16397_v18 = vld [vmem:[#allocation2 + $0x18] sm:$0xff] }
 0x109   : > { %1310 = vst.msk [vmem:[#allocation2 + $0x49] sm:$0xff] %vm764_vm0, %v1277_v10  ;;  %v1280_v15 = vmax.f32 %v1248_v11, 0.0  ;;  %v1246_v16 = vadd.f32 %v16370_v45, %v1207_v12  ;;  %v1212_v17 = vmul.f32 %v14369_v13, %v16365_v43  ;;  %v1464_v27 = vrot.slane %v16397_v18, 1 }
 0x10a   : > { %v1100_v19 = vpop.f32.mrf.mxu0  ;;  %v16399_v20 = vld [vmem:[#allocation2 + $0x38] sm:$0xff]  ;;  %v16401_v21 = vld [vmem:[#allocation2 + $0x40] sm:$0x3] }
 0x10b   : > { %1313 = vst.msk [vmem:[#allocation2 + $0x69] sm:$0xff] %vm764_vm0, %v1280_v15  ;;  %v1278_v22 = vmax.f32 %v1246_v16, 0.0  ;;  %v1251_v23 = vadd.f32 %v16370_v45, %v1212_v17  ;;  %v1210_v24 = vmul.f32 %v16365_v43, %v1100_v19  ;;  %v1470_v28 = vrot.slane %v16399_v20, 1 }
 0x10c   : > { %v14370_v1 = vpop.f32.mrf.mxu0  ;;  %v16407_v3 = vld [vmem:[#allocation2 + $0x20] sm:$0xff]  ;;  %v16409_v26 = vld [vmem:[#allocation2 + $0x28] sm:$0x3]  ;;  %v1472_v29 = vrot.slane %v16401_v21, 1  ;;  %v16428_v37 = vpack.c.bf16 %v16399_v20, %v16392_v14 }
 0x10d   : > { %1311 = vst.msk [vmem:[#allocation2 + $0x51] sm:$0xff] %vm764_vm0, %v1278_v22  ;;  %v1283_v30 = vmax.f32 %v1251_v23, 0.0  ;;  %v1249_v31 = vadd.f32 %v16370_v45, %v1210_v24  ;;  %v1213_v32 = vmul.f32 %v14370_v1, %v16365_v43  ;;  %v16419_v2 = vpack.c.bf16 %v16407_v3, %v16397_v18 }
 0x10e   : > { %v1103_v34 = vpop.f32.mrf.mxu0  ;;  %v1465_v38 = vrot.slane %v16407_v3, 1  ;;  %v1467_v39 = vrot.slane %v16409_v26, 1  ;;  %v1471_v44 = vsel %vm1458_vm2, %v1469_v25, %v1470_v28  ;;  %v1473_v49 = vsel %vm1458_vm2, %v1470_v28, %v1472_v29  ;;  %v16443_v53 = vld [vmem:[#allocation2 + $0x60] sm:$0xff] }
 0x10f   : > { %1316 = vst.msk [vmem:[#allocation2 + $0x91] sm:$0xff] %vm764_vm0, %v1283_v30  ;;  %v1281_v46 = vmax.f32 %v1249_v31, 0.0  ;;  %v1252_v47 = vadd.f32 %v16370_v45, %v1213_v32  ;;  %v1211_v48 = vmul.f32 %v16365_v43, %v1103_v34  ;;  %14428 = vmatmul.mubr.msk.bf16.vlgmr.msra.gmra.mxu0 %vm764_vm0, %v16419_v2  ;;  %v1479_v5 = vrot.slane %v16443_v53, 1 }
 0x110   : > { %v14373_v50 = vpop.f32.mrf.mxu0  ;;  %14431 = vmatprep.mubr.msk.bf16.mxu0 %vm764_vm0, %v16428_v37  ;;  %v1466_v51 = vsel %vm1458_vm2, %v1464_v27, %v1465_v38  ;;  %v1468_v52 = vsel %vm1458_vm2, %v1465_v38, %v1467_v39  ;;  %14494 = vmatpush3.bf16.msra.mxu0 %v16351_v36  ;;  %v16451_v58 = vld [vmem:[#allocation2 + $0x48] sm:$0xff]  ;;  %v16459_v36 = vpack.c.bf16 %v1473_v49, %v1471_v44 }
 0x111   : > { %1314 = vst.msk [vmem:[#allocation2 + $0x79] sm:$0xff] %vm764_vm0, %v1281_v46  ;;  %v1284_v54 = vmax.f32 %v1252_v47, 0.0  ;;  %v1250_v55 = vadd.f32 %v16370_v45, %v1211_v48  ;;  %v1216_v56 = vmul.f32 %v14373_v50, %v16365_v43  ;;  %v16449_v57 = vpack.c.bf16 %v1468_v52, %v1466_v51  ;;  %14561 = vmatprep.subr.bf16.mxu0 %v16424_v33 }
 0x112   : > { %v1116_v60 = vpop.f32.mrf.mxu0  ;;  %23502 = vst [vmem:[#allocation10_spill] sm:$0xff] %v16459_v36  ;;  %v16461_v61 = vld [vmem:[#allocation2 + $0x68] sm:$0xff]  ;;  %v16463_v62 = vld [vmem:[#allocation2 + $0x70] sm:$0x3]  ;;  %v1474_v9 = vrot.slane %v16451_v58, 1 }
 0x113   : > { %23501 = vst [vmem:[#allocation9_spill] sm:$0xff] %v16449_v57  ;;  %1317 = vst.msk [vmem:[#allocation2 + $0x99] sm:$0xff] %vm764_vm0, %v1284_v54  ;;  %v1282_v63 = vmax.f32 %v1250_v55, 0.0  ;;  %v1255_v0 = vadd.f32 %v16370_v45, %v1216_v56  ;;  %v1214_v4 = vmul.f32 %v16365_v43, %v1116_v60  ;;  %14394 = vmatmul.mubr.msk.bf16.vlgmr.msra.gmra.mxu1 %vm764_vm0, %v16449_v57  ;;  %v1480_v10 = vrot.slane %v16461_v61, 1 }
 0x114   : > { %14460 = vmatpush3.bf16.msra.mxu1 %v16345_v35  ;;  %14397 = vmatprep.mubr.msk.bf16.mxu1 %vm764_vm0, %v16459_v36  ;;  %v14374_v6 = vpop.f32.mrf.mxu0  ;;  %v16474_v7 = vld [vmem:[#allocation2 + $0x50] sm:$0xff]  ;;  %v16476_v8 = vld [vmem:[#allocation2 + $0x58] sm:$0x3]  ;;  %v1482_v11 = vrot.slane %v16463_v62, 1  ;;  %v16491_v17 = vpack.c.bf16 %v16461_v61, %v16443_v53 }
 0x115   : > { %1315 = vst.msk [vmem:[#allocation2 + $0x81] sm:$0xff] %vm764_vm0, %v1282_v63  ;;  %v1287_v12 = vmax.f32 %v1255_v0, 0.0  ;;  %v1253_v13 = vadd.f32 %v16370_v45, %v1214_v4  ;;  %v1217_v35 = vmul.f32 %v14374_v6, %v16365_v43  ;;  %v16486_v15 = vpack.c.bf16 %v16474_v7, %v16451_v58  ;;  %14527 = vmatprep.subr.bf16.mxu1 %v16456_v59 }
 0x116   : > { %v1119_v16 = vpop.f32.mrf.mxu0  ;;  %v1475_v19 = vrot.slane %v16474_v7, 1  ;;  %v1477_v22 = vrot.slane %v16476_v8, 1  ;;  %v1481_v23 = vsel %vm1458_vm2, %v1479_v5, %v1480_v10  ;;  %v1483_v27 = vsel %vm1458_vm2, %v1480_v10, %v1482_v11  ;;  %v16506_v31 = vld [vmem:[#allocation2 + $0x90] sm:$0xff] }
 0x117   : > { %1320 = vst.msk [vmem:[#allocation2 + $0xc1] sm:$0xff] %vm764_vm0, %v1287_v12  ;;  %v1285_v24 = vmax.f32 %v1253_v13, 0.0  ;;  %v1256_v25 = vadd.f32 %v16370_v45, %v1217_v35  ;;  %v1215_v1 = vmul.f32 %v16365_v43, %v1119_v16  ;;  %14432 = vmatmul.mubr.msk.bf16.gmra.mxu0 %vm764_vm0, %v16486_v15  ;;  %v16515_v47 = vpack.c.bf16 %v1483_v27, %v1481_v23 }
 0x118   : > { %v14377_v28 = vpop.f32.mrf.mxu0  ;;  %14435 = vmatprep.mubr.msk.bf16.mxu0 %vm764_vm0, %v16491_v17  ;;  %v1476_v29 = vsel %vm1458_vm2, %v1474_v9, %v1475_v19  ;;  %v1478_v30 = vsel %vm1458_vm2, %v1475_v19, %v1477_v22  ;;  %v16513_v44 = vld [vmem:[#allocation2 + $0x78] sm:$0xff]  ;;  %v1489_v54 = vrot.slane %v16506_v31, 1 }
 0x119   : > { %1318 = vst.msk [vmem:[#allocation2 + $0xa9] sm:$0xff] %vm764_vm0, %v1285_v24  ;;  %v1288_v32 = vmax.f32 %v1256_v25, 0.0  ;;  %v1254_v34 = vadd.f32 %v16370_v45, %v1215_v1  ;;  %v1220_v38 = vmul.f32 %v14377_v28, %v16365_v43  ;;  %v16511_v39 = vpack.c.bf16 %v1478_v30, %v1476_v29  ;;  %23504 = vst [vmem:[#allocation12_spill] sm:$0xff] %v16515_v47 }
 0x11a   : > { %v1132_v46 = vpop.f32.mrf.mxu0  ;;  %v16517_v48 = vld [vmem:[#allocation2 + $0x98] sm:$0xff]  ;;  %v16519_v49 = vld [vmem:[#allocation2 + $0xa0] sm:$0x3]  ;;  %v1484_v63 = vrot.slane %v16513_v44, 1 }
 0x11b   : > { %23503 = vst [vmem:[#allocation11_spill] sm:$0xff] %v16511_v39  ;;  %1321 = vst.msk [vmem:[#allocation2 + $0xc9] sm:$0xff] %vm764_vm0, %v1288_v32  ;;  %v1286_v50 = vmax.f32 %v1254_v34, 0.0  ;;  %v1259_v51 = vadd.f32 %v16370_v45, %v1220_v38  ;;  %v1218_v52 = vmul.f32 %v16365_v43, %v1132_v46  ;;  %14398 = vmatmul.mubr.msk.bf16.gmra.mxu1 %vm764_vm0, %v16511_v39  ;;  %v1490_v0 = vrot.slane %v16517_v48, 1 }
 0x11c   : > { %14401 = vmatprep.mubr.msk.bf16.mxu1 %vm764_vm0, %v16515_v47  ;;  %v14378_v55 = vpop.f32.mrf.mxu0  ;;  %v16529_v56 = vld [vmem:[#allocation2 + $0x80] sm:$0xff]  ;;  %v16531_v60 = vld [vmem:[#allocation2 + $0x88] sm:$0x3]  ;;  %v1492_v4 = vrot.slane %v16519_v49, 1  ;;  %v16545_v12 = vpack.c.bf16 %v16517_v48, %v16506_v31 }
 0x11d   : > { %1319 = vst.msk [vmem:[#allocation2 + $0xb1] sm:$0xff] %vm764_vm0, %v1286_v50  ;;  %v1291_v5 = vmax.f32 %v1259_v51, 0.0  ;;  %v1257_v6 = vadd.f32 %v16370_v45, %v1218_v52  ;;  %v1221_v9 = vmul.f32 %v14378_v55, %v16365_v43  ;;  %v16541_v10 = vpack.c.bf16 %v16529_v56, %v16513_v44 }
 0x11e   : > { %v1135_v11 = vpop.f32.mrf.mxu0  ;;  %v1485_v13 = vrot.slane %v16529_v56, 1  ;;  %v1487_v35 = vrot.slane %v16531_v60, 1  ;;  %v1491_v16 = vsel %vm1458_vm2, %v1489_v54, %v1490_v0  ;;  %v1493_v24 = vsel %vm1458_vm2, %v1490_v0, %v1492_v4  ;;  %v16560_v28 = vld [vmem:[#allocation2 + $0xc0] sm:$0xff] }
 0x11f   : > { %1324 = vst.msk [vmem:[#allocation2 + $0xf1] sm:$0xff] %vm764_vm0, %v1291_v5  ;;  %v1289_v19 = vmax.f32 %v1257_v6, 0.0  ;;  %v1260_v22 = vadd.f32 %v16370_v45, %v1221_v9  ;;  %v1219_v23 = vmul.f32 %v16365_v43, %v1135_v11  ;;  %14436 = vmatmul.mubr.msk.bf16.gmra.mxu0 %vm764_vm0, %v16541_v10  ;;  %v16569_v50 = vpack.c.bf16 %v1493_v24, %v1491_v16 }
 0x120   : > { %v14381_v25 = vpop.f32.mrf.mxu0  ;;  %14439 = vmatprep.mubr.msk.bf16.mxu0 %vm764_vm0, %v16545_v12  ;;  %v1486_v1 = vsel %vm1458_vm2, %v1484_v63, %v1485_v13  ;;  %v1488_v27 = vsel %vm1458_vm2, %v1485_v13, %v1487_v35  ;;  %v16567_v38 = vld [vmem:[#allocation2 + $0xa8] sm:$0xff]  ;;  %v1499_v0 = vrot.slane %v16560_v28, 1 }
 0x121   : > { %1322 = vst.msk [vmem:[#allocation2 + $0xd9] sm:$0xff] %vm764_vm0, %v1289_v19  ;;  %v1292_v29 = vmax.f32 %v1260_v22, 0.0  ;;  %v1258_v30 = vadd.f32 %v16370_v45, %v1219_v23  ;;  %v1224_v32 = vmul.f32 %v14381_v25, %v16365_v43  ;;  %v16565_v34 = vpack.c.bf16 %v1488_v27, %v1486_v1  ;;  %23506 = vst [vmem:[#allocation14_spill] sm:$0xff] %v16569_v50 }
 0x122   : > { %v1148_v46 = vpop.f32.mrf.mxu0  ;;  %v16571_v51 = vld [vmem:[#allocation2 + $0xc8] sm:$0xff]  ;;  %v16573_v52 = vld [vmem:[#allocation2 + $0xd0] sm:$0x3]  ;;  %v1494_v9 = vrot.slane %v16567_v38, 1 }
 0x123   : > { %23505 = vst [vmem:[#allocation13_spill] sm:$0xff] %v16565_v34  ;;  %1325 = vst.msk [vmem:[#allocation2 + $0xf9] sm:$0xff] %vm764_vm0, %v1292_v29  ;;  %v1290_v54 = vmax.f32 %v1258_v30, 0.0  ;;  %v1263_v55 = vadd.f32 %v16370_v45, %v1224_v32  ;;  %v1222_v63 = vmul.f32 %v16365_v43, %v1148_v46  ;;  %14402 = vmatmul.mubr.msk.bf16.gmra.mxu1 %vm764_vm0, %v16565_v34  ;;  %v1500_v11 = vrot.slane %v16571_v51, 1 }
 0x124   : > { %14405 = vmatprep.mubr.msk.bf16.mxu1 %vm764_vm0, %v16569_v50  ;;  %v14382_v4 = vpop.f32.mrf.mxu0  ;;  %v16583_v5 = vld [vmem:[#allocation2 + $0xb0] sm:$0xff]  ;;  %v16585_v6 = vld [vmem:[#allocation2 + $0xb8] sm:$0x3]  ;;  %v1502_v13 = vrot.slane %v16573_v52, 1  ;;  %v16599_v24 = vpack.c.bf16 %v16571_v51, %v16560_v28 }
 0x125   : > { %1323 = vst.msk [vmem:[#allocation2 + $0xe1] sm:$0xff] %vm764_vm0, %v1290_v54  ;;  %v1295_v35 = vmax.f32 %v1263_v55, 0.0  ;;  %v1261_v16 = vadd.f32 %v16370_v45, %v1222_v63  ;;  %v1225_v19 = vmul.f32 %v14382_v4, %v16365_v43  ;;  %v16595_v22 = vpack.c.bf16 %v16583_v5, %v16567_v38 }
 0x126   : > { %v1151_v23 = vpop.f32.mrf.mxu0  ;;  %v1495_v25 = vrot.slane %v16583_v5, 1  ;;  %v1497_v1 = vrot.slane %v16585_v6, 1  ;;  %v1501_v27 = vsel %vm1458_vm2, %v1499_v0, %v1500_v11  ;;  %v1503_v46 = vsel %vm1458_vm2, %v1500_v11, %v1502_v13  ;;  %v16614_v0 = vld [vmem:[#allocation2 + $0xf0] sm:$0xff] }
 0x127   : > { %1328 = vst.msk [vmem:[#allocation2 + $0x121] sm:$0xff] %vm764_vm0, %v1295_v35  ;;  %v1293_v29 = vmax.f32 %v1261_v16, 0.0  ;;  %v1264_v30 = vadd.f32 %v16370_v45, %v1225_v19  ;;  %v1223_v32 = vmul.f32 %v16365_v43, %v1151_v23  ;;  %14440 = vmatmul.mubr.msk.bf16.gmra.mxu0 %vm764_vm0, %v16595_v22  ;;  %23507 = vst [vmem:[#allocation15_spill] sm:$0xff] %v16614_v0 }
 0x128   : > { %v14385_v54 = vpop.f32.mrf.mxu0  ;;  %14443 = vmatprep.mubr.msk.bf16.mxu0 %vm764_vm0, %v16599_v24  ;;  %v1496_v55 = vsel %vm1458_vm2, %v1494_v9, %v1495_v25  ;;  %v1498_v63 = vsel %vm1458_vm2, %v1495_v25, %v1497_v1  ;;  %v16621_v11 = vld [vmem:[#allocation2 + $0xd8] sm:$0xff]  ;;  %v16623_v23 = vpack.c.bf16 %v1503_v46, %v1501_v27 }
 0x129   : > { %1326 = vst.msk [vmem:[#allocation2 + $0x109] sm:$0xff] %vm764_vm0, %v1293_v29  ;;  %v1296_v4 = vmax.f32 %v1264_v30, 0.0  ;;  %v1262_v35 = vadd.f32 %v16370_v45, %v1223_v32  ;;  %v1228_v16 = vmul.f32 %v14385_v54, %v16365_v43  ;;  %v16619_v19 = vpack.c.bf16 %v1498_v63, %v1496_v55  ;;  %23509 = vst [vmem:[#allocation17_spill] sm:$0xff] %v16621_v11 }
 0x12a   : > { %v1164_v13 = vpop.f32.mrf.mxu0  ;;  %23510 = vst [vmem:[#allocation18_spill] sm:$0xff] %v16623_v23  ;;  %v16625_v42 = vld [vmem:[#allocation2 + $0xf8] sm:$0xff]  ;;  %v16627_v9 = vld [vmem:[#allocation2 + $0x100] sm:$0x3]  ;;  %v1509_v30 = vrot.slane %v16614_v0, 1  ;;  %v1504_v54 = vrot.slane %v16621_v11, 1 }
 0x12b   : > { %23508 = vst [vmem:[#allocation16_spill] sm:$0xff] %v16619_v19  ;;  %1329 = vst.msk [vmem:[#allocation2 + $0x129] sm:$0xff] %vm764_vm0, %v1296_v4  ;;  %v1294_v25 = vmax.f32 %v1262_v35, 0.0  ;;  %v1267_v1 = vadd.f32 %v16370_v45, %v1228_v16  ;;  %v1226_v29 = vmul.f32 %v16365_v43, %v1164_v13  ;;  %14406 = vmatmul.mubr.msk.bf16.gmra.mxu1 %vm764_vm0, %v16619_v19  ;;  %v1510_v55 = vrot.slane %v16625_v42, 1 }
 0x12c   : > { %14409 = vmatprep.mubr.msk.bf16.mxu1 %vm764_vm0, %v16623_v23  ;;  %v14386_v27 = vpop.f32.mrf.mxu0  ;;  %v16637_v32 = vld [vmem:[#allocation2 + $0xe0] sm:$0xff]  ;;  %v16639_v46 = vld [vmem:[#allocation2 + $0xe8] sm:$0x3]  ;;  %v1512_v63 = vrot.slane %v16627_v9, 1  ;;  %v16653_v19 = vpack.c.bf16 %v16625_v42, %v16614_v0 }
 0x12d   : > { %1327 = vst.msk [vmem:[#allocation2 + $0x111] sm:$0xff] %vm764_vm0, %v1294_v25  ;;  %v1299_v4 = vmax.f32 %v1267_v1, 0.0  ;;  %v1265_v35 = vadd.f32 %v16370_v45, %v1226_v29  ;;  %v1229_v16 = vmul.f32 %v14386_v27, %v16365_v43  ;;  %v16649_v13 = vpack.c.bf16 %v16637_v32, %v16621_v11 }
 0x12e   : > { %v1167_v23 = vpop.f32.mrf.mxu0  ;;  %23511 = vst [vmem:[#allocation19_spill] sm:$0xff] %v16653_v19  ;;  %v1505_v50 = vrot.slane %v16637_v32, 1  ;;  %v1507_v34 = vrot.slane %v16639_v46, 1  ;;  %v1511_v25 = vsel %vm1458_vm2, %v1509_v30, %v1510_v55  ;;  %v1513_v47 = vsel %vm1458_vm2, %v1510_v55, %v1512_v63  ;;  %v16668_v57 = vld [vmem:[#allocation2 + $0x120] sm:$0xff] }
 0x12f   : > { %1332 = vst.msk [vmem:[#allocation2 + $0x151] sm:$0xff] %vm764_vm0, %v1299_v4  ;;  %v1297_v1 = vmax.f32 %v1265_v35, 0.0  ;;  %v1268_v29 = vadd.f32 %v16370_v45, %v1229_v16  ;;  %v1227_v27 = vmul.f32 %v16365_v43, %v1167_v23  ;;  %14444 = vmatmul.mubr.msk.bf16.gmra.mxu0 %vm764_vm0, %v16649_v13  ;;  %23512 = vst [vmem:[#allocation20_spill] sm:$0xff] %v16668_v57 }
 0x130   : > { %v14389_v39 = vpop.f32.mrf.mxu0  ;;  %14447 = vmatprep.mubr.msk.bf16.mxu0 %vm764_vm0, %v16653_v19  ;;  %v1506_v36 = vsel %vm1458_vm2, %v1504_v54, %v1505_v50  ;;  %v1508_v30 = vsel %vm1458_vm2, %v1505_v50, %v1507_v34  ;;  %v16675_v55 = vld [vmem:[#allocation2 + $0x108] sm:$0xff]  ;;  %v16677_v0 = vpack.c.bf16 %v1513_v47, %v1511_v25 }
 0x131   : > { %1330 = vst.msk [vmem:[#allocation2 + $0x139] sm:$0xff] %vm764_vm0, %v1297_v1  ;;  %v1300_v4 = vmax.f32 %v1268_v29, 0.0  ;;  %v1266_v23 = vadd.f32 %v16370_v45, %v1227_v27  ;;  %v1232_v35 = vmul.f32 %v14389_v39, %v16365_v43  ;;  %v16673_v16 = vpack.c.bf16 %v1508_v30, %v1506_v36  ;;  %23514 = vst [vmem:[#allocation22_spill] sm:$0xff] %v16675_v55 }
 0x132   : > { %v1180_v63 = vpop.f32.mrf.mxu0  ;;  %23515 = vst [vmem:[#allocation23_spill] sm:$0xff] %v16677_v0  ;;  %v16679_v19 = vld [vmem:[#allocation2 + $0x128] sm:$0xff]  ;;  %v16681_v54 = vld [vmem:[#allocation2 + $0x130] sm:$0x3]  ;;  %v1519_v36 = vrot.slane %v16668_v57, 1  ;;  %v1514_v29 = vrot.slane %v16675_v55, 1 }
 0x133   : > { %23513 = vst [vmem:[#allocation21_spill] sm:$0xff] %v16673_v16  ;;  %23516 = vst [vmem:[#allocation24_spill] sm:$0xff] %v16679_v19  ;;  %v1298_v34 = vmax.f32 %v1266_v23, 0.0  ;;  %v1271_v50 = vadd.f32 %v16370_v45, %v1232_v35  ;;  %v1230_v1 = vmul.f32 %v16365_v43, %v1180_v63  ;;  %14410 = vmatmul.mubr.msk.bf16.gmra.mxu1 %vm764_vm0, %v16673_v16  ;;  %v1520_v27 = vrot.slane %v16679_v19, 1 }
 0x134   : > { %23517 = vst [vmem:[#allocation25_spill] sm:$0xff] %v16681_v54  ;;  %1333 = vst.msk [vmem:[#allocation2 + $0x159] sm:$0xff] %vm764_vm0, %v1300_v4  ;;  %14413 = vmatprep.mubr.msk.bf16.mxu1 %vm764_vm0, %v16677_v0  ;;  %v14390_v39 = vpop.f32.mrf.mxu0  ;;  %v16691_v47 = vld [vmem:[#allocation2 + $0x110] sm:$0xff]  ;;  %v16693_v25 = vld [vmem:[#allocation2 + $0x118] sm:$0x3]  ;;  %v1522_v30 = vrot.slane %v16681_v54, 1  ;;  %v16707_v16 = vpack.c.bf16 %v16679_v19, %v16668_v57 }
 0x135   : > { %1331 = vst.msk [vmem:[#allocation2 + $0x141] sm:$0xff] %vm764_vm0, %v1298_v34  ;;  %v1303_v4 = vmax.f32 %v1271_v50, 0.0  ;;  %v1269_v23 = vadd.f32 %v16370_v45, %v1230_v1  ;;  %v1233_v35 = vmul.f32 %v14390_v39, %v16365_v43  ;;  %v16703_v63 = vpack.c.bf16 %v16691_v47, %v16675_v55 }
 0x136   : > { %v1183_v0 = vpop.f32.mrf.mxu0  ;;  %v1515_v11 = vrot.slane %v16691_v47, 1  ;;  %v1517_v54 = vrot.slane %v16693_v25, 1  ;;  %v1521_v34 = vsel %vm1458_vm2, %v1519_v36, %v1520_v27  ;;  %v1523_v55 = vsel %vm1458_vm2, %v1520_v27, %v1522_v30 }
 0x137   : > { %1336 = vst.msk [vmem:[#allocation2 + $0x181] sm:$0xff] %vm764_vm0, %v1303_v4  ;;  %v1301_v50 = vmax.f32 %v1269_v23, 0.0  ;;  %v1272_v1 = vadd.f32 %v16370_v45, %v1233_v35  ;;  %v1231_v39 = vmul.f32 %v16365_v43, %v1183_v0  ;;  %14448 = vmatmul.mubr.msk.bf16.gmra.mxu0 %vm764_vm0, %v16703_v63  ;;  %v16726_v43 = vld [vmem:[#allocation2 + $0x150] sm:$0xff]  ;;  %v16728_v0 = vpack.c.bf16 %v1523_v55, %v1521_v34 }
 0x138   : > { %14451 = vmatprep.mubr.msk.bf16.mxu0 %vm764_vm0, %v16707_v16  ;;  %v1516_v57 = vsel %vm1458_vm2, %v1514_v29, %v1515_v11  ;;  %v1518_v19 = vsel %vm1458_vm2, %v1515_v11, %v1517_v54  ;;  %23519 = vst [vmem:[#allocation27_spill] sm:$0xff] %v16726_v43  ;;  %v16730_v35 = vld [vmem:[#allocation2 + $0x138] sm:$0xff]  ;;  %v1529_v54 = vrot.slane %v16726_v43, 1 }
 0x139   : > { %1334 = vst.msk [vmem:[#allocation2 + $0x169] sm:$0xff] %vm764_vm0, %v1301_v50  ;;  %v1304_v36 = vmax.f32 %v1272_v1, 0.0  ;;  %v1270_v4 = vadd.f32 %v16370_v45, %v1231_v39  ;;  %v16724_v23 = vpack.c.bf16 %v1518_v19, %v1516_v57  ;;  %23520 = vst [vmem:[#allocation28_spill] sm:$0xff] %v16728_v0  ;;  %v1524_v34 = vrot.slane %v16730_v35, 1 }
 0x13a   : > { %23521 = vst [vmem:[#allocation29_spill] sm:$0xff] %v16730_v35 }
 0x13b   : > { %23518 = vst [vmem:[#allocation26_spill] sm:$0xff] %v16724_v23  ;;  %v16732_v27 = vld [vmem:[#allocation2 + $0x158] sm:$0xff]  ;;  %v16734_v30 = vld [vmem:[#allocation2 + $0x160] sm:$0x3]  ;;  %1337 = vst.msk [vmem:[#allocation2 + $0x189] sm:$0xff] %vm764_vm0, %v1304_v36  ;;  %v1302_v11 = vmax.f32 %v1270_v4, 0.0  ;;  %14414 = vmatmul.mubr.msk.bf16.gmra.mxu1 %vm764_vm0, %v16724_v23 }
 0x13c   : > { %v1530_v45 = vrot.slane %v16732_v27, 1  ;;  %v1532_v57 = vrot.slane %v16734_v30, 1  ;;  %14417 = vmatprep.mubr.msk.bf16.mxu1 %vm764_vm0, %v16728_v0  ;;  %v16743_v19 = vld [vmem:[#allocation2 + $0x140] sm:$0xff]  ;;  %v16745_v55 = vld [vmem:[#allocation2 + $0x148] sm:$0x3]  ;;  %v16758_v39 = vpack.c.bf16 %v16732_v27, %v16726_v43 }
 0x13d   : > { %1335 = vst.msk [vmem:[#allocation2 + $0x171] sm:$0xff] %vm764_vm0, %v1302_v11  ;;  %v16751_v29 = vpack.c.bf16 %v16743_v19, %v16730_v35  ;;  %v1525_v50 = vrot.slane %v16743_v19, 1  ;;  %v1527_v1 = vrot.slane %v16745_v55, 1 }
 0x13e   : > { %v1531_v11 = vsel %vm1458_vm2, %v1529_v54, %v1530_v45  ;;  %v1533_v0 = vsel %vm1458_vm2, %v1530_v45, %v1532_v57 }
 0x13f   : > { %14452 = vmatmul.mubr.msk.bf16.gmra.mxu0 %vm764_vm0, %v16751_v29  ;;  %v1526_v36 = vsel %vm1458_vm2, %v1524_v34, %v1525_v50  ;;  %v1528_v4 = vsel %vm1458_vm2, %v1525_v50, %v1527_v1  ;;  %v16770_v35 = vpack.c.bf16 %v1533_v0, %v1531_v11  ;;  %v2027_v11 = vrot.slane %v16407_v3, 2  ;;  %v16812_v3 = vld [vmem:[%s23498_s27 + $0x38] sm:$0xff]  }
 0x140   : > { %14455 = vmatprep.mubr.msk.bf16.mxu0 %vm764_vm0, %v16758_v39  ;;  %v16768_v23 = vpack.c.bf16 %v1528_v4, %v1526_v36  ;;  %v16772_v43 = vld [vmem:[#allocation2 + $0x168] sm:$0xff] }
 0x141   : > { %23523 = vst [vmem:[#allocation31_spill] sm:$0xff] %v16770_v35  ;;  %23524 = vst [vmem:[#allocation32_spill] sm:$0xff] %v16772_v43  ;;  %v1534_v57 = vrot.slane %v16772_v43, 1 }
 0x142   : > { %23522 = vst [vmem:[#allocation30_spill] sm:$0xff] %v16768_v23 }
 0x143   : > { %14418 = vmatmul.mubr.msk.bf16.gmra.mxu1 %vm764_vm0, %v16768_v23  ;;  %v2032_v23 = vrot.slane %v16399_v20, 2 }
 0x144   : > { %14421 = vmatprep.mubr.msk.bf16.mxu1 %vm764_vm0, %v16770_v35  ;;  %v16778_v34 = vld [vmem:[#allocation2 + $0x170] sm:$0xff]  ;;  %v16780_v54 = vld [vmem:[#allocation2 + $0x178] sm:$0x3]  ;;  %v2029_v35 = vrot.slane %v16409_v26, 2 }
 0x145   : > { %v16784_v45 = vpack.c.bf16 %v16778_v34, %v16772_v43  ;;  %v1535_v0 = vrot.slane %v16778_v34, 1  ;;  %v1537_v50 = vrot.slane %v16780_v54, 1  ;;  %v2034_v43 = vrot.slane %v16401_v21, 2 }
 0x146   : > { %v2030_v20 = vsel %vm2020_vm3, %v2027_v11, %v2029_v35  ;;  %v2037_v35 = vrot.slane %v16474_v7, 2 }
 0x147   : > { %14456 = vmatmul.mubr.msk.bf16.gmra.mxu0 %vm764_vm0, %v16784_v45  ;;  %v1536_v1 = vsel %vm1458_vm2, %v1534_v57, %v1535_v0  ;;  %v1538_v36 = vsel %vm1458_vm2, %v1535_v0, %v1537_v50  ;;  %v23525_v57 = vpack.c.bf16 %v16358_v41, %v16355_v40  ;;  %v2031_v0 = vrot.slane %v16392_v14, 2 }
 0x148   : > { %14495 = vmatprep.mubr.msk.bf16.mxu0 %vm764_vm0, %v16419_v2  ;;  %v16795_v4 = vpack.c.bf16 %v1538_v36, %v1536_v1  ;;  %v2026_v2 = vrot.slane %v16397_v18, 2  ;;  %v2035_v41 = vsel %vm2020_vm3, %v2032_v23, %v2034_v43  ;;  %v16828_v18 = vld [vmem:[%s23498_s27 + $0x30] sm:$0xff]   ;;  %v2044_v43 = vrot.slane %v16463_v62, 2 }
 0x149   : > { %v2033_v40 = vsel %vm2020_vm3, %v2031_v0, %v2032_v23  ;;  %v2039_v23 = vrot.slane %v16476_v8, 2  ;;  %v2036_v50 = vrot.slane %v16451_v58, 2  ;;  %v2041_v1 = vrot.slane %v16443_v53, 2 }
 0x14a   : > { %v2028_v26 = vsel %vm2020_vm3, %v2026_v2, %v2027_v11  ;;  %v16831_v21 = vpack.c.bf16 %v2035_v41, %v2033_v40  ;;  %v2047_v53 = vrot.slane %v16529_v56, 2  ;;  %v2049_v36 = vrot.slane %v16531_v60, 2 }
 0x14b   : > { %14422 = vmatmul.mubr.msk.bf16.gmra.mxu1 %vm764_vm0, %v16795_v4  ;;  %v16823_v14 = vpack.c.bf16 %v2030_v20, %v2028_v26  ;;  %v2038_v7 = vsel %vm2020_vm3, %v2036_v50, %v2037_v35  ;;  %v2040_v8 = vsel %vm2020_vm3, %v2037_v35, %v2039_v23  ;;  %v2052_v11 = vrot.slane %v16517_v48, 2 }
 0x14c   : > { %14461 = vmatprep.mubr.msk.bf16.mxu1 %vm764_vm0, %v23525_v57  ;;  %v16853_v62 = vpack.c.bf16 %v2040_v8, %v2038_v7  ;;  %v2054_v57 = vrot.slane %v16519_v49, 2  ;;  %v2046_v2 = vrot.slane %v16513_v44, 2  ;;  %v2051_v0 = vrot.slane %v16506_v31, 2  ;;  %v23526_v7 = vld [vmem:[#allocation17_spill] sm:$0xff] }
 0x14d   : > { %v2050_v56 = vsel %vm2020_vm3, %v2047_v53, %v2049_v36  ;;  %v2057_v31 = vrot.slane %v16583_v5, 2  ;;  %v2059_v44 = vrot.slane %v16585_v6, 2  ;;  %v2062_v40 = vrot.slane %v16571_v51, 2  ;;  %v23528_v36 = vld [vmem:[#allocation19_spill] sm:$0xff] }
 0x14e   : > { %v2048_v26 = vsel %vm2020_vm3, %v2046_v2, %v2047_v53  ;;  %v2053_v60 = vsel %vm2020_vm3, %v2051_v0, %v2052_v11  ;;  %v2055_v48 = vsel %vm2020_vm3, %v2052_v11, %v2054_v57  ;;  %v2064_v41 = vrot.slane %v16573_v52, 2  ;;  %v23529_v0 = vld [vmem:[#allocation24_spill] sm:$0xff] }
 0x14f   : > { %14496 = vmatmul.mubr.msk.bf16.vlgmr.msra.gmra.mxu0 %vm764_vm0, %v16428_v37  ;;  %v16875_v49 = vpack.c.bf16 %v2050_v56, %v2048_v26  ;;  %v16877_v20 = vpack.c.bf16 %v2055_v48, %v2053_v60  ;;  %v2056_v35 = vrot.slane %v16567_v38, 2  ;;  %v2061_v23 = vrot.slane %v16560_v28, 2  ;;  %v23530_v56 = vld [vmem:[#allocation25_spill] sm:$0xff]  ;;  %v23531_v48 = vld [vmem:[#allocation22_spill] sm:$0xff] }
 0x150   : > { %14499 = vmatprep.mubr.msk.bf16.mxu0 %vm764_vm0, %v16486_v15  ;;  %14562 = vmatpush3.bf16.msra.mxu0 %v16424_v33  ;;  %v2042_v33 = vrot.slane %v16461_v61, 2  ;;  %v2060_v5 = vsel %vm2020_vm3, %v2057_v31, %v2059_v44  ;;  %v2065_v51 = vsel %vm2020_vm3, %v2062_v40, %v2064_v41  ;;  %v2067_v28 = vrot.slane %v16637_v32, 2  ;;  %v23532_v44 = vld [vmem:[#allocation20_spill] sm:$0xff] }
 0x151   : > { %14629 = vmatprep.subr.bf16.mxu0 %v16812_v3  ;;  %v2063_v6 = vsel %vm2020_vm3, %v2061_v23, %v2062_v40  ;;  %v2069_v38 = vrot.slane %v16639_v46, 2  ;;  %v2072_v50 = vrot.slane %v16625_v42, 2  ;;  %v2066_v8 = vrot.slane %v23526_v7, 2 }
 0x152   : > { %v2043_v61 = vsel %vm2020_vm3, %v2041_v1, %v2042_v33  ;;  %v2074_v1 = vrot.slane %v16627_v9, 2  ;;  %v2077_v57 = vrot.slane %v16691_v47, 2  ;;  %v2079_v2 = vrot.slane %v16693_v25, 2 }
 0x153   : > { %14462 = vmatmul.mubr.msk.bf16.vlgmr.msra.gmra.mxu1 %vm764_vm0, %v16823_v14  ;;  %v2068_v53 = vsel %vm2020_vm3, %v2066_v8, %v2067_v28  ;;  %v2070_v32 = vsel %vm2020_vm3, %v2067_v28, %v2069_v38  ;;  %v2082_v26 = vrot.slane %v23529_v0, 2  ;;  %v2084_v60 = vrot.slane %v23530_v56, 2  ;;  %v23533_v38 = vld [vmem:[#allocation29_spill] sm:$0xff]  ;;  %v23537_v56 = vld [vmem:[#allocation10_spill] sm:$0xff] }
 0x154   : > { %14528 = vmatpush3.bf16.msra.mxu1 %v16456_v59  ;;  %14465 = vmatprep.mubr.msk.bf16.mxu1 %vm764_vm0, %v16831_v21  ;;  %v2045_v59 = vsel %vm2020_vm3, %v2042_v33, %v2044_v43  ;;  %v2058_v33 = vsel %vm2020_vm3, %v2056_v35, %v2057_v31  ;;  %v16899_v43 = vpack.c.bf16 %v2065_v51, %v2063_v6  ;;  %v2076_v31 = vrot.slane %v23531_v48, 2  ;;  %v23540_v48 = vld [vmem:[#allocation13_spill] sm:$0xff] }
 0x155   : > { %14595 = vmatprep.subr.bf16.mxu1 %v16828_v18  ;;  %v16855_v58 = vpack.c.bf16 %v2045_v59, %v2043_v61  ;;  %v16897_v52 = vpack.c.bf16 %v2060_v5, %v2058_v33  ;;  %v23527_v61 = vld [vmem:[#allocation15_spill] sm:$0xff]  ;;  %v2075_v42 = vsel %vm2020_vm3, %v2072_v50, %v2074_v1  ;;  %v16919_v9 = vpack.c.bf16 %v2070_v32, %v2068_v53 }
 0x156   : > { %v2071_v59 = vrot.slane %v23527_v61, 2  ;;  %v2081_v40 = vrot.slane %v23532_v44, 2  ;;  %v2078_v41 = vsel %vm2020_vm3, %v2076_v31, %v2077_v57  ;;  %v2080_v47 = vsel %vm2020_vm3, %v2077_v57, %v2079_v2  ;;  %v23534_v1 = vld [vmem:[#allocation27_spill] sm:$0xff]  ;;  %v23542_v31 = vld [vmem:[#allocation16_spill] sm:$0xff]  ;;  %v23543_v44 = vld [vmem:[#allocation18_spill] sm:$0xff] }
 0x157   : > { %14500 = vmatmul.mubr.msk.bf16.gmra.mxu0 %vm764_vm0, %v16491_v17  ;;  %v2085_v35 = vsel %vm2020_vm3, %v2082_v26, %v2084_v60  ;;  %v16941_v23 = vpack.c.bf16 %v2080_v47, %v2078_v41  ;;  %v2087_v5 = vrot.slane %v16743_v19, 2  ;;  %v2089_v6 = vrot.slane %v16745_v55, 2  ;;  %v23538_v60 = vld [vmem:[#allocation11_spill] sm:$0xff]  ;;  %v23546_v47 = vld [vmem:[#allocation26_spill] sm:$0xff] }
 0x158   : > { %14503 = vmatprep.mubr.msk.bf16.mxu0 %vm764_vm0, %v16541_v10  ;;  %v2073_v46 = vsel %vm2020_vm3, %v2071_v59, %v2072_v50  ;;  %v2083_v25 = vsel %vm2020_vm3, %v2081_v40, %v2082_v26  ;;  %v2092_v51 = vrot.slane %v16732_v27, 2  ;;  %v2094_v28 = vrot.slane %v16734_v30, 2  ;;  %v1387_v59 = vld [vmem:[#allocation2 + $0x188] sm:$0xff]  ;;  %v23544_v40 = vld [vmem:[#allocation21_spill] sm:$0xff]  ;;  %v23545_v41 = vld [vmem:[#allocation23_spill] sm:$0xff] }
 0x159   : > { %v16921_v11 = vpack.c.bf16 %v2075_v42, %v2073_v46  ;;  %v16943_v33 = vpack.c.bf16 %v2085_v35, %v2083_v25  ;;  %v2086_v50 = vrot.slane %v23533_v38, 2  ;;  %v2091_v7 = vrot.slane %v23534_v1, 2  ;;  %v1386_v46 = vld [vmem:[#allocation2 + $0x180] sm:$0xff]  ;;  %v23535_v42 = vld [vmem:[#allocation32_spill] sm:$0xff]  ;;  %v1388_v35 = vld [vmem:[#allocation2 + $0x190] sm:$0x3] }
 0x15a   : > { %v2090_v19 = vsel %vm2020_vm3, %v2087_v5, %v2089_v6  ;;  %v2095_v27 = vsel %vm2020_vm3, %v2092_v51, %v2094_v28  ;;  %v2097_v53 = vrot.slane %v16778_v34, 2  ;;  %v2099_v32 = vrot.slane %v16780_v54, 2  ;;  %v23536_v54 = vld [vmem:[#allocation9_spill] sm:$0xff]  ;;  %v23547_v25 = vld [vmem:[#allocation28_spill] sm:$0xff] }
 0x15b   : > { %14466 = vmatmul.mubr.msk.bf16.gmra.mxu1 %vm764_vm0, %v16853_v62  ;;  %v2088_v8 = vsel %vm2020_vm3, %v2086_v50, %v2087_v5  ;;  %v2093_v55 = vsel %vm2020_vm3, %v2091_v7, %v2092_v51  ;;  %v2096_v57 = vrot.slane %v23535_v42, 2  ;;  %v16974_v2 = vpack.c.bf16 %v1387_v59, %v1386_v46  ;;  %v23548_v5 = vld [vmem:[#allocation30_spill] sm:$0xff] }
 0x15c   : > { %14469 = vmatprep.mubr.msk.bf16.mxu1 %vm764_vm0, %v16855_v58  ;;  %v16963_v30 = vpack.c.bf16 %v2090_v19, %v2088_v8  ;;  %v16965_v61 = vpack.c.bf16 %v2095_v27, %v2093_v55  ;;  %v2100_v26 = vsel %vm2020_vm3, %v2097_v53, %v2099_v32  ;;  %v2822_v6 = vrot.slane %v1387_v59, 2  ;;  %v23549_v8 = vld [vmem:[#allocation31_spill] sm:$0xff]  ;;  %v17060_v32 = vld [vmem:[#allocation2 + $0x198] sm:$0xff] }
 0x15d   : > { %v2098_v0 = vsel %vm2020_vm3, %v2096_v57, %v2097_v53  ;;  %v2824_v51 = vrot.slane %v1388_v35, 2  ;;  %v2821_v28 = vrot.slane %v1386_v46, 2  ;;  %v2609_v1 = vrot.slane %v1387_v59, 1  ;;  %v17062_v59 = vld [vmem:[#allocation2 + $0x1a0] sm:$0xff] }
 0x15e   : > { %v16982_v34 = vpack.c.bf16 %v2100_v26, %v2098_v0  ;;  %v2611_v7 = vrot.slane %v1388_v35, 1  ;;  %v2608_v19 = vrot.slane %v1386_v46, 1  ;;  %v3456_v42 = vrot.slane %v17060_v32, 2  ;;  %v17072_v0 = vld [vmem:[#allocation2 + $0x1a8] sm:$0x3] }
 0x15f   : > { %14504 = vmatmul.mubr.msk.bf16.gmra.mxu0 %vm764_vm0, %v16545_v12  ;;  %v2823_v38 = vsel %vm2020_vm3, %v2821_v28, %v2822_v6  ;;  %v2825_v50 = vsel %vm2020_vm3, %v2822_v6, %v2824_v51  ;;  %v3457_v46 = vrot.slane %v17062_v59, 2 }
 0x160   : > { %14507 = vmatprep.mubr.msk.bf16.mxu0 %vm764_vm0, %v16595_v22  ;;  %v17054_v55 = vpack.c.bf16 %v2825_v50, %v2823_v38  ;;  %v2610_v27 = vsel %vm1458_vm2, %v2608_v19, %v2609_v1  ;;  %v2612_v53 = vsel %vm1458_vm2, %v2609_v1, %v2611_v7 }
 0x161   : > { %v17068_v57 = vpack.c.bf16 %v2612_v53, %v2610_v27  ;;  %v17077_v26 = vsel %vm2020_vm3, %v3456_v42, %v3457_v46 }
 0x163   : > { %14470 = vmatmul.mubr.msk.bf16.gmra.mxu1 %vm764_vm0, %v16875_v49 }
 0x164   : > { %14473 = vmatprep.mubr.msk.bf16.mxu1 %vm764_vm0, %v16877_v20 }
 0x167   : > { %14508 = vmatmul.mubr.msk.bf16.gmra.mxu0 %vm764_vm0, %v16599_v24 }
 0x168   : > { %14511 = vmatprep.mubr.msk.bf16.mxu0 %vm764_vm0, %v16649_v13 }
 0x16b   : > { %14474 = vmatmul.mubr.msk.bf16.gmra.mxu1 %vm764_vm0, %v16897_v52 }
 0x16c   : > { %14477 = vmatprep.mubr.msk.bf16.mxu1 %vm764_vm0, %v16899_v43 }
 0x16f   : > { %14512 = vmatmul.mubr.msk.bf16.gmra.mxu0 %vm764_vm0, %v23528_v36 }
 0x170   : > { %14515 = vmatprep.mubr.msk.bf16.mxu0 %vm764_vm0, %v16703_v63 }
 0x173   : > { %14478 = vmatmul.mubr.msk.bf16.gmra.mxu1 %vm764_vm0, %v16919_v9 }
 0x174   : > { %14481 = vmatprep.mubr.msk.bf16.mxu1 %vm764_vm0, %v16921_v11 }
 0x177   : > { %14516 = vmatmul.mubr.msk.bf16.gmra.mxu0 %vm764_vm0, %v16707_v16 }
 0x178   : > { %14519 = vmatprep.mubr.msk.bf16.mxu0 %vm764_vm0, %v16751_v29 }
 0x17b   : > { %14482 = vmatmul.mubr.msk.bf16.gmra.mxu1 %vm764_vm0, %v16941_v23 }
 0x17c   : > { %14485 = vmatprep.mubr.msk.bf16.mxu1 %vm764_vm0, %v16943_v33 }
 0x17f   : > { %14520 = vmatmul.mubr.msk.bf16.gmra.mxu0 %vm764_vm0, %v16758_v39 }
 0x180   : > { %14523 = vmatprep.mubr.msk.bf16.mxu0 %vm764_vm0, %v16784_v45 }
 0x183   : > { %14486 = vmatmul.mubr.msk.bf16.gmra.mxu1 %vm764_vm0, %v16963_v30 }
 0x184   : > { %14489 = vmatprep.mubr.msk.bf16.mxu1 %vm764_vm0, %v16965_v61 }
 0x187   : > { %14524 = vmatmul.mubr.msk.bf16.gmra.mxu0 %vm764_vm0, %v16974_v2 }
 0x188   : > { %14563 = vmatprep.mubr.msk.bf16.mxu0 %vm764_vm0, %v16823_v14  ;;  %v16996_v14 = vld [vmem:[%s23498_s27 + $0x40] sm:$0xff]  }
 0x18b   : > { %14490 = vmatmul.mubr.msk.bf16.gmra.mxu1 %vm764_vm0, %v16982_v34 }
 0x18c   : > { %14529 = vmatprep.mubr.msk.bf16.mxu1 %vm764_vm0, %v23536_v54  ;;  %v3459_v54 = vrot.slane %v17072_v0, 2 }
 0x18f   : > { %14564 = vmatmul.mubr.msk.bf16.vlgmr.msra.gmra.mxu0 %vm764_vm0, %v16831_v21 }
 0x190   : > { %14567 = vmatprep.mubr.msk.bf16.mxu0 %vm764_vm0, %v16853_v62  ;;  %14630 = vmatpush3.bf16.msra.mxu0 %v16812_v3  ;;  %v23539_v3 = vld [vmem:[#allocation12_spill] sm:$0xff] }
 0x193   : > { %14530 = vmatmul.mubr.msk.bf16.vlgmr.msra.gmra.mxu1 %vm764_vm0, %v23537_v56 }
 0x194   : > { %14596 = vmatpush3.bf16.msra.mxu1 %v16828_v18  ;;  %14533 = vmatprep.mubr.msk.bf16.mxu1 %vm764_vm0, %v23538_v60  ;;  %v23541_v18 = vld [vmem:[#allocation14_spill] sm:$0xff] }
 0x195   : > { %14663 = vmatprep.subr.bf16.mxu1 %v16996_v14 }
 0x197   : > { %14568 = vmatmul.mubr.msk.bf16.gmra.mxu0 %vm764_vm0, %v16855_v58 }
 0x198   : > { %14571 = vmatprep.mubr.msk.bf16.mxu0 %vm764_vm0, %v16875_v49 }
 0x19b   : > { %14534 = vmatmul.mubr.msk.bf16.gmra.mxu1 %vm764_vm0, %v23539_v3 }
 0x19c   : > { %14537 = vmatprep.mubr.msk.bf16.mxu1 %vm764_vm0, %v23540_v48 }
 0x19f   : > { %14572 = vmatmul.mubr.msk.bf16.gmra.mxu0 %vm764_vm0, %v16877_v20 }
 0x1a0   : > { %14575 = vmatprep.mubr.msk.bf16.mxu0 %vm764_vm0, %v16897_v52 }
 0x1a3   : > { %14538 = vmatmul.mubr.msk.bf16.gmra.mxu1 %vm764_vm0, %v23541_v18 }
 0x1a4   : > { %14541 = vmatprep.mubr.msk.bf16.mxu1 %vm764_vm0, %v23542_v31 }
 0x1a7   : > { %14576 = vmatmul.mubr.msk.bf16.gmra.mxu0 %vm764_vm0, %v16899_v43 }
 0x1a8   : > { %14579 = vmatprep.mubr.msk.bf16.mxu0 %vm764_vm0, %v16919_v9 }
 0x1ab   : > { %14542 = vmatmul.mubr.msk.bf16.gmra.mxu1 %vm764_vm0, %v23543_v44 }
 0x1ac   : > { %14545 = vmatprep.mubr.msk.bf16.mxu1 %vm764_vm0, %v23544_v40 }
 0x1af   : > { %14580 = vmatmul.mubr.msk.bf16.gmra.mxu0 %vm764_vm0, %v16921_v11 }
 0x1b0   : > { %14583 = vmatprep.mubr.msk.bf16.mxu0 %vm764_vm0, %v16941_v23 }
 0x1b3   : > { %14546 = vmatmul.mubr.msk.bf16.gmra.mxu1 %vm764_vm0, %v23545_v41 }
 0x1b4   : > { %14549 = vmatprep.mubr.msk.bf16.mxu1 %vm764_vm0, %v23546_v47 }
 0x1b7   : > { %14584 = vmatmul.mubr.msk.bf16.gmra.mxu0 %vm764_vm0, %v16943_v33 }
 0x1b8   : > { %14587 = vmatprep.mubr.msk.bf16.mxu0 %vm764_vm0, %v16963_v30 }
 0x1bb   : > { %14550 = vmatmul.mubr.msk.bf16.gmra.mxu1 %vm764_vm0, %v23547_v25 }
 0x1bc   : > { %14553 = vmatprep.mubr.msk.bf16.mxu1 %vm764_vm0, %v23548_v5 }
 0x1bf   : > { %14588 = vmatmul.mubr.msk.bf16.gmra.mxu0 %vm764_vm0, %v16965_v61 }
 0x1c0   : > { %14591 = vmatprep.mubr.msk.bf16.mxu0 %vm764_vm0, %v16982_v34 }
 0x1c3   : > { %14554 = vmatmul.mubr.msk.bf16.gmra.mxu1 %vm764_vm0, %v23549_v8 }
 0x1c4   : > { %14557 = vmatprep.mubr.msk.bf16.mxu1 %vm764_vm0, %v16795_v4 }
 0x1c7   : > { %14592 = vmatmul.mubr.msk.bf16.gmra.mxu0 %vm764_vm0, %v17054_v55 }
 0x1c8   : > { %14631 = vmatprep.mubr.msk.bf16.mxu0 %vm764_vm0, %v23537_v56  ;;  %v17081_v56 = vsel %vm2020_vm3, %v3457_v46, %v3459_v54 }
 0x1cb   : > { %14558 = vmatmul.mubr.msk.bf16.gmra.mxu1 %vm764_vm0, %v17068_v57 }
 0x1cc   : > { %14597 = vmatprep.mubr.msk.bf16.mxu1 %vm764_vm0, %v16428_v37 }
 0x1cf   : > { %v14429_v35 = vpop.f32.mrf.mxu0  ;;  %14632 = vmatmul.mubr.msk.bf16.vlgmr.msra.gmra.mxu0 %vm764_vm0, %v23538_v60 }
 0x1d0   : > { %14635 = vmatprep.mubr.msk.bf16.mxu0 %vm764_vm0, %v23539_v3 }
 0x1d1   : > { %v1893_v51 = vpop.f32.mrf.mxu0 }
 0x1d3   : > { %v14395_v37 = vpop.f32.mrf.mxu1  ;;  %14598 = vmatmul.mubr.msk.bf16.vlgmr.msra.gmra.mxu1 %vm764_vm0, %v16486_v15  ;;  %v14430_v28 = vpop.f32.mrf.mxu0 }
 0x1d4   : > { %v17091_v38 = vadd.f32 %v14429_v35, %v14395_v37  ;;  %14664 = vmatpush3.bf16.msra.mxu1 %v16996_v14  ;;  %14601 = vmatprep.mubr.msk.bf16.mxu1 %vm764_vm0, %v16491_v17 }
 0x1d5   : > { %v1678_v60 = vpop.f32.mrf.mxu1  ;;  %v1896_v50 = vpop.f32.mrf.mxu0 }
 0x1d6   : > { %v17096_v1 = vadd.f32 %v1893_v51, %v1678_v60  ;;  %v15813_v51 = vld [vmem:[%s16182_s26] sm:$0xff] }
 0x1d7   : > { %v14396_v7 = vpop.f32.mrf.mxu1  ;;  %v14433_v19 = vpop.f32.mrf.mxu0  ;;  %14636 = vmatmul.mubr.msk.bf16.gmra.mxu0 %vm764_vm0, %v23540_v48  ;;  %3701 = vrot.lane.b32.xlu0 %v15813_v51, %s23474_s5 }
 0x1d8   : > { %v17100_v3 = vadd.f32 %v14430_v28, %v14396_v7  ;;  %14639 = vmatprep.mubr.msk.bf16.mxu0 %vm764_vm0, %v23541_v18  ;;  %v15815_v7 = vld [vmem:[%s16182_s26 + $0x8] sm:$0xff] }
 0x1d9   : > { %v1681_v15 = vpop.f32.mrf.mxu1  ;;  %v1909_v14 = vpop.f32.mrf.mxu0 }
 0x1da   : > { %v17104_v27 = vadd.f32 %v1896_v50, %v1681_v15 }
 0x1db   : > { %v14399_v17 = vpop.f32.mrf.mxu1  ;;  %14602 = vmatmul.mubr.msk.bf16.gmra.mxu1 %vm764_vm0, %v16541_v10  ;;  %v14434_v53 = vpop.f32.mrf.mxu0  ;;  %3703 = vrot.lane.b32.xlu0 %v15815_v7, %s23474_s5 }
 0x1dc   : > { %v17108_v42 = vadd.f32 %v14433_v19, %v14399_v17  ;;  %14605 = vmatprep.mubr.msk.bf16.mxu1 %vm764_vm0, %v16545_v12  ;;  %v15814_v12 = vld [vmem:[%s16182_s26 + $0x10] sm:$0xff] }
 0x1dd   : > { %v1694_v48 = vpop.f32.mrf.mxu1  ;;  %v1912_v46 = vpop.f32.mrf.mxu0  ;;  %3705 = vrot.lane.b32.xlu1 %v15814_v12, %s23474_s5 }
 0x1de   : > { %v17112_v54 = vadd.f32 %v1909_v14, %v1694_v48  ;;  %v15817_v48 = vld [vmem:[%s16182_s26 + $0x20] sm:$0xff] }
 0x1df   : > { %v14400_v18 = vpop.f32.mrf.mxu1  ;;  %v14437_v35 = vpop.f32.mrf.mxu0  ;;  %14640 = vmatmul.mubr.msk.bf16.gmra.mxu0 %vm764_vm0, %v23542_v31  ;;  %3709 = vrot.lane.b32.xlu0 %v15817_v48, %s23474_s5 }
 0x1e0   : > { %v17118_v10 = vadd.f32 %v14434_v53, %v14400_v18  ;;  %14643 = vmatprep.mubr.msk.bf16.mxu0 %vm764_vm0, %v23543_v44  ;;  %v15816_v44 = vld [vmem:[%s16182_s26 + $0x18] sm:$0xff] }
 0x1e1   : > { %v1697_v37 = vpop.f32.mrf.mxu1  ;;  %v1925_v28 = vpop.f32.mrf.mxu0  ;;  %3707 = vrot.lane.b32.xlu1 %v15816_v44, %s23474_s5 }
 0x1e2   : > { %v17124_v60 = vadd.f32 %v1912_v46, %v1697_v37  ;;  %v15819_v37 = vld [vmem:[%s16182_s26 + $0x30] sm:$0xff] }
 0x1e3   : > { %v14403_v50 = vpop.f32.mrf.mxu1  ;;  %14606 = vmatmul.mubr.msk.bf16.gmra.mxu1 %vm764_vm0, %v16595_v22  ;;  %v14438_v31 = vpop.f32.mrf.mxu0  ;;  %3713 = vrot.lane.b32.xlu0 %v15819_v37, %s23474_s5 }
 0x1e4   : > { %v17130_v19 = vadd.f32 %v14437_v35, %v14403_v50  ;;  %14609 = vmatprep.mubr.msk.bf16.mxu1 %vm764_vm0, %v16599_v24  ;;  %v15818_v24 = vld [vmem:[%s16182_s26 + $0x28] sm:$0xff] }
 0x1e5   : > { %v1710_v15 = vpop.f32.mrf.mxu1  ;;  %v1928_v14 = vpop.f32.mrf.mxu0  ;;  %3711 = vrot.lane.b32.xlu1 %v15818_v24, %s23474_s5 }
 0x1e6   : > { %v17136_v17 = vadd.f32 %v1925_v28, %v1710_v15  ;;  %v15821_v15 = vld [vmem:[%s16182_s26 + $0x40] sm:$0xff] }
 0x1e7   : > { %v14404_v53 = vpop.f32.mrf.mxu1  ;;  %v14441_v22 = vpop.f32.mrf.mxu0  ;;  %14644 = vmatmul.mubr.msk.bf16.gmra.mxu0 %vm764_vm0, %v23544_v40  ;;  %3717 = vrot.lane.b32.xlu0 %v15821_v15, %s23474_s5 }
 0x1e8   : > { %v17142_v46 = vadd.f32 %v14438_v31, %v14404_v53  ;;  %14647 = vmatprep.mubr.msk.bf16.mxu0 %vm764_vm0, %v23545_v41  ;;  %v15820_v41 = vld [vmem:[%s16182_s26 + $0x38] sm:$0xff] }
 0x1e9   : > { %v1713_v18 = vpop.f32.mrf.mxu1  ;;  %v1941_v35 = vpop.f32.mrf.mxu0  ;;  %3715 = vrot.lane.b32.xlu1 %v15820_v41, %s23474_s5 }
 0x1ea   : > { %v17148_v51 = vadd.f32 %v1928_v14, %v1713_v18  ;;  %v15823_v18 = vld [vmem:[%s16182_s26 + $0x50] sm:$0xff] }
 0x1eb   : > { %v14407_v12 = vpop.f32.mrf.mxu1  ;;  %14610 = vmatmul.mubr.msk.bf16.gmra.mxu1 %vm764_vm0, %v16649_v13  ;;  %v14442_v40 = vpop.f32.mrf.mxu0  ;;  %3721 = vrot.lane.b32.xlu0 %v15823_v18, %s23474_s5 }
 0x1ec   : > { %v17154_v28 = vadd.f32 %v14441_v22, %v14407_v12  ;;  %14613 = vmatprep.mubr.msk.bf16.mxu1 %vm764_vm0, %v23528_v36  ;;  %v15822_v36 = vld [vmem:[%s16182_s26 + $0x48] sm:$0xff] }
 0x1ed   : > { %v1726_v50 = vpop.f32.mrf.mxu1  ;;  %v1944_v31 = vpop.f32.mrf.mxu0  ;;  %3719 = vrot.lane.b32.xlu1 %v15822_v36, %s23474_s5  ;;  %v15827_v36 = vld [vmem:[%s16182_s26 + $0x70] sm:$0xff] }
 0x1ee   : > { %v17160_v7 = vadd.f32 %v1941_v35, %v1726_v50  ;;  %v15825_v50 = vld [vmem:[%s16182_s26 + $0x60] sm:$0xff] }
 0x1ef   : > { %v14408_v44 = vpop.f32.mrf.mxu1  ;;  %v14445_v13 = vpop.f32.mrf.mxu0  ;;  %14648 = vmatmul.mubr.msk.bf16.gmra.mxu0 %vm764_vm0, %v23546_v47  ;;  %3725 = vrot.lane.b32.xlu0 %v15825_v50, %s23474_s5 }
 0x1f0   : > { %v17166_v14 = vadd.f32 %v14442_v40, %v14408_v44  ;;  %14651 = vmatprep.mubr.msk.bf16.mxu0 %vm764_vm0, %v23547_v25  ;;  %v15824_v25 = vld [vmem:[%s16182_s26 + $0x58] sm:$0xff] }
 0x1f1   : > { %v1729_v53 = vpop.f32.mrf.mxu1  ;;  %v1957_v22 = vpop.f32.mrf.mxu0  ;;  %3723 = vrot.lane.b32.xlu1 %v15824_v25, %s23474_s5 }
 0x1f2   : > { %v17172_v48 = vadd.f32 %v1944_v31, %v1729_v53 }
 0x1f3   : > { %v14411_v24 = vpop.f32.mrf.mxu1  ;;  %14614 = vmatmul.mubr.msk.bf16.gmra.mxu1 %vm764_vm0, %v16703_v63  ;;  %v14446_v47 = vpop.f32.mrf.mxu0  ;;  %3729 = vrot.lane.b32.xlu0 %v15827_v36, %s23474_s5 }
 0x1f4   : > { %v17178_v35 = vadd.f32 %v14445_v13, %v14411_v24  ;;  %14617 = vmatprep.mubr.msk.bf16.mxu1 %vm764_vm0, %v16707_v16  ;;  %v15826_v16 = vld [vmem:[%s16182_s26 + $0x68] sm:$0xff]  ;;  %v3246_v24 = vrot.slane %v17072_v0, 1 }
 0x1f5   : > { %v1742_v12 = vpop.f32.mrf.mxu1  ;;  %v17184_v40 = vpop.f32.mrf.mxu0  ;;  %3727 = vrot.lane.b32.xlu1 %v15826_v16, %s23474_s5  ;;  %v15830_v16 = vld [vmem:[%s16182_s26 + $0x88] sm:$0xff] }
 0x1f6   : > { %v17186_v37 = vadd.f32 %v1957_v22, %v1742_v12  ;;  %v3244_v22 = vrot.slane %v17062_v59, 1 }
 0x1f7   : > { %v14412_v63 = vpop.f32.mrf.mxu1  ;;  %v14449_v41 = vpop.f32.mrf.mxu0  ;;  %14652 = vmatmul.mubr.msk.bf16.gmra.mxu0 %vm764_vm0, %v23548_v5 }
 0x1f8   : > { %v17192_v31 = vadd.f32 %v14446_v47, %v14412_v63  ;;  %14655 = vmatprep.mubr.msk.bf16.mxu0 %vm764_vm0, %v23549_v8  ;;  %v3243_v8 = vrot.slane %v17060_v32, 1  ;;  %v15828_v47 = vld [vmem:[%s16182_s26 + $0x78] sm:$0xff]  ;;  %v3247_v50 = vsel %vm1458_vm2, %v3244_v22, %v3246_v24 }
 0x1f9   : > { %v17198_v44 = vpop.f32.mrf.mxu1  ;;  %v1973_v13 = vpop.f32.mrf.mxu0  ;;  %3731 = vrot.lane.b32.xlu1 %v15828_v47, %s23474_s5  ;;  %v15831_v47 = vld [vmem:[%s16182_s26 + $0x90] sm:$0xff] }
 0x1fa   : > { %v3245_v0 = vsel %vm1458_vm2, %v3243_v8, %v3244_v22  ;;  %v15832_v8 = vld [vmem:[%s16182_s26 + $0x98] sm:$0xff] }
 0x1fb   : > { %v14415_v15 = vpop.f32.mrf.mxu1  ;;  %14618 = vmatmul.mubr.msk.bf16.gmra.mxu1 %vm764_vm0, %v16751_v29  ;;  %v14450_v5 = vpop.f32.mrf.mxu0  ;;  %v3250_v36 = vpack.c.bf16 %v3247_v50, %v3245_v0  ;;  %v15834_v0 = vld [vmem:[%s16182_s26 + $0xa8] sm:$0xff] }
 0x1fc   : > { %v17204_v53 = vadd.f32 %v14449_v41, %v14415_v15  ;;  %14621 = vmatprep.mubr.msk.bf16.mxu1 %vm764_vm0, %v16758_v39  ;;  %v15829_v39 = vld [vmem:[%s16182_s26 + $0x80] sm:$0xff] }
 0x1fd   : > { %v1758_v29 = vpop.f32.mrf.mxu1  ;;  %v17213_v18 = vpop.f32.mrf.mxu0  ;;  %3733 = vrot.lane.b32.xlu0 %v15829_v39, %s23474_s5  ;;  %3735 = vrot.lane.b32.xlu1 %v15830_v16, %s23474_s5  ;;  %v3034_v39 = vpack.c.bf16 %v17062_v59, %v17060_v32  ;;  %v15835_v59 = vld [vmem:[%s16182_s26 + $0xb0] sm:$0xff] }
 0x1fe   : > { %v17215_v25 = vadd.f32 %v1973_v13, %v1758_v29 }
 0x1ff   : > { %v14416_v12 = vpop.f32.mrf.mxu1  ;;  %v14453_v63 = vpop.f32.mrf.mxu0  ;;  %14656 = vmatmul.mubr.msk.bf16.gmra.mxu0 %vm764_vm0, %v16795_v4 }
 0x200   : > { %v17221_v41 = vadd.f32 %v14450_v5, %v14416_v12  ;;  %14659 = vmatprep.mubr.msk.bf16.mxu0 %vm764_vm0, %v17068_v57 }
 0x201   : > { %v17229_v13 = vpop.f32.mrf.mxu1  ;;  %v1989_v15 = vpop.f32.mrf.mxu0  ;;  %3737 = vrot.lane.b32.xlu0 %v15831_v47, %s23474_s5  ;;  %3739 = vrot.lane.b32.xlu1 %v15832_v8, %s23474_s5 }
 0x203   : > { %v14419_v4 = vpop.f32.mrf.mxu1  ;;  %14622 = vmatmul.mubr.msk.bf16.gmra.mxu1 %vm764_vm0, %v16784_v45  ;;  %v14454_v5 = vpop.f32.mrf.mxu0 }
 0x204   : > { %v17235_v57 = vadd.f32 %v14453_v63, %v14419_v4  ;;  %14625 = vmatprep.mubr.msk.bf16.mxu1 %vm764_vm0, %v16974_v2  ;;  %v15833_v63 = vld [vmem:[%s16182_s26 + $0xa0] sm:$0xff] }
 0x205   : > { %v1774_v22 = vpop.f32.mrf.mxu1  ;;  %v17241_v24 = vpop.f32.mrf.mxu0  ;;  %3741 = vrot.lane.b32.xlu0 %v15833_v63, %s23474_s5  ;;  %3743 = vrot.lane.b32.xlu1 %v15834_v0, %s23474_s5  ;;  %v15838_v63 = vld [vmem:[%s16182_s26 + $0xc8] sm:$0xff] }
 0x206   : > { %v17243_v45 = vadd.f32 %v1989_v15, %v1774_v22 }
 0x207   : > { %v14420_v29 = vpop.f32.mrf.mxu1  ;;  %v14457_v12 = vpop.f32.mrf.mxu0  ;;  %14660 = vmatmul.mubr.msk.bf16.gmra.mxu0 %vm764_vm0, %v3250_v36 }
 0x208   : > { %v17250_v2 = vadd.f32 %v14454_v5, %v14420_v29  ;;  %v15836_v5 = vld [vmem:[%s16182_s26 + $0xb8] sm:$0xff] }
 0x209   : > { %v17254_v50 = vpop.f32.mrf.mxu1  ;;  %v2005_v16 = vpop.f32.mrf.mxu0  ;;  %3745 = vrot.lane.b32.xlu0 %v15835_v59, %s23474_s5  ;;  %3747 = vrot.lane.b32.xlu1 %v15836_v5, %s23474_s5  ;;  %v15839_v59 = vld [vmem:[%s16182_s26 + $0xd0] sm:$0xff] }
 0x20b   : > { %v14423_v15 = vpop.f32.mrf.mxu1  ;;  %14626 = vmatmul.mubr.msk.bf16.gmra.mxu1 %vm764_vm0, %v3034_v39  ;;  %v14458_v32 = vpop.f32.mrf.mxu0  ;;  %v15837_v39 = vld [vmem:[%s16182_s26 + $0xc0] sm:$0xff] }
 0x20c   : > { %v17259_v4 = vadd.f32 %v14457_v12, %v14423_v15  ;;  %14665 = vmatprep.mubr.msk.bf16.mxu1 %vm764_vm0, %v16831_v21 }
 0x20d   : > { %v1790_v36 = vpop.f32.mrf.mxu1  ;;  %v17265_v47 = vpop.f32.mrf.mxu0  ;;  %3749 = vrot.lane.b32.xlu0 %v15837_v39, %s23474_s5  ;;  %3751 = vrot.lane.b32.xlu1 %v15838_v63, %s23474_s5 }
 0x20e   : > { %23550 = vst [vmem:[#allocation17_spill] sm:$0xff] %v17265_v47  ;;  %v17267_v8 = vadd.f32 %v2005_v16, %v1790_v36  ;;  %v15841_v47 = vld [vmem:[%s16182_s26 + $0xe0] sm:$0xff] }
 0x20f   : > { %v14424_v22 = vpop.f32.mrf.mxu1  ;;  %v14497_v29 = vpop.f32.mrf.mxu0 }
 0x210   : > { %v17271_v12 = vadd.f32 %v14458_v32, %v14424_v22  ;;  %v15840_v32 = vld [vmem:[%s16182_s26 + $0xd8] sm:$0xff] }
 0x211   : > { %v17275_v21 = vpop.f32.mrf.mxu1  ;;  %v2446_v0 = vpop.f32.mrf.mxu0  ;;  %3753 = vrot.lane.b32.xlu0 %v15839_v59, %s23474_s5  ;;  %3755 = vrot.lane.b32.xlu1 %v15840_v32, %s23474_s5 }
 0x213   : > { %v14463_v15 = vpop.f32.mrf.mxu1  ;;  %14666 = vmatmul.mubr.msk.bf16.vlgmr.msra.gmra.mxu1 %vm764_vm0, %v16853_v62  ;;  %v14498_v16 = vpop.f32.mrf.mxu0 }
 0x214   : > { %v2369_v5 = vadd.f32 %v14463_v15, %v17091_v38  ;;  %14669 = vmatprep.mubr.msk.bf16.mxu1 %vm764_vm0, %v16855_v58  ;;  %v15842_v15 = vld [vmem:[%s16182_s26 + $0xe8] sm:$0xff] }
 0x215   : > { %v2240_v36 = vpop.f32.mrf.mxu1  ;;  %v17286_v22 = vpop.f32.mrf.mxu0  ;;  %3757 = vrot.lane.b32.xlu0 %v15841_v47, %s23474_s5  ;;  %3759 = vrot.lane.b32.xlu1 %v15842_v15, %s23474_s5 }
 0x216   : > { %v2367_v39 = vadd.f32 %v2240_v36, %v17096_v1  ;;  %v17289_v63 = vadd.f32 %v14497_v29, %v2369_v5  ;;  %v15843_v36 = vld [vmem:[%s16182_s26 + $0xf0] sm:$0xff] }
 0x217   : > { %v14464_v62 = vpop.f32.mrf.mxu1  ;;  %v14501_v6 = vpop.f32.mrf.mxu0 }
 0x218   : > { %v2370_v38 = vadd.f32 %v14464_v62, %v17100_v3  ;;  %v17294_v58 = vadd.f32 %v2446_v0, %v2367_v39  ;;  %v15844_v0 = vld [vmem:[%s16182_s26 + $0xf8] sm:$0xff]  ;;  %s23630_s26 = sld [smem:[#allocation98_spill]] }
 0x219   : > { %v2243_v59 = vpop.f32.mrf.mxu1  ;;  %v2462_v32 = vpop.f32.mrf.mxu0  ;;  %3761 = vrot.lane.b32.xlu0 %v15843_v36, %s23474_s5  ;;  %3763 = vrot.lane.b32.xlu1 %v15844_v0, %s23474_s5 }
 0x21a   : > { %v17299_v1 = vadd.f32 %v2243_v59, %v17104_v27  ;;  %v17301_v29 = vadd.f32 %v14498_v16, %v2370_v38 }
 0x21b   : > { %v14467_v5 = vpop.f32.mrf.mxu1  ;;  %14670 = vmatmul.mubr.msk.bf16.gmra.mxu1 %vm764_vm0, %v16875_v49  ;;  %v14502_v47 = vpop.f32.mrf.mxu0 }
 0x21c   : > { %v2373_v3 = vadd.f32 %v14467_v5, %v17108_v42  ;;  %14673 = vmatprep.mubr.msk.bf16.mxu1 %vm764_vm0, %v16877_v20 }
 0x21d   : > { %v2256_v27 = vpop.f32.mrf.mxu1  ;;  %v17312_v39 = vpop.f32.mrf.mxu0 }
 0x21e   : > { %v2371_v16 = vadd.f32 %v2256_v27, %v17112_v54  ;;  %v17315_v62 = vadd.f32 %v14501_v6, %v2373_v3 }
 0x21f   : > { %v14468_v49 = vpop.f32.mrf.mxu1  ;;  %v14505_v38 = vpop.f32.mrf.mxu0 }
 0x220   : > { %v2374_v15 = vadd.f32 %v14468_v49, %v17118_v10  ;;  %v17318_v59 = vadd.f32 %v2462_v32, %v2371_v16 }
 0x221   : > { %v2259_v42 = vpop.f32.mrf.mxu1  ;;  %v2478_v5 = vpop.f32.mrf.mxu0 }
 0x222   : > { %v17321_v20 = vadd.f32 %v2259_v42, %v17124_v60  ;;  %v17323_v36 = vadd.f32 %v14502_v47, %v2374_v15  ;;  %v15779_v60 = vld [vmem:[%s23551_s1 + $0x8] ss:$0 sps:$4 sm:$0xff]  }
 0x223   : > { %v14471_v0 = vpop.f32.mrf.mxu1  ;;  %14674 = vmatmul.mubr.msk.bf16.gmra.mxu1 %vm764_vm0, %v16897_v52  ;;  %v14506_v54 = vpop.f32.mrf.mxu0  ;;  %15725 = vmatprep.subr.msk.bf16.mxu0 %vm4017_vm4, %v15779_v60 }
 0x224   : > { %v2377_v6 = vadd.f32 %v14471_v0, %v17130_v19  ;;  %14677 = vmatprep.mubr.msk.bf16.mxu1 %vm764_vm0, %v16899_v43  ;;  %v4019_v43 = vsel %vm4017_vm4, %v15779_v60, 0 }
 0x225   : > { %v2272_v10 = vpop.f32.mrf.mxu1  ;;  %v17330_v32 = vpop.f32.mrf.mxu0  ;;  %14698 = vmatpush3.bf16.msra.mxu0 %v4019_v43 }
 0x226   : > { %v2375_v3 = vadd.f32 %v2272_v10, %v17136_v17  ;;  %v17333_v27 = vadd.f32 %v14505_v38, %v2377_v6 }
 0x227   : > { %v14472_v47 = vpop.f32.mrf.mxu1  ;;  %v14509_v52 = vpop.f32.mrf.mxu0 }
 0x228   : > { %v2378_v16 = vadd.f32 %v14472_v47, %v17142_v46  ;;  %v17339_v19 = vadd.f32 %v2478_v5, %v2375_v3 }
 0x229   : > { %v2275_v49 = vpop.f32.mrf.mxu1  ;;  %v2494_v15 = vpop.f32.mrf.mxu0 }
 0x22a   : > { %v17344_v17 = vadd.f32 %v2275_v49, %v17148_v51  ;;  %v17346_v38 = vadd.f32 %v14506_v54, %v2378_v16 }
 0x22b   : > { %v14475_v42 = vpop.f32.mrf.mxu1  ;;  %14678 = vmatmul.mubr.msk.bf16.gmra.mxu1 %vm764_vm0, %v16919_v9  ;;  %v14510_v0 = vpop.f32.mrf.mxu0 }
 0x22c   : > { %v2381_v46 = vadd.f32 %v14475_v42, %v17154_v28  ;;  %14681 = vmatprep.mubr.msk.bf16.mxu1 %vm764_vm0, %v16921_v11 }
 0x22d   : > { %v2288_v5 = vpop.f32.mrf.mxu1  ;;  %v17353_v6 = vpop.f32.mrf.mxu0 }
 0x22e   : > { %v2379_v10 = vadd.f32 %v2288_v5, %v17160_v7  ;;  %v17356_v3 = vadd.f32 %v14509_v52, %v2381_v46 }
 0x22f   : > { %v14476_v51 = vpop.f32.mrf.mxu1  ;;  %v14513_v54 = vpop.f32.mrf.mxu0 }
 0x230   : > { %v2382_v60 = vadd.f32 %v14476_v51, %v17166_v14  ;;  %v17359_v47 = vadd.f32 %v2494_v15, %v2379_v10 }
 0x231   : > { %v2291_v9 = vpop.f32.mrf.mxu1  ;;  %v2510_v16 = vpop.f32.mrf.mxu0 }
 0x232   : > { %v17362_v28 = vadd.f32 %v2291_v9, %v17172_v48  ;;  %v17364_v43 = vadd.f32 %v14510_v0, %v2382_v60 }
 0x233   : > { %v14479_v11 = vpop.f32.mrf.mxu1  ;;  %14682 = vmatmul.mubr.msk.bf16.gmra.mxu1 %vm764_vm0, %v16941_v23  ;;  %v14514_v7 = vpop.f32.mrf.mxu0 }
 0x234   : > { %v2385_v52 = vadd.f32 %v14479_v11, %v17178_v35  ;;  %14685 = vmatprep.mubr.msk.bf16.mxu1 %vm764_vm0, %v16943_v33 }
 0x235   : > { %v2304_v14 = vpop.f32.mrf.mxu1  ;;  %v17371_v49 = vpop.f32.mrf.mxu0 }
 0x236   : > { %v2383_v15 = vadd.f32 %v2304_v14, %v17186_v37  ;;  %v17374_v42 = vadd.f32 %v14513_v54, %v2385_v52 }
 0x237   : > { %v14480_v48 = vpop.f32.mrf.mxu1  ;;  %v14517_v0 = vpop.f32.mrf.mxu0 }
 0x238   : > { %v2386_v46 = vadd.f32 %v14480_v48, %v17192_v31  ;;  %v17377_v5 = vadd.f32 %v2510_v16, %v2383_v15 }
 0x239   : > { %v17379_v23 = vpop.f32.mrf.mxu1  ;;  %v2526_v10 = vpop.f32.mrf.mxu0 }
 0x23a   : > { %v17381_v35 = vadd.f32 %v14514_v7, %v2386_v46 }
 0x23b   : > { %v14483_v51 = vpop.f32.mrf.mxu1  ;;  %14686 = vmatmul.mubr.msk.bf16.gmra.mxu1 %vm764_vm0, %v16963_v30  ;;  %v14518_v33 = vpop.f32.mrf.mxu0 }
 0x23c   : > { %v2389_v37 = vadd.f32 %v14483_v51, %v17204_v53  ;;  %14689 = vmatprep.mubr.msk.bf16.mxu1 %vm764_vm0, %v16965_v61 }
 0x23d   : > { %v2320_v54 = vpop.f32.mrf.mxu1  ;;  %v17388_v60 = vpop.f32.mrf.mxu0 }
 0x23e   : > { %v2387_v31 = vadd.f32 %v2320_v54, %v17215_v25  ;;  %v17391_v9 = vadd.f32 %v14517_v0, %v2389_v37 }
 0x23f   : > { %v14484_v16 = vpop.f32.mrf.mxu1  ;;  %v14521_v11 = vpop.f32.mrf.mxu0 }
 0x240   : > { %v2390_v7 = vadd.f32 %v14484_v16, %v17221_v41  ;;  %v17394_v52 = vadd.f32 %v2526_v10, %v2387_v31  ;;  %v15780_v10 = vld [vmem:[%s23551_s1] sm:$0xff]   ;;  %v23552_v31 = vpack.c.bf16 %v17081_v56, %v17077_v26 }
 0x241   : > { %v17396_v30 = vpop.f32.mrf.mxu1  ;;  %v2542_v14 = vpop.f32.mrf.mxu0  ;;  %14699 = vmatprep.subr.bf16.mxu0 %v15780_v10 }
 0x242   : > { %v17398_v53 = vadd.f32 %v14518_v33, %v2390_v7  ;;  %14700 = vmatpush3.bf16.msra.mxu0 %v15780_v10 }
 0x243   : > { %v14487_v15 = vpop.f32.mrf.mxu1  ;;  %14690 = vmatmul.mubr.msk.bf16.gmra.mxu1 %vm764_vm0, %v16982_v34  ;;  %v14522_v61 = vpop.f32.mrf.mxu0 }
 0x244   : > { %v2393_v25 = vadd.f32 %v14487_v15, %v17235_v57  ;;  %14693 = vmatprep.mubr.msk.bf16.mxu1 %vm764_vm0, %v17054_v55 }
 0x245   : > { %v2336_v48 = vpop.f32.mrf.mxu1  ;;  %v17405_v0 = vpop.f32.mrf.mxu0 }
 0x246   : > { %v2391_v41 = vadd.f32 %v2336_v48, %v17243_v45  ;;  %v17408_v46 = vadd.f32 %v14521_v11, %v2393_v25 }
 0x247   : > { %v14488_v51 = vpop.f32.mrf.mxu1  ;;  %v14525_v33 = vpop.f32.mrf.mxu0 }
 0x248   : > { %v2394_v34 = vadd.f32 %v14488_v51, %v17250_v2  ;;  %v17414_v37 = vadd.f32 %v2542_v14, %v2391_v41 }
 0x249   : > { %v17416_v57 = vpop.f32.mrf.mxu1  ;;  %v2558_v55 = vpop.f32.mrf.mxu0 }
 0x24a   : > { %v17418_v54 = vadd.f32 %v14522_v61, %v2394_v34 }
 0x24b   : > { %v14491_v45 = vpop.f32.mrf.mxu1  ;;  %14694 = vmatmul.mubr.msk.bf16.gmra.mxu1 %vm764_vm0, %v23552_v31  ;;  %v14526_v16 = vpop.f32.mrf.mxu0 }
 0x24c   : > { %v2397_v11 = vadd.f32 %v14491_v45, %v17259_v4 }
 0x24d   : > { %v2352_v7 = vpop.f32.mrf.mxu1  ;;  %v17425_v2 = vpop.f32.mrf.mxu0 }
 0x24e   : > { %v2395_v14 = vadd.f32 %v2352_v7, %v17267_v8  ;;  %v17428_v15 = vadd.f32 %v14525_v33, %v2397_v11 }
 0x24f   : > { %v14492_v25 = vpop.f32.mrf.mxu1  ;;  %v14565_v48 = vpop.f32.mrf.mxu0 }
 0x250   : > { %v2398_v61 = vadd.f32 %v14492_v25, %v17271_v12  ;;  %v17431_v41 = vadd.f32 %v2558_v55, %v2395_v14 }
 0x251   : > { %v17433_v10 = vpop.f32.mrf.mxu1  ;;  %v17435_v26 = vpop.f32.mrf.mxu0 }
 0x252   : > { %v17437_v56 = vadd.f32 %v14526_v16, %v2398_v61 }
 0x253   : > { %v14531_v4 = vpop.f32.mrf.mxu1  ;;  %v17439_v51 = vpop.f32.mrf.mxu0 }
 0x254   : > { %v2791_v34 = vadd.f32 %v14531_v4, %v17289_v63 }
 0x255   : > { %v2662_v8 = vpop.f32.mrf.mxu1  ;;  %v17442_v33 = vpop.f32.mrf.mxu0 }
 0x256   : > { %23553 = vst [vmem:[#allocation15_spill] sm:$0xff] %v17442_v33  ;;  %v17445_v45 = vadd.f32 %v2662_v8, %v17294_v58  ;;  %v17447_v12 = vadd.f32 %v14565_v48, %v2791_v34 }
 0x257   : > { %v14532_v55 = vpop.f32.mrf.mxu1  ;;  %v14569_v31 = vpop.f32.mrf.mxu0 }
 0x258   : > { %v17450_v11 = vadd.f32 %v14532_v55, %v17301_v29 }
 0x259   : > { %v17452_v16 = vpop.f32.mrf.mxu1  ;;  %v17454_v7 = vpop.f32.mrf.mxu0 }
 0x25a   : > { %23554 = vst [vmem:[#allocation19_spill] sm:$0xff] %v17454_v7 }
 0x25b   : > { %v14535_v14 = vpop.f32.mrf.mxu1  ;;  %v17456_v25 = vpop.f32.mrf.mxu0 }
 0x25c   : > { %23555 = vst [vmem:[#allocation24_spill] sm:$0xff] %v17456_v25  ;;  %v2795_v63 = vadd.f32 %v14535_v14, %v17315_v62 }
 0x25d   : > { %v2678_v61 = vpop.f32.mrf.mxu1  ;;  %v17459_v4 = vpop.f32.mrf.mxu0 }
 0x25e   : > { %23556 = vst [vmem:[#allocation25_spill] sm:$0xff] %v17459_v4  ;;  %v17462_v58 = vadd.f32 %v2678_v61, %v17318_v59  ;;  %v17464_v48 = vadd.f32 %v14569_v31, %v2795_v63 }
 0x25f   : > { %v14536_v34 = vpop.f32.mrf.mxu1  ;;  %v14573_v29 = vpop.f32.mrf.mxu0 }
 0x260   : > { %v17467_v8 = vadd.f32 %v14536_v34, %v17323_v36 }
 0x261   : > { %v17469_v55 = vpop.f32.mrf.mxu1  ;;  %v17471_v7 = vpop.f32.mrf.mxu0 }
 0x262   : > { %23557 = vst [vmem:[#allocation22_spill] sm:$0xff] %v17467_v8  ;;  %23558 = vst [vmem:[#allocation20_spill] sm:$0xff] %v17471_v7 }
 0x263   : > { %v14539_v25 = vpop.f32.mrf.mxu1  ;;  %v17473_v33 = vpop.f32.mrf.mxu0 }
 0x264   : > { %23559 = vst [vmem:[#allocation29_spill] sm:$0xff] %v17473_v33  ;;  %v2799_v62 = vadd.f32 %v14539_v25, %v17333_v27 }
 0x265   : > { %v2694_v14 = vpop.f32.mrf.mxu1  ;;  %v17476_v4 = vpop.f32.mrf.mxu0 }
 0x266   : > { %23560 = vst [vmem:[#allocation27_spill] sm:$0xff] %v17476_v4  ;;  %v17479_v59 = vadd.f32 %v2694_v14, %v17339_v19  ;;  %v17481_v31 = vadd.f32 %v14573_v29, %v2799_v62 }
 0x267   : > { %v14540_v63 = vpop.f32.mrf.mxu1  ;;  %v14577_v36 = vpop.f32.mrf.mxu0 }
 0x268   : > { %v17484_v61 = vadd.f32 %v14540_v63, %v17346_v38 }
 0x269   : > { %v17486_v34 = vpop.f32.mrf.mxu1  ;;  %v17488_v7 = vpop.f32.mrf.mxu0 }
 0x26a   : > { %23561 = vst [vmem:[#allocation32_spill] sm:$0xff] %v17484_v61  ;;  %23562 = vst [vmem:[#allocation9_spill] sm:$0xff] %v17488_v7 }
 0x26b   : > { %v14543_v33 = vpop.f32.mrf.mxu1  ;;  %v17490_v8 = vpop.f32.mrf.mxu0 }
 0x26c   : > { %23563 = vst [vmem:[#allocation10_spill] sm:$0xff] %v17490_v8  ;;  %v2803_v27 = vadd.f32 %v14543_v33, %v17356_v3 }
 0x26d   : > { %v2710_v25 = vpop.f32.mrf.mxu1  ;;  %v17493_v4 = vpop.f32.mrf.mxu0 }
 0x26e   : > { %23564 = vst [vmem:[#allocation11_spill] sm:$0xff] %v17493_v4  ;;  %v17496_v19 = vadd.f32 %v2710_v25, %v17359_v47  ;;  %v17498_v29 = vadd.f32 %v14577_v36, %v2803_v27 }
 0x26f   : > { %v14544_v62 = vpop.f32.mrf.mxu1  ;;  %v14581_v38 = vpop.f32.mrf.mxu0 }
 0x270   : > { %v17501_v14 = vadd.f32 %v14544_v62, %v17364_v43 }
 0x271   : > { %v17503_v63 = vpop.f32.mrf.mxu1  ;;  %v17505_v7 = vpop.f32.mrf.mxu0 }
 0x272   : > { %23565 = vst [vmem:[#allocation12_spill] sm:$0xff] %v17501_v14  ;;  %23566 = vst [vmem:[#allocation13_spill] sm:$0xff] %v17505_v7 }
 0x273   : > { %v14547_v8 = vpop.f32.mrf.mxu1  ;;  %v17507_v61 = vpop.f32.mrf.mxu0 }
 0x274   : > { %23567 = vst [vmem:[#allocation14_spill] sm:$0xff] %v17507_v61  ;;  %v2807_v3 = vadd.f32 %v14547_v8, %v17374_v42 }
 0x275   : > { %v2726_v33 = vpop.f32.mrf.mxu1  ;;  %v17510_v4 = vpop.f32.mrf.mxu0 }
 0x276   : > { %23568 = vst [vmem:[#allocation16_spill] sm:$0xff] %v17510_v4  ;;  %v17513_v47 = vadd.f32 %v2726_v33, %v17377_v5  ;;  %v17515_v36 = vadd.f32 %v14581_v38, %v2807_v3 }
 0x277   : > { %v14548_v27 = vpop.f32.mrf.mxu1  ;;  %v14585_v43 = vpop.f32.mrf.mxu0 }
 0x278   : > { %v17518_v25 = vadd.f32 %v14548_v27, %v17381_v35 }
 0x279   : > { %v17520_v62 = vpop.f32.mrf.mxu1  ;;  %v17522_v7 = vpop.f32.mrf.mxu0 }
 0x27a   : > { %23569 = vst [vmem:[#allocation18_spill] sm:$0xff] %v17518_v25  ;;  %23570 = vst [vmem:[#allocation21_spill] sm:$0xff] %v17522_v7 }
 0x27b   : > { %v14551_v61 = vpop.f32.mrf.mxu1  ;;  %v17524_v14 = vpop.f32.mrf.mxu0 }
 0x27c   : > { %23571 = vst [vmem:[#allocation23_spill] sm:$0xff] %v17524_v14  ;;  %v2811_v42 = vadd.f32 %v14551_v61, %v17391_v9 }
 0x27d   : > { %v2742_v8 = vpop.f32.mrf.mxu1  ;;  %v17527_v4 = vpop.f32.mrf.mxu0 }
 0x27e   : > { %23572 = vst [vmem:[#allocation26_spill] sm:$0xff] %v17527_v4  ;;  %v17530_v5 = vadd.f32 %v2742_v8, %v17394_v52  ;;  %v17532_v38 = vadd.f32 %v14585_v43, %v2811_v42 }
 0x27f   : > { %v14552_v3 = vpop.f32.mrf.mxu1  ;;  %v14589_v35 = vpop.f32.mrf.mxu0 }
 0x280   : > { %v17535_v33 = vadd.f32 %v14552_v3, %v17398_v53 }
 0x281   : > { %v17537_v27 = vpop.f32.mrf.mxu1  ;;  %v17539_v7 = vpop.f32.mrf.mxu0 }
 0x282   : > { %23573 = vst [vmem:[#allocation28_spill] sm:$0xff] %v17535_v33  ;;  %23574 = vst [vmem:[#allocation30_spill] sm:$0xff] %v17539_v7 }
 0x283   : > { %v14555_v14 = vpop.f32.mrf.mxu1  ;;  %v17541_v25 = vpop.f32.mrf.mxu0 }
 0x284   : > { %23575 = vst [vmem:[#allocation31_spill] sm:$0xff] %v17541_v25  ;;  %v2815_v9 = vadd.f32 %v14555_v14, %v17408_v46 }
 0x285   : > { %v2758_v61 = vpop.f32.mrf.mxu1  ;;  %v17544_v4 = vpop.f32.mrf.mxu0 }
 0x286   : > { %23576 = vst [vmem:[#allocation33_spill] sm:$0xff] %v17544_v4  ;;  %v17547_v52 = vadd.f32 %v2758_v61, %v17414_v37  ;;  %v17549_v43 = vadd.f32 %v14589_v35, %v2815_v9 }
 0x287   : > { %v14556_v42 = vpop.f32.mrf.mxu1  ;;  %v14593_v53 = vpop.f32.mrf.mxu0 }
 0x288   : > { %23577 = vst [vmem:[#allocation34_spill] sm:$0xff] %v17547_v52  ;;  %v17552_v8 = vadd.f32 %v14556_v42, %v17418_v54 }
 0x289   : > { %v17554_v3 = vpop.f32.mrf.mxu1  ;;  %v17556_v7 = vpop.f32.mrf.mxu0 }
 0x28a   : > { %23578 = vst [vmem:[#allocation35_spill] sm:$0xff] %v17552_v8  ;;  %23579 = vst [vmem:[#allocation36_spill] sm:$0xff] %v17554_v3 }
 0x28b   : > { %23580 = vst [vmem:[#allocation37_spill] sm:$0xff] %v17556_v7  ;;  %v14559_v25 = vpop.f32.mrf.mxu1  ;;  %v17558_v33 = vpop.f32.mrf.mxu0 }
 0x28c   : > { %23581 = vst [vmem:[#allocation38_spill] sm:$0xff] %v17558_v33  ;;  %v2819_v46 = vadd.f32 %v14559_v25, %v17428_v15 }
 0x28d   : > { %v2774_v14 = vpop.f32.mrf.mxu1  ;;  %v17566_v9 = vpop.f32.mrf.mxu0 }
 0x28e   : > { %v17562_v37 = vadd.f32 %v2774_v14, %v17431_v41  ;;  %v17564_v35 = vadd.f32 %v14593_v53, %v2819_v46  ;;  %23583 = vst [vmem:[#allocation40_spill] sm:$0xff] %v17566_v9 }
 0x28f   : > { %v14560_v61 = vpop.f32.mrf.mxu1  ;;  %v17573_v7 = vpop.f32.mrf.mxu0 }
 0x290   : > { %23582 = vst [vmem:[#allocation39_spill] sm:$0xff] %v17562_v37  ;;  %v17569_v54 = vadd.f32 %v14560_v61, %v17437_v56 }
 0x291   : > { %v17571_v42 = vpop.f32.mrf.mxu1  ;;  %v17580_v41 = vpop.f32.mrf.mxu0 }
 0x292   : > { %23584 = vst [vmem:[#allocation41_spill] sm:$0xff] %v17569_v54  ;;  %23585 = vst [vmem:[#allocation42_spill] sm:$0xff] %v17571_v42 }
 0x293   : > { %v14599_v4 = vpop.f32.mrf.mxu1  ;;  %v17586_v46 = vpop.f32.mrf.mxu0 }
 0x294   : > { %v17576_v33 = vadd.f32 %v14599_v4, %v17447_v12 }
 0x295   : > { %v17578_v15 = vpop.f32.mrf.mxu1  ;;  %v17593_v9 = vpop.f32.mrf.mxu0 }
 0x297   : > { %v17582_v25 = vpop.f32.mrf.mxu1  ;;  %v17599_v54 = vpop.f32.mrf.mxu0 }
 0x298   : > { %23589 = vst [vmem:[#allocation46_spill] sm:$0xff] %v17599_v54 }
 0x299   : > { %v17584_v53 = vpop.f32.mrf.mxu1  ;;  %v17606_v52 = vpop.f32.mrf.mxu0 }
 0x29a   : > { %23592 = vst [vmem:[#allocation49_spill] sm:$0xff] %v17606_v52 }
 0x29b   : > { %v14603_v56 = vpop.f32.mrf.mxu1  ;;  %v17612_v3 = vpop.f32.mrf.mxu0 }
 0x29c   : > { %v17589_v14 = vadd.f32 %v14603_v56, %v17464_v48  ;;  %23595 = vst [vmem:[#allocation52_spill] sm:$0xff] %v17612_v3  ;;  %v17632_v3 = vpop.permute.xlu1 %3705 }
 0x29d   : > { %v17591_v61 = vpop.f32.mrf.mxu1  ;;  %v17619_v54 = vpop.f32.mrf.mxu0 }
 0x29e   : > { %23586 = vst [vmem:[#allocation43_spill] sm:$0xff] %v17589_v14  ;;  %23598 = vst [vmem:[#allocation55_spill] sm:$0xff] %v17619_v54 }
 0x29f   : > { %v17595_v12 = vpop.f32.mrf.mxu1 }
 0x2a0   : > { %23587 = vst [vmem:[#allocation44_spill] sm:$0xff] %v17595_v12  ;;  %v17644_v54 = vpop.permute.xlu1 %3707 }
 0x2a1   : > { %v17597_v4 = vpop.f32.mrf.mxu1 }
 0x2a2   : > { %23588 = vst [vmem:[#allocation45_spill] sm:$0xff] %v17597_v4 }
 0x2a3   : > { %v14607_v42 = vpop.f32.mrf.mxu1 }
 0x2a4   : > { %v17602_v37 = vadd.f32 %v14607_v42, %v17481_v31  ;;  %v17623_v42 = vpop.permute.xlu0 %3701 }
 0x2a5   : > { %v17604_v8 = vpop.f32.mrf.mxu1 }
 0x2a6   : > { %23590 = vst [vmem:[#allocation47_spill] sm:$0xff] %v17602_v37  ;;  %23591 = vst [vmem:[#allocation48_spill] sm:$0xff] %v17604_v8  ;;  %v17627_v8 = vpop.f32.mrf.mxu0 }
 0x2a7   : > { %v17608_v48 = vpop.f32.mrf.mxu1  ;;  %23601 = vst [vmem:[#allocation58_spill] sm:$0xff] %v17627_v8 }
 0x2a8   : > { %23593 = vst [vmem:[#allocation50_spill] sm:$0xff] %v17608_v48 }
 0x2a9   : > { %v17610_v56 = vpop.f32.mrf.mxu1 }
 0x2aa   : > { %23594 = vst [vmem:[#allocation51_spill] sm:$0xff] %v17610_v56 }
 0x2ab   : > { %v14611_v14 = vpop.f32.mrf.mxu1 }
 0x2ac   : > { %v17615_v12 = vadd.f32 %v14611_v14, %v17498_v29  ;;  %v17636_v14 = vpop.permute.xlu0 %3703 }
 0x2ad   : > { %v17617_v4 = vpop.f32.mrf.mxu1  ;;  %23604 = vst [vmem:[#allocation61_spill] sm:$0xff] %v17636_v14 }
 0x2ae   : > { %23596 = vst [vmem:[#allocation53_spill] sm:$0xff] %v17615_v12  ;;  %23597 = vst [vmem:[#allocation54_spill] sm:$0xff] %v17617_v4  ;;  %v17638_v12 = vpop.f32.mrf.mxu0 }
 0x2af   : > { %v17621_v31 = vpop.f32.mrf.mxu1  ;;  %23605 = vst [vmem:[#allocation62_spill] sm:$0xff] %v17638_v12  ;;  %v17659_v12 = vpop.permute.xlu1 %3711 }
 0x2b0   : > { %23599 = vst [vmem:[#allocation56_spill] sm:$0xff] %v17621_v31  ;;  %23613 = vst [vmem:[#allocation70_spill] sm:$0xff] %v17659_v12 }
 0x2b1   : > { %v17625_v37 = vpop.f32.mrf.mxu1 }
 0x2b2   : > { %23600 = vst [vmem:[#allocation57_spill] sm:$0xff] %v17625_v37  ;;  %v17646_v37 = vpop.f32.mrf.mxu0 }
 0x2b3   : > { %v14615_v48 = vpop.f32.mrf.mxu1  ;;  %23608 = vst [vmem:[#allocation65_spill] sm:$0xff] %v17646_v37 }
 0x2b4   : > { %v17630_v56 = vadd.f32 %v14615_v48, %v17515_v36  ;;  %v17651_v48 = vpop.permute.xlu0 %3709 }
 0x2b5   : > { %v17634_v29 = vpop.f32.mrf.mxu1 }
 0x2b6   : > { %23602 = vst [vmem:[#allocation59_spill] sm:$0xff] %v17630_v56  ;;  %23603 = vst [vmem:[#allocation60_spill] sm:$0xff] %v17634_v29  ;;  %v17655_v29 = vpop.f32.mrf.mxu0 }
 0x2b7   : > { %v17640_v4 = vpop.f32.mrf.mxu1  ;;  %23611 = vst [vmem:[#allocation68_spill] sm:$0xff] %v17655_v29 }
 0x2b8   : > { %23606 = vst [vmem:[#allocation63_spill] sm:$0xff] %v17640_v4  ;;  %v17665_v52 = vpop.f32.mrf.mxu0 }
 0x2b9   : > { %v17642_v31 = vpop.f32.mrf.mxu1  ;;  %23615 = vst [vmem:[#allocation72_spill] sm:$0xff] %v17665_v52  ;;  %v1977_v52 = vadd.f32 %v17213_v18, %v17229_v13 }
 0x2ba   : > { %23607 = vst [vmem:[#allocation64_spill] sm:$0xff] %v17642_v31  ;;  %v17663_v31 = vpop.permute.xlu0 %3713 }
 0x2bb   : > { %v14619_v8 = vpop.f32.mrf.mxu1 }
 0x2bc   : > { %v17649_v36 = vadd.f32 %v14619_v8, %v17532_v38 }
 0x2bd   : > { %v17653_v56 = vpop.f32.mrf.mxu1 }
 0x2be   : > { %23609 = vst [vmem:[#allocation66_spill] sm:$0xff] %v17649_v36  ;;  %23610 = vst [vmem:[#allocation67_spill] sm:$0xff] %v17653_v56  ;;  %v17672_v36 = vpop.permute.xlu1 %3715  ;;  %v17674_v56 = vpop.f32.mrf.mxu0 }
 0x2bf   : > { %v17657_v14 = vpop.f32.mrf.mxu1  ;;  %23618 = vst [vmem:[#allocation75_spill] sm:$0xff] %v17674_v56 }
 0x2c0   : > { %23612 = vst [vmem:[#allocation69_spill] sm:$0xff] %v17657_v14  ;;  %v17678_v14 = vpop.permute.xlu0 %3717  ;;  %v17693_v56 = vpop.f32.mrf.mxu0 }
 0x2c1   : > { %v17661_v4 = vpop.f32.mrf.mxu1  ;;  %23620 = vst [vmem:[#allocation77_spill] sm:$0xff] %v17678_v14 }
 0x2c2   : > { %23614 = vst [vmem:[#allocation71_spill] sm:$0xff] %v17661_v4  ;;  %v1961_v4 = vadd.f32 %v17184_v40, %v17198_v44  ;;  %v2388_v40 = vadd.f32 %v17396_v30, %v1977_v52  ;;  %v17700_v13 = vpop.permute.xlu1 %3719  ;;  %v17718_v52 = vpop.f32.mrf.mxu0 }
 0x2c3   : > { %v14623_v37 = vpop.f32.mrf.mxu1 }
 0x2c4   : > { %v17668_v38 = vadd.f32 %v14623_v37, %v17549_v43  ;;  %v1993_v43 = vadd.f32 %v17241_v24, %v17254_v50  ;;  %v23621_v37 = vld [vmem:[#allocation17_spill] sm:$0xff] }
 0x2c5   : > { %v17670_v8 = vpop.f32.mrf.mxu1 }
 0x2c6   : > { %23616 = vst [vmem:[#allocation73_spill] sm:$0xff] %v17668_v38  ;;  %23617 = vst [vmem:[#allocation74_spill] sm:$0xff] %v17670_v8  ;;  %v2009_v38 = vadd.f32 %v23621_v37, %v17275_v21  ;;  %v2384_v8 = vadd.f32 %v17379_v23, %v1961_v4  ;;  %v2392_v44 = vadd.f32 %v17416_v57, %v1993_v43  ;;  %v17710_v23 = vpop.permute.xlu0 %3721  ;;  %v23625_v4 = vld [vmem:[#allocation24_spill] sm:$0xff] }
 0x2c7   : > { %v17676_v29 = vpop.f32.mrf.mxu1  ;;  %v2578_v21 = vadd.f32 %v17312_v39, %v17321_v20  ;;  %v2582_v57 = vadd.f32 %v17330_v32, %v17344_v17  ;;  %v2594_v20 = vadd.f32 %v17388_v60, %v2388_v40  ;;  %v23628_v37 = vld [vmem:[#allocation32_spill] sm:$0xff] }
 0x2c8   : > { %23619 = vst [vmem:[#allocation76_spill] sm:$0xff] %v17676_v29  ;;  %v2574_v29 = vadd.f32 %v17286_v22, %v17299_v1  ;;  %v2396_v24 = vadd.f32 %v17433_v10, %v2009_v38  ;;  %v3002_v1 = vadd.f32 %v17435_v26, %v17445_v45  ;;  %v2586_v10 = vadd.f32 %v17353_v6, %v17362_v28  ;;  %v23622_v6 = vld [vmem:[#allocation15_spill] sm:$0xff] }
 0x2c9   : > { %v17682_v12 = vpop.f32.mrf.mxu1  ;;  %v2794_v30 = vadd.f32 %v17469_v55, %v2578_v21  ;;  %v2598_v26 = vadd.f32 %v17405_v0, %v2392_v44  ;;  %v3005_v55 = vadd.f32 %v17439_v51, %v17450_v11  ;;  %v2798_v32 = vadd.f32 %v17486_v34, %v2582_v57  ;;  %v23623_v0 = vld [vmem:[#allocation19_spill] sm:$0xff]  ;;  %v17740_v11 = vpop.permute.xlu1 %3723  ;;  %v23624_v34 = vld [vmem:[#allocation22_spill] sm:$0xff] }
 0x2ca   : > { %v2790_v50 = vadd.f32 %v17452_v16, %v2574_v29  ;;  %v2590_v16 = vadd.f32 %v17371_v49, %v2384_v8  ;;  %v3208_v45 = vadd.f32 %v17578_v15, %v3002_v1  ;;  %v17729_v17 = vadd.f32 %v17425_v2, %v2396_v24  ;;  %v23627_v8 = vld [vmem:[#allocation20_spill] sm:$0xff]  ;;  %v17761_v44 = vld [vmem:[%s23630_s26] ss:$0 sm:$0xff]  ;;  %v17763_v24 = vpop.permute.xlu0 %3725  ;;  %v23634_v57 = vld [vmem:[#allocation10_spill] sm:$0xff]  ;;  %s22993_s26 = scalar_lea.vmem [#allocation3], %s12899_s9 }
 0x2cb   : > { %v14627_v14 = vpop.f32.mrf.mxu1  ;;  %v3211_v60 = vadd.f32 %v17582_v25, %v3005_v55  ;;  %v3006_v15 = vadd.f32 %v23623_v0, %v17462_v58  ;;  %v3426_v51 = vadd.f32 %v17573_v7, %v17576_v33  ;;  %v3009_v29 = vadd.f32 %v23625_v4, %v23624_v34  ;;  %v17750_v25 = vpop.f32.mrf.mxu0  ;;  %v23629_v7 = vld [vmem:[#allocation29_spill] sm:$0xff]  ;;  %v23638_v0 = vld [vmem:[#allocation14_spill] sm:$0xff]  ;;  %v23639_v34 = vld [vmem:[#allocation16_spill] sm:$0xff]  ;;  %s12833_s8 = sshll.u32 %s22993_s26, 4  ;;  %s23235_s8 = int_to_ptr.vmem [resolvable:$true] %s12833_s8 }
 0x2cc   : > { %v17698_v18 = vadd.f32 %v14627_v14, %v17564_v35  ;;  %v3003_v28 = vadd.f32 %v23622_v6, %v2790_v50  ;;  %v2802_v35 = vadd.f32 %v17503_v63, %v2586_v10  ;;  %v2806_v2 = vadd.f32 %v17520_v62, %v2590_v16  ;;  %v23626_v14 = vld [vmem:[#allocation25_spill] sm:$0xff]  ;;  %v23631_v50 = vld [vmem:[#allocation27_spill] sm:$0xff]  ;;  %s15845_s1 = scalar_lea.vmem %s23235_s8, 4096 }
 0x2cd   : > { %v17706_v22 = vpop.f32.mrf.mxu1  ;;  %v3007_v38 = vadd.f32 %v23626_v14, %v2794_v30  ;;  %v17748_v63 = vadd.f32 %v23627_v8, %v17479_v59  ;;  %v17755_v33 = vadd.f32 %v23629_v7, %v23628_v37  ;;  %v3424_v62 = vadd.f32 %v17580_v41, %v3208_v45  ;;  %v23633_v30 = vld [vmem:[#allocation12_spill] sm:$0xff]  ;;  %v23635_v16 = vld [vmem:[#allocation11_spill] sm:$0xff]  ;;  %p15846_p11 = scmp.ne.s32.totalorder %s23235_s8, %s15845_s1 }
 0x2ce   : > { %v3209_v58 = vadd.f32 %v17584_v53, %v3003_v28  ;;  %v2810_v59 = vadd.f32 %v17537_v27, %v2594_v20  ;;  %v17767_v21 = vadd.f32 %v23631_v50, %v2798_v32  ;;  %v23632_v53 = vld [vmem:[#allocation9_spill] sm:$0xff]  ;;  %v17775_v10 = vadd.f32 %v23634_v57, %v23633_v30  ;;  %v17783_v20 = vpop.f32.mrf.mxu0  ;;  %v23637_v28 = vld [vmem:[#allocation18_spill] sm:$0xff]  ;;  %v23642_v7 = vld [vmem:[#allocation28_spill] sm:$0xff] }
 0x2cf   : > { %v17720_v39 = vpop.f32.mrf.mxu1  ;;  %v17771_v1 = vadd.f32 %v23632_v53, %v17496_v19  ;;  %v17778_v45 = vadd.f32 %v23635_v16, %v2802_v35  ;;  %v3427_v6 = vadd.f32 %v17586_v46, %v3211_v60  ;;  %v23636_v32 = vld [vmem:[#allocation13_spill] sm:$0xff]  ;;  %v17794_v4 = vadd.f32 %v23639_v34, %v2806_v2  ;;  %v23646_v30 = vld [vmem:[#allocation43_spill] sm:$0xff]  ;;  %v23647_v57 = vld [vmem:[#allocation46_spill] sm:$0xff]  ;;  %v17826_v16 = vpop.permute.xlu0 %3729  ;;  %p15847_p12 = pnand %p15846_p11, %p16079_p5 }
 0x2d0   : > { %v17787_v19 = vadd.f32 %v23636_v32, %v17513_v47  ;;  %v3212_v46 = vadd.f32 %v17591_v61, %v3006_v15  ;;  %v17804_v47 = vld [vmem:[%s23640_s6] ss:$0 sm:$0xff]  ;;  %v23641_v2 = vld [vmem:[#allocation21_spill] sm:$0xff]  ;;  %v23644_v15 = vld [vmem:[#allocation26_spill] sm:$0xff] }
 0x2d1   : > { %v17732_v49 = vpop.f32.mrf.mxu1  ;;  %v17810_v37 = vadd.f32 %v23641_v2, %v17530_v5  ;;  %v23649_v32 = vld [vmem:[#allocation34_spill] sm:$0xff]  ;;  %p15848_p13 = pneg %p15847_p12 }
 0x2d3   : > { %v14667_v43 = vpop.f32.mrf.mxu1 }
 0x2d4   : > { %v3639_v40 = vadd.f32 %v14667_v43, %v3426_v51  ;;  %v17791_v51 = vadd.f32 %v23638_v0, %v23637_v28  ;;  %v17806_v43 = vpop.permute.xlu1 %3727  ;;  %v23650_v28 = vld [vmem:[#allocation30_spill] sm:$0xff] }
 0x2d5   : > { %v3510_v41 = vpop.f32.mrf.mxu1  ;;  %v17833_v0 = vadd.f32 %v23650_v28, %v23649_v32 }
 0x2d6   : > { %v3637_v55 = vadd.f32 %v3510_v41, %v3424_v62  ;;  %v3800_v27 = vsel %vm3797_vm5, %v3639_v40, %v17632_v3  ;;  %v3425_v3 = vadd.f32 %v17593_v9, %v3209_v58  ;;  %v23643_v40 = vld [vmem:[#allocation23_spill] sm:$0xff]  ;;  %v17817_v9 = vadd.f32 %v23644_v15, %v2810_v59  ;;  %v23645_v62 = vld [vmem:[#allocation44_spill] sm:$0xff]  ;;  %v17829_v59 = vpop.f32.mrf.mxu0 }
 0x2d7   : > { %v14668_v35 = vpop.f32.mrf.mxu1  ;;  %v3839_v14 = vmul.f32 %v17761_v44, %v3800_v27  ;;  %v17814_v61 = vadd.f32 %v23643_v40, %v23642_v7  ;;  %v3215_v50 = vadd.f32 %v23645_v62, %v3009_v29  ;;  %v3430_v41 = vadd.f32 %v23647_v57, %v23646_v30  ;;  %v23652_v7 = vld [vmem:[#allocation49_spill] sm:$0xff]  ;;  %v23654_v62 = vld [vmem:[#allocation35_spill] sm:$0xff]  ;;  %v23656_v57 = vld [vmem:[#allocation52_spill] sm:$0xff] }
 0x2d8   : > { %v3640_v60 = vadd.f32 %v14668_v35, %v3427_v6  ;;  %v3798_v8 = vsel %vm3797_vm5, %v3637_v55, %v17623_v42  ;;  %v23648_v55 = vld [vmem:[#allocation36_spill] sm:$0xff] }
 0x2d9   : > { %v3513_v58 = vpop.f32.mrf.mxu1  ;;  %6685 = vrot.lane.b32.xlu0 %v3798_v8, %s23474_s5  ;;  %v3837_v42 = vmul.f32 %v17761_v44, %v3798_v8  ;;  %v2814_v6 = vadd.f32 %v23648_v55, %v2598_v26  ;;  %v3878_v29 = vadd.f32 %v17804_v47, %v3839_v14 }
 0x2da   : > { %v3638_v53 = vadd.f32 %v3513_v58, %v3425_v3  ;;  %v3801_v5 = vsel %vm3797_vm5, %v3640_v60, %v17644_v54  ;;  %v23651_v3 = vld [vmem:[#allocation45_spill] sm:$0xff]  ;;  %v3428_v54 = vadd.f32 %v23652_v7, %v3212_v46 }
 0x2db   : > { %v14671_v34 = vpop.f32.mrf.mxu1  ;;  %v3840_v35 = vmul.f32 %v17761_v44, %v3801_v5  ;;  %v3213_v8 = vadd.f32 %v23651_v3, %v3007_v38  ;;  %v23653_v60 = vld [vmem:[#allocation61_spill] sm:$0xff]  ;;  %v3876_v26 = vadd.f32 %v17804_v47, %v3837_v42  ;;  %v23655_v38 = vld [vmem:[#allocation31_spill] sm:$0xff]  ;;  %v3910_v55 = vmax.f32 %v3878_v29, 0.0  ;;  %v23657_v3 = vld [vmem:[#allocation48_spill] sm:$0xff] }
 0x2dc   : > { %v3643_v2 = vadd.f32 %v14671_v34, %v3430_v41  ;;  %v3799_v40 = vsel %vm3797_vm5, %v3638_v53, %v23653_v60  ;;  %v17848_v30 = vadd.f32 %v23655_v38, %v23654_v62  ;;  %v3431_v41 = vadd.f32 %v23656_v57, %v3215_v50  ;;  %v17853_v53 = vpop.permute.xlu1 %3731  ;;  %v23658_v60 = vld [vmem:[#allocation55_spill] sm:$0xff]  ;;  %v23661_v57 = vld [vmem:[#allocation58_spill] sm:$0xff] }
 0x2dd   : > { %v3526_v15 = vpop.f32.mrf.mxu1  ;;  %6689 = vrot.lane.b32.xlu0 %v3800_v27, %s23474_s5  ;;  %6687 = vrot.lane.b32.xlu1 %v3799_v40, %s23474_s5  ;;  %v3838_v58 = vmul.f32 %v17761_v44, %v3799_v40  ;;  %v3879_v14 = vadd.f32 %v17804_v47, %v3840_v35  ;;  %v17855_v27 = vpop.f32.mrf.mxu0  ;;  %v3216_v7 = vadd.f32 %v23657_v3, %v17748_v63  ;;  %v3908_v40 = vmax.f32 %v3876_v26, 0.0  ;;  %v23659_v63 = vld [vmem:[#allocation50_spill] sm:$0xff] }
 0x2de   : > { %v3641_v46 = vadd.f32 %v3526_v15, %v3428_v54  ;;  %v3804_v42 = vsel %vm3797_vm5, %v3643_v2, %v17663_v31  ;;  %v3429_v50 = vadd.f32 %v23658_v60, %v3213_v8  ;;  %v17864_v2 = vpop.permute.xlu0 %3733  ;;  %v23660_v8 = vld [vmem:[#allocation47_spill] sm:$0xff] }
 0x2df   : > { %v3877_v32 = vadd.f32 %v17804_v47, %v3838_v58  ;;  %v14672_v28 = vpop.f32.mrf.mxu1  ;;  %v3911_v34 = vmax.f32 %v3879_v14, 0.0  ;;  %v3843_v35 = vmul.f32 %v17761_v44, %v3804_v42  ;;  %v3219_v14 = vadd.f32 %v23659_v63, %v17755_v33  ;;  %v17875_v26 = vpop.f32.mrf.mxu0  ;;  %v23663_v33 = vld [vmem:[#allocation51_spill] sm:$0xff] }
 0x2e0   : > { %v3644_v54 = vadd.f32 %v14672_v28, %v3431_v41  ;;  %v3802_v31 = vsel %vm3797_vm5, %v3641_v46, %v17651_v48  ;;  %v3434_v41 = vadd.f32 %v23661_v57, %v23660_v8  ;;  %v23662_v46 = vld [vmem:[#allocation33_spill] sm:$0xff]  ;;  %v3217_v3 = vadd.f32 %v23663_v33, %v17767_v21  ;;  %v23668_v33 = vld [vmem:[#allocation68_spill] sm:$0xff] }
 0x2e1   : > { %v3909_v15 = vmax.f32 %v3877_v32, 0.0  ;;  %v3529_v29 = vpop.f32.mrf.mxu1  ;;  %v3941_v62 = vpack.c.bf16 %v3911_v34, %v3910_v55  ;;  %6691 = vrot.lane.b32.xlu1 %v3801_v5, %s23474_s5  ;;  %6693 = vrot.lane.b32.xlu0 %v3802_v31, %s23474_s5  ;;  %v3841_v58 = vmul.f32 %v17761_v44, %v3802_v31  ;;  %v17878_v55 = vadd.f32 %v23662_v46, %v2814_v6  ;;  %v17901_v8 = vpop.f32.mrf.mxu0 }
 0x2e2   : > { %v3642_v38 = vadd.f32 %v3529_v29, %v3429_v50  ;;  %v3805_v48 = vsel %vm3797_vm5, %v3644_v54, %v17672_v36  ;;  %v3882_v28 = vadd.f32 %v17804_v47, %v3843_v35  ;;  %v23664_v50 = vld [vmem:[#allocation62_spill] sm:$0xff]  ;;  %v17887_v54 = vpop.permute.xlu1 %3735 }
 0x2e3   : > { %v3940_v5 = vpack.c.bf16 %v3909_v15, %v3908_v40  ;;  %v14675_v32 = vpop.f32.mrf.mxu1  ;;  %v3844_v34 = vmul.f32 %v17761_v44, %v3805_v48  ;;  %v3432_v31 = vadd.f32 %v23664_v50, %v3216_v7  ;;  %v23665_v29 = vld [vmem:[#allocation70_spill] sm:$0xff]  ;;  %v3880_v6 = vadd.f32 %v17804_v47, %v3841_v58  ;;  %v23666_v7 = vld [vmem:[#allocation65_spill] sm:$0xff]  ;;  %v17899_v58 = vpop.permute.xlu0 %3737 }
 0x2e4   : > { %v3647_v60 = vadd.f32 %v14675_v32, %v3434_v41  ;;  %v3803_v36 = vsel %vm3797_vm5, %v3642_v38, %v23665_v29  ;;  %v3435_v15 = vadd.f32 %v23666_v7, %v3219_v14  ;;  %v3914_v57 = vmax.f32 %v3882_v28, 0.0  ;;  %v23667_v32 = vld [vmem:[#allocation54_spill] sm:$0xff]  ;;  %v23669_v50 = vld [vmem:[#allocation77_spill] sm:$0xff]  ;;  %v23672_v7 = vld [vmem:[#allocation72_spill] sm:$0xff] }
 0x2e5   : > { %v3542_v63 = vpop.f32.mrf.mxu1  ;;  %14701 = vmatprep.mubr.msk.bf16.mxu0 %vm3968_vm6, %v3940_v5  ;;  %6697 = vrot.lane.b32.xlu0 %v3804_v42, %s23474_s5  ;;  %v3842_v35 = vmul.f32 %v17761_v44, %v3803_v36  ;;  %v3883_v40 = vadd.f32 %v17804_v47, %v3844_v34  ;;  %v3220_v34 = vadd.f32 %v23667_v32, %v17771_v1  ;;  %v23671_v1 = vld [vmem:[#allocation53_spill] sm:$0xff] }
 0x2e6   : > { %v3645_v21 = vadd.f32 %v3542_v63, %v3432_v31  ;;  %6695 = vrot.lane.b32.xlu1 %v3803_v36, %s23474_s5  ;;  %14702 = vmatmul.mubr.msk.bf16.vlgmr.msra.gmra.mxu0 %vm3968_vm6, %v3941_v62  ;;  %v3808_v38 = vsel %vm3797_vm5, %v3647_v60, %v17710_v23  ;;  %v3433_v14 = vadd.f32 %v23668_v33, %v3217_v3  ;;  %v3912_v60 = vmax.f32 %v3880_v6, 0.0  ;;  %v23670_v63 = vld [vmem:[#allocation56_spill] sm:$0xff]  ;;  %v17919_v6 = vpop.permute.xlu1 %3739  ;;  %v23675_v33 = vld [vmem:[#allocation57_spill] sm:$0xff] }
 0x2e7   : > { %v3881_v42 = vadd.f32 %v17804_v47, %v3842_v35  ;;  %v14676_v41 = vpop.f32.mrf.mxu1  ;;  %v3915_v46 = vmax.f32 %v3883_v40, 0.0  ;;  %v3847_v5 = vmul.f32 %v17761_v44, %v3808_v38  ;;  %v3223_v35 = vadd.f32 %v23670_v63, %v17775_v10 }
 0x2e8   : > { %v3648_v62 = vadd.f32 %v14676_v41, %v3435_v15  ;;  %v3806_v23 = vsel %vm3797_vm5, %v3645_v21, %v23669_v50  ;;  %v3438_v3 = vadd.f32 %v23672_v7, %v23671_v1  ;;  %v17921_v15 = vpop.f32.mrf.mxu0 }
 0x2e9   : > { %v3913_v31 = vmax.f32 %v3881_v42, 0.0  ;;  %v3545_v29 = vpop.f32.mrf.mxu1  ;;  %v3943_v36 = vpack.c.bf16 %v3915_v46, %v3914_v57  ;;  %6701 = vrot.lane.b32.xlu0 %v3806_v23, %s23474_s5  ;;  %v3845_v28 = vmul.f32 %v17761_v44, %v3806_v23  ;;  %v23673_v57 = vld [vmem:[#allocation39_spill] sm:$0xff]  ;;  %v23674_v42 = vld [vmem:[#allocation37_spill] sm:$0xff]  ;;  %v3886_v10 = vadd.f32 %v17804_v47, %v3847_v5 }
 0x2ea   : > { %v3646_v40 = vadd.f32 %v3545_v29, %v3433_v14  ;;  %6699 = vrot.lane.b32.xlu1 %v3805_v48, %s23474_s5  ;;  %v3809_v21 = vsel %vm3797_vm5, %v3648_v62, %v17740_v11  ;;  %v17925_v41 = vadd.f32 %v23674_v42, %v23673_v57  ;;  %v3221_v14 = vadd.f32 %v23675_v33, %v17778_v45  ;;  %v23676_v23 = vld [vmem:[#allocation75_spill] sm:$0xff]  ;;  %v17934_v29 = vpop.permute.xlu0 %3741  ;;  %v23677_v57 = vld [vmem:[#allocation60_spill] sm:$0xff] }
 0x2eb   : > { %v3942_v46 = vpack.c.bf16 %v3913_v31, %v3912_v60  ;;  %v14679_v32 = vpop.f32.mrf.mxu1  ;;  %v3848_v48 = vmul.f32 %v17761_v44, %v3809_v21  ;;  %v3436_v11 = vadd.f32 %v23676_v23, %v3220_v34  ;;  %v3884_v63 = vadd.f32 %v17804_v47, %v3845_v28  ;;  %v17946_v31 = vpop.f32.mrf.mxu0 }
 0x2ec   : > { %v3651_v50 = vadd.f32 %v14679_v32, %v3438_v3  ;;  %v3807_v62 = vsel %vm3797_vm5, %v3646_v40, %v17700_v13  ;;  %v3439_v13 = vadd.f32 %v17693_v56, %v3223_v35  ;;  %v3918_v28 = vmax.f32 %v3886_v10, 0.0  ;;  %v17955_v35 = vpop.permute.xlu1 %3743 }
 0x2ed   : > { %v3558_v1 = vpop.f32.mrf.mxu1  ;;  %14705 = vmatprep.mubr.msk.bf16.mxu0 %vm3968_vm6, %v3942_v46  ;;  %6705 = vrot.lane.b32.xlu0 %v3808_v38, %s23474_s5  ;;  %v3846_v5 = vmul.f32 %v17761_v44, %v3807_v62  ;;  %v3887_v60 = vadd.f32 %v17804_v47, %v3848_v48  ;;  %v3224_v42 = vadd.f32 %v23677_v57, %v17787_v19 }
 0x2ee   : > { %v3649_v45 = vadd.f32 %v3558_v1, %v3436_v11  ;;  %6703 = vrot.lane.b32.xlu1 %v3807_v62, %s23474_s5  ;;  %14706 = vmatmul.mubr.msk.bf16.gmra.mxu0 %vm3968_vm6, %v3943_v36  ;;  %v3812_v34 = vsel %vm3797_vm5, %v3651_v50, %v17826_v16  ;;  %v3437_v36 = vadd.f32 %v17718_v52, %v3221_v14  ;;  %v3916_v16 = vmax.f32 %v3884_v63, 0.0  ;;  %v23678_v50 = vld [vmem:[#allocation63_spill] sm:$0xff]  ;;  %v17966_v11 = vpop.permute.xlu0 %3745  ;;  %v23680_v62 = vld [vmem:[#allocation42_spill] sm:$0xff]  ;;  %v17972_v1 = vpop.f32.mrf.mxu0 }
 0x2ef   : > { %v3885_v40 = vadd.f32 %v17804_v47, %v3846_v5  ;;  %v14680_v38 = vpop.f32.mrf.mxu1  ;;  %v3919_v7 = vmax.f32 %v3887_v60, 0.0  ;;  %v3851_v3 = vmul.f32 %v17761_v44, %v3812_v34  ;;  %v3227_v23 = vadd.f32 %v23678_v50, %v17791_v51  ;;  %v23679_v52 = vld [vmem:[#allocation59_spill] sm:$0xff] }
 0x2f0   : > { %v3652_v46 = vadd.f32 %v14680_v38, %v3439_v13  ;;  %v3810_v56 = vsel %vm3797_vm5, %v3649_v45, %v17763_v24  ;;  %v3442_v14 = vadd.f32 %v17750_v25, %v23679_v52  ;;  %v17970_v63 = vadd.f32 %v23680_v62, %v17729_v17  ;;  %v23681_v45 = vld [vmem:[#allocation64_spill] sm:$0xff]  ;;  %v17993_v57 = vpop.f32.mrf.mxu0 }
 0x2f1   : > { %v3917_v32 = vmax.f32 %v3885_v40, 0.0  ;;  %v3561_v10 = vpop.f32.mrf.mxu1  ;;  %v3945_v48 = vpack.c.bf16 %v3919_v7, %v3918_v28  ;;  %6709 = vrot.lane.b32.xlu0 %v3810_v56, %s23474_s5  ;;  %v3849_v33 = vmul.f32 %v17761_v44, %v3810_v56  ;;  %v3890_v51 = vadd.f32 %v17804_v47, %v3851_v3 }
 0x2f2   : > { %v3650_v19 = vadd.f32 %v3561_v10, %v3437_v36  ;;  %6707 = vrot.lane.b32.xlu1 %v3809_v21, %s23474_s5  ;;  %v3813_v24 = vsel %vm3797_vm5, %v3652_v46, %v17853_v53  ;;  %v3225_v25 = vadd.f32 %v23681_v45, %v17794_v4  ;;  %v3440_v53 = vadd.f32 %v17783_v20, %v3224_v42 }
 0x2f3   : > { %v3944_v5 = vpack.c.bf16 %v3917_v32, %v3916_v16  ;;  %v14683_v60 = vpop.f32.mrf.mxu1  ;;  %v3852_v21 = vmul.f32 %v17761_v44, %v3813_v24  ;;  %v3888_v17 = vadd.f32 %v17804_v47, %v3849_v33  ;;  %v3443_v20 = vadd.f32 %v17829_v59, %v3227_v23  ;;  %v23682_v16 = vld [vmem:[#allocation67_spill] sm:$0xff] }
 0x2f4   : > { %v3655_v13 = vadd.f32 %v14683_v60, %v3442_v14  ;;  %v3811_v28 = vsel %vm3797_vm5, %v3650_v19, %v17806_v43  ;;  %v17991_v43 = vpop.permute.xlu1 %3747  ;;  %v3922_v42 = vmax.f32 %v3890_v51, 0.0  ;;  %v3228_v32 = vadd.f32 %v23682_v16, %v17810_v37  ;;  %v23683_v14 = vld [vmem:[#allocation69_spill] sm:$0xff]  ;;  %v18013_v60 = vpop.f32.mrf.mxu0 }
 0x2f5   : > { %v3574_v40 = vpop.f32.mrf.mxu1  ;;  %14709 = vmatprep.mubr.msk.bf16.mxu0 %vm3968_vm6, %v3944_v5  ;;  %6713 = vrot.lane.b32.xlu0 %v3812_v34, %s23474_s5  ;;  %v3850_v38 = vmul.f32 %v17761_v44, %v3811_v28  ;;  %v3891_v7 = vadd.f32 %v17804_v47, %v3852_v21  ;;  %v3441_v59 = vadd.f32 %v17855_v27, %v3225_v25  ;;  %v3920_v33 = vmax.f32 %v3888_v17, 0.0  ;;  %v23684_v27 = vld [vmem:[#allocation66_spill] sm:$0xff]  ;;  %v23685_v51 = vld [vmem:[#allocation41_spill] sm:$0xff] }
 0x2f6   : > { %v3653_v3 = vadd.f32 %v3574_v40, %v3440_v53  ;;  %6711 = vrot.lane.b32.xlu1 %v3811_v28, %s23474_s5  ;;  %14710 = vmatmul.mubr.msk.bf16.gmra.mxu0 %vm3968_vm6, %v3945_v48  ;;  %v3816_v4 = vsel %vm3797_vm5, %v3655_v13, %v17899_v58  ;;  %v18002_v48 = vpop.permute.xlu0 %3749  ;;  %v3231_v62 = vadd.f32 %v23683_v14, %v17814_v61  ;;  %v23686_v21 = vld [vmem:[#allocation38_spill] sm:$0xff] }
 0x2f7   : > { %v3889_v34 = vadd.f32 %v17804_v47, %v3850_v38  ;;  %v14684_v46 = vpop.f32.mrf.mxu1  ;;  %v3923_v36 = vmax.f32 %v3891_v7, 0.0  ;;  %v3855_v56 = vmul.f32 %v17761_v44, %v3816_v4  ;;  %v3446_v5 = vadd.f32 %v17875_v26, %v23684_v27  ;;  %v15781_v38 = vld [vmem:[%s23688_s12 + $0x8] sm:$0xff]  }
 0x2f8   : > { %v3656_v10 = vadd.f32 %v14684_v46, %v3443_v20  ;;  %v3814_v58 = vsel %vm3797_vm5, %v3653_v3, %v17864_v2  ;;  %v18017_v45 = vadd.f32 %v23686_v21, %v23685_v51  ;;  %v3444_v26 = vadd.f32 %v17901_v8, %v3228_v32  ;;  %v18026_v40 = vpop.permute.xlu1 %3751  ;;  %v3396_v46 = vpop.f32.mrf.mxu0  ;;  %14733 = vmatprep.subr.bf16.mxu1 %v15781_v38  ;;  %v23692_v51 = vld [vmem:[#allocation40_spill] sm:$0xff] }
 0x2f9   : > { %v3921_v50 = vmax.f32 %v3889_v34, 0.0  ;;  %v3577_v23 = vpop.f32.mrf.mxu1  ;;  %v3947_v19 = vpack.c.bf16 %v3923_v36, %v3922_v42  ;;  %6717 = vrot.lane.b32.xlu0 %v3814_v58, %s23474_s5  ;;  %v3853_v52 = vmul.f32 %v17761_v44, %v3814_v58  ;;  %v3894_v53 = vadd.f32 %v17804_v47, %v3855_v56  ;;  %14734 = vmatpush3.bf16.msra.mxu1 %v15781_v38 }
 0x2fa   : > { %v3654_v37 = vadd.f32 %v3577_v23, %v3441_v59  ;;  %6715 = vrot.lane.b32.xlu1 %v3813_v24, %s23474_s5  ;;  %v3817_v2 = vsel %vm3797_vm5, %v3656_v10, %v17919_v6  ;;  %v23687_v24 = vld [vmem:[#allocation71_spill] sm:$0xff]  ;;  %v3754_v42 = vpop.permute.xlu0 %3753  ;;  %v23689_v10 = vld [vmem:[#allocation74_spill] sm:$0xff]  ;;  %v3031_v21 = vadd.f32 %v23692_v51, %v17970_v63 }
 0x2fb   : > { %v3946_v25 = vpack.c.bf16 %v3921_v50, %v3920_v33  ;;  %v14687_v13 = vpop.f32.mrf.mxu1  ;;  %v3856_v61 = vmul.f32 %v17761_v44, %v3817_v2  ;;  %v3229_v28 = vadd.f32 %v23687_v24, %v17817_v9  ;;  %v3892_v7 = vadd.f32 %v17804_v47, %v3853_v52 }
 0x2fc   : > { %v3659_v17 = vadd.f32 %v14687_v13, %v3446_v5  ;;  %v3815_v6 = vsel %vm3797_vm5, %v3654_v37, %v17887_v54  ;;  %v3447_v54 = vadd.f32 %v17921_v15, %v3231_v62  ;;  %v3926_v36 = vmax.f32 %v3894_v53, 0.0  ;;  %v23690_v62 = vld [vmem:[#allocation76_spill] sm:$0xff] }
 0x2fd   : > { %v3590_v3 = vpop.f32.mrf.mxu1  ;;  %14713 = vmatprep.mubr.msk.bf16.mxu0 %vm3968_vm6, %v3946_v25  ;;  %6721 = vrot.lane.b32.xlu0 %v3816_v4, %s23474_s5  ;;  %v3854_v9 = vmul.f32 %v17761_v44, %v3815_v6  ;;  %v3895_v8 = vadd.f32 %v17804_v47, %v3856_v61  ;;  %v3232_v59 = vadd.f32 %v23689_v10, %v17833_v0  ;;  %v3924_v50 = vmax.f32 %v3892_v7, 0.0 }
 0x2fe   : > { %v3657_v20 = vadd.f32 %v3590_v3, %v3444_v26  ;;  %6719 = vrot.lane.b32.xlu1 %v3815_v6, %s23474_s5  ;;  %14714 = vmatmul.mubr.msk.bf16.gmra.mxu0 %vm3968_vm6, %v3947_v19  ;;  %v3820_v34 = vsel %vm3797_vm5, %v3659_v17, %v17966_v11  ;;  %v3445_v33 = vadd.f32 %v17946_v31, %v3229_v28  ;;  %v14661_v11 = vpop.f32.mrf.mxu0  ;;  %v23691_v31 = vld [vmem:[#allocation73_spill] sm:$0xff]  ;;  %v18066_v28 = vpop.permute.xlu0 %3757 }
 0x2ff   : > { %v3893_v56 = vadd.f32 %v17804_v47, %v3854_v9  ;;  %v14688_v4 = vpop.f32.mrf.mxu1  ;;  %v3927_v16 = vmax.f32 %v3895_v8, 0.0  ;;  %v3859_v32 = vmul.f32 %v17761_v44, %v3820_v34  ;;  %v3235_v37 = vadd.f32 %v23690_v62, %v17848_v30 }
 0x300   : > { %v3660_v58 = vadd.f32 %v14688_v4, %v3447_v54  ;;  %v3818_v15 = vsel %vm3797_vm5, %v3657_v20, %v17934_v29  ;;  %v3450_v27 = vadd.f32 %v17972_v1, %v23691_v31  ;;  %v3756_v29 = vpop.permute.xlu1 %3755  ;;  %v3233_v30 = vadd.f32 %v17682_v12, %v17878_v55 }
 0x301   : > { %v3925_v23 = vmax.f32 %v3893_v56, 0.0  ;;  %v3593_v19 = vpop.f32.mrf.mxu1  ;;  %v3949_v52 = vpack.c.bf16 %v3927_v16, %v3926_v36  ;;  %6725 = vrot.lane.b32.xlu0 %v3818_v15, %s23474_s5  ;;  %v3857_v14 = vmul.f32 %v17761_v44, %v3818_v15  ;;  %v3898_v53 = vadd.f32 %v17804_v47, %v3859_v32 }
 0x302   : > { %v3658_v0 = vadd.f32 %v3593_v19, %v3445_v33  ;;  %6723 = vrot.lane.b32.xlu1 %v3817_v2, %s23474_s5  ;;  %v3821_v5 = vsel %vm3797_vm5, %v3660_v58, %v17991_v43  ;;  %v3448_v24 = vadd.f32 %v17993_v57, %v3232_v59  ;;  %v3409_v43 = vpop.f32.mrf.mxu0  ;;  %v3236_v8 = vadd.f32 %v17706_v22, %v17925_v41  ;;  %v3762_v58 = vpop.permute.xlu0 %3761 }
 0x303   : > { %v3948_v25 = vpack.c.bf16 %v3925_v23, %v3924_v50  ;;  %v14691_v13 = vpop.f32.mrf.mxu1  ;;  %v3860_v61 = vmul.f32 %v17761_v44, %v3821_v5  ;;  %v3896_v63 = vadd.f32 %v17804_v47, %v3857_v14  ;;  %v3930_v6 = vmax.f32 %v3898_v53, 0.0 }
 0x304   : > { %v3663_v2 = vadd.f32 %v14691_v13, %v3450_v27  ;;  %v3819_v1 = vsel %vm3797_vm5, %v3658_v0, %v17955_v35  ;;  %v3451_v35 = vadd.f32 %v18013_v60, %v3235_v37  ;;  %v3449_v54 = vadd.f32 %v3396_v46, %v3233_v30  ;;  %v3760_v36 = vpop.permute.xlu1 %3759  ;;  %v14662_v56 = vpop.f32.mrf.mxu0 }
 0x305   : > { %v3606_v17 = vpop.f32.mrf.mxu1  ;;  %14717 = vmatprep.mubr.msk.bf16.mxu0 %vm3968_vm6, %v3948_v25  ;;  %6729 = vrot.lane.b32.xlu0 %v3820_v34, %s23474_s5  ;;  %v3858_v26 = vmul.f32 %v17761_v44, %v3819_v1  ;;  %v3899_v12 = vadd.f32 %v17804_v47, %v3860_v61  ;;  %v3928_v60 = vmax.f32 %v3896_v63, 0.0  ;;  %v3454_v10 = vadd.f32 %v14661_v11, %v17698_v18 }
 0x306   : > { %v3661_v55 = vadd.f32 %v3606_v17, %v3448_v24  ;;  %6727 = vrot.lane.b32.xlu1 %v3819_v1, %s23474_s5  ;;  %14718 = vmatmul.mubr.msk.bf16.gmra.mxu0 %vm3968_vm6, %v3949_v52  ;;  %v3824_v57 = vsel %vm3797_vm5, %v3663_v2, %v3754_v42  ;;  %v3239_v22 = vadd.f32 %v17720_v39, %v18017_v45  ;;  %v3412_v39 = vpop.f32.mrf.mxu0 }
 0x307   : > { %v3897_v38 = vadd.f32 %v17804_v47, %v3858_v26  ;;  %v14692_v7 = vpop.f32.mrf.mxu1  ;;  %v3931_v3 = vmax.f32 %v3899_v12, 0.0  ;;  %v3863_v9 = vmul.f32 %v17761_v44, %v3824_v57  ;;  %v3452_v50 = vadd.f32 %v3409_v43, %v3236_v8  ;;  %v4324_v8 = vld [vmem:[#allocation2] sm:$0xff] }
 0x308   : > { %v3664_v20 = vadd.f32 %v14692_v7, %v3451_v35  ;;  %v3822_v34 = vsel %vm3797_vm5, %v3661_v55, %v18002_v48  ;;  %v3237_v23 = vadd.f32 %v17732_v49, %v3031_v21  ;;  %v3455_v62 = vadd.f32 %v14662_v56, %v3239_v22  ;;  %v3764_v27 = vpop.permute.xlu1 %3763  ;;  %v18131_v56 = vld [vmem:[%s23688_s12 + $0x10] sm:$0xff]  }
 0x309   : > { %v3929_v4 = vmax.f32 %v3897_v38, 0.0  ;;  %v3609_v42 = vpop.f32.mrf.mxu1  ;;  %v3951_v16 = vpack.c.bf16 %v3931_v3, %v3930_v6  ;;  %6733 = vrot.lane.b32.xlu0 %v3822_v34, %s23474_s5  ;;  %v3861_v32 = vmul.f32 %v17761_v44, %v3822_v34  ;;  %v3902_v33 = vadd.f32 %v17804_v47, %v3863_v9  ;;  %14801 = vmatprep.subr.bf16.mxu1 %v18131_v56 }
 0x30a   : > { %v3662_v41 = vadd.f32 %v3609_v42, %v3449_v54  ;;  %6731 = vrot.lane.b32.xlu1 %v3821_v5, %s23474_s5  ;;  %v3825_v48 = vsel %vm3797_vm5, %v3664_v20, %v3756_v29  ;;  %v3453_v51 = vadd.f32 %v3412_v39, %v3237_v23  ;;  %v4444_v54 = vrot.slane %v4324_v8, 1 }
 0x30b   : > { %v3950_v46 = vpack.c.bf16 %v3929_v4, %v3928_v60  ;;  %v14695_v59 = vpop.f32.mrf.mxu1  ;;  %v3864_v15 = vmul.f32 %v17761_v44, %v3825_v48  ;;  %v3900_v45 = vadd.f32 %v17804_v47, %v3861_v32  ;;  %v18141_v32 = vld [vmem:[%s23688_s12 + $0x18] sm:$0xff]  }
 0x30c   : > { %v3667_v19 = vadd.f32 %v14695_v59, %v3454_v10  ;;  %v3823_v18 = vsel %vm3797_vm5, %v3662_v41, %v18026_v40  ;;  %v3934_v40 = vmax.f32 %v3902_v33, 0.0  ;;  %v5005_v10 = vrot.slane %v4324_v8, 2 }
 0x30d   : > { %v3622_v11 = vpop.f32.mrf.mxu1  ;;  %14721 = vmatprep.mubr.msk.bf16.mxu0 %vm3968_vm6, %v3950_v46  ;;  %6737 = vrot.lane.b32.xlu0 %v3824_v57, %s23474_s5  ;;  %v3862_v52 = vmul.f32 %v17761_v44, %v3823_v18  ;;  %v3903_v14 = vadd.f32 %v17804_v47, %v3864_v15  ;;  %v3932_v13 = vmax.f32 %v3900_v45, 0.0  ;;  %v18160_v15 = vld [vmem:[%s23694_s11] ss:$0 sm:$0xff] }
 0x30e   : > { %v3665_v37 = vadd.f32 %v3622_v11, %v3452_v50  ;;  %6735 = vrot.lane.b32.xlu1 %v3823_v18, %s23474_s5  ;;  %14722 = vmatmul.mubr.msk.bf16.gmra.mxu0 %vm3968_vm6, %v3951_v16  ;;  %v3828_v49 = vsel %vm3797_vm5, %v3667_v19, %v3762_v58  ;;  %v18155_v58 = vld [vmem:[%s23693_s10] ss:$0 sm:$0xff] }
 0x30f   : > { %v3901_v0 = vadd.f32 %v17804_v47, %v3862_v52  ;;  %v14696_v31 = vpop.f32.mrf.mxu1  ;;  %v3935_v29 = vmax.f32 %v3903_v14, 0.0  ;;  %v3867_v5 = vmul.f32 %v17761_v44, %v3828_v49 }
 0x310   : > { %v3668_v21 = vadd.f32 %v14696_v31, %v3455_v62  ;;  %v3826_v25 = vsel %vm3797_vm5, %v3665_v37, %v18066_v28 }
 0x311   : > { %v3933_v53 = vmax.f32 %v3901_v0, 0.0  ;;  %v3625_v61 = vpop.f32.mrf.mxu1  ;;  %v3953_v30 = vpack.c.bf16 %v3935_v29, %v3934_v40  ;;  %6741 = vrot.lane.b32.xlu0 %v3826_v25, %s23474_s5  ;;  %v3865_v2 = vmul.f32 %v17761_v44, %v3826_v25  ;;  %v3906_v63 = vadd.f32 %v17804_v47, %v3867_v5 }
 0x312   : > { %v3666_v24 = vadd.f32 %v3625_v61, %v3453_v51  ;;  %6739 = vrot.lane.b32.xlu1 %v3825_v48, %s23474_s5  ;;  %v3829_v1 = vsel %vm3797_vm5, %v3668_v21, %v3764_v27 }
 0x313   : > { %v3952_v43 = vpack.c.bf16 %v3933_v53, %v3932_v13  ;;  %v3868_v17 = vmul.f32 %v17761_v44, %v3829_v1  ;;  %v3904_v26 = vadd.f32 %v17804_v47, %v3865_v2  ;;  %v3938_v57 = vmax.f32 %v3906_v63, 0.0 }
 0x314   : > { %v3827_v28 = vsel %vm3797_vm5, %v3666_v24, %v3760_v36  ;;  %v4326_v36 = vld [vmem:[#allocation2 + $0x10] sm:$0x3] }
 0x315   : > { %14725 = vmatprep.mubr.msk.bf16.mxu0 %vm3968_vm6, %v3952_v43  ;;  %v3866_v12 = vmul.f32 %v17761_v44, %v3827_v28  ;;  %6745 = vrot.lane.b32.xlu0 %v3828_v49, %s23474_s5  ;;  %v3907_v55 = vadd.f32 %v17804_v47, %v3868_v17  ;;  %v3936_v38 = vmax.f32 %v3904_v26, 0.0  ;;  %v15782_v44 = vld [vmem:[%s23688_s12] sm:$0xff]   ;;  %v4447_v4 = vrot.slane %v4326_v36, 1 }
 0x316   : > { %6743 = vrot.lane.b32.xlu1 %v3827_v28, %s23474_s5  ;;  %14726 = vmatmul.mubr.msk.bf16.gmra.mxu0 %vm3968_vm6, %v3953_v30  ;;  %v5008_v48 = vrot.slane %v4326_v36, 2 }
 0x317   : > { %v3905_v35 = vadd.f32 %v17804_v47, %v3866_v12  ;;  %v3939_v6 = vmax.f32 %v3907_v55, 0.0  ;;  %14767 = vmatprep.subr.bf16.mxu0 %v15782_v44  ;;  %v4325_v47 = vld [vmem:[#allocation2 + $0x8] sm:$0xff] }
 0x318   : > { %14768 = vmatpush3.bf16.msra.mxu0 %v15782_v44  ;;  %v4378_v20 = vpack.c.bf16 %v4325_v47, %v4324_v8  ;;  %v4445_v34 = vrot.slane %v4325_v47, 1  ;;  %v5006_v22 = vrot.slane %v4325_v47, 2 }
 0x319   : > { %v3937_v7 = vmax.f32 %v3905_v35, 0.0  ;;  %v3955_v3 = vpack.c.bf16 %v3939_v6, %v3938_v57  ;;  %14835 = vmatprep.subr.bf16.mxu0 %v18141_v32 }
 0x31a   : > { %6747 = vrot.lane.b32.xlu1 %v3829_v1, %s23474_s5  ;;  %v4446_v60 = vsel %vm1458_vm2, %v4444_v54, %v4445_v34  ;;  %v4448_v42 = vsel %vm1458_vm2, %v4445_v34, %v4447_v4  ;;  %v18145_v41 = vsel %vm2020_vm3, %v5005_v10, %v5006_v22  ;;  %v18148_v46 = vsel %vm2020_vm3, %v5006_v22, %v5008_v48 }
 0x31b   : > { %v3954_v9 = vpack.c.bf16 %v3937_v7, %v3936_v38  ;;  %v4556_v16 = vpack.c.bf16 %v4448_v42, %v4446_v60  ;;  %v18214_v42 = vld [vmem:[%s23688_s12 + $0x28] sm:$0xff]  }
 0x31d   : > { %14729 = vmatprep.mubr.msk.bf16.mxu0 %vm3968_vm6, %v3954_v9  ;;  %14735 = vmatprep.mubr.msk.bf16.mxu1 %vm764_vm0, %v4556_v16 }
 0x31e   : > { %14730 = vmatmul.mubr.msk.bf16.gmra.mxu0 %vm3968_vm6, %v3955_v3 }
 0x31f   : > { %14769 = vmatprep.mubr.msk.bf16.mxu0 %vm764_vm0, %v4378_v20 }
 0x3a6   : > { %v14703_v33 = vpop.f32.mrf.mxu0 }
 0x3a7   : > { %v4191_v50 = vmul.f32 %v14703_v33, %v18155_v58 }
 0x3a8   : > { %v4055_v23 = vpop.f32.mrf.mxu0 }
 0x3a9   : > { %v4230_v19 = vadd.f32 %v18160_v15, %v4191_v50  ;;  %v4189_v18 = vmul.f32 %v18155_v58, %v4055_v23 }
 0x3aa   : > { %v14704_v39 = vpop.f32.mrf.mxu0 }
 0x3ab   : > { %v4262_v45 = vmax.f32 %v4230_v19, 0.0  ;;  %v4228_v11 = vadd.f32 %v18160_v15, %v4189_v18  ;;  %v4192_v52 = vmul.f32 %v14704_v39, %v18155_v58 }
 0x3ac   : > { %v4058_v14 = vpop.f32.mrf.mxu0 }
 0x3ad   : > { %4294 = vst.msk [vmem:[#allocation2 + $0x31] sm:$0xff] %vm764_vm0, %v4262_v45  ;;  %v4260_v62 = vmax.f32 %v4228_v11, 0.0  ;;  %v4231_v37 = vadd.f32 %v18160_v15, %v4192_v52  ;;  %v4190_v49 = vmul.f32 %v18155_v58, %v4058_v14 }
 0x3ae   : > { %v14707_v40 = vpop.f32.mrf.mxu0 }
 0x3af   : > { %4292 = vst.msk [vmem:[#allocation2 + $0x19] sm:$0xff] %vm764_vm0, %v4260_v62  ;;  %v4263_v0 = vmax.f32 %v4231_v37, 0.0  ;;  %v4229_v31 = vadd.f32 %v18160_v15, %v4190_v49  ;;  %v4195_v27 = vmul.f32 %v14707_v40, %v18155_v58 }
 0x3b0   : > { %v4071_v29 = vpop.f32.mrf.mxu0 }
 0x3b1   : > { %4295 = vst.msk [vmem:[#allocation2 + $0x39] sm:$0xff] %vm764_vm0, %v4263_v0  ;;  %v4261_v5 = vmax.f32 %v4229_v31, 0.0  ;;  %v4234_v51 = vadd.f32 %v18160_v15, %v4195_v27  ;;  %v4193_v21 = vmul.f32 %v18155_v58, %v4071_v29  ;;  %v18246_v0 = vld [vmem:[%s23688_s12 + $0x20] sm:$0xff]  }
 0x3b2   : > { %v14708_v25 = vpop.f32.mrf.mxu0 }
 0x3b3   : > { %4293 = vst.msk [vmem:[#allocation2 + $0x21] sm:$0xff] %vm764_vm0, %v4261_v5  ;;  %v4266_v13 = vmax.f32 %v4234_v51, 0.0  ;;  %v4232_v53 = vadd.f32 %v18160_v15, %v4193_v21  ;;  %v4196_v61 = vmul.f32 %v14708_v25, %v18155_v58 }
 0x3b4   : > { %v4074_v30 = vpop.f32.mrf.mxu0  ;;  %v18182_v63 = vld [vmem:[#allocation2 + $0x30] sm:$0xff] }
 0x3b5   : > { %4298 = vst.msk [vmem:[#allocation2 + $0x61] sm:$0xff] %vm764_vm0, %v4266_v13  ;;  %v4264_v2 = vmax.f32 %v4232_v53, 0.0  ;;  %v4235_v24 = vadd.f32 %v18160_v15, %v4196_v61  ;;  %v4194_v1 = vmul.f32 %v18155_v58, %v4074_v30  ;;  %v4454_v3 = vrot.slane %v18182_v63, 1 }
 0x3b6   : > { %v14711_v43 = vpop.f32.mrf.mxu0  ;;  %v18187_v12 = vld [vmem:[#allocation2 + $0x18] sm:$0xff] }
 0x3b7   : > { %4296 = vst.msk [vmem:[#allocation2 + $0x49] sm:$0xff] %vm764_vm0, %v4264_v2  ;;  %v4267_v17 = vmax.f32 %v4235_v24, 0.0  ;;  %v4233_v28 = vadd.f32 %v18160_v15, %v4194_v1  ;;  %v4199_v26 = vmul.f32 %v14711_v43, %v18155_v58  ;;  %v4449_v47 = vrot.slane %v18187_v12, 1 }
 0x3b8   : > { %v4087_v55 = vpop.f32.mrf.mxu0  ;;  %v18189_v35 = vld [vmem:[#allocation2 + $0x38] sm:$0xff]  ;;  %v18191_v57 = vld [vmem:[#allocation2 + $0x40] sm:$0x3] }
 0x3b9   : > { %4299 = vst.msk [vmem:[#allocation2 + $0x69] sm:$0xff] %vm764_vm0, %v4267_v17  ;;  %v4265_v6 = vmax.f32 %v4233_v28, 0.0  ;;  %v4238_v38 = vadd.f32 %v18160_v15, %v4199_v26  ;;  %v4197_v7 = vmul.f32 %v18155_v58, %v4087_v55  ;;  %v4455_v20 = vrot.slane %v18189_v35, 1 }
 0x3ba   : > { %v14712_v9 = vpop.f32.mrf.mxu0  ;;  %v18197_v44 = vld [vmem:[#allocation2 + $0x20] sm:$0xff]  ;;  %v18199_v8 = vld [vmem:[#allocation2 + $0x28] sm:$0x3]  ;;  %v4457_v54 = vrot.slane %v18191_v57, 1  ;;  %v18218_v10 = vpack.c.bf16 %v18189_v35, %v18182_v63 }
 0x3bb   : > { %4297 = vst.msk [vmem:[#allocation2 + $0x51] sm:$0xff] %vm764_vm0, %v4265_v6  ;;  %v4270_v34 = vmax.f32 %v4238_v38, 0.0  ;;  %v4236_v36 = vadd.f32 %v18160_v15, %v4197_v7  ;;  %v4200_v60 = vmul.f32 %v14712_v9, %v18155_v58  ;;  %v18209_v4 = vpack.c.bf16 %v18197_v44, %v18187_v12 }
 0x3bc   : > { %v4090_v16 = vpop.f32.mrf.mxu0  ;;  %v4450_v22 = vrot.slane %v18197_v44, 1  ;;  %v4452_v48 = vrot.slane %v18199_v8, 1  ;;  %v4456_v33 = vsel %vm1458_vm2, %v4454_v3, %v4455_v20  ;;  %v4458_v18 = vsel %vm1458_vm2, %v4455_v20, %v4457_v54  ;;  %v18233_v52 = vld [vmem:[#allocation2 + $0x60] sm:$0xff] }
 0x3bd   : > { %4302 = vst.msk [vmem:[#allocation2 + $0x91] sm:$0xff] %vm764_vm0, %v4270_v34  ;;  %v4268_v50 = vmax.f32 %v4236_v36, 0.0  ;;  %v4239_v23 = vadd.f32 %v18160_v15, %v4200_v60  ;;  %v4198_v19 = vmul.f32 %v18155_v58, %v4090_v16  ;;  %14770 = vmatmul.mubr.msk.bf16.vlgmr.msra.gmra.mxu0 %vm764_vm0, %v18209_v4  ;;  %v4464_v25 = vrot.slane %v18233_v52, 1 }
 0x3be   : > { %v14715_v39 = vpop.f32.mrf.mxu0  ;;  %14773 = vmatprep.mubr.msk.bf16.mxu0 %vm764_vm0, %v18218_v10  ;;  %v4451_v45 = vsel %vm1458_vm2, %v4449_v47, %v4450_v22  ;;  %v4453_v11 = vsel %vm1458_vm2, %v4450_v22, %v4452_v48  ;;  %14836 = vmatpush3.bf16.msra.mxu0 %v18141_v32  ;;  %v18241_v40 = vld [vmem:[#allocation2 + $0x48] sm:$0xff]  ;;  %v18249_v32 = vpack.c.bf16 %v4458_v18, %v4456_v33 }
 0x3bf   : > { %4300 = vst.msk [vmem:[#allocation2 + $0x79] sm:$0xff] %vm764_vm0, %v4268_v50  ;;  %v4271_v14 = vmax.f32 %v4239_v23, 0.0  ;;  %v4237_v62 = vadd.f32 %v18160_v15, %v4198_v19  ;;  %v4203_v37 = vmul.f32 %v14715_v39, %v18155_v58  ;;  %v18239_v49 = vpack.c.bf16 %v4453_v11, %v4451_v45  ;;  %14903 = vmatprep.subr.bf16.mxu0 %v18214_v42 }
 0x3c0   : > { %v4103_v31 = vpop.f32.mrf.mxu0  ;;  %23696 = vst [vmem:[#allocation15_spill] sm:$0xff] %v18249_v32  ;;  %v18251_v27 = vld [vmem:[#allocation2 + $0x68] sm:$0xff]  ;;  %v18253_v29 = vld [vmem:[#allocation2 + $0x70] sm:$0x3]  ;;  %v4459_v30 = vrot.slane %v18241_v40, 1 }
 0x3c1   : > { %23695 = vst [vmem:[#allocation17_spill] sm:$0xff] %v18239_v49  ;;  %4303 = vst.msk [vmem:[#allocation2 + $0x99] sm:$0xff] %vm764_vm0, %v4271_v14  ;;  %v4269_v5 = vmax.f32 %v4237_v62, 0.0  ;;  %v4242_v51 = vadd.f32 %v18160_v15, %v4203_v37  ;;  %v4201_v21 = vmul.f32 %v18155_v58, %v4103_v31  ;;  %14736 = vmatmul.mubr.msk.bf16.vlgmr.msra.gmra.mxu1 %vm764_vm0, %v18239_v49  ;;  %v4465_v2 = vrot.slane %v18251_v27, 1 }
 0x3c2   : > { %14802 = vmatpush3.bf16.msra.mxu1 %v18131_v56  ;;  %14739 = vmatprep.mubr.msk.bf16.mxu1 %vm764_vm0, %v18249_v32  ;;  %v14716_v13 = vpop.f32.mrf.mxu0  ;;  %v18264_v53 = vld [vmem:[#allocation2 + $0x50] sm:$0xff]  ;;  %v18266_v61 = vld [vmem:[#allocation2 + $0x58] sm:$0x3]  ;;  %v4467_v24 = vrot.slane %v18253_v29, 1  ;;  %v18281_v26 = vpack.c.bf16 %v18251_v27, %v18233_v52 }
 0x3c3   : > { %4301 = vst.msk [vmem:[#allocation2 + $0x81] sm:$0xff] %vm764_vm0, %v4269_v5  ;;  %v4274_v1 = vmax.f32 %v4242_v51, 0.0  ;;  %v4240_v43 = vadd.f32 %v18160_v15, %v4201_v21  ;;  %v4204_v56 = vmul.f32 %v14716_v13, %v18155_v58  ;;  %v18276_v17 = vpack.c.bf16 %v18264_v53, %v18241_v40  ;;  %14869 = vmatprep.subr.bf16.mxu1 %v18246_v0 }
 0x3c4   : > { %v4106_v28 = vpop.f32.mrf.mxu0  ;;  %v4460_v55 = vrot.slane %v18264_v53, 1  ;;  %v4462_v6 = vrot.slane %v18266_v61, 1  ;;  %v4466_v38 = vsel %vm1458_vm2, %v4464_v25, %v4465_v2  ;;  %v4468_v47 = vsel %vm1458_vm2, %v4465_v2, %v4467_v24  ;;  %v18296_v36 = vld [vmem:[#allocation2 + $0x90] sm:$0xff] }
 0x3c5   : > { %4306 = vst.msk [vmem:[#allocation2 + $0xc1] sm:$0xff] %vm764_vm0, %v4274_v1  ;;  %v4272_v7 = vmax.f32 %v4240_v43, 0.0  ;;  %v4243_v3 = vadd.f32 %v18160_v15, %v4204_v56  ;;  %v4202_v9 = vmul.f32 %v18155_v58, %v4106_v28  ;;  %14774 = vmatmul.mubr.msk.bf16.gmra.mxu0 %vm764_vm0, %v18276_v17  ;;  %v18305_v23 = vpack.c.bf16 %v4468_v47, %v4466_v38 }
 0x3c6   : > { %v14719_v20 = vpop.f32.mrf.mxu0  ;;  %14777 = vmatprep.mubr.msk.bf16.mxu0 %vm764_vm0, %v18281_v26  ;;  %v4461_v54 = vsel %vm1458_vm2, %v4459_v30, %v4460_v55  ;;  %v4463_v34 = vsel %vm1458_vm2, %v4460_v55, %v4462_v6  ;;  %v18303_v33 = vld [vmem:[#allocation2 + $0x78] sm:$0xff]  ;;  %v4474_v14 = vrot.slane %v18296_v36, 1 }
 0x3c7   : > { %4304 = vst.msk [vmem:[#allocation2 + $0xa9] sm:$0xff] %vm764_vm0, %v4272_v7  ;;  %v4275_v60 = vmax.f32 %v4243_v3, 0.0  ;;  %v4241_v16 = vadd.f32 %v18160_v15, %v4202_v9  ;;  %v4207_v22 = vmul.f32 %v14719_v20, %v18155_v58  ;;  %v18301_v48 = vpack.c.bf16 %v4463_v34, %v4461_v54  ;;  %23698 = vst [vmem:[#allocation22_spill] sm:$0xff] %v18305_v23 }
 0x3c8   : > { %v4119_v50 = vpop.f32.mrf.mxu0  ;;  %v18307_v19 = vld [vmem:[#allocation2 + $0x98] sm:$0xff]  ;;  %v18309_v18 = vld [vmem:[#allocation2 + $0xa0] sm:$0x3]  ;;  %v4469_v5 = vrot.slane %v18303_v33, 1 }
 0x3c9   : > { %23697 = vst [vmem:[#allocation19_spill] sm:$0xff] %v18301_v48  ;;  %4307 = vst.msk [vmem:[#allocation2 + $0xc9] sm:$0xff] %vm764_vm0, %v4275_v60  ;;  %v4273_v39 = vmax.f32 %v4241_v16, 0.0  ;;  %v4246_v45 = vadd.f32 %v18160_v15, %v4207_v22  ;;  %v4205_v11 = vmul.f32 %v18155_v58, %v4119_v50  ;;  %14740 = vmatmul.mubr.msk.bf16.gmra.mxu1 %vm764_vm0, %v18301_v48  ;;  %v4475_v51 = vrot.slane %v18307_v19, 1 }
 0x3ca   : > { %14743 = vmatprep.mubr.msk.bf16.mxu1 %vm764_vm0, %v18305_v23  ;;  %v14720_v62 = vpop.f32.mrf.mxu0  ;;  %v18319_v37 = vld [vmem:[#allocation2 + $0x80] sm:$0xff]  ;;  %v18321_v31 = vld [vmem:[#allocation2 + $0x88] sm:$0x3]  ;;  %v4477_v21 = vrot.slane %v18309_v18, 1  ;;  %v18335_v1 = vpack.c.bf16 %v18307_v19, %v18296_v36 }
 0x3cb   : > { %4305 = vst.msk [vmem:[#allocation2 + $0xb1] sm:$0xff] %vm764_vm0, %v4273_v39  ;;  %v4278_v25 = vmax.f32 %v4246_v45, 0.0  ;;  %v4244_v13 = vadd.f32 %v18160_v15, %v4205_v11  ;;  %v4208_v30 = vmul.f32 %v14720_v62, %v18155_v58  ;;  %v18331_v2 = vpack.c.bf16 %v18319_v37, %v18303_v33 }
 0x3cc   : > { %v4122_v24 = vpop.f32.mrf.mxu0  ;;  %v4470_v43 = vrot.slane %v18319_v37, 1  ;;  %v4472_v56 = vrot.slane %v18321_v31, 1  ;;  %v4476_v28 = vsel %vm1458_vm2, %v4474_v14, %v4475_v51  ;;  %v4478_v7 = vsel %vm1458_vm2, %v4475_v51, %v4477_v21  ;;  %v18350_v20 = vld [vmem:[#allocation2 + $0xc0] sm:$0xff] }
 0x3cd   : > { %4310 = vst.msk [vmem:[#allocation2 + $0xf1] sm:$0xff] %vm764_vm0, %v4278_v25  ;;  %v4276_v55 = vmax.f32 %v4244_v13, 0.0  ;;  %v4247_v6 = vadd.f32 %v18160_v15, %v4208_v30  ;;  %v4206_v38 = vmul.f32 %v18155_v58, %v4122_v24  ;;  %14778 = vmatmul.mubr.msk.bf16.gmra.mxu0 %vm764_vm0, %v18331_v2  ;;  %v18359_v39 = vpack.c.bf16 %v4478_v7, %v4476_v28 }
 0x3ce   : > { %v14723_v3 = vpop.f32.mrf.mxu0  ;;  %14781 = vmatprep.mubr.msk.bf16.mxu0 %vm764_vm0, %v18335_v1  ;;  %v4471_v9 = vsel %vm1458_vm2, %v4469_v5, %v4470_v43  ;;  %v4473_v47 = vsel %vm1458_vm2, %v4470_v43, %v4472_v56  ;;  %v18357_v22 = vld [vmem:[#allocation2 + $0xa8] sm:$0xff]  ;;  %v4484_v51 = vrot.slane %v18350_v20, 1 }
 0x3cf   : > { %4308 = vst.msk [vmem:[#allocation2 + $0xd9] sm:$0xff] %vm764_vm0, %v4276_v55  ;;  %v4279_v54 = vmax.f32 %v4247_v6, 0.0  ;;  %v4245_v34 = vadd.f32 %v18160_v15, %v4206_v38  ;;  %v4211_v60 = vmul.f32 %v14723_v3, %v18155_v58  ;;  %v18355_v16 = vpack.c.bf16 %v4473_v47, %v4471_v9  ;;  %23700 = vst [vmem:[#allocation25_spill] sm:$0xff] %v18359_v39 }
 0x3d0   : > { %v4135_v50 = vpop.f32.mrf.mxu0  ;;  %v18361_v45 = vld [vmem:[#allocation2 + $0xc8] sm:$0xff]  ;;  %v18363_v11 = vld [vmem:[#allocation2 + $0xd0] sm:$0x3]  ;;  %v4479_v30 = vrot.slane %v18357_v22, 1 }
 0x3d1   : > { %23699 = vst [vmem:[#allocation24_spill] sm:$0xff] %v18355_v16  ;;  %4311 = vst.msk [vmem:[#allocation2 + $0xf9] sm:$0xff] %vm764_vm0, %v4279_v54  ;;  %v4277_v14 = vmax.f32 %v4245_v34, 0.0  ;;  %v4250_v62 = vadd.f32 %v18160_v15, %v4211_v60  ;;  %v4209_v5 = vmul.f32 %v18155_v58, %v4135_v50  ;;  %14744 = vmatmul.mubr.msk.bf16.gmra.mxu1 %vm764_vm0, %v18355_v16  ;;  %v4485_v24 = vrot.slane %v18361_v45, 1 }
 0x3d2   : > { %14747 = vmatprep.mubr.msk.bf16.mxu1 %vm764_vm0, %v18359_v39  ;;  %v14724_v21 = vpop.f32.mrf.mxu0  ;;  %v18373_v25 = vld [vmem:[#allocation2 + $0xb0] sm:$0xff]  ;;  %v18375_v13 = vld [vmem:[#allocation2 + $0xb8] sm:$0x3]  ;;  %v4487_v43 = vrot.slane %v18363_v11, 1  ;;  %v18389_v7 = vpack.c.bf16 %v18361_v45, %v18350_v20 }
 0x3d3   : > { %4309 = vst.msk [vmem:[#allocation2 + $0xe1] sm:$0xff] %vm764_vm0, %v4277_v14  ;;  %v4282_v56 = vmax.f32 %v4250_v62, 0.0  ;;  %v4248_v28 = vadd.f32 %v18160_v15, %v4209_v5  ;;  %v4212_v55 = vmul.f32 %v14724_v21, %v18155_v58  ;;  %v18385_v6 = vpack.c.bf16 %v18373_v25, %v18357_v22 }
 0x3d4   : > { %v4138_v38 = vpop.f32.mrf.mxu0  ;;  %v4480_v3 = vrot.slane %v18373_v25, 1  ;;  %v4482_v9 = vrot.slane %v18375_v13, 1  ;;  %v4486_v47 = vsel %vm1458_vm2, %v4484_v51, %v4485_v24  ;;  %v4488_v50 = vsel %vm1458_vm2, %v4485_v24, %v4487_v43  ;;  %v18404_v51 = vld [vmem:[#allocation2 + $0xf0] sm:$0xff] }
 0x3d5   : > { %4314 = vst.msk [vmem:[#allocation2 + $0x121] sm:$0xff] %vm764_vm0, %v4282_v56  ;;  %v4280_v54 = vmax.f32 %v4248_v28, 0.0  ;;  %v4251_v34 = vadd.f32 %v18160_v15, %v4212_v55  ;;  %v4210_v60 = vmul.f32 %v18155_v58, %v4138_v38  ;;  %14782 = vmatmul.mubr.msk.bf16.gmra.mxu0 %vm764_vm0, %v18385_v6  ;;  %23701 = vst [vmem:[#allocation20_spill] sm:$0xff] %v18404_v51 }
 0x3d6   : > { %v14727_v14 = vpop.f32.mrf.mxu0  ;;  %14785 = vmatprep.mubr.msk.bf16.mxu0 %vm764_vm0, %v18389_v7  ;;  %v4481_v62 = vsel %vm1458_vm2, %v4479_v30, %v4480_v3  ;;  %v4483_v5 = vsel %vm1458_vm2, %v4480_v3, %v4482_v9  ;;  %v18411_v24 = vld [vmem:[#allocation2 + $0xd8] sm:$0xff]  ;;  %v18413_v38 = vpack.c.bf16 %v4488_v50, %v4486_v47 }
 0x3d7   : > { %4312 = vst.msk [vmem:[#allocation2 + $0x109] sm:$0xff] %vm764_vm0, %v4280_v54  ;;  %v4283_v21 = vmax.f32 %v4251_v34, 0.0  ;;  %v4249_v56 = vadd.f32 %v18160_v15, %v4210_v60  ;;  %v4215_v28 = vmul.f32 %v14727_v14, %v18155_v58  ;;  %v18409_v55 = vpack.c.bf16 %v4483_v5, %v4481_v62  ;;  %23703 = vst [vmem:[#allocation29_spill] sm:$0xff] %v18411_v24 }
 0x3d8   : > { %v4151_v43 = vpop.f32.mrf.mxu0  ;;  %23704 = vst [vmem:[#allocation27_spill] sm:$0xff] %v18413_v38  ;;  %v18415_v59 = vld [vmem:[#allocation2 + $0xf8] sm:$0xff]  ;;  %v18417_v30 = vld [vmem:[#allocation2 + $0x100] sm:$0x3]  ;;  %v4494_v34 = vrot.slane %v18404_v51, 1  ;;  %v4489_v14 = vrot.slane %v18411_v24, 1 }
 0x3d9   : > { %23702 = vst [vmem:[#allocation32_spill] sm:$0xff] %v18409_v55  ;;  %4315 = vst.msk [vmem:[#allocation2 + $0x129] sm:$0xff] %vm764_vm0, %v4283_v21  ;;  %v4281_v3 = vmax.f32 %v4249_v56, 0.0  ;;  %v4254_v9 = vadd.f32 %v18160_v15, %v4215_v28  ;;  %v4213_v54 = vmul.f32 %v18155_v58, %v4151_v43  ;;  %14748 = vmatmul.mubr.msk.bf16.gmra.mxu1 %vm764_vm0, %v18409_v55  ;;  %v4495_v62 = vrot.slane %v18415_v59, 1 }
 0x3da   : > { %14751 = vmatprep.mubr.msk.bf16.mxu1 %vm764_vm0, %v18413_v38  ;;  %v14728_v47 = vpop.f32.mrf.mxu0  ;;  %v18427_v60 = vld [vmem:[#allocation2 + $0xe0] sm:$0xff]  ;;  %v18429_v50 = vld [vmem:[#allocation2 + $0xe8] sm:$0x3]  ;;  %v4497_v5 = vrot.slane %v18417_v30, 1  ;;  %v18443_v55 = vpack.c.bf16 %v18415_v59, %v18404_v51 }
 0x3db   : > { %4313 = vst.msk [vmem:[#allocation2 + $0x111] sm:$0xff] %vm764_vm0, %v4281_v3  ;;  %v4286_v21 = vmax.f32 %v4254_v9, 0.0  ;;  %v4252_v56 = vadd.f32 %v18160_v15, %v4213_v54  ;;  %v4216_v28 = vmul.f32 %v14728_v47, %v18155_v58  ;;  %v18439_v43 = vpack.c.bf16 %v18427_v60, %v18411_v24 }
 0x3dc   : > { %v4154_v38 = vpop.f32.mrf.mxu0  ;;  %23705 = vst [vmem:[#allocation9_spill] sm:$0xff] %v18443_v55  ;;  %v4490_v39 = vrot.slane %v18427_v60, 1  ;;  %v4492_v16 = vrot.slane %v18429_v50, 1  ;;  %v4496_v3 = vsel %vm1458_vm2, %v4494_v34, %v4495_v62  ;;  %v4498_v23 = vsel %vm1458_vm2, %v4495_v62, %v4497_v5  ;;  %v18458_v49 = vld [vmem:[#allocation2 + $0x120] sm:$0xff] }
 0x3dd   : > { %4318 = vst.msk [vmem:[#allocation2 + $0x151] sm:$0xff] %vm764_vm0, %v4286_v21  ;;  %v4284_v9 = vmax.f32 %v4252_v56, 0.0  ;;  %v4255_v54 = vadd.f32 %v18160_v15, %v4216_v28  ;;  %v4214_v47 = vmul.f32 %v18155_v58, %v4154_v38  ;;  %14786 = vmatmul.mubr.msk.bf16.gmra.mxu0 %vm764_vm0, %v18439_v43  ;;  %23706 = vst [vmem:[#allocation12_spill] sm:$0xff] %v18458_v49 }
 0x3de   : > { %v14731_v48 = vpop.f32.mrf.mxu0  ;;  %14789 = vmatprep.mubr.msk.bf16.mxu0 %vm764_vm0, %v18443_v55  ;;  %v4491_v32 = vsel %vm1458_vm2, %v4489_v14, %v4490_v39  ;;  %v4493_v34 = vsel %vm1458_vm2, %v4490_v39, %v4492_v16  ;;  %v18465_v62 = vld [vmem:[#allocation2 + $0x108] sm:$0xff]  ;;  %v18467_v51 = vpack.c.bf16 %v4498_v23, %v4496_v3 }
 0x3df   : > { %4316 = vst.msk [vmem:[#allocation2 + $0x139] sm:$0xff] %vm764_vm0, %v4284_v9  ;;  %v4287_v21 = vmax.f32 %v4255_v54, 0.0  ;;  %v4253_v38 = vadd.f32 %v18160_v15, %v4214_v47  ;;  %v4219_v56 = vmul.f32 %v14731_v48, %v18155_v58  ;;  %v18463_v28 = vpack.c.bf16 %v4493_v34, %v4491_v32  ;;  %23708 = vst [vmem:[#allocation11_spill] sm:$0xff] %v18465_v62 }
 0x3e0   : > { %v4167_v5 = vpop.f32.mrf.mxu0  ;;  %23709 = vst [vmem:[#allocation13_spill] sm:$0xff] %v18467_v51  ;;  %v18469_v55 = vld [vmem:[#allocation2 + $0x128] sm:$0xff]  ;;  %v18471_v14 = vld [vmem:[#allocation2 + $0x130] sm:$0x3]  ;;  %v4504_v32 = vrot.slane %v18458_v49, 1  ;;  %v4499_v54 = vrot.slane %v18465_v62, 1 }
 0x3e1   : > { %23707 = vst [vmem:[#allocation10_spill] sm:$0xff] %v18463_v28  ;;  %23710 = vst [vmem:[#allocation18_spill] sm:$0xff] %v18469_v55  ;;  %v4285_v16 = vmax.f32 %v4253_v38, 0.0  ;;  %v4258_v39 = vadd.f32 %v18160_v15, %v4219_v56  ;;  %v4217_v9 = vmul.f32 %v18155_v58, %v4167_v5  ;;  %14752 = vmatmul.mubr.msk.bf16.gmra.mxu1 %vm764_vm0, %v18463_v28  ;;  %v4505_v47 = vrot.slane %v18469_v55, 1 }
 0x3e2   : > { %23711 = vst [vmem:[#allocation14_spill] sm:$0xff] %v18471_v14  ;;  %4319 = vst.msk [vmem:[#allocation2 + $0x159] sm:$0xff] %vm764_vm0, %v4287_v21  ;;  %14755 = vmatprep.mubr.msk.bf16.mxu1 %vm764_vm0, %v18467_v51  ;;  %v14732_v48 = vpop.f32.mrf.mxu0  ;;  %v18481_v23 = vld [vmem:[#allocation2 + $0x110] sm:$0xff]  ;;  %v18483_v3 = vld [vmem:[#allocation2 + $0x118] sm:$0x3]  ;;  %v4507_v34 = vrot.slane %v18471_v14, 1  ;;  %v18497_v28 = vpack.c.bf16 %v18469_v55, %v18458_v49 }
 0x3e3   : > { %4317 = vst.msk [vmem:[#allocation2 + $0x141] sm:$0xff] %vm764_vm0, %v4285_v16  ;;  %v4290_v21 = vmax.f32 %v4258_v39, 0.0  ;;  %v4256_v38 = vadd.f32 %v18160_v15, %v4217_v9  ;;  %v4220_v56 = vmul.f32 %v14732_v48, %v18155_v58  ;;  %v18493_v5 = vpack.c.bf16 %v18481_v23, %v18465_v62 }
 0x3e4   : > { %v4170_v51 = vpop.f32.mrf.mxu0  ;;  %v4500_v24 = vrot.slane %v18481_v23, 1  ;;  %v4502_v14 = vrot.slane %v18483_v3, 1  ;;  %v4506_v16 = vsel %vm1458_vm2, %v4504_v32, %v4505_v47  ;;  %v4508_v62 = vsel %vm1458_vm2, %v4505_v47, %v4507_v34 }
 0x3e5   : > { %4322 = vst.msk [vmem:[#allocation2 + $0x181] sm:$0xff] %vm764_vm0, %v4290_v21  ;;  %v4288_v39 = vmax.f32 %v4256_v38, 0.0  ;;  %v4259_v9 = vadd.f32 %v18160_v15, %v4220_v56  ;;  %v4218_v48 = vmul.f32 %v18155_v58, %v4170_v51  ;;  %14790 = vmatmul.mubr.msk.bf16.gmra.mxu0 %vm764_vm0, %v18493_v5  ;;  %v18516_v58 = vld [vmem:[#allocation2 + $0x150] sm:$0xff]  ;;  %v18518_v51 = vpack.c.bf16 %v4508_v62, %v4506_v16 }
 0x3e6   : > { %14793 = vmatprep.mubr.msk.bf16.mxu0 %vm764_vm0, %v18497_v28  ;;  %v4501_v49 = vsel %vm1458_vm2, %v4499_v54, %v4500_v24  ;;  %v4503_v55 = vsel %vm1458_vm2, %v4500_v24, %v4502_v14  ;;  %23713 = vst [vmem:[#allocation21_spill] sm:$0xff] %v18516_v58  ;;  %v18520_v56 = vld [vmem:[#allocation2 + $0x138] sm:$0xff]  ;;  %v4514_v14 = vrot.slane %v18516_v58, 1 }
 0x3e7   : > { %4320 = vst.msk [vmem:[#allocation2 + $0x169] sm:$0xff] %vm764_vm0, %v4288_v39  ;;  %v4291_v32 = vmax.f32 %v4259_v9, 0.0  ;;  %v4257_v21 = vadd.f32 %v18160_v15, %v4218_v48  ;;  %v18514_v38 = vpack.c.bf16 %v4503_v55, %v4501_v49  ;;  %23714 = vst [vmem:[#allocation28_spill] sm:$0xff] %v18518_v51  ;;  %v4509_v16 = vrot.slane %v18520_v56, 1 }
 0x3e8   : > { %23715 = vst [vmem:[#allocation23_spill] sm:$0xff] %v18520_v56 }
 0x3e9   : > { %23712 = vst [vmem:[#allocation16_spill] sm:$0xff] %v18514_v38  ;;  %v18522_v47 = vld [vmem:[#allocation2 + $0x158] sm:$0xff]  ;;  %v18524_v34 = vld [vmem:[#allocation2 + $0x160] sm:$0x3]  ;;  %4323 = vst.msk [vmem:[#allocation2 + $0x189] sm:$0xff] %vm764_vm0, %v4291_v32  ;;  %v4289_v24 = vmax.f32 %v4257_v21, 0.0  ;;  %14756 = vmatmul.mubr.msk.bf16.gmra.mxu1 %vm764_vm0, %v18514_v38 }
 0x3ea   : > { %v4515_v15 = vrot.slane %v18522_v47, 1  ;;  %v4517_v49 = vrot.slane %v18524_v34, 1  ;;  %14759 = vmatprep.mubr.msk.bf16.mxu1 %vm764_vm0, %v18518_v51  ;;  %v18533_v55 = vld [vmem:[#allocation2 + $0x140] sm:$0xff]  ;;  %v18535_v62 = vld [vmem:[#allocation2 + $0x148] sm:$0x3]  ;;  %v18548_v48 = vpack.c.bf16 %v18522_v47, %v18516_v58 }
 0x3eb   : > { %4321 = vst.msk [vmem:[#allocation2 + $0x171] sm:$0xff] %vm764_vm0, %v4289_v24  ;;  %v18541_v54 = vpack.c.bf16 %v18533_v55, %v18520_v56  ;;  %v4510_v39 = vrot.slane %v18533_v55, 1  ;;  %v4512_v9 = vrot.slane %v18535_v62, 1 }
 0x3ec   : > { %v4516_v24 = vsel %vm1458_vm2, %v4514_v14, %v4515_v15  ;;  %v4518_v51 = vsel %vm1458_vm2, %v4515_v15, %v4517_v49 }
 0x3ed   : > { %14794 = vmatmul.mubr.msk.bf16.gmra.mxu0 %vm764_vm0, %v18541_v54  ;;  %v4511_v32 = vsel %vm1458_vm2, %v4509_v16, %v4510_v39  ;;  %v4513_v21 = vsel %vm1458_vm2, %v4510_v39, %v4512_v9  ;;  %v18560_v56 = vpack.c.bf16 %v4518_v51, %v4516_v24  ;;  %v5011_v24 = vrot.slane %v18197_v44, 2  ;;  %v18602_v44 = vld [vmem:[%s23688_s12 + $0x38] sm:$0xff]  }
 0x3ee   : > { %14797 = vmatprep.mubr.msk.bf16.mxu0 %vm764_vm0, %v18548_v48  ;;  %v18558_v38 = vpack.c.bf16 %v4513_v21, %v4511_v32  ;;  %v18562_v58 = vld [vmem:[#allocation2 + $0x168] sm:$0xff] }
 0x3ef   : > { %23717 = vst [vmem:[#allocation44_spill] sm:$0xff] %v18560_v56  ;;  %23718 = vst [vmem:[#allocation43_spill] sm:$0xff] %v18562_v58  ;;  %v4519_v49 = vrot.slane %v18562_v58, 1 }
 0x3f0   : > { %23716 = vst [vmem:[#allocation26_spill] sm:$0xff] %v18558_v38 }
 0x3f1   : > { %14760 = vmatmul.mubr.msk.bf16.gmra.mxu1 %vm764_vm0, %v18558_v38  ;;  %v5016_v38 = vrot.slane %v18189_v35, 2 }
 0x3f2   : > { %14763 = vmatprep.mubr.msk.bf16.mxu1 %vm764_vm0, %v18560_v56  ;;  %v18568_v16 = vld [vmem:[#allocation2 + $0x170] sm:$0xff]  ;;  %v18570_v14 = vld [vmem:[#allocation2 + $0x178] sm:$0x3]  ;;  %v5013_v56 = vrot.slane %v18199_v8, 2 }
 0x3f3   : > { %v18574_v15 = vpack.c.bf16 %v18568_v16, %v18562_v58  ;;  %v4520_v51 = vrot.slane %v18568_v16, 1  ;;  %v4522_v39 = vrot.slane %v18570_v14, 1  ;;  %v5018_v58 = vrot.slane %v18191_v57, 2 }
 0x3f4   : > { %v5014_v35 = vsel %vm2020_vm3, %v5011_v24, %v5013_v56  ;;  %v5021_v56 = vrot.slane %v18264_v53, 2 }
 0x3f5   : > { %14798 = vmatmul.mubr.msk.bf16.gmra.mxu0 %vm764_vm0, %v18574_v15  ;;  %v4521_v9 = vsel %vm1458_vm2, %v4519_v49, %v4520_v51  ;;  %v4523_v32 = vsel %vm1458_vm2, %v4520_v51, %v4522_v39  ;;  %v23719_v49 = vpack.c.bf16 %v18148_v46, %v18145_v41  ;;  %v5015_v51 = vrot.slane %v18182_v63, 2 }
 0x3f6   : > { %14837 = vmatprep.mubr.msk.bf16.mxu0 %vm764_vm0, %v18209_v4  ;;  %v18585_v21 = vpack.c.bf16 %v4523_v32, %v4521_v9  ;;  %v5010_v4 = vrot.slane %v18187_v12, 2  ;;  %v5019_v46 = vsel %vm2020_vm3, %v5016_v38, %v5018_v58  ;;  %v18618_v12 = vld [vmem:[%s23688_s12 + $0x30] sm:$0xff]   ;;  %v5028_v58 = vrot.slane %v18253_v29, 2 }
 0x3f7   : > { %v5017_v41 = vsel %vm2020_vm3, %v5015_v51, %v5016_v38  ;;  %v5023_v38 = vrot.slane %v18266_v61, 2  ;;  %v5020_v39 = vrot.slane %v18241_v40, 2  ;;  %v5025_v9 = vrot.slane %v18233_v52, 2 }
 0x3f8   : > { %v5012_v8 = vsel %vm2020_vm3, %v5010_v4, %v5011_v24  ;;  %v18621_v57 = vpack.c.bf16 %v5019_v46, %v5017_v41  ;;  %v5031_v52 = vrot.slane %v18319_v37, 2  ;;  %v5033_v32 = vrot.slane %v18321_v31, 2 }
 0x3f9   : > { %14764 = vmatmul.mubr.msk.bf16.gmra.mxu1 %vm764_vm0, %v18585_v21  ;;  %v18613_v63 = vpack.c.bf16 %v5014_v35, %v5012_v8  ;;  %v5022_v53 = vsel %vm2020_vm3, %v5020_v39, %v5021_v56  ;;  %v5024_v61 = vsel %vm2020_vm3, %v5021_v56, %v5023_v38  ;;  %v5036_v24 = vrot.slane %v18307_v19, 2 }
 0x3fa   : > { %14803 = vmatprep.mubr.msk.bf16.mxu1 %vm764_vm0, %v23719_v49  ;;  %v18643_v29 = vpack.c.bf16 %v5024_v61, %v5022_v53  ;;  %v5038_v49 = vrot.slane %v18309_v18, 2  ;;  %v5030_v4 = vrot.slane %v18303_v33, 2  ;;  %v5035_v51 = vrot.slane %v18296_v36, 2  ;;  %v23720_v53 = vld [vmem:[#allocation29_spill] sm:$0xff] }
 0x3fb   : > { %v5034_v37 = vsel %vm2020_vm3, %v5031_v52, %v5033_v32  ;;  %v5041_v36 = vrot.slane %v18373_v25, 2  ;;  %v5043_v33 = vrot.slane %v18375_v13, 2  ;;  %v5046_v41 = vrot.slane %v18361_v45, 2  ;;  %v23722_v32 = vld [vmem:[#allocation9_spill] sm:$0xff] }
 0x3fc   : > { %v5032_v8 = vsel %vm2020_vm3, %v5030_v4, %v5031_v52  ;;  %v5037_v31 = vsel %vm2020_vm3, %v5035_v51, %v5036_v24  ;;  %v5039_v19 = vsel %vm2020_vm3, %v5036_v24, %v5038_v49  ;;  %v5048_v46 = vrot.slane %v18363_v11, 2  ;;  %v23723_v51 = vld [vmem:[#allocation18_spill] sm:$0xff] }
 0x3fd   : > { %14838 = vmatmul.mubr.msk.bf16.vlgmr.msra.gmra.mxu0 %vm764_vm0, %v18218_v10  ;;  %v18665_v18 = vpack.c.bf16 %v5034_v37, %v5032_v8  ;;  %v18667_v35 = vpack.c.bf16 %v5039_v19, %v5037_v31  ;;  %v5040_v56 = vrot.slane %v18357_v22, 2  ;;  %v5045_v38 = vrot.slane %v18350_v20, 2  ;;  %v23724_v37 = vld [vmem:[#allocation14_spill] sm:$0xff]  ;;  %v23725_v19 = vld [vmem:[#allocation11_spill] sm:$0xff] }
 0x3fe   : > { %14841 = vmatprep.mubr.msk.bf16.mxu0 %vm764_vm0, %v18276_v17  ;;  %14904 = vmatpush3.bf16.msra.mxu0 %v18214_v42  ;;  %v5026_v42 = vrot.slane %v18251_v27, 2  ;;  %v5044_v25 = vsel %vm2020_vm3, %v5041_v36, %v5043_v33  ;;  %v5049_v45 = vsel %vm2020_vm3, %v5046_v41, %v5048_v46  ;;  %v5051_v20 = vrot.slane %v18427_v60, 2  ;;  %v23726_v33 = vld [vmem:[#allocation12_spill] sm:$0xff] }
 0x3ff   : > { %14971 = vmatprep.subr.bf16.mxu0 %v18602_v44  ;;  %v5047_v13 = vsel %vm2020_vm3, %v5045_v38, %v5046_v41  ;;  %v5053_v22 = vrot.slane %v18429_v50, 2  ;;  %v5056_v39 = vrot.slane %v18415_v59, 2  ;;  %v5050_v61 = vrot.slane %v23720_v53, 2 }
 0x400   : > { %v5027_v27 = vsel %vm2020_vm3, %v5025_v9, %v5026_v42  ;;  %v5058_v9 = vrot.slane %v18417_v30, 2  ;;  %v5061_v49 = vrot.slane %v18481_v23, 2  ;;  %v5063_v4 = vrot.slane %v18483_v3, 2 }
 0x401   : > { %14804 = vmatmul.mubr.msk.bf16.vlgmr.msra.gmra.mxu1 %vm764_vm0, %v18613_v63  ;;  %v5052_v52 = vsel %vm2020_vm3, %v5050_v61, %v5051_v20  ;;  %v5054_v60 = vsel %vm2020_vm3, %v5051_v20, %v5053_v22  ;;  %v5066_v8 = vrot.slane %v23723_v51, 2  ;;  %v5068_v31 = vrot.slane %v23724_v37, 2  ;;  %v23727_v22 = vld [vmem:[#allocation23_spill] sm:$0xff] }
 0x402   : > { %14870 = vmatpush3.bf16.msra.mxu1 %v18246_v0  ;;  %14807 = vmatprep.mubr.msk.bf16.mxu1 %vm764_vm0, %v18621_v57  ;;  %v5029_v0 = vsel %vm2020_vm3, %v5026_v42, %v5028_v58  ;;  %v5042_v42 = vsel %vm2020_vm3, %v5040_v56, %v5041_v36  ;;  %v18689_v58 = vpack.c.bf16 %v5049_v45, %v5047_v13  ;;  %v5060_v36 = vrot.slane %v23725_v19, 2  ;;  %v23731_v37 = vld [vmem:[#allocation15_spill] sm:$0xff]  ;;  %v23734_v19 = vld [vmem:[#allocation24_spill] sm:$0xff] }
 0x403   : > { %14937 = vmatprep.subr.bf16.mxu1 %v18618_v12  ;;  %v18645_v40 = vpack.c.bf16 %v5029_v0, %v5027_v27  ;;  %v18687_v11 = vpack.c.bf16 %v5044_v25, %v5042_v42  ;;  %v23721_v27 = vld [vmem:[#allocation20_spill] sm:$0xff]  ;;  %v5059_v59 = vsel %vm2020_vm3, %v5056_v39, %v5058_v9  ;;  %v18709_v30 = vpack.c.bf16 %v5054_v60, %v5052_v52  ;;  %v23728_v9 = vld [vmem:[#allocation21_spill] sm:$0xff] }
 0x404   : > { %v5055_v0 = vrot.slane %v23721_v27, 2  ;;  %v5065_v41 = vrot.slane %v23726_v33, 2  ;;  %v5062_v46 = vsel %vm2020_vm3, %v5060_v36, %v5061_v49  ;;  %v5064_v23 = vsel %vm2020_vm3, %v5061_v49, %v5063_v4  ;;  %v23736_v36 = vld [vmem:[#allocation32_spill] sm:$0xff]  ;;  %v23737_v33 = vld [vmem:[#allocation27_spill] sm:$0xff] }
 0x405   : > { %14842 = vmatmul.mubr.msk.bf16.gmra.mxu0 %vm764_vm0, %v18281_v26  ;;  %v5069_v56 = vsel %vm2020_vm3, %v5066_v8, %v5068_v31  ;;  %v18731_v38 = vpack.c.bf16 %v5064_v23, %v5062_v46  ;;  %v5071_v25 = vrot.slane %v18533_v55, 2  ;;  %v5073_v13 = vrot.slane %v18535_v62, 2  ;;  %v23732_v31 = vld [vmem:[#allocation19_spill] sm:$0xff]  ;;  %v23739_v46 = vld [vmem:[#allocation13_spill] sm:$0xff]  ;;  %v23740_v23 = vld [vmem:[#allocation16_spill] sm:$0xff] }
 0x406   : > { %14845 = vmatprep.mubr.msk.bf16.mxu0 %vm764_vm0, %v18331_v2  ;;  %v5057_v50 = vsel %vm2020_vm3, %v5055_v0, %v5056_v39  ;;  %v5067_v3 = vsel %vm2020_vm3, %v5065_v41, %v5066_v8  ;;  %v5076_v45 = vrot.slane %v18522_v47, 2  ;;  %v5078_v20 = vrot.slane %v18524_v34, 2  ;;  %v4373_v0 = vld [vmem:[#allocation2 + $0x188] sm:$0xff]  ;;  %v23738_v41 = vld [vmem:[#allocation10_spill] sm:$0xff] }
 0x407   : > { %v18711_v24 = vpack.c.bf16 %v5059_v59, %v5057_v50  ;;  %v18733_v42 = vpack.c.bf16 %v5069_v56, %v5067_v3  ;;  %v5070_v39 = vrot.slane %v23727_v22, 2  ;;  %v5075_v53 = vrot.slane %v23728_v9, 2  ;;  %v4372_v50 = vld [vmem:[#allocation2 + $0x180] sm:$0xff]  ;;  %v23741_v3 = vld [vmem:[#allocation28_spill] sm:$0xff]  ;;  %v4374_v56 = vld [vmem:[#allocation2 + $0x190] sm:$0x3] }
 0x408   : > { %v5074_v55 = vsel %vm2020_vm3, %v5071_v25, %v5073_v13  ;;  %v5079_v47 = vsel %vm2020_vm3, %v5076_v45, %v5078_v20  ;;  %v5081_v52 = vrot.slane %v18568_v16, 2  ;;  %v5083_v60 = vrot.slane %v18570_v14, 2  ;;  %v23729_v59 = vld [vmem:[#allocation43_spill] sm:$0xff]  ;;  %v23730_v14 = vld [vmem:[#allocation17_spill] sm:$0xff] }
 0x409   : > { %14808 = vmatmul.mubr.msk.bf16.gmra.mxu1 %vm764_vm0, %v18643_v29  ;;  %v5072_v61 = vsel %vm2020_vm3, %v5070_v39, %v5071_v25  ;;  %v5077_v62 = vsel %vm2020_vm3, %v5075_v53, %v5076_v45  ;;  %v5080_v49 = vrot.slane %v23729_v59, 2  ;;  %v18764_v4 = vpack.c.bf16 %v4373_v0, %v4372_v50  ;;  %v23742_v25 = vld [vmem:[#allocation26_spill] sm:$0xff] }
 0x40a   : > { %14811 = vmatprep.mubr.msk.bf16.mxu1 %vm764_vm0, %v18645_v40  ;;  %v18753_v34 = vpack.c.bf16 %v5074_v55, %v5072_v61  ;;  %v18755_v27 = vpack.c.bf16 %v5079_v47, %v5077_v62  ;;  %v5084_v8 = vsel %vm2020_vm3, %v5081_v52, %v5083_v60  ;;  %v5806_v13 = vrot.slane %v4373_v0, 2  ;;  %v23743_v61 = vld [vmem:[#allocation44_spill] sm:$0xff]  ;;  %v18850_v60 = vld [vmem:[#allocation2 + $0x198] sm:$0xff] }
 0x40b   : > { %v5082_v51 = vsel %vm2020_vm3, %v5080_v49, %v5081_v52  ;;  %v5808_v45 = vrot.slane %v4374_v56, 2  ;;  %v5805_v20 = vrot.slane %v4372_v50, 2  ;;  %v5593_v9 = vrot.slane %v4373_v0, 1  ;;  %v18852_v0 = vld [vmem:[#allocation2 + $0x1a0] sm:$0xff] }
 0x40c   : > { %v18772_v16 = vpack.c.bf16 %v5084_v8, %v5082_v51  ;;  %v5595_v53 = vrot.slane %v4374_v56, 1  ;;  %v5592_v55 = vrot.slane %v4372_v50, 1  ;;  %v6440_v59 = vrot.slane %v18850_v60, 2  ;;  %v18862_v51 = vld [vmem:[#allocation2 + $0x1a8] sm:$0x3] }
 0x40d   : > { %14846 = vmatmul.mubr.msk.bf16.gmra.mxu0 %vm764_vm0, %v18335_v1  ;;  %v5807_v22 = vsel %vm2020_vm3, %v5805_v20, %v5806_v13  ;;  %v5809_v39 = vsel %vm2020_vm3, %v5806_v13, %v5808_v45  ;;  %v6441_v50 = vrot.slane %v18852_v0, 2 }
 0x40e   : > { %14849 = vmatprep.mubr.msk.bf16.mxu0 %vm764_vm0, %v18385_v6  ;;  %v18844_v62 = vpack.c.bf16 %v5809_v39, %v5807_v22  ;;  %v5594_v47 = vsel %vm1458_vm2, %v5592_v55, %v5593_v9  ;;  %v5596_v52 = vsel %vm1458_vm2, %v5593_v9, %v5595_v53 }
 0x40f   : > { %v18858_v49 = vpack.c.bf16 %v5596_v52, %v5594_v47  ;;  %v18867_v8 = vsel %vm2020_vm3, %v6440_v59, %v6441_v50 }
 0x411   : > { %14812 = vmatmul.mubr.msk.bf16.gmra.mxu1 %vm764_vm0, %v18665_v18 }
 0x412   : > { %14815 = vmatprep.mubr.msk.bf16.mxu1 %vm764_vm0, %v18667_v35 }
 0x415   : > { %14850 = vmatmul.mubr.msk.bf16.gmra.mxu0 %vm764_vm0, %v18389_v7 }
 0x416   : > { %14853 = vmatprep.mubr.msk.bf16.mxu0 %vm764_vm0, %v18439_v43 }
 0x419   : > { %14816 = vmatmul.mubr.msk.bf16.gmra.mxu1 %vm764_vm0, %v18687_v11 }
 0x41a   : > { %14819 = vmatprep.mubr.msk.bf16.mxu1 %vm764_vm0, %v18689_v58 }
 0x41d   : > { %14854 = vmatmul.mubr.msk.bf16.gmra.mxu0 %vm764_vm0, %v23722_v32 }
 0x41e   : > { %14857 = vmatprep.mubr.msk.bf16.mxu0 %vm764_vm0, %v18493_v5 }
 0x421   : > { %14820 = vmatmul.mubr.msk.bf16.gmra.mxu1 %vm764_vm0, %v18709_v30 }
 0x422   : > { %14823 = vmatprep.mubr.msk.bf16.mxu1 %vm764_vm0, %v18711_v24 }
 0x425   : > { %14858 = vmatmul.mubr.msk.bf16.gmra.mxu0 %vm764_vm0, %v18497_v28 }
 0x426   : > { %14861 = vmatprep.mubr.msk.bf16.mxu0 %vm764_vm0, %v18541_v54 }
 0x429   : > { %14824 = vmatmul.mubr.msk.bf16.gmra.mxu1 %vm764_vm0, %v18731_v38 }
 0x42a   : > { %14827 = vmatprep.mubr.msk.bf16.mxu1 %vm764_vm0, %v18733_v42 }
 0x42d   : > { %14862 = vmatmul.mubr.msk.bf16.gmra.mxu0 %vm764_vm0, %v18548_v48 }
 0x42e   : > { %14865 = vmatprep.mubr.msk.bf16.mxu0 %vm764_vm0, %v18574_v15 }
 0x431   : > { %14828 = vmatmul.mubr.msk.bf16.gmra.mxu1 %vm764_vm0, %v18753_v34 }
 0x432   : > { %14831 = vmatprep.mubr.msk.bf16.mxu1 %vm764_vm0, %v18755_v27 }
 0x435   : > { %14866 = vmatmul.mubr.msk.bf16.gmra.mxu0 %vm764_vm0, %v18764_v4 }
 0x436   : > { %14905 = vmatprep.mubr.msk.bf16.mxu0 %vm764_vm0, %v18613_v63  ;;  %v18786_v63 = vld [vmem:[%s23688_s12 + $0x40] sm:$0xff]  }
 0x439   : > { %14832 = vmatmul.mubr.msk.bf16.gmra.mxu1 %vm764_vm0, %v18772_v16 }
 0x43a   : > { %14871 = vmatprep.mubr.msk.bf16.mxu1 %vm764_vm0, %v23730_v14  ;;  %v6443_v14 = vrot.slane %v18862_v51, 2 }
 0x43d   : > { %14906 = vmatmul.mubr.msk.bf16.vlgmr.msra.gmra.mxu0 %vm764_vm0, %v18621_v57 }
 0x43e   : > { %14909 = vmatprep.mubr.msk.bf16.mxu0 %vm764_vm0, %v18643_v29  ;;  %14972 = vmatpush3.bf16.msra.mxu0 %v18602_v44  ;;  %v23733_v44 = vld [vmem:[#allocation22_spill] sm:$0xff] }
 0x441   : > { %14872 = vmatmul.mubr.msk.bf16.vlgmr.msra.gmra.mxu1 %vm764_vm0, %v23731_v37 }
 0x442   : > { %14938 = vmatpush3.bf16.msra.mxu1 %v18618_v12  ;;  %14875 = vmatprep.mubr.msk.bf16.mxu1 %vm764_vm0, %v23732_v31  ;;  %v23735_v12 = vld [vmem:[#allocation25_spill] sm:$0xff] }
 0x443   : > { %15005 = vmatprep.subr.bf16.mxu1 %v18786_v63 }
 0x445   : > { %14910 = vmatmul.mubr.msk.bf16.gmra.mxu0 %vm764_vm0, %v18645_v40 }
 0x446   : > { %14913 = vmatprep.mubr.msk.bf16.mxu0 %vm764_vm0, %v18665_v18 }
 0x449   : > { %14876 = vmatmul.mubr.msk.bf16.gmra.mxu1 %vm764_vm0, %v23733_v44 }
 0x44a   : > { %14879 = vmatprep.mubr.msk.bf16.mxu1 %vm764_vm0, %v23734_v19 }
 0x44d   : > { %14914 = vmatmul.mubr.msk.bf16.gmra.mxu0 %vm764_vm0, %v18667_v35 }
 0x44e   : > { %14917 = vmatprep.mubr.msk.bf16.mxu0 %vm764_vm0, %v18687_v11 }
 0x451   : > { %14880 = vmatmul.mubr.msk.bf16.gmra.mxu1 %vm764_vm0, %v23735_v12 }
 0x452   : > { %14883 = vmatprep.mubr.msk.bf16.mxu1 %vm764_vm0, %v23736_v36 }
 0x455   : > { %14918 = vmatmul.mubr.msk.bf16.gmra.mxu0 %vm764_vm0, %v18689_v58 }
 0x456   : > { %14921 = vmatprep.mubr.msk.bf16.mxu0 %vm764_vm0, %v18709_v30 }
 0x459   : > { %14884 = vmatmul.mubr.msk.bf16.gmra.mxu1 %vm764_vm0, %v23737_v33 }
 0x45a   : > { %14887 = vmatprep.mubr.msk.bf16.mxu1 %vm764_vm0, %v23738_v41 }
 0x45d   : > { %14922 = vmatmul.mubr.msk.bf16.gmra.mxu0 %vm764_vm0, %v18711_v24 }
 0x45e   : > { %14925 = vmatprep.mubr.msk.bf16.mxu0 %vm764_vm0, %v18731_v38 }
 0x461   : > { %14888 = vmatmul.mubr.msk.bf16.gmra.mxu1 %vm764_vm0, %v23739_v46 }
 0x462   : > { %14891 = vmatprep.mubr.msk.bf16.mxu1 %vm764_vm0, %v23740_v23 }
 0x465   : > { %14926 = vmatmul.mubr.msk.bf16.gmra.mxu0 %vm764_vm0, %v18733_v42 }
 0x466   : > { %14929 = vmatprep.mubr.msk.bf16.mxu0 %vm764_vm0, %v18753_v34 }
 0x469   : > { %14892 = vmatmul.mubr.msk.bf16.gmra.mxu1 %vm764_vm0, %v23741_v3 }
 0x46a   : > { %14895 = vmatprep.mubr.msk.bf16.mxu1 %vm764_vm0, %v23742_v25 }
 0x46d   : > { %14930 = vmatmul.mubr.msk.bf16.gmra.mxu0 %vm764_vm0, %v18755_v27 }
 0x46e   : > { %14933 = vmatprep.mubr.msk.bf16.mxu0 %vm764_vm0, %v18772_v16 }
 0x471   : > { %14896 = vmatmul.mubr.msk.bf16.gmra.mxu1 %vm764_vm0, %v23743_v61 }
 0x472   : > { %14899 = vmatprep.mubr.msk.bf16.mxu1 %vm764_vm0, %v18585_v21 }
 0x475   : > { %14934 = vmatmul.mubr.msk.bf16.gmra.mxu0 %vm764_vm0, %v18844_v62 }
 0x476   : > { %14973 = vmatprep.mubr.msk.bf16.mxu0 %vm764_vm0, %v23731_v37  ;;  %v18871_v37 = vsel %vm2020_vm3, %v6441_v50, %v6443_v14 }
 0x479   : > { %14900 = vmatmul.mubr.msk.bf16.gmra.mxu1 %vm764_vm0, %v18858_v49 }
 0x47a   : > { %14939 = vmatprep.mubr.msk.bf16.mxu1 %vm764_vm0, %v18218_v10 }
 0x47d   : > { %v14771_v56 = vpop.f32.mrf.mxu0  ;;  %14974 = vmatmul.mubr.msk.bf16.vlgmr.msra.gmra.mxu0 %vm764_vm0, %v23732_v31 }
 0x47e   : > { %14977 = vmatprep.mubr.msk.bf16.mxu0 %vm764_vm0, %v23733_v44 }
 0x47f   : > { %v4878_v45 = vpop.f32.mrf.mxu0 }
 0x481   : > { %v14737_v10 = vpop.f32.mrf.mxu1  ;;  %14940 = vmatmul.mubr.msk.bf16.vlgmr.msra.gmra.mxu1 %vm764_vm0, %v18276_v17  ;;  %v14772_v20 = vpop.f32.mrf.mxu0 }
 0x482   : > { %v18881_v22 = vadd.f32 %v14771_v56, %v14737_v10  ;;  %15006 = vmatpush3.bf16.msra.mxu1 %v18786_v63  ;;  %14943 = vmatprep.mubr.msk.bf16.mxu1 %vm764_vm0, %v18281_v26 }
 0x483   : > { %v4663_v31 = vpop.f32.mrf.mxu1  ;;  %v4881_v39 = vpop.f32.mrf.mxu0 }
 0x484   : > { %v18886_v9 = vadd.f32 %v4878_v45, %v4663_v31 }
 0x485   : > { %v14738_v53 = vpop.f32.mrf.mxu1  ;;  %v14775_v55 = vpop.f32.mrf.mxu0  ;;  %14978 = vmatmul.mubr.msk.bf16.gmra.mxu0 %vm764_vm0, %v23734_v19 }
 0x486   : > { %v18890_v44 = vadd.f32 %v14772_v20, %v14738_v53  ;;  %14981 = vmatprep.mubr.msk.bf16.mxu0 %vm764_vm0, %v23735_v12 }
 0x487   : > { %v4666_v17 = vpop.f32.mrf.mxu1  ;;  %v4894_v47 = vpop.f32.mrf.mxu0 }
 0x488   : > { %v18894_v63 = vadd.f32 %v4881_v39, %v4666_v17 }
 0x489   : > { %v14741_v52 = vpop.f32.mrf.mxu1  ;;  %14944 = vmatmul.mubr.msk.bf16.gmra.mxu1 %vm764_vm0, %v18331_v2  ;;  %v14776_v26 = vpop.f32.mrf.mxu0 }
 0x48a   : > { %v18898_v59 = vadd.f32 %v14775_v55, %v14741_v52  ;;  %14947 = vmatprep.mubr.msk.bf16.mxu1 %vm764_vm0, %v18335_v1 }
 0x48b   : > { %v4679_v19 = vpop.f32.mrf.mxu1  ;;  %v4897_v50 = vpop.f32.mrf.mxu0 }
 0x48c   : > { %v18902_v14 = vadd.f32 %v4894_v47, %v4679_v19 }
 0x48d   : > { %v14742_v56 = vpop.f32.mrf.mxu1  ;;  %v14779_v12 = vpop.f32.mrf.mxu0  ;;  %14982 = vmatmul.mubr.msk.bf16.gmra.mxu0 %vm764_vm0, %v23736_v36 }
 0x48e   : > { %v18906_v45 = vadd.f32 %v14776_v26, %v14742_v56  ;;  %14985 = vmatprep.mubr.msk.bf16.mxu0 %vm764_vm0, %v23737_v33 }
 0x48f   : > { %v4682_v2 = vpop.f32.mrf.mxu1  ;;  %v4910_v10 = vpop.f32.mrf.mxu0 }
 0x490   : > { %v18910_v20 = vadd.f32 %v4897_v50, %v4682_v2 }
 0x491   : > { %v14745_v31 = vpop.f32.mrf.mxu1  ;;  %14948 = vmatmul.mubr.msk.bf16.gmra.mxu1 %vm764_vm0, %v18385_v6  ;;  %v14780_v1 = vpop.f32.mrf.mxu0 }
 0x492   : > { %v18914_v39 = vadd.f32 %v14779_v12, %v14745_v31  ;;  %14951 = vmatprep.mubr.msk.bf16.mxu1 %vm764_vm0, %v18389_v7 }
 0x493   : > { %v4695_v36 = vpop.f32.mrf.mxu1  ;;  %v4913_v53 = vpop.f32.mrf.mxu0 }
 0x494   : > { %v18918_v55 = vadd.f32 %v4910_v10, %v4695_v36 }
 0x495   : > { %v14746_v17 = vpop.f32.mrf.mxu1  ;;  %v14783_v33 = vpop.f32.mrf.mxu0  ;;  %14986 = vmatmul.mubr.msk.bf16.gmra.mxu0 %vm764_vm0, %v23738_v41 }
 0x496   : > { %v18922_v47 = vadd.f32 %v14780_v1, %v14746_v17  ;;  %14989 = vmatprep.mubr.msk.bf16.mxu0 %vm764_vm0, %v23739_v46 }
 0x497   : > { %v4698_v6 = vpop.f32.mrf.mxu1  ;;  %v4926_v52 = vpop.f32.mrf.mxu0 }
 0x498   : > { %v18926_v26 = vadd.f32 %v4913_v53, %v4698_v6 }
 0x499   : > { %v14749_v19 = vpop.f32.mrf.mxu1  ;;  %14952 = vmatmul.mubr.msk.bf16.gmra.mxu1 %vm764_vm0, %v18439_v43  ;;  %v14784_v7 = vpop.f32.mrf.mxu0 }
 0x49a   : > { %v18930_v50 = vadd.f32 %v14783_v33, %v14749_v19  ;;  %14955 = vmatprep.mubr.msk.bf16.mxu1 %vm764_vm0, %v23722_v32 }
 0x49b   : > { %v4711_v41 = vpop.f32.mrf.mxu1  ;;  %v4929_v56 = vpop.f32.mrf.mxu0 }
 0x49c   : > { %v18934_v12 = vadd.f32 %v4926_v52, %v4711_v41 }
 0x49d   : > { %v14750_v2 = vpop.f32.mrf.mxu1  ;;  %v14787_v46 = vpop.f32.mrf.mxu0  ;;  %14990 = vmatmul.mubr.msk.bf16.gmra.mxu0 %vm764_vm0, %v23740_v23 }
 0x49e   : > { %v18938_v10 = vadd.f32 %v14784_v7, %v14750_v2  ;;  %14993 = vmatprep.mubr.msk.bf16.mxu0 %vm764_vm0, %v23741_v3  ;;  %v6230_v2 = vrot.slane %v18862_v51, 1 }
 0x49f   : > { %v4714_v43 = vpop.f32.mrf.mxu1  ;;  %v4942_v31 = vpop.f32.mrf.mxu0 }
 0x4a0   : > { %v18942_v1 = vadd.f32 %v4929_v56, %v4714_v43  ;;  %v6228_v56 = vrot.slane %v18852_v0, 1 }
 0x4a1   : > { %v14753_v36 = vpop.f32.mrf.mxu1  ;;  %14956 = vmatmul.mubr.msk.bf16.gmra.mxu1 %vm764_vm0, %v18493_v5  ;;  %v14788_v32 = vpop.f32.mrf.mxu0 }
 0x4a2   : > { %v18946_v53 = vadd.f32 %v14787_v46, %v14753_v36  ;;  %14959 = vmatprep.mubr.msk.bf16.mxu1 %vm764_vm0, %v18497_v28 }
 0x4a3   : > { %v4727_v23 = vpop.f32.mrf.mxu1  ;;  %v18950_v17 = vpop.f32.mrf.mxu0 }
 0x4a4   : > { %v18952_v33 = vadd.f32 %v4942_v31, %v4727_v23 }
 0x4a5   : > { %v14754_v3 = vpop.f32.mrf.mxu1  ;;  %v14791_v6 = vpop.f32.mrf.mxu0  ;;  %14994 = vmatmul.mubr.msk.bf16.gmra.mxu0 %vm764_vm0, %v23742_v25  ;;  %v6227_v25 = vrot.slane %v18850_v60, 1 }
 0x4a6   : > { %v18956_v52 = vadd.f32 %v14788_v32, %v14754_v3  ;;  %14997 = vmatprep.mubr.msk.bf16.mxu0 %vm764_vm0, %v23743_v61  ;;  %v6231_v32 = vsel %vm1458_vm2, %v6228_v56, %v6230_v2  ;;  %v6018_v2 = vpack.c.bf16 %v18852_v0, %v18850_v60 }
 0x4a7   : > { %v18960_v5 = vpop.f32.mrf.mxu1  ;;  %v4958_v19 = vpop.f32.mrf.mxu0 }
 0x4a9   : > { %v14757_v7 = vpop.f32.mrf.mxu1  ;;  %14960 = vmatmul.mubr.msk.bf16.gmra.mxu1 %vm764_vm0, %v18541_v54  ;;  %v14792_v28 = vpop.f32.mrf.mxu0 }
 0x4aa   : > { %v18964_v41 = vadd.f32 %v14791_v6, %v14757_v7  ;;  %14963 = vmatprep.mubr.msk.bf16.mxu1 %vm764_vm0, %v18548_v48  ;;  %v6229_v48 = vsel %vm1458_vm2, %v6227_v25, %v6228_v56 }
 0x4ab   : > { %v4743_v61 = vpop.f32.mrf.mxu1  ;;  %v18971_v46 = vpop.f32.mrf.mxu0 }
 0x4ac   : > { %v18973_v43 = vadd.f32 %v4958_v19, %v4743_v61  ;;  %v6234_v19 = vpack.c.bf16 %v6231_v32, %v6229_v48 }
 0x4ad   : > { %v14758_v31 = vpop.f32.mrf.mxu1  ;;  %v14795_v36 = vpop.f32.mrf.mxu0  ;;  %14998 = vmatmul.mubr.msk.bf16.gmra.mxu0 %vm764_vm0, %v18585_v21 }
 0x4ae   : > { %v18977_v54 = vadd.f32 %v14792_v28, %v14758_v31  ;;  %15001 = vmatprep.mubr.msk.bf16.mxu0 %vm764_vm0, %v18858_v49 }
 0x4af   : > { %v18983_v51 = vpop.f32.mrf.mxu1  ;;  %v4974_v23 = vpop.f32.mrf.mxu0 }
 0x4b1   : > { %v14761_v3 = vpop.f32.mrf.mxu1  ;;  %14964 = vmatmul.mubr.msk.bf16.gmra.mxu1 %vm764_vm0, %v18574_v15  ;;  %v14796_v6 = vpop.f32.mrf.mxu0 }
 0x4b2   : > { %v18987_v7 = vadd.f32 %v14795_v36, %v14761_v3  ;;  %14967 = vmatprep.mubr.msk.bf16.mxu1 %vm764_vm0, %v18764_v4 }
 0x4b3   : > { %v4759_v21 = vpop.f32.mrf.mxu1  ;;  %v18991_v49 = vpop.f32.mrf.mxu0 }
 0x4b4   : > { %v18993_v28 = vadd.f32 %v4974_v23, %v4759_v21 }
 0x4b5   : > { %v14762_v25 = vpop.f32.mrf.mxu1  ;;  %v14799_v56 = vpop.f32.mrf.mxu0  ;;  %15002 = vmatmul.mubr.msk.bf16.gmra.mxu0 %vm764_vm0, %v6234_v19 }
 0x4b6   : > { %v18998_v15 = vadd.f32 %v14796_v6, %v14762_v25 }
 0x4b7   : > { %v19000_v61 = vpop.f32.mrf.mxu1  ;;  %v4990_v31 = vpop.f32.mrf.mxu0 }
 0x4b9   : > { %v14765_v36 = vpop.f32.mrf.mxu1  ;;  %14968 = vmatmul.mubr.msk.bf16.gmra.mxu1 %vm764_vm0, %v6018_v2  ;;  %v14800_v4 = vpop.f32.mrf.mxu0 }
 0x4ba   : > { %v19003_v48 = vadd.f32 %v14799_v56, %v14765_v36  ;;  %15007 = vmatprep.mubr.msk.bf16.mxu1 %vm764_vm0, %v18621_v57 }
 0x4bb   : > { %v4775_v32 = vpop.f32.mrf.mxu1  ;;  %v19007_v23 = vpop.f32.mrf.mxu0 }
 0x4bc   : > { %23744 = vst [vmem:[#allocation46_spill] sm:$0xff] %v19007_v23  ;;  %v19009_v60 = vadd.f32 %v4990_v31, %v4775_v32 }
 0x4bd   : > { %v14766_v0 = vpop.f32.mrf.mxu1  ;;  %v14839_v3 = vpop.f32.mrf.mxu0 }
 0x4be   : > { %v19011_v6 = vadd.f32 %v14800_v4, %v14766_v0 }
 0x4bf   : > { %v19013_v19 = vpop.f32.mrf.mxu1  ;;  %v5430_v21 = vpop.f32.mrf.mxu0 }
 0x4c0   : > { %23745 = vst [vmem:[#allocation36_spill] sm:$0xff] %v19013_v19 }
 0x4c1   : > { %v14805_v25 = vpop.f32.mrf.mxu1  ;;  %15008 = vmatmul.mubr.msk.bf16.vlgmr.msra.gmra.mxu1 %vm764_vm0, %v18643_v29  ;;  %v14840_v56 = vpop.f32.mrf.mxu0 }
 0x4c2   : > { %v5353_v2 = vadd.f32 %v14805_v25, %v18881_v22  ;;  %15011 = vmatprep.mubr.msk.bf16.mxu1 %vm764_vm0, %v18645_v40 }
 0x4c3   : > { %v5224_v57 = vpop.f32.mrf.mxu1  ;;  %v19020_v31 = vpop.f32.mrf.mxu0 }
 0x4c4   : > { %v5351_v36 = vadd.f32 %v5224_v57, %v18886_v9  ;;  %v19023_v4 = vadd.f32 %v14839_v3, %v5353_v2 }
 0x4c5   : > { %v14806_v32 = vpop.f32.mrf.mxu1  ;;  %v14843_v0 = vpop.f32.mrf.mxu0 }
 0x4c6   : > { %v5354_v13 = vadd.f32 %v14806_v32, %v18890_v44  ;;  %v19026_v23 = vadd.f32 %v5430_v21, %v5351_v36 }
 0x4c7   : > { %v5227_v29 = vpop.f32.mrf.mxu1  ;;  %v5446_v19 = vpop.f32.mrf.mxu0 }
 0x4c8   : > { %v19029_v22 = vadd.f32 %v5227_v29, %v18894_v63  ;;  %v19031_v25 = vadd.f32 %v14840_v56, %v5354_v13 }
 0x4c9   : > { %v14809_v40 = vpop.f32.mrf.mxu1  ;;  %15012 = vmatmul.mubr.msk.bf16.gmra.mxu1 %vm764_vm0, %v18665_v18  ;;  %v14844_v9 = vpop.f32.mrf.mxu0 }
 0x4ca   : > { %v5357_v3 = vadd.f32 %v14809_v40, %v18898_v59  ;;  %15015 = vmatprep.mubr.msk.bf16.mxu1 %vm764_vm0, %v18667_v35 }
 0x4cb   : > { %v5240_v44 = vpop.f32.mrf.mxu1  ;;  %v19038_v21 = vpop.f32.mrf.mxu0 }
 0x4cc   : > { %v5355_v2 = vadd.f32 %v5240_v44, %v18902_v14  ;;  %v19041_v57 = vadd.f32 %v14843_v0, %v5357_v3 }
 0x4cd   : > { %v14810_v63 = vpop.f32.mrf.mxu1  ;;  %v14847_v13 = vpop.f32.mrf.mxu0 }
 0x4ce   : > { %v5358_v56 = vadd.f32 %v14810_v63, %v18906_v45  ;;  %v19044_v36 = vadd.f32 %v5446_v19, %v5355_v2 }
 0x4cf   : > { %v5243_v18 = vpop.f32.mrf.mxu1  ;;  %v5462_v32 = vpop.f32.mrf.mxu0 }
 0x4d0   : > { %v19047_v59 = vadd.f32 %v5243_v18, %v18910_v20  ;;  %v19049_v29 = vadd.f32 %v14844_v9, %v5358_v56  ;;  %v15790_v20 = vld [vmem:[%s23298_s15 + $0x8] sm:$0xff]  }
 0x4d1   : > { %v14813_v35 = vpop.f32.mrf.mxu1  ;;  %15016 = vmatmul.mubr.msk.bf16.gmra.mxu1 %vm764_vm0, %v18687_v11  ;;  %v14848_v14 = vpop.f32.mrf.mxu0  ;;  %15039 = vmatprep.subr.bf16.mxu0 %v15790_v20 }
 0x4d2   : > { %v5361_v0 = vadd.f32 %v14813_v35, %v18914_v39  ;;  %15019 = vmatprep.mubr.msk.bf16.mxu1 %vm764_vm0, %v18689_v58  ;;  %15040 = vmatpush3.bf16.msra.mxu0 %v15790_v20 }
 0x4d3   : > { %v5256_v45 = vpop.f32.mrf.mxu1  ;;  %v19056_v19 = vpop.f32.mrf.mxu0 }
 0x4d4   : > { %v5359_v40 = vadd.f32 %v5256_v45, %v18918_v55  ;;  %v19059_v3 = vadd.f32 %v14847_v13, %v5361_v0 }
 0x4d5   : > { %v14814_v9 = vpop.f32.mrf.mxu1  ;;  %v14851_v44 = vpop.f32.mrf.mxu0 }
 0x4d6   : > { %v5362_v11 = vadd.f32 %v14814_v9, %v18922_v47  ;;  %v19065_v2 = vadd.f32 %v5462_v32, %v5359_v40 }
 0x4d7   : > { %v5259_v39 = vpop.f32.mrf.mxu1  ;;  %v5478_v58 = vpop.f32.mrf.mxu0 }
 0x4d8   : > { %v19068_v63 = vadd.f32 %v5259_v39, %v18926_v26  ;;  %v19070_v55 = vadd.f32 %v14848_v14, %v5362_v11 }
 0x4d9   : > { %v14817_v13 = vpop.f32.mrf.mxu1  ;;  %15020 = vmatmul.mubr.msk.bf16.gmra.mxu1 %vm764_vm0, %v18709_v30  ;;  %v14852_v56 = vpop.f32.mrf.mxu0 }
 0x4da   : > { %v5365_v18 = vadd.f32 %v14817_v13, %v18930_v50  ;;  %15023 = vmatprep.mubr.msk.bf16.mxu1 %vm764_vm0, %v18711_v24 }
 0x4db   : > { %v5272_v47 = vpop.f32.mrf.mxu1  ;;  %v19077_v32 = vpop.f32.mrf.mxu0 }
 0x4dc   : > { %v5363_v35 = vadd.f32 %v5272_v47, %v18934_v12  ;;  %v19080_v0 = vadd.f32 %v14851_v44, %v5365_v18 }
 0x4dd   : > { %v14818_v26 = vpop.f32.mrf.mxu1  ;;  %v14855_v14 = vpop.f32.mrf.mxu0 }
 0x4de   : > { %v5366_v45 = vadd.f32 %v14818_v26, %v18938_v10  ;;  %v19083_v40 = vadd.f32 %v5478_v58, %v5363_v35 }
 0x4df   : > { %v5275_v30 = vpop.f32.mrf.mxu1  ;;  %v5494_v20 = vpop.f32.mrf.mxu0 }
 0x4e0   : > { %v19086_v50 = vadd.f32 %v5275_v30, %v18942_v1  ;;  %v19088_v9 = vadd.f32 %v14852_v56, %v5366_v45 }
 0x4e1   : > { %v14821_v24 = vpop.f32.mrf.mxu1  ;;  %15024 = vmatmul.mubr.msk.bf16.gmra.mxu1 %vm764_vm0, %v18731_v38  ;;  %v14856_v12 = vpop.f32.mrf.mxu0 }
 0x4e2   : > { %v5369_v44 = vadd.f32 %v14821_v24, %v18946_v53  ;;  %15027 = vmatprep.mubr.msk.bf16.mxu1 %vm764_vm0, %v18733_v42 }
 0x4e3   : > { %v5288_v10 = vpop.f32.mrf.mxu1  ;;  %v19095_v11 = vpop.f32.mrf.mxu0 }
 0x4e4   : > { %v5367_v39 = vadd.f32 %v5288_v10, %v18952_v33  ;;  %v19098_v58 = vadd.f32 %v14855_v14, %v5369_v44 }
 0x4e5   : > { %v14822_v1 = vpop.f32.mrf.mxu1  ;;  %v14859_v13 = vpop.f32.mrf.mxu0 }
 0x4e6   : > { %v5370_v56 = vadd.f32 %v14822_v1, %v18956_v52  ;;  %v19101_v18 = vadd.f32 %v5494_v20, %v5367_v39 }
 0x4e7   : > { %v19103_v38 = vpop.f32.mrf.mxu1  ;;  %v5510_v47 = vpop.f32.mrf.mxu0 }
 0x4e8   : > { %v19105_v53 = vadd.f32 %v14856_v12, %v5370_v56  ;;  %v15791_v56 = vld [vmem:[%s23298_s15] sm:$0xff]  }
 0x4e9   : > { %v14825_v35 = vpop.f32.mrf.mxu1  ;;  %15028 = vmatmul.mubr.msk.bf16.gmra.mxu1 %vm764_vm0, %v18753_v34  ;;  %v14860_v42 = vpop.f32.mrf.mxu0  ;;  %15041 = vmatprep.subr.bf16.mxu0 %v15791_v56 }
 0x4ea   : > { %v5373_v33 = vadd.f32 %v14825_v35, %v18964_v41  ;;  %15031 = vmatprep.mubr.msk.bf16.mxu1 %vm764_vm0, %v18755_v27  ;;  %15042 = vmatpush3.bf16.msra.mxu0 %v15791_v56 }
 0x4eb   : > { %v5304_v26 = vpop.f32.mrf.mxu1  ;;  %v19112_v14 = vpop.f32.mrf.mxu0 }
 0x4ec   : > { %v5371_v52 = vadd.f32 %v5304_v26, %v18973_v43  ;;  %v19115_v45 = vadd.f32 %v14859_v13, %v5373_v33  ;;  %v23746_v26 = vpack.c.bf16 %v18871_v37, %v18867_v8 }
 0x4ed   : > { %v14826_v30 = vpop.f32.mrf.mxu1  ;;  %v14863_v20 = vpop.f32.mrf.mxu0 }
 0x4ee   : > { %v5374_v24 = vadd.f32 %v14826_v30, %v18977_v54  ;;  %v19118_v12 = vadd.f32 %v5510_v47, %v5371_v52 }
 0x4ef   : > { %v19120_v34 = vpop.f32.mrf.mxu1  ;;  %v5526_v44 = vpop.f32.mrf.mxu0 }
 0x4f0   : > { %v19122_v41 = vadd.f32 %v14860_v42, %v5374_v24 }
 0x4f1   : > { %v14829_v10 = vpop.f32.mrf.mxu1  ;;  %15032 = vmatmul.mubr.msk.bf16.gmra.mxu1 %vm764_vm0, %v18772_v16  ;;  %v14864_v27 = vpop.f32.mrf.mxu0 }
 0x4f2   : > { %v5377_v43 = vadd.f32 %v14829_v10, %v18987_v7  ;;  %15035 = vmatprep.mubr.msk.bf16.mxu1 %vm764_vm0, %v18844_v62 }
 0x4f3   : > { %v5320_v39 = vpop.f32.mrf.mxu1  ;;  %v19129_v1 = vpop.f32.mrf.mxu0 }
 0x4f4   : > { %v5375_v54 = vadd.f32 %v5320_v39, %v18993_v28  ;;  %v19132_v13 = vadd.f32 %v14863_v20, %v5377_v43 }
 0x4f5   : > { %v14830_v47 = vpop.f32.mrf.mxu1  ;;  %v14867_v35 = vpop.f32.mrf.mxu0 }
 0x4f6   : > { %v5378_v16 = vadd.f32 %v14830_v47, %v18998_v15  ;;  %v19138_v42 = vadd.f32 %v5526_v44, %v5375_v54 }
 0x4f7   : > { %v19140_v7 = vpop.f32.mrf.mxu1  ;;  %v5542_v62 = vpop.f32.mrf.mxu0 }
 0x4f8   : > { %v19142_v33 = vadd.f32 %v14864_v27, %v5378_v16 }
 0x4f9   : > { %v14833_v28 = vpop.f32.mrf.mxu1  ;;  %15036 = vmatmul.mubr.msk.bf16.gmra.mxu1 %vm764_vm0, %v23746_v26  ;;  %v14868_v52 = vpop.f32.mrf.mxu0 }
 0x4fa   : > { %v5381_v30 = vadd.f32 %v14833_v28, %v19003_v48 }
 0x4fb   : > { %v5336_v20 = vpop.f32.mrf.mxu1  ;;  %v19149_v15 = vpop.f32.mrf.mxu0 }
 0x4fc   : > { %v5379_v24 = vadd.f32 %v5336_v20, %v19009_v60  ;;  %v19152_v44 = vadd.f32 %v14867_v35, %v5381_v30 }
 0x4fd   : > { %v14834_v10 = vpop.f32.mrf.mxu1  ;;  %v14907_v43 = vpop.f32.mrf.mxu0 }
 0x4fe   : > { %v5382_v27 = vadd.f32 %v14834_v10, %v19011_v6  ;;  %v19155_v39 = vadd.f32 %v5542_v62, %v5379_v24 }
 0x4ff   : > { %v19157_v54 = vpop.f32.mrf.mxu1  ;;  %v19159_v8 = vpop.f32.mrf.mxu0 }
 0x500   : > { %v19161_v37 = vadd.f32 %v14868_v52, %v5382_v27 }
 0x501   : > { %v14873_v48 = vpop.f32.mrf.mxu1  ;;  %v19163_v56 = vpop.f32.mrf.mxu0 }
 0x502   : > { %v5775_v47 = vadd.f32 %v14873_v48, %v19023_v4 }
 0x503   : > { %v5646_v60 = vpop.f32.mrf.mxu1  ;;  %v19166_v35 = vpop.f32.mrf.mxu0 }
 0x504   : > { %v19169_v16 = vadd.f32 %v5646_v60, %v19026_v23  ;;  %v19171_v6 = vadd.f32 %v14907_v43, %v5775_v47 }
 0x505   : > { %v14874_v62 = vpop.f32.mrf.mxu1  ;;  %v14911_v28 = vpop.f32.mrf.mxu0 }
 0x506   : > { %v19174_v26 = vadd.f32 %v14874_v62, %v19031_v25 }
 0x507   : > { %v19176_v52 = vpop.f32.mrf.mxu1  ;;  %v19178_v30 = vpop.f32.mrf.mxu0 }
 0x508   : > { %23747 = vst [vmem:[#allocation34_spill] sm:$0xff] %v19178_v30 }
 0x509   : > { %v14877_v20 = vpop.f32.mrf.mxu1  ;;  %v19180_v24 = vpop.f32.mrf.mxu0 }
 0x50a   : > { %23748 = vst [vmem:[#allocation30_spill] sm:$0xff] %v19180_v24  ;;  %v5779_v4 = vadd.f32 %v14877_v20, %v19041_v57 }
 0x50b   : > { %v5662_v10 = vpop.f32.mrf.mxu1  ;;  %v19183_v27 = vpop.f32.mrf.mxu0 }
 0x50c   : > { %23749 = vst [vmem:[#allocation45_spill] sm:$0xff] %v19183_v27  ;;  %v19186_v23 = vadd.f32 %v5662_v10, %v19044_v36  ;;  %v19188_v43 = vadd.f32 %v14911_v28, %v5779_v4 }
 0x50d   : > { %v14878_v48 = vpop.f32.mrf.mxu1  ;;  %v14915_v25 = vpop.f32.mrf.mxu0 }
 0x50e   : > { %v19191_v47 = vadd.f32 %v14878_v48, %v19049_v29 }
 0x50f   : > { %v19193_v60 = vpop.f32.mrf.mxu1  ;;  %v19195_v62 = vpop.f32.mrf.mxu0 }
 0x510   : > { %23750 = vst [vmem:[#allocation49_spill] sm:$0xff] %v19191_v47  ;;  %23751 = vst [vmem:[#allocation61_spill] sm:$0xff] %v19195_v62 }
 0x511   : > { %v14881_v24 = vpop.f32.mrf.mxu1  ;;  %v19197_v30 = vpop.f32.mrf.mxu0 }
 0x512   : > { %23752 = vst [vmem:[#allocation35_spill] sm:$0xff] %v19197_v30  ;;  %v5783_v57 = vadd.f32 %v14881_v24, %v19059_v3 }
 0x513   : > { %v5678_v20 = vpop.f32.mrf.mxu1  ;;  %v19200_v27 = vpop.f32.mrf.mxu0 }
 0x514   : > { %23753 = vst [vmem:[#allocation31_spill] sm:$0xff] %v19200_v27  ;;  %v19203_v36 = vadd.f32 %v5678_v20, %v19065_v2  ;;  %v19205_v28 = vadd.f32 %v14915_v25, %v5783_v57 }
 0x515   : > { %v14882_v4 = vpop.f32.mrf.mxu1  ;;  %v14919_v29 = vpop.f32.mrf.mxu0 }
 0x516   : > { %v19208_v10 = vadd.f32 %v14882_v4, %v19070_v55 }
 0x517   : > { %v19210_v48 = vpop.f32.mrf.mxu1  ;;  %v19212_v62 = vpop.f32.mrf.mxu0 }
 0x518   : > { %23754 = vst [vmem:[#allocation52_spill] sm:$0xff] %v19208_v10  ;;  %23755 = vst [vmem:[#allocation48_spill] sm:$0xff] %v19212_v62 }
 0x519   : > { %v14885_v30 = vpop.f32.mrf.mxu1  ;;  %v19214_v47 = vpop.f32.mrf.mxu0 }
 0x51a   : > { %23756 = vst [vmem:[#allocation55_spill] sm:$0xff] %v19214_v47  ;;  %v5787_v3 = vadd.f32 %v14885_v30, %v19080_v0 }
 0x51b   : > { %v5694_v24 = vpop.f32.mrf.mxu1  ;;  %v19217_v27 = vpop.f32.mrf.mxu0 }
 0x51c   : > { %23757 = vst [vmem:[#allocation50_spill] sm:$0xff] %v19217_v27  ;;  %v19220_v2 = vadd.f32 %v5694_v24, %v19083_v40  ;;  %v19222_v25 = vadd.f32 %v14919_v29, %v5787_v3 }
 0x51d   : > { %v14886_v57 = vpop.f32.mrf.mxu1  ;;  %v14923_v55 = vpop.f32.mrf.mxu0 }
 0x51e   : > { %v19225_v20 = vadd.f32 %v14886_v57, %v19088_v9 }
 0x51f   : > { %v19227_v4 = vpop.f32.mrf.mxu1  ;;  %v19229_v62 = vpop.f32.mrf.mxu0 }
 0x520   : > { %23758 = vst [vmem:[#allocation47_spill] sm:$0xff] %v19225_v20  ;;  %23759 = vst [vmem:[#allocation58_spill] sm:$0xff] %v19229_v62 }
 0x521   : > { %v14889_v47 = vpop.f32.mrf.mxu1  ;;  %v19231_v10 = vpop.f32.mrf.mxu0 }
 0x522   : > { %23760 = vst [vmem:[#allocation33_spill] sm:$0xff] %v19231_v10  ;;  %v5791_v0 = vadd.f32 %v14889_v47, %v19098_v58 }
 0x523   : > { %v5710_v30 = vpop.f32.mrf.mxu1  ;;  %v19234_v27 = vpop.f32.mrf.mxu0 }
 0x524   : > { %23761 = vst [vmem:[#allocation51_spill] sm:$0xff] %v19234_v27  ;;  %v19237_v40 = vadd.f32 %v5710_v30, %v19101_v18  ;;  %v19239_v29 = vadd.f32 %v14923_v55, %v5791_v0 }
 0x525   : > { %v14890_v3 = vpop.f32.mrf.mxu1  ;;  %v14927_v9 = vpop.f32.mrf.mxu0 }
 0x526   : > { %v19242_v24 = vadd.f32 %v14890_v3, %v19105_v53 }
 0x527   : > { %v19244_v57 = vpop.f32.mrf.mxu1  ;;  %v19246_v62 = vpop.f32.mrf.mxu0 }
 0x528   : > { %23762 = vst [vmem:[#allocation62_spill] sm:$0xff] %v19242_v24  ;;  %23763 = vst [vmem:[#allocation70_spill] sm:$0xff] %v19246_v62 }
 0x529   : > { %v14893_v10 = vpop.f32.mrf.mxu1  ;;  %v19248_v20 = vpop.f32.mrf.mxu0 }
 0x52a   : > { %23764 = vst [vmem:[#allocation65_spill] sm:$0xff] %v19248_v20  ;;  %v5795_v58 = vadd.f32 %v14893_v10, %v19115_v45 }
 0x52b   : > { %v5726_v47 = vpop.f32.mrf.mxu1  ;;  %v19251_v27 = vpop.f32.mrf.mxu0 }
 0x52c   : > { %23765 = vst [vmem:[#allocation54_spill] sm:$0xff] %v19251_v27  ;;  %v19254_v18 = vadd.f32 %v5726_v47, %v19118_v12  ;;  %v19256_v55 = vadd.f32 %v14927_v9, %v5795_v58 }
 0x52d   : > { %v14894_v0 = vpop.f32.mrf.mxu1  ;;  %v14931_v53 = vpop.f32.mrf.mxu0 }
 0x52e   : > { %v19259_v30 = vadd.f32 %v14894_v0, %v19122_v41 }
 0x52f   : > { %v19261_v3 = vpop.f32.mrf.mxu1  ;;  %v19263_v62 = vpop.f32.mrf.mxu0 }
 0x530   : > { %23766 = vst [vmem:[#allocation68_spill] sm:$0xff] %v19259_v30  ;;  %23767 = vst [vmem:[#allocation77_spill] sm:$0xff] %v19263_v62 }
 0x531   : > { %v14897_v20 = vpop.f32.mrf.mxu1  ;;  %v19265_v24 = vpop.f32.mrf.mxu0 }
 0x532   : > { %23768 = vst [vmem:[#allocation56_spill] sm:$0xff] %v19265_v24  ;;  %v5799_v45 = vadd.f32 %v14897_v20, %v19132_v13 }
 0x533   : > { %v5742_v10 = vpop.f32.mrf.mxu1  ;;  %v19268_v27 = vpop.f32.mrf.mxu0 }
 0x534   : > { %23769 = vst [vmem:[#allocation53_spill] sm:$0xff] %v19268_v27  ;;  %v19271_v12 = vadd.f32 %v5742_v10, %v19138_v42  ;;  %v19273_v9 = vadd.f32 %v14931_v53, %v5799_v45 }
 0x535   : > { %v14898_v58 = vpop.f32.mrf.mxu1  ;;  %v14935_v41 = vpop.f32.mrf.mxu0 }
 0x536   : > { %23770 = vst [vmem:[#allocation72_spill] sm:$0xff] %v19271_v12  ;;  %v19276_v47 = vadd.f32 %v14898_v58, %v19142_v33 }
 0x537   : > { %v19278_v0 = vpop.f32.mrf.mxu1  ;;  %v19280_v62 = vpop.f32.mrf.mxu0 }
 0x538   : > { %23771 = vst [vmem:[#allocation39_spill] sm:$0xff] %v19276_v47  ;;  %23772 = vst [vmem:[#allocation37_spill] sm:$0xff] %v19278_v0 }
 0x539   : > { %23773 = vst [vmem:[#allocation57_spill] sm:$0xff] %v19280_v62  ;;  %v14901_v24 = vpop.f32.mrf.mxu1  ;;  %v19282_v30 = vpop.f32.mrf.mxu0 }
 0x53a   : > { %23774 = vst [vmem:[#allocation75_spill] sm:$0xff] %v19282_v30  ;;  %v5803_v13 = vadd.f32 %v14901_v24, %v19152_v44 }
 0x53b   : > { %v5758_v20 = vpop.f32.mrf.mxu1  ;;  %v19290_v45 = vpop.f32.mrf.mxu0 }
 0x53c   : > { %v19286_v42 = vadd.f32 %v5758_v20, %v19155_v39  ;;  %v19288_v53 = vadd.f32 %v14935_v41, %v5803_v13  ;;  %23776 = vst [vmem:[#allocation63_spill] sm:$0xff] %v19290_v45 }
 0x53d   : > { %v14902_v10 = vpop.f32.mrf.mxu1  ;;  %v19297_v62 = vpop.f32.mrf.mxu0 }
 0x53e   : > { %23775 = vst [vmem:[#allocation60_spill] sm:$0xff] %v19286_v42  ;;  %v19293_v33 = vadd.f32 %v14902_v10, %v19161_v37 }
 0x53f   : > { %v19295_v58 = vpop.f32.mrf.mxu1  ;;  %v19304_v39 = vpop.f32.mrf.mxu0 }
 0x540   : > { %23777 = vst [vmem:[#allocation59_spill] sm:$0xff] %v19293_v33  ;;  %23778 = vst [vmem:[#allocation42_spill] sm:$0xff] %v19295_v58 }
 0x541   : > { %v14941_v27 = vpop.f32.mrf.mxu1  ;;  %v19310_v13 = vpop.f32.mrf.mxu0 }
 0x542   : > { %v19300_v30 = vadd.f32 %v14941_v27, %v19171_v6 }
 0x543   : > { %v19302_v44 = vpop.f32.mrf.mxu1  ;;  %v19317_v45 = vpop.f32.mrf.mxu0 }
 0x545   : > { %v19306_v24 = vpop.f32.mrf.mxu1  ;;  %v19323_v33 = vpop.f32.mrf.mxu0 }
 0x546   : > { %23782 = vst [vmem:[#allocation66_spill] sm:$0xff] %v19323_v33 }
 0x547   : > { %v19308_v41 = vpop.f32.mrf.mxu1  ;;  %v19330_v12 = vpop.f32.mrf.mxu0 }
 0x548   : > { %23785 = vst [vmem:[#allocation71_spill] sm:$0xff] %v19330_v12 }
 0x549   : > { %v14945_v37 = vpop.f32.mrf.mxu1  ;;  %v19336_v0 = vpop.f32.mrf.mxu0 }
 0x54a   : > { %v19313_v20 = vadd.f32 %v14945_v37, %v19188_v43  ;;  %23788 = vst [vmem:[#allocation73_spill] sm:$0xff] %v19336_v0 }
 0x54b   : > { %v19315_v10 = vpop.f32.mrf.mxu1  ;;  %v19343_v33 = vpop.f32.mrf.mxu0 }
 0x54c   : > { %23779 = vst [vmem:[#allocation64_spill] sm:$0xff] %v19313_v20  ;;  %23791 = vst [vmem:[#allocation20_spill] sm:$0xff] %v19343_v33 }
 0x54d   : > { %v19319_v6 = vpop.f32.mrf.mxu1 }
 0x54e   : > { %23780 = vst [vmem:[#allocation67_spill] sm:$0xff] %v19319_v6 }
 0x54f   : > { %v19321_v27 = vpop.f32.mrf.mxu1 }
 0x550   : > { %23781 = vst [vmem:[#allocation69_spill] sm:$0xff] %v19321_v27 }
 0x551   : > { %v14949_v58 = vpop.f32.mrf.mxu1 }
 0x552   : > { %v19326_v42 = vadd.f32 %v14949_v58, %v19205_v28 }
 0x553   : > { %v19328_v47 = vpop.f32.mrf.mxu1 }
 0x554   : > { %23783 = vst [vmem:[#allocation41_spill] sm:$0xff] %v19326_v42  ;;  %23784 = vst [vmem:[#allocation38_spill] sm:$0xff] %v19328_v47  ;;  %v19349_v42 = vpop.permute.xlu0 %6685  ;;  %v19351_v47 = vpop.f32.mrf.mxu0 }
 0x555   : > { %v19332_v43 = vpop.f32.mrf.mxu1  ;;  %23794 = vst [vmem:[#allocation14_spill] sm:$0xff] %v19351_v47 }
 0x556   : > { %23786 = vst [vmem:[#allocation74_spill] sm:$0xff] %v19332_v43 }
 0x557   : > { %v19334_v37 = vpop.f32.mrf.mxu1 }
 0x558   : > { %23787 = vst [vmem:[#allocation76_spill] sm:$0xff] %v19334_v37 }
 0x559   : > { %v14953_v20 = vpop.f32.mrf.mxu1 }
 0x55a   : > { %v19339_v6 = vadd.f32 %v14953_v20, %v19222_v25  ;;  %v19358_v25 = vpop.permute.xlu1 %6687  ;;  %v19360_v20 = vpop.f32.mrf.mxu0 }
 0x55b   : > { %v19341_v27 = vpop.f32.mrf.mxu1  ;;  %23797 = vst [vmem:[#allocation23_spill] sm:$0xff] %v19358_v25  ;;  %23798 = vst [vmem:[#allocation21_spill] sm:$0xff] %v19360_v20 }
 0x55c   : > { %23789 = vst [vmem:[#allocation40_spill] sm:$0xff] %v19339_v6  ;;  %23790 = vst [vmem:[#allocation29_spill] sm:$0xff] %v19341_v27  ;;  %v19364_v27 = vpop.permute.xlu0 %6689 }
 0x55d   : > { %v19345_v28 = vpop.f32.mrf.mxu1 }
 0x55e   : > { %23792 = vst [vmem:[#allocation9_spill] sm:$0xff] %v19345_v28  ;;  %v19370_v47 = vpop.permute.xlu1 %6691 }
 0x55f   : > { %v19347_v58 = vpop.f32.mrf.mxu1 }
 0x560   : > { %23793 = vst [vmem:[#allocation18_spill] sm:$0xff] %v19347_v58  ;;  %v19368_v58 = vpop.f32.mrf.mxu0 }
 0x561   : > { %v14957_v43 = vpop.f32.mrf.mxu1  ;;  %23801 = vst [vmem:[#allocation15_spill] sm:$0xff] %v19368_v58 }
 0x562   : > { %v19354_v37 = vadd.f32 %v14957_v43, %v19239_v29  ;;  %v19385_v25 = vpop.permute.xlu1 %6695 }
 0x563   : > { %v19356_v0 = vpop.f32.mrf.mxu1  ;;  %23807 = vst [vmem:[#allocation27_spill] sm:$0xff] %v19385_v25  ;;  %v4962_v25 = vadd.f32 %v18971_v46, %v18983_v51 }
 0x564   : > { %23795 = vst [vmem:[#allocation11_spill] sm:$0xff] %v19354_v37  ;;  %23796 = vst [vmem:[#allocation12_spill] sm:$0xff] %v19356_v0  ;;  %v19377_v37 = vpop.permute.xlu0 %6693  ;;  %v19379_v0 = vpop.f32.mrf.mxu0 }
 0x565   : > { %v19362_v6 = vpop.f32.mrf.mxu1  ;;  %23804 = vst [vmem:[#allocation24_spill] sm:$0xff] %v19379_v0 }
 0x566   : > { %23799 = vst [vmem:[#allocation43_spill] sm:$0xff] %v19362_v6  ;;  %v19400_v0 = vpop.permute.xlu1 %6699 }
 0x567   : > { %v19366_v28 = vpop.f32.mrf.mxu1  ;;  %23813 = vst [vmem:[#allocation44_spill] sm:$0xff] %v19400_v0  ;;  %v5372_v0 = vadd.f32 %v19120_v34, %v4962_v25  ;;  %v5566_v34 = vadd.f32 %v19056_v19, %v19068_v63 }
 0x568   : > { %23800 = vst [vmem:[#allocation17_spill] sm:$0xff] %v19366_v28  ;;  %v19387_v28 = vpop.f32.mrf.mxu0  ;;  %v19389_v12 = vpop.permute.xlu0 %6697 }
 0x569   : > { %v14961_v33 = vpop.f32.mrf.mxu1  ;;  %23808 = vst [vmem:[#allocation10_spill] sm:$0xff] %v19387_v28  ;;  %v4946_v28 = vadd.f32 %v18950_v17, %v18960_v5  ;;  %v5782_v19 = vadd.f32 %v19210_v48, %v5566_v34  ;;  %v23820_v48 = vld [vmem:[#allocation30_spill] sm:$0xff] }
 0x56a   : > { %v19373_v29 = vadd.f32 %v14961_v33, %v19256_v55 }
 0x56b   : > { %v19375_v43 = vpop.f32.mrf.mxu1 }
 0x56c   : > { %23802 = vst [vmem:[#allocation19_spill] sm:$0xff] %v19373_v29  ;;  %23803 = vst [vmem:[#allocation22_spill] sm:$0xff] %v19375_v43  ;;  %v19396_v29 = vpop.f32.mrf.mxu0 }
 0x56d   : > { %v19381_v20 = vpop.f32.mrf.mxu1  ;;  %23811 = vst [vmem:[#allocation28_spill] sm:$0xff] %v19396_v29 }
 0x56e   : > { %23805 = vst [vmem:[#allocation25_spill] sm:$0xff] %v19381_v20  ;;  %v19416_v29 = vpop.f32.mrf.mxu0 }
 0x56f   : > { %v19383_v6 = vpop.f32.mrf.mxu1 }
 0x570   : > { %23806 = vst [vmem:[#allocation32_spill] sm:$0xff] %v19383_v6  ;;  %v19404_v6 = vpop.permute.xlu0 %6701 }
 0x571   : > { %v14965_v58 = vpop.f32.mrf.mxu1  ;;  %23815 = vst [vmem:[#allocation79_spill] sm:$0xff] %v19404_v6  ;;  %v5368_v6 = vadd.f32 %v19103_v38, %v4946_v28 }
 0x572   : > { %v19392_v55 = vadd.f32 %v14965_v58, %v19273_v9  ;;  %v4978_v9 = vadd.f32 %v18991_v49, %v19000_v61  ;;  %v23816_v58 = vld [vmem:[#allocation36_spill] sm:$0xff]  ;;  %v5562_v49 = vadd.f32 %v19038_v21, %v19047_v59 }
 0x573   : > { %v19394_v33 = vpop.f32.mrf.mxu1  ;;  %v5574_v59 = vadd.f32 %v19095_v11, %v5368_v6  ;;  %v23821_v6 = vld [vmem:[#allocation45_spill] sm:$0xff] }
 0x574   : > { %23809 = vst [vmem:[#allocation13_spill] sm:$0xff] %v19392_v55  ;;  %23810 = vst [vmem:[#allocation16_spill] sm:$0xff] %v19394_v33  ;;  %v23817_v55 = vld [vmem:[#allocation46_spill] sm:$0xff]  ;;  %v5376_v5 = vadd.f32 %v19140_v7, %v4978_v9  ;;  %v5778_v38 = vadd.f32 %v19193_v60, %v5562_v49  ;;  %v5570_v7 = vadd.f32 %v19077_v32, %v19086_v50  ;;  %v19443_v21 = vpop.permute.xlu0 %6705  ;;  %v23825_v9 = vld [vmem:[#allocation31_spill] sm:$0xff] }
 0x575   : > { %v19398_v43 = vpop.f32.mrf.mxu1  ;;  %v4994_v33 = vadd.f32 %v23817_v55, %v23816_v58  ;;  %v19489_v58 = vadd.f32 %v23825_v9, %v5782_v19  ;;  %v23832_v19 = vld [vmem:[#allocation33_spill] sm:$0xff]  ;;  %v23839_v9 = vld [vmem:[#allocation64_spill] sm:$0xff] }
 0x576   : > { %23812 = vst [vmem:[#allocation26_spill] sm:$0xff] %v19398_v43  ;;  %v5558_v43 = vadd.f32 %v19020_v31, %v19029_v22  ;;  %v19430_v31 = vpop.permute.xlu1 %6703  ;;  %v5986_v22 = vadd.f32 %v19159_v8, %v19169_v16  ;;  %v5989_v16 = vadd.f32 %v19163_v56, %v19174_v26  ;;  %v5582_v63 = vadd.f32 %v19129_v1, %v5376_v5  ;;  %v23819_v1 = vld [vmem:[#allocation49_spill] sm:$0xff]  ;;  %v23826_v5 = vld [vmem:[#allocation48_spill] sm:$0xff] }
 0x577   : > { %v19402_v20 = vpop.f32.mrf.mxu1  ;;  %v5380_v46 = vadd.f32 %v19157_v54, %v4994_v33  ;;  %v19439_v54 = vpop.f32.mrf.mxu0  ;;  %v5786_v11 = vadd.f32 %v19227_v4, %v5570_v7  ;;  %v6410_v56 = vadd.f32 %v19297_v62, %v19300_v30  ;;  %v5790_v26 = vadd.f32 %v19244_v57, %v5574_v59  ;;  %v23824_v62 = vld [vmem:[#allocation35_spill] sm:$0xff] }
 0x578   : > { %23814 = vst [vmem:[#allocation78_spill] sm:$0xff] %v19402_v20  ;;  %v5774_v51 = vadd.f32 %v19176_v52, %v5558_v43  ;;  %v6192_v8 = vadd.f32 %v19302_v44, %v5986_v22  ;;  %v5991_v28 = vadd.f32 %v23821_v6, %v5778_v38  ;;  %v23823_v43 = vld [vmem:[#allocation52_spill] sm:$0xff]  ;;  %v19485_v33 = vld [vmem:[%s23296_s13] ss:$0 sm:$0xff]  ;;  %v23829_v38 = vld [vmem:[#allocation50_spill] sm:$0xff] }
 0x579   : > { %v14969_v20 = vpop.f32.mrf.mxu1  ;;  %v19453_v32 = vadd.f32 %v19149_v15, %v5380_v46  ;;  %v5993_v15 = vadd.f32 %v23820_v48, %v23819_v1  ;;  %v19472_v4 = vpop.f32.mrf.mxu0  ;;  %v19479_v30 = vadd.f32 %v23824_v62, %v23823_v43  ;;  %v23827_v46 = vld [vmem:[#allocation47_spill] sm:$0xff]  ;;  %v19502_v34 = vadd.f32 %v23829_v38, %v5786_v11  ;;  %v23834_v6 = vld [vmem:[#allocation70_spill] sm:$0xff]  ;;  %v23842_v38 = vld [vmem:[#allocation72_spill] sm:$0xff] }
 0x57a   : > { %v19421_v17 = vadd.f32 %v14969_v20, %v19288_v53  ;;  %v5578_v53 = vadd.f32 %v19112_v14, %v5372_v0  ;;  %v5987_v50 = vadd.f32 %v19166_v35, %v5774_v51  ;;  %v6195_v14 = vadd.f32 %v19306_v24, %v5989_v16  ;;  %v23818_v0 = vld [vmem:[#allocation34_spill] sm:$0xff]  ;;  %v23822_v35 = vld [vmem:[#allocation61_spill] sm:$0xff]  ;;  %v19474_v20 = vpop.permute.xlu1 %6707  ;;  %v23828_v51 = vld [vmem:[#allocation55_spill] sm:$0xff] }
 0x57b   : > { %v19428_v61 = vpop.f32.mrf.mxu1  ;;  %v5990_v44 = vadd.f32 %v23818_v0, %v19186_v23  ;;  %v19470_v25 = vadd.f32 %v23822_v35, %v19203_v36  ;;  %v6408_v55 = vadd.f32 %v19304_v39, %v6192_v8  ;;  %v19497_v49 = vadd.f32 %v23828_v51, %v23827_v46  ;;  %v19499_v39 = vpop.permute.xlu0 %6709  ;;  %v23831_v16 = vld [vmem:[#allocation62_spill] sm:$0xff]  ;;  %v23833_v0 = vld [vmem:[#allocation51_spill] sm:$0xff]  ;;  %v23835_v35 = vld [vmem:[#allocation68_spill] sm:$0xff] }
 0x57c   : > { %v6193_v23 = vadd.f32 %v19308_v41, %v5987_v50  ;;  %v5794_v36 = vadd.f32 %v19261_v3, %v5578_v53  ;;  %v19493_v41 = vadd.f32 %v23826_v5, %v19220_v2  ;;  %v6411_v3 = vadd.f32 %v19310_v13, %v6195_v14  ;;  %v19507_v53 = vpop.f32.mrf.mxu0  ;;  %v23830_v2 = vld [vmem:[#allocation58_spill] sm:$0xff]  ;;  %v23838_v62 = vld [vmem:[#allocation67_spill] sm:$0xff]  ;;  %v23841_v51 = vld [vmem:[#allocation37_spill] sm:$0xff] }
 0x57d   : > { %v19441_v52 = vpop.f32.mrf.mxu1  ;;  %v19511_v8 = vadd.f32 %v23830_v2, %v19237_v40  ;;  %v19515_v50 = vadd.f32 %v23832_v19, %v23831_v16  ;;  %v6196_v13 = vadd.f32 %v19315_v10, %v5990_v44  ;;  %v19528_v40 = vld [vmem:[%s23297_s14] ss:$0 sm:$0xff]  ;;  %v23837_v10 = vld [vmem:[#allocation54_spill] sm:$0xff] }
 0x57e   : > { %v19539_v44 = vadd.f32 %v23837_v10, %v5794_v36  ;;  %v19551_v36 = vpop.f32.mrf.mxu0  ;;  %v23847_v10 = vld [vmem:[#allocation39_spill] sm:$0xff] }
 0x57f   : > { %v19456_v60 = vpop.f32.mrf.mxu1  ;;  %v19559_v19 = vpop.permute.xlu0 %6713 }
 0x581   : > { %v15009_v24 = vpop.f32.mrf.mxu1 }
 0x582   : > { %v6623_v57 = vadd.f32 %v15009_v24, %v6410_v56  ;;  %v19518_v56 = vadd.f32 %v23833_v0, %v5790_v26  ;;  %v19532_v26 = vadd.f32 %v23834_v6, %v19254_v18  ;;  %v23836_v24 = vld [vmem:[#allocation65_spill] sm:$0xff]  ;;  %v23840_v18 = vld [vmem:[#allocation66_spill] sm:$0xff] }
 0x583   : > { %v6494_v22 = vpop.f32.mrf.mxu1  ;;  %v19536_v43 = vadd.f32 %v23836_v24, %v23835_v35  ;;  %v6414_v5 = vadd.f32 %v23840_v18, %v23839_v9  ;;  %v23844_v0 = vld [vmem:[#allocation69_spill] sm:$0xff] }
 0x584   : > { %v6621_v7 = vadd.f32 %v6494_v22, %v6408_v55  ;;  %v6783_v59 = vsel %vm3797_vm5, %v6623_v57, %v19364_v27  ;;  %v6409_v27 = vadd.f32 %v19317_v45, %v6193_v23  ;;  %v19543_v23 = vpop.permute.xlu1 %6711  ;;  %v6199_v57 = vadd.f32 %v23838_v62, %v5993_v15  ;;  %v23849_v62 = vld [vmem:[#allocation73_spill] sm:$0xff] }
 0x585   : > { %v15010_v11 = vpop.f32.mrf.mxu1  ;;  %v6822_v1 = vmul.f32 %v19485_v33, %v6783_v59  ;;  %v5798_v22 = vadd.f32 %v23841_v51, %v5582_v63 }
 0x586   : > { %v6624_v14 = vadd.f32 %v15010_v11, %v6411_v3  ;;  %v6781_v48 = vsel %vm3797_vm5, %v6621_v7, %v19349_v42  ;;  %v23843_v7 = vld [vmem:[#allocation77_spill] sm:$0xff]  ;;  %v6197_v11 = vadd.f32 %v23844_v0, %v5991_v28  ;;  %v23848_v28 = vld [vmem:[#allocation56_spill] sm:$0xff]  ;;  %v6415_v9 = vadd.f32 %v23849_v62, %v6199_v57 }
 0x587   : > { %v6497_v45 = vpop.f32.mrf.mxu1  ;;  %9668 = vrot.lane.b32.xlu0 %v6781_v48, %s23474_s5  ;;  %v6820_v42 = vmul.f32 %v19485_v33, %v6781_v48  ;;  %v19555_v3 = vadd.f32 %v23843_v7, %v23842_v38  ;;  %v6861_v16 = vadd.f32 %v19528_v40, %v6822_v1  ;;  %v23845_v48 = vld [vmem:[#allocation71_spill] sm:$0xff]  ;;  %v23856_v62 = vld [vmem:[#allocation53_spill] sm:$0xff] }
 0x588   : > { %v6622_v55 = vadd.f32 %v6497_v45, %v6409_v27  ;;  %v6784_v46 = vsel %vm3797_vm5, %v6624_v14, %v19370_v47  ;;  %v6412_v47 = vadd.f32 %v23845_v48, %v6196_v13  ;;  %v23846_v14 = vld [vmem:[#allocation23_spill] sm:$0xff]  ;;  %v19572_v45 = vadd.f32 %v23848_v28, %v23847_v10  ;;  %v19581_v7 = vpop.permute.xlu1 %6715  ;;  %v23851_v48 = vld [vmem:[#allocation20_spill] sm:$0xff]  ;;  %v23854_v10 = vld [vmem:[#allocation14_spill] sm:$0xff] }
 0x589   : > { %v15013_v2 = vpop.f32.mrf.mxu1  ;;  %v6823_v15 = vmul.f32 %v19485_v33, %v6784_v46  ;;  %v6859_v6 = vadd.f32 %v19528_v40, %v6820_v42  ;;  %v6413_v57 = vadd.f32 %v23851_v48, %v6197_v11  ;;  %v23853_v11 = vld [vmem:[#allocation41_spill] sm:$0xff] }
 0x58a   : > { %v6627_v27 = vadd.f32 %v15013_v2, %v6414_v5  ;;  %v6782_v63 = vsel %vm3797_vm5, %v6622_v55, %v23846_v14  ;;  %v19577_v55 = vpop.f32.mrf.mxu0  ;;  %v23850_v2 = vld [vmem:[#allocation38_spill] sm:$0xff]  ;;  %v6418_v28 = vadd.f32 %v23854_v10, %v23853_v11  ;;  %v23858_v48 = vld [vmem:[#allocation21_spill] sm:$0xff] }
 0x58b   : > { %v6510_v35 = vpop.f32.mrf.mxu1  ;;  %9672 = vrot.lane.b32.xlu0 %v6783_v59, %s23474_s5  ;;  %9670 = vrot.lane.b32.xlu1 %v6782_v63, %s23474_s5  ;;  %v6821_v1 = vmul.f32 %v19485_v33, %v6782_v63  ;;  %v6862_v24 = vadd.f32 %v19528_v40, %v6823_v15  ;;  %v6893_v59 = vmax.f32 %v6861_v16, 0.0  ;;  %v6200_v15 = vadd.f32 %v23850_v2, %v19470_v25  ;;  %v23852_v25 = vld [vmem:[#allocation74_spill] sm:$0xff] }
 0x58c   : > { %v6625_v13 = vadd.f32 %v6510_v35, %v6412_v47  ;;  %v6787_v42 = vsel %vm3797_vm5, %v6627_v27, %v19389_v12  ;;  %v6891_v27 = vmax.f32 %v6859_v6, 0.0  ;;  %v19591_v35 = vpop.permute.xlu0 %6717 }
 0x58d   : > { %v6860_v18 = vadd.f32 %v19528_v40, %v6821_v1  ;;  %v15014_v5 = vpop.f32.mrf.mxu1  ;;  %v6894_v51 = vmax.f32 %v6862_v24, 0.0  ;;  %v6826_v38 = vmul.f32 %v19485_v33, %v6787_v42  ;;  %v6203_v1 = vadd.f32 %v23852_v25, %v19479_v30  ;;  %v23857_v30 = vld [vmem:[#allocation76_spill] sm:$0xff] }
 0x58e   : > { %v6628_v0 = vadd.f32 %v15014_v5, %v6415_v9  ;;  %v6785_v12 = vsel %vm3797_vm5, %v6625_v13, %v19377_v37  ;;  %v23855_v37 = vld [vmem:[#allocation44_spill] sm:$0xff]  ;;  %v19599_v13 = vpop.f32.mrf.mxu0 }
 0x58f   : > { %v6892_v47 = vmax.f32 %v6860_v18, 0.0  ;;  %v6513_v16 = vpop.f32.mrf.mxu1  ;;  %v6924_v14 = vpack.c.bf16 %v6894_v51, %v6893_v59  ;;  %9674 = vrot.lane.b32.xlu1 %v6784_v46, %s23474_s5  ;;  %9676 = vrot.lane.b32.xlu0 %v6785_v12, %s23474_s5  ;;  %v6824_v63 = vmul.f32 %v19485_v33, %v6785_v12  ;;  %v19602_v46 = vadd.f32 %v23856_v62, %v5798_v22  ;;  %v23859_v12 = vld [vmem:[#allocation27_spill] sm:$0xff] }
 0x590   : > { %v6626_v24 = vadd.f32 %v6513_v16, %v6413_v57  ;;  %v6788_v6 = vsel %vm3797_vm5, %v6628_v0, %v23855_v37  ;;  %v6865_v18 = vadd.f32 %v19528_v40, %v6826_v38  ;;  %v6201_v51 = vadd.f32 %v23857_v30, %v19489_v58  ;;  %v19627_v62 = vpop.permute.xlu0 %6721  ;;  %v23863_v30 = vld [vmem:[#allocation79_spill] sm:$0xff] }
 0x591   : > { %v6923_v9 = vpack.c.bf16 %v6892_v47, %v6891_v27  ;;  %v15017_v59 = vpop.f32.mrf.mxu1  ;;  %v6827_v5 = vmul.f32 %v19485_v33, %v6788_v6  ;;  %v6416_v57 = vadd.f32 %v23858_v48, %v6200_v15  ;;  %v6863_v16 = vadd.f32 %v19528_v40, %v6824_v63  ;;  %v19616_v27 = vpop.permute.xlu1 %6719  ;;  %v23860_v15 = vld [vmem:[#allocation15_spill] sm:$0xff] }
 0x592   : > { %v6631_v2 = vadd.f32 %v15017_v59, %v6418_v28  ;;  %v6786_v0 = vsel %vm3797_vm5, %v6626_v24, %v23859_v12  ;;  %v6419_v47 = vadd.f32 %v23860_v15, %v6203_v1  ;;  %v19623_v24 = vpop.f32.mrf.mxu0  ;;  %v6897_v11 = vmax.f32 %v6865_v18, 0.0  ;;  %v23867_v15 = vld [vmem:[#allocation60_spill] sm:$0xff] }
 0x593   : > { %v6526_v25 = vpop.f32.mrf.mxu1  ;;  %15043 = vmatprep.mubr.msk.bf16.mxu0 %vm6955_vm7, %v6923_v9  ;;  %9680 = vrot.lane.b32.xlu0 %v6787_v42, %s23474_s5  ;;  %v6825_v22 = vmul.f32 %v19485_v33, %v6786_v0  ;;  %v6866_v38 = vadd.f32 %v19528_v40, %v6827_v5  ;;  %v23861_v9 = vld [vmem:[#allocation29_spill] sm:$0xff]  ;;  %v23862_v5 = vld [vmem:[#allocation24_spill] sm:$0xff] }
 0x594   : > { %v6629_v58 = vadd.f32 %v6526_v25, %v6416_v57  ;;  %9678 = vrot.lane.b32.xlu1 %v6786_v0, %s23474_s5  ;;  %15044 = vmatmul.mubr.msk.bf16.vlgmr.msra.gmra.mxu0 %vm6955_vm7, %v6924_v14  ;;  %v6791_v63 = vsel %vm3797_vm5, %v6631_v2, %v19443_v21  ;;  %v6204_v59 = vadd.f32 %v23861_v9, %v19493_v41  ;;  %v6895_v2 = vmax.f32 %v6863_v16, 0.0  ;;  %v23864_v0 = vld [vmem:[#allocation9_spill] sm:$0xff]  ;;  %v23865_v41 = vld [vmem:[#allocation40_spill] sm:$0xff]  ;;  %v19643_v16 = vpop.f32.mrf.mxu0 }
 0x595   : > { %v6864_v42 = vadd.f32 %v19528_v40, %v6825_v22  ;;  %v15018_v10 = vpop.f32.mrf.mxu1  ;;  %v6898_v28 = vmax.f32 %v6866_v38, 0.0  ;;  %v6830_v37 = vmul.f32 %v19485_v33, %v6791_v63  ;;  %v6417_v1 = vadd.f32 %v23862_v5, %v6201_v51  ;;  %v23866_v38 = vld [vmem:[#allocation10_spill] sm:$0xff]  ;;  %v19651_v9 = vpop.permute.xlu1 %6723 }
 0x596   : > { %v6632_v14 = vadd.f32 %v15018_v10, %v6419_v47  ;;  %v6789_v21 = vsel %vm3797_vm5, %v6629_v58, %v23863_v30  ;;  %v6207_v25 = vadd.f32 %v23864_v0, %v19497_v49  ;;  %v6422_v51 = vadd.f32 %v23866_v38, %v23865_v41  ;;  %v23868_v47 = vld [vmem:[#allocation57_spill] sm:$0xff]  ;;  %v23870_v30 = vld [vmem:[#allocation28_spill] sm:$0xff] }
 0x597   : > { %v6896_v48 = vmax.f32 %v6864_v42, 0.0  ;;  %v6529_v18 = vpop.f32.mrf.mxu1  ;;  %v6926_v57 = vpack.c.bf16 %v6898_v28, %v6897_v11  ;;  %9684 = vrot.lane.b32.xlu0 %v6789_v21, %s23474_s5  ;;  %v6828_v12 = vmul.f32 %v19485_v33, %v6789_v21  ;;  %v19647_v11 = vadd.f32 %v23868_v47, %v23867_v15 }
 0x598   : > { %v6630_v22 = vadd.f32 %v6529_v18, %v6417_v1  ;;  %9682 = vrot.lane.b32.xlu1 %v6788_v6, %s23474_s5  ;;  %v6792_v58 = vsel %vm3797_vm5, %v6632_v14, %v19474_v20  ;;  %v6869_v28 = vadd.f32 %v19528_v40, %v6830_v37  ;;  %v23869_v6 = vld [vmem:[#allocation18_spill] sm:$0xff]  ;;  %v6420_v20 = vadd.f32 %v23870_v30, %v6204_v59 }
 0x599   : > { %v6925_v42 = vpack.c.bf16 %v6896_v48, %v6895_v2  ;;  %v15021_v10 = vpop.f32.mrf.mxu1  ;;  %v6831_v49 = vmul.f32 %v19485_v33, %v6792_v58  ;;  %v6205_v5 = vadd.f32 %v23869_v6, %v19502_v34  ;;  %v6867_v21 = vadd.f32 %v19528_v40, %v6828_v12  ;;  %v19663_v48 = vpop.permute.xlu0 %6725  ;;  %v23872_v6 = vld [vmem:[#allocation43_spill] sm:$0xff]  ;;  %v23874_v30 = vld [vmem:[#allocation42_spill] sm:$0xff] }
 0x59a   : > { %v6635_v1 = vadd.f32 %v15021_v10, %v6422_v51  ;;  %v6790_v14 = vsel %vm3797_vm5, %v6630_v22, %v19430_v31  ;;  %v6423_v31 = vadd.f32 %v19416_v29, %v6207_v25  ;;  %v19670_v12 = vpop.f32.mrf.mxu0  ;;  %v6901_v0 = vmax.f32 %v6869_v28, 0.0  ;;  %v23871_v51 = vld [vmem:[#allocation12_spill] sm:$0xff] }
 0x59b   : > { %v6542_v18 = vpop.f32.mrf.mxu1  ;;  %15047 = vmatprep.mubr.msk.bf16.mxu0 %vm6955_vm7, %v6925_v42  ;;  %9688 = vrot.lane.b32.xlu0 %v6791_v63, %s23474_s5  ;;  %v6829_v37 = vmul.f32 %v19485_v33, %v6790_v14  ;;  %v6870_v2 = vadd.f32 %v19528_v40, %v6831_v49  ;;  %v6208_v15 = vadd.f32 %v23871_v51, %v19511_v8  ;;  %v6899_v25 = vmax.f32 %v6867_v21, 0.0  ;;  %v19681_v49 = vpop.permute.xlu1 %6727 }
 0x59c   : > { %v6633_v34 = vadd.f32 %v6542_v18, %v6420_v20  ;;  %9686 = vrot.lane.b32.xlu1 %v6790_v14, %s23474_s5  ;;  %15048 = vmatmul.mubr.msk.bf16.gmra.mxu0 %vm6955_vm7, %v6926_v57  ;;  %v6795_v59 = vsel %vm3797_vm5, %v6635_v1, %v19559_v19  ;;  %v6421_v57 = vadd.f32 %v19439_v54, %v6205_v5  ;;  %v23873_v54 = vld [vmem:[#allocation11_spill] sm:$0xff]  ;;  %v19694_v14 = vpop.f32.mrf.mxu0 }
 0x59d   : > { %v6868_v63 = vadd.f32 %v19528_v40, %v6829_v37  ;;  %v15022_v22 = vpop.f32.mrf.mxu1  ;;  %v6902_v41 = vmax.f32 %v6870_v2, 0.0  ;;  %v6834_v38 = vmul.f32 %v19485_v33, %v6795_v59  ;;  %v6211_v1 = vadd.f32 %v23872_v6, %v19515_v50  ;;  %v6730_v2 = vpop.permute.xlu0 %6729 }
 0x59e   : > { %v6636_v47 = vadd.f32 %v15022_v22, %v6423_v31  ;;  %v6793_v29 = vsel %vm3797_vm5, %v6633_v34, %v19499_v39  ;;  %v6426_v5 = vadd.f32 %v19472_v4, %v23873_v54  ;;  %v19692_v20 = vadd.f32 %v23874_v30, %v19453_v32  ;;  %v23877_v54 = vld [vmem:[#allocation25_spill] sm:$0xff] }
 0x59f   : > { %v6900_v19 = vmax.f32 %v6868_v63, 0.0  ;;  %v6545_v42 = vpop.f32.mrf.mxu1  ;;  %v6928_v10 = vpack.c.bf16 %v6902_v41, %v6901_v0  ;;  %9692 = vrot.lane.b32.xlu0 %v6793_v29, %s23474_s5  ;;  %v6832_v28 = vmul.f32 %v19485_v33, %v6793_v29  ;;  %v6873_v37 = vadd.f32 %v19528_v40, %v6834_v38  ;;  %v23876_v29 = vld [vmem:[#allocation22_spill] sm:$0xff] }
 0x5a0   : > { %v6634_v8 = vadd.f32 %v6545_v42, %v6421_v57  ;;  %9690 = vrot.lane.b32.xlu1 %v6792_v58, %s23474_s5  ;;  %v6796_v39 = vsel %vm3797_vm5, %v6636_v47, %v19581_v7  ;;  %v23875_v58 = vld [vmem:[#allocation17_spill] sm:$0xff]  ;;  %v6424_v31 = vadd.f32 %v19507_v53, %v6208_v15  ;;  %v6427_v53 = vadd.f32 %v19551_v36, %v6211_v1  ;;  %v19717_v57 = vpop.permute.xlu1 %6731 }
 0x5a1   : > { %v6927_v21 = vpack.c.bf16 %v6900_v19, %v6899_v25  ;;  %v15025_v18 = vpop.f32.mrf.mxu1  ;;  %v6835_v50 = vmul.f32 %v19485_v33, %v6796_v39  ;;  %v6209_v34 = vadd.f32 %v23875_v58, %v19518_v56  ;;  %v6871_v32 = vadd.f32 %v19528_v40, %v6832_v28 }
 0x5a2   : > { %v6639_v4 = vadd.f32 %v15025_v18, %v6426_v5  ;;  %v6794_v7 = vsel %vm3797_vm5, %v6634_v8, %v19543_v23  ;;  %v19713_v23 = vpop.f32.mrf.mxu0  ;;  %v6905_v38 = vmax.f32 %v6873_v37, 0.0  ;;  %v6212_v25 = vadd.f32 %v23876_v29, %v19532_v26  ;;  %v19726_v8 = vpop.permute.xlu0 %6733  ;;  %v23879_v18 = vld [vmem:[#allocation59_spill] sm:$0xff] }
 0x5a3   : > { %v6558_v0 = vpop.f32.mrf.mxu1  ;;  %15051 = vmatprep.mubr.msk.bf16.mxu0 %vm6955_vm7, %v6927_v21  ;;  %9696 = vrot.lane.b32.xlu0 %v6795_v59, %s23474_s5  ;;  %v6833_v63 = vmul.f32 %v19485_v33, %v6794_v7  ;;  %v6874_v22 = vadd.f32 %v19528_v40, %v6835_v50  ;;  %v6425_v36 = vadd.f32 %v19577_v55, %v6209_v34  ;;  %v6903_v42 = vmax.f32 %v6871_v32, 0.0  ;;  %v23878_v55 = vld [vmem:[#allocation19_spill] sm:$0xff]  ;;  %v15792_v32 = vld [vmem:[%s23301_s18 + $0x8] sm:$0xff]  }
 0x5a4   : > { %v6637_v41 = vadd.f32 %v6558_v0, %v6424_v31  ;;  %9694 = vrot.lane.b32.xlu1 %v6794_v7, %s23474_s5  ;;  %15052 = vmatmul.mubr.msk.bf16.gmra.mxu0 %vm6955_vm7, %v6928_v10  ;;  %v6799_v56 = vsel %vm3797_vm5, %v6639_v4, %v19627_v62  ;;  %v6215_v5 = vadd.f32 %v23877_v54, %v19536_v43  ;;  %v19735_v21 = vpop.f32.mrf.mxu0  ;;  %v23880_v37 = vld [vmem:[#allocation75_spill] sm:$0xff]  ;;  %v23883_v54 = vld [vmem:[#allocation26_spill] sm:$0xff] }
 0x5a5   : > { %v6872_v51 = vadd.f32 %v19528_v40, %v6833_v63  ;;  %v15026_v59 = vpop.f32.mrf.mxu1  ;;  %v6906_v15 = vmax.f32 %v6874_v22, 0.0  ;;  %v6838_v47 = vmul.f32 %v19485_v33, %v6799_v56  ;;  %v6430_v30 = vadd.f32 %v19599_v13, %v23878_v55  ;;  %15075 = vmatprep.subr.bf16.mxu1 %v15792_v32  ;;  %v23885_v55 = vld [vmem:[#allocation63_spill] sm:$0xff] }
 0x5a6   : > { %v6640_v19 = vadd.f32 %v15026_v59, %v6427_v53  ;;  %v6797_v62 = vsel %vm3797_vm5, %v6637_v41, %v19591_v35  ;;  %v19739_v50 = vadd.f32 %v23880_v37, %v23879_v18  ;;  %v6428_v13 = vadd.f32 %v19623_v24, %v6212_v25  ;;  %v19756_v41 = vpop.permute.xlu1 %6735  ;;  %v6738_v29 = vpop.permute.xlu0 %6737  ;;  %v23882_v25 = vld [vmem:[#allocation16_spill] sm:$0xff]  ;;  %15076 = vmatpush3.bf16.msra.mxu1 %v15792_v32 }
 0x5a7   : > { %v6904_v10 = vmax.f32 %v6872_v51, 0.0  ;;  %v6561_v28 = vpop.f32.mrf.mxu1  ;;  %v6930_v6 = vpack.c.bf16 %v6906_v15, %v6905_v38  ;;  %9700 = vrot.lane.b32.xlu0 %v6797_v62, %s23474_s5  ;;  %v6836_v1 = vmul.f32 %v19485_v33, %v6797_v62  ;;  %v6877_v4 = vadd.f32 %v19528_v40, %v6838_v47  ;;  %v6380_v38 = vpop.f32.mrf.mxu0 }
 0x5a8   : > { %v6638_v26 = vadd.f32 %v6561_v28, %v6425_v36  ;;  %9698 = vrot.lane.b32.xlu1 %v6796_v39, %s23474_s5  ;;  %v6800_v35 = vsel %vm3797_vm5, %v6640_v19, %v19651_v9  ;;  %v23881_v39 = vld [vmem:[#allocation32_spill] sm:$0xff]  ;;  %v6216_v19 = vadd.f32 %v23882_v25, %v19555_v3 }
 0x5a9   : > { %v6929_v58 = vpack.c.bf16 %v6904_v10, %v6903_v42  ;;  %v15029_v34 = vpop.f32.mrf.mxu1  ;;  %v6839_v43 = vmul.f32 %v19485_v33, %v6800_v35  ;;  %v6213_v31 = vadd.f32 %v23881_v39, %v19539_v44  ;;  %v6875_v0 = vadd.f32 %v19528_v40, %v6836_v1 }
 0x5aa   : > { %v6643_v7 = vadd.f32 %v15029_v34, %v6430_v30  ;;  %v6798_v9 = vsel %vm3797_vm5, %v6638_v26, %v19616_v27  ;;  %v6431_v27 = vadd.f32 %v19643_v16, %v6215_v5  ;;  %v6909_v51 = vmax.f32 %v6877_v4, 0.0  ;;  %v6740_v4 = vpop.permute.xlu1 %6739 }
 0x5ab   : > { %v6574_v63 = vpop.f32.mrf.mxu1  ;;  %15055 = vmatprep.mubr.msk.bf16.mxu0 %vm6955_vm7, %v6929_v58  ;;  %9704 = vrot.lane.b32.xlu0 %v6799_v56, %s23474_s5  ;;  %v6837_v22 = vmul.f32 %v19485_v33, %v6798_v9  ;;  %v6878_v44 = vadd.f32 %v19528_v40, %v6839_v43  ;;  %v6429_v62 = vadd.f32 %v19670_v12, %v6213_v31  ;;  %v6907_v42 = vmax.f32 %v6875_v0, 0.0  ;;  %v23884_v12 = vld [vmem:[#allocation13_spill] sm:$0xff] }
 0x5ac   : > { %v6641_v24 = vadd.f32 %v6574_v63, %v6428_v13  ;;  %9702 = vrot.lane.b32.xlu1 %v6798_v9, %s23474_s5  ;;  %15056 = vmatmul.mubr.msk.bf16.gmra.mxu0 %vm6955_vm7, %v6930_v6  ;;  %v6803_v53 = vsel %vm3797_vm5, %v6643_v7, %v6730_v2  ;;  %v15003_v2 = vpop.f32.mrf.mxu0  ;;  %v6219_v5 = vadd.f32 %v23883_v54, %v19572_v45  ;;  %v23886_v45 = vld [vmem:[#allocation78_spill] sm:$0xff]  ;;  %v6742_v9 = vpop.permute.xlu0 %6741 }
 0x5ad   : > { %v6876_v59 = vadd.f32 %v19528_v40, %v6837_v22  ;;  %v15030_v56 = vpop.f32.mrf.mxu1  ;;  %v6910_v15 = vmax.f32 %v6878_v44, 0.0  ;;  %v6842_v47 = vmul.f32 %v19485_v33, %v6803_v53  ;;  %v6434_v26 = vadd.f32 %v19694_v14, %v23884_v12 }
 0x5ae   : > { %v6644_v36 = vadd.f32 %v15030_v56, %v6431_v27  ;;  %v6801_v16 = vsel %vm3797_vm5, %v6641_v24, %v19663_v48  ;;  %v6015_v30 = vadd.f32 %v23885_v55, %v19692_v20  ;;  %v6217_v43 = vadd.f32 %v23886_v45, %v19602_v46 }
 0x5af   : > { %v6908_v10 = vmax.f32 %v6876_v59, 0.0  ;;  %v6577_v28 = vpop.f32.mrf.mxu1  ;;  %v6932_v6 = vpack.c.bf16 %v6910_v15, %v6909_v51  ;;  %9708 = vrot.lane.b32.xlu0 %v6801_v16, %s23474_s5  ;;  %v6840_v1 = vmul.f32 %v19485_v33, %v6801_v16  ;;  %v6881_v58 = vadd.f32 %v19528_v40, %v6842_v47 }
 0x5b0   : > { %v6642_v3 = vadd.f32 %v6577_v28, %v6429_v62  ;;  %9706 = vrot.lane.b32.xlu1 %v6800_v35, %s23474_s5  ;;  %v6804_v48 = vsel %vm3797_vm5, %v6644_v36, %v19717_v57  ;;  %v6432_v39 = vadd.f32 %v19713_v23, %v6216_v19  ;;  %v6393_v57 = vpop.f32.mrf.mxu0  ;;  %v6220_v24 = vadd.f32 %v19428_v61, %v19647_v11 }
 0x5b1   : > { %v6931_v18 = vpack.c.bf16 %v6908_v10, %v6907_v42  ;;  %v15033_v37 = vpop.f32.mrf.mxu1  ;;  %v6843_v34 = vmul.f32 %v19485_v33, %v6804_v48  ;;  %v6879_v31 = vadd.f32 %v19528_v40, %v6840_v1  ;;  %v6913_v32 = vmax.f32 %v6881_v58, 0.0  ;;  %v6746_v42 = vpop.permute.xlu0 %6745 }
 0x5b2   : > { %v6647_v35 = vadd.f32 %v15033_v37, %v6434_v26  ;;  %v6802_v14 = vsel %vm3797_vm5, %v6642_v3, %v19681_v49  ;;  %v6435_v49 = vadd.f32 %v19735_v21, %v6219_v5  ;;  %v15004_v59 = vpop.f32.mrf.mxu0  ;;  %v6438_v25 = vadd.f32 %v15003_v2, %v19421_v17 }
 0x5b3   : > { %v6590_v20 = vpop.f32.mrf.mxu1  ;;  %15059 = vmatprep.mubr.msk.bf16.mxu0 %vm6955_vm7, %v6931_v18  ;;  %9712 = vrot.lane.b32.xlu0 %v6803_v53, %s23474_s5  ;;  %v6841_v7 = vmul.f32 %v19485_v33, %v6802_v14  ;;  %v6882_v13 = vadd.f32 %v19528_v40, %v6843_v34  ;;  %v6433_v53 = vadd.f32 %v6380_v38, %v6217_v43  ;;  %v6911_v56 = vmax.f32 %v6879_v31, 0.0 }
 0x5b4   : > { %v6645_v46 = vadd.f32 %v6590_v20, %v6432_v39  ;;  %9710 = vrot.lane.b32.xlu1 %v6802_v14, %s23474_s5  ;;  %15060 = vmatmul.mubr.msk.bf16.gmra.mxu0 %vm6955_vm7, %v6932_v6  ;;  %v6807_v23 = vsel %vm3797_vm5, %v6647_v35, %v6738_v29  ;;  %v6223_v19 = vadd.f32 %v19441_v52, %v19739_v50  ;;  %v6396_v50 = vpop.f32.mrf.mxu0 }
 0x5b5   : > { %v6880_v0 = vadd.f32 %v19528_v40, %v6841_v7  ;;  %v15034_v63 = vpop.f32.mrf.mxu1  ;;  %v6914_v22 = vmax.f32 %v6882_v13, 0.0  ;;  %v6846_v44 = vmul.f32 %v19485_v33, %v6807_v23  ;;  %v6436_v10 = vadd.f32 %v6393_v57, %v6220_v24  ;;  %v7307_v24 = vld [vmem:[#allocation2] sm:$0xff] }
 0x5b6   : > { %v6648_v27 = vadd.f32 %v15034_v63, %v6435_v49  ;;  %v6805_v51 = vsel %vm3797_vm5, %v6645_v46, %v19726_v8  ;;  %v6744_v8 = vpop.permute.xlu1 %6743  ;;  %v6221_v28 = vadd.f32 %v19456_v60, %v6015_v30  ;;  %v6439_v5 = vadd.f32 %v15004_v59, %v6223_v19  ;;  %v7309_v59 = vld [vmem:[#allocation2 + $0x10] sm:$0x3] }
 0x5b7   : > { %v6912_v21 = vmax.f32 %v6880_v0, 0.0  ;;  %v6593_v15 = vpop.f32.mrf.mxu1  ;;  %v6934_v47 = vpack.c.bf16 %v6914_v22, %v6913_v32  ;;  %9716 = vrot.lane.b32.xlu0 %v6805_v51, %s23474_s5  ;;  %v6844_v29 = vmul.f32 %v19485_v33, %v6805_v51  ;;  %v6885_v62 = vadd.f32 %v19528_v40, %v6846_v44 }
 0x5b8   : > { %v6646_v61 = vadd.f32 %v6593_v15, %v6433_v53  ;;  %9714 = vrot.lane.b32.xlu1 %v6804_v48, %s23474_s5  ;;  %v6808_v11 = vsel %vm3797_vm5, %v6648_v27, %v6740_v4  ;;  %v6437_v30 = vadd.f32 %v6396_v50, %v6221_v28  ;;  %v7427_v53 = vrot.slane %v7307_v24, 1 }
 0x5b9   : > { %v6933_v38 = vpack.c.bf16 %v6912_v21, %v6911_v56  ;;  %v15037_v36 = vpop.f32.mrf.mxu1  ;;  %v6847_v16 = vmul.f32 %v19485_v33, %v6808_v11  ;;  %v6883_v2 = vadd.f32 %v19528_v40, %v6844_v29  ;;  %v19849_v56 = vld [vmem:[%s23301_s18 + $0x10] sm:$0xff]   ;;  %v7430_v15 = vrot.slane %v7309_v59, 1 }
 0x5ba   : > { %v6651_v17 = vadd.f32 %v15037_v36, %v6438_v25  ;;  %v6806_v52 = vsel %vm3797_vm5, %v6646_v61, %v19756_v41  ;;  %v6917_v41 = vmax.f32 %v6885_v62, 0.0  ;;  %v6748_v58 = vpop.permute.xlu1 %6747  ;;  %15143 = vmatprep.subr.bf16.mxu1 %v19849_v56  ;;  %v19859_v25 = vld [vmem:[%s23301_s18 + $0x18] sm:$0xff]   ;;  %v7988_v19 = vrot.slane %v7307_v24, 2  ;;  %v19873_v62 = vld [vmem:[%s23299_s16] ss:$0 sm:$0xff] }
 0x5bb   : > { %v6606_v6 = vpop.f32.mrf.mxu1  ;;  %15063 = vmatprep.mubr.msk.bf16.mxu0 %vm6955_vm7, %v6933_v38  ;;  %9720 = vrot.lane.b32.xlu0 %v6807_v23, %s23474_s5  ;;  %v6845_v1 = vmul.f32 %v19485_v33, %v6806_v52  ;;  %v6886_v54 = vadd.f32 %v19528_v40, %v6847_v16  ;;  %v6915_v34 = vmax.f32 %v6883_v2, 0.0 }
 0x5bc   : > { %v6649_v3 = vadd.f32 %v6606_v6, %v6436_v10  ;;  %9718 = vrot.lane.b32.xlu1 %v6806_v52, %s23474_s5  ;;  %15064 = vmatmul.mubr.msk.bf16.gmra.mxu0 %vm6955_vm7, %v6934_v47  ;;  %v6811_v60 = vsel %vm3797_vm5, %v6651_v17, %v6746_v42  ;;  %v19878_v42 = vld [vmem:[%s23300_s17] ss:$0 sm:$0xff] }
 0x5bd   : > { %v6884_v12 = vadd.f32 %v19528_v40, %v6845_v1  ;;  %v15038_v26 = vpop.f32.mrf.mxu1  ;;  %v6918_v48 = vmax.f32 %v6886_v54, 0.0  ;;  %v6850_v55 = vmul.f32 %v19485_v33, %v6811_v60 }
 0x5be   : > { %v6652_v18 = vadd.f32 %v15038_v26, %v6439_v5  ;;  %v6809_v37 = vsel %vm3797_vm5, %v6649_v3, %v6742_v9 }
 0x5bf   : > { %v6916_v4 = vmax.f32 %v6884_v12, 0.0  ;;  %v6609_v45 = vpop.f32.mrf.mxu1  ;;  %v6936_v43 = vpack.c.bf16 %v6918_v48, %v6917_v41  ;;  %9724 = vrot.lane.b32.xlu0 %v6809_v37, %s23474_s5  ;;  %v6848_v35 = vmul.f32 %v19485_v33, %v6809_v37  ;;  %v6889_v31 = vadd.f32 %v19528_v40, %v6850_v55 }
 0x5c0   : > { %v6650_v39 = vadd.f32 %v6609_v45, %v6437_v30  ;;  %9722 = vrot.lane.b32.xlu1 %v6808_v11, %s23474_s5  ;;  %v6812_v14 = vsel %vm3797_vm5, %v6652_v18, %v6748_v58 }
 0x5c1   : > { %v6935_v57 = vpack.c.bf16 %v6916_v4, %v6915_v34  ;;  %v6851_v20 = vmul.f32 %v19485_v33, %v6812_v14  ;;  %v6887_v13 = vadd.f32 %v19528_v40, %v6848_v35  ;;  %v6921_v23 = vmax.f32 %v6889_v31, 0.0 }
 0x5c2   : > { %v6810_v7 = vsel %vm3797_vm5, %v6650_v39, %v6744_v8  ;;  %v7991_v8 = vrot.slane %v7309_v59, 2 }
 0x5c3   : > { %15067 = vmatprep.mubr.msk.bf16.mxu0 %vm6955_vm7, %v6935_v57  ;;  %v6849_v9 = vmul.f32 %v19485_v33, %v6810_v7  ;;  %9728 = vrot.lane.b32.xlu0 %v6811_v60, %s23474_s5  ;;  %v6890_v46 = vadd.f32 %v19528_v40, %v6851_v20  ;;  %v6919_v0 = vmax.f32 %v6887_v13, 0.0  ;;  %v15793_v33 = vld [vmem:[%s23301_s18] sm:$0xff]  }
 0x5c4   : > { %9726 = vrot.lane.b32.xlu1 %v6810_v7, %s23474_s5  ;;  %15068 = vmatmul.mubr.msk.bf16.gmra.mxu0 %vm6955_vm7, %v6936_v43 }
 0x5c5   : > { %v6888_v49 = vadd.f32 %v19528_v40, %v6849_v9  ;;  %v6922_v32 = vmax.f32 %v6890_v46, 0.0  ;;  %15109 = vmatprep.subr.bf16.mxu0 %v15793_v33  ;;  %v7308_v40 = vld [vmem:[#allocation2 + $0x8] sm:$0xff] }
 0x5c6   : > { %15110 = vmatpush3.bf16.msra.mxu0 %v15793_v33  ;;  %v7361_v27 = vpack.c.bf16 %v7308_v40, %v7307_v24  ;;  %v7428_v51 = vrot.slane %v7308_v40, 1  ;;  %v7989_v61 = vrot.slane %v7308_v40, 2 }
 0x5c7   : > { %v6920_v63 = vmax.f32 %v6888_v49, 0.0  ;;  %v6938_v22 = vpack.c.bf16 %v6922_v32, %v6921_v23  ;;  %15177 = vmatprep.subr.bf16.mxu0 %v19859_v25 }
 0x5c8   : > { %9730 = vrot.lane.b32.xlu1 %v6812_v14, %s23474_s5  ;;  %v7429_v21 = vsel %vm1458_vm2, %v7427_v53, %v7428_v51  ;;  %v7431_v47 = vsel %vm1458_vm2, %v7428_v51, %v7430_v15  ;;  %v19863_v11 = vsel %vm2020_vm3, %v7988_v19, %v7989_v61  ;;  %v19866_v38 = vsel %vm2020_vm3, %v7989_v61, %v7991_v8 }
 0x5c9   : > { %v6937_v44 = vpack.c.bf16 %v6920_v63, %v6919_v0  ;;  %v7539_v29 = vpack.c.bf16 %v7431_v47, %v7429_v21  ;;  %v19932_v47 = vld [vmem:[%s23301_s18 + $0x28] sm:$0xff]  }
 0x5cb   : > { %15071 = vmatprep.mubr.msk.bf16.mxu0 %vm6955_vm7, %v6937_v44  ;;  %15077 = vmatprep.mubr.msk.bf16.mxu1 %vm764_vm0, %v7539_v29 }
 0x5cc   : > { %15072 = vmatmul.mubr.msk.bf16.gmra.mxu0 %vm6955_vm7, %v6938_v22 }
 0x5cd   : > { %15111 = vmatprep.mubr.msk.bf16.mxu0 %vm764_vm0, %v7361_v27 }
 0x654   : > { %v15045_v16 = vpop.f32.mrf.mxu0 }
 0x655   : > { %v7174_v10 = vmul.f32 %v15045_v16, %v19873_v62 }
 0x656   : > { %v7038_v28 = vpop.f32.mrf.mxu0 }
 0x657   : > { %v7213_v17 = vadd.f32 %v19878_v42, %v7174_v10  ;;  %v7172_v52 = vmul.f32 %v19873_v62, %v7038_v28 }
 0x658   : > { %v15046_v50 = vpop.f32.mrf.mxu0 }
 0x659   : > { %v7245_v2 = vmax.f32 %v7213_v17, 0.0  ;;  %v7211_v6 = vadd.f32 %v19878_v42, %v7172_v52  ;;  %v7175_v1 = vmul.f32 %v15046_v50, %v19873_v62 }
 0x65a   : > { %v7041_v54 = vpop.f32.mrf.mxu0 }
 0x65b   : > { %7277 = vst.msk [vmem:[#allocation2 + $0x31] sm:$0xff] %vm764_vm0, %v7245_v2  ;;  %v7243_v5 = vmax.f32 %v7211_v6, 0.0  ;;  %v7214_v3 = vadd.f32 %v19878_v42, %v7175_v1  ;;  %v7173_v60 = vmul.f32 %v19873_v62, %v7041_v54 }
 0x65c   : > { %v15049_v41 = vpop.f32.mrf.mxu0 }
 0x65d   : > { %7275 = vst.msk [vmem:[#allocation2 + $0x19] sm:$0xff] %vm764_vm0, %v7243_v5  ;;  %v7246_v12 = vmax.f32 %v7214_v3, 0.0  ;;  %v7212_v26 = vadd.f32 %v19878_v42, %v7173_v60  ;;  %v7178_v48 = vmul.f32 %v15049_v41, %v19873_v62 }
 0x65e   : > { %v7054_v55 = vpop.f32.mrf.mxu0 }
 0x65f   : > { %7278 = vst.msk [vmem:[#allocation2 + $0x39] sm:$0xff] %vm764_vm0, %v7246_v12  ;;  %v7244_v30 = vmax.f32 %v7212_v26, 0.0  ;;  %v7217_v18 = vadd.f32 %v19878_v42, %v7178_v48  ;;  %v7176_v37 = vmul.f32 %v19873_v62, %v7054_v55  ;;  %v19964_v12 = vld [vmem:[%s23301_s18 + $0x20] sm:$0xff]  }
 0x660   : > { %v15050_v58 = vpop.f32.mrf.mxu0 }
 0x661   : > { %7276 = vst.msk [vmem:[#allocation2 + $0x21] sm:$0xff] %vm764_vm0, %v7244_v30  ;;  %v7249_v34 = vmax.f32 %v7217_v18, 0.0  ;;  %v7215_v4 = vadd.f32 %v19878_v42, %v7176_v37  ;;  %v7179_v45 = vmul.f32 %v15050_v58, %v19873_v62 }
 0x662   : > { %v7057_v43 = vpop.f32.mrf.mxu0  ;;  %v19900_v31 = vld [vmem:[#allocation2 + $0x30] sm:$0xff] }
 0x663   : > { %7281 = vst.msk [vmem:[#allocation2 + $0x61] sm:$0xff] %vm764_vm0, %v7249_v34  ;;  %v7247_v35 = vmax.f32 %v7215_v4, 0.0  ;;  %v7218_v39 = vadd.f32 %v19878_v42, %v7179_v45  ;;  %v7177_v14 = vmul.f32 %v19873_v62, %v7057_v43  ;;  %v7437_v22 = vrot.slane %v19900_v31, 1 }
 0x664   : > { %v15053_v57 = vpop.f32.mrf.mxu0  ;;  %v19905_v9 = vld [vmem:[#allocation2 + $0x18] sm:$0xff] }
 0x665   : > { %7279 = vst.msk [vmem:[#allocation2 + $0x49] sm:$0xff] %vm764_vm0, %v7247_v35  ;;  %v7250_v20 = vmax.f32 %v7218_v39, 0.0  ;;  %v7216_v7 = vadd.f32 %v19878_v42, %v7177_v14  ;;  %v7182_v13 = vmul.f32 %v15053_v57, %v19873_v62  ;;  %v7432_v40 = vrot.slane %v19905_v9, 1 }
 0x666   : > { %v7070_v46 = vpop.f32.mrf.mxu0  ;;  %v19907_v49 = vld [vmem:[#allocation2 + $0x38] sm:$0xff]  ;;  %v19909_v23 = vld [vmem:[#allocation2 + $0x40] sm:$0x3] }
 0x667   : > { %7282 = vst.msk [vmem:[#allocation2 + $0x69] sm:$0xff] %vm764_vm0, %v7250_v20  ;;  %v7248_v32 = vmax.f32 %v7216_v7, 0.0  ;;  %v7221_v0 = vadd.f32 %v19878_v42, %v7182_v13  ;;  %v7180_v63 = vmul.f32 %v19873_v62, %v7070_v46  ;;  %v7438_v27 = vrot.slane %v19907_v49, 1 }
 0x668   : > { %v15054_v44 = vpop.f32.mrf.mxu0  ;;  %v19915_v33 = vld [vmem:[#allocation2 + $0x20] sm:$0xff]  ;;  %v19917_v24 = vld [vmem:[#allocation2 + $0x28] sm:$0x3]  ;;  %v7440_v53 = vrot.slane %v19909_v23, 1  ;;  %v19936_v19 = vpack.c.bf16 %v19907_v49, %v19900_v31 }
 0x669   : > { %7280 = vst.msk [vmem:[#allocation2 + $0x51] sm:$0xff] %vm764_vm0, %v7248_v32  ;;  %v7253_v51 = vmax.f32 %v7221_v0, 0.0  ;;  %v7219_v59 = vadd.f32 %v19878_v42, %v7180_v63  ;;  %v7183_v21 = vmul.f32 %v15054_v44, %v19873_v62  ;;  %v19927_v15 = vpack.c.bf16 %v19915_v33, %v19905_v9 }
 0x66a   : > { %v7073_v29 = vpop.f32.mrf.mxu0  ;;  %v7433_v61 = vrot.slane %v19915_v33, 1  ;;  %v7435_v8 = vrot.slane %v19917_v24, 1  ;;  %v7439_v16 = vsel %vm1458_vm2, %v7437_v22, %v7438_v27  ;;  %v7441_v52 = vsel %vm1458_vm2, %v7438_v27, %v7440_v53  ;;  %v19951_v1 = vld [vmem:[#allocation2 + $0x60] sm:$0xff] }
 0x66b   : > { %7285 = vst.msk [vmem:[#allocation2 + $0x91] sm:$0xff] %vm764_vm0, %v7253_v51  ;;  %v7251_v10 = vmax.f32 %v7219_v59, 0.0  ;;  %v7222_v28 = vadd.f32 %v19878_v42, %v7183_v21  ;;  %v7181_v17 = vmul.f32 %v19873_v62, %v7073_v29  ;;  %15112 = vmatmul.mubr.msk.bf16.vlgmr.msra.gmra.mxu0 %vm764_vm0, %v19927_v15  ;;  %v7447_v58 = vrot.slane %v19951_v1, 1 }
 0x66c   : > { %v15057_v50 = vpop.f32.mrf.mxu0  ;;  %15115 = vmatprep.mubr.msk.bf16.mxu0 %vm764_vm0, %v19936_v19  ;;  %v7434_v2 = vsel %vm1458_vm2, %v7432_v40, %v7433_v61  ;;  %v7436_v6 = vsel %vm1458_vm2, %v7433_v61, %v7435_v8  ;;  %15178 = vmatpush3.bf16.msra.mxu0 %v19859_v25  ;;  %v19959_v41 = vld [vmem:[#allocation2 + $0x48] sm:$0xff]  ;;  %v19967_v25 = vpack.c.bf16 %v7441_v52, %v7439_v16 }
 0x66d   : > { %7283 = vst.msk [vmem:[#allocation2 + $0x79] sm:$0xff] %vm764_vm0, %v7251_v10  ;;  %v7254_v54 = vmax.f32 %v7222_v28, 0.0  ;;  %v7220_v5 = vadd.f32 %v19878_v42, %v7181_v17  ;;  %v7186_v3 = vmul.f32 %v15057_v50, %v19873_v62  ;;  %v19957_v60 = vpack.c.bf16 %v7436_v6, %v7434_v2  ;;  %15245 = vmatprep.subr.bf16.mxu0 %v19932_v47 }
 0x66e   : > { %v7086_v26 = vpop.f32.mrf.mxu0  ;;  %23888 = vst [vmem:[#allocation46_spill] sm:$0xff] %v19967_v25  ;;  %v19969_v48 = vld [vmem:[#allocation2 + $0x68] sm:$0xff]  ;;  %v19971_v55 = vld [vmem:[#allocation2 + $0x70] sm:$0x3]  ;;  %v7442_v43 = vrot.slane %v19959_v41, 1 }
 0x66f   : > { %23887 = vst [vmem:[#allocation36_spill] sm:$0xff] %v19957_v60  ;;  %7286 = vst.msk [vmem:[#allocation2 + $0x99] sm:$0xff] %vm764_vm0, %v7254_v54  ;;  %v7252_v30 = vmax.f32 %v7220_v5, 0.0  ;;  %v7225_v18 = vadd.f32 %v19878_v42, %v7186_v3  ;;  %v7184_v37 = vmul.f32 %v19873_v62, %v7086_v26  ;;  %15078 = vmatmul.mubr.msk.bf16.vlgmr.msra.gmra.mxu1 %vm764_vm0, %v19957_v60  ;;  %v7448_v35 = vrot.slane %v19969_v48, 1 }
 0x670   : > { %15144 = vmatpush3.bf16.msra.mxu1 %v19849_v56  ;;  %15081 = vmatprep.mubr.msk.bf16.mxu1 %vm764_vm0, %v19967_v25  ;;  %v15058_v34 = vpop.f32.mrf.mxu0  ;;  %v19982_v4 = vld [vmem:[#allocation2 + $0x50] sm:$0xff]  ;;  %v19984_v45 = vld [vmem:[#allocation2 + $0x58] sm:$0x3]  ;;  %v7450_v39 = vrot.slane %v19971_v55, 1  ;;  %v19999_v13 = vpack.c.bf16 %v19969_v48, %v19951_v1 }
 0x671   : > { %7284 = vst.msk [vmem:[#allocation2 + $0x81] sm:$0xff] %vm764_vm0, %v7252_v30  ;;  %v7257_v14 = vmax.f32 %v7225_v18, 0.0  ;;  %v7223_v57 = vadd.f32 %v19878_v42, %v7184_v37  ;;  %v7187_v56 = vmul.f32 %v15058_v34, %v19873_v62  ;;  %v19994_v20 = vpack.c.bf16 %v19982_v4, %v19959_v41  ;;  %15211 = vmatprep.subr.bf16.mxu1 %v19964_v12 }
 0x672   : > { %v7089_v7 = vpop.f32.mrf.mxu0  ;;  %v7443_v46 = vrot.slane %v19982_v4, 1  ;;  %v7445_v32 = vrot.slane %v19984_v45, 1  ;;  %v7449_v0 = vsel %vm1458_vm2, %v7447_v58, %v7448_v35  ;;  %v7451_v40 = vsel %vm1458_vm2, %v7448_v35, %v7450_v39  ;;  %v20014_v59 = vld [vmem:[#allocation2 + $0x90] sm:$0xff] }
 0x673   : > { %7289 = vst.msk [vmem:[#allocation2 + $0xc1] sm:$0xff] %vm764_vm0, %v7257_v14  ;;  %v7255_v63 = vmax.f32 %v7223_v57, 0.0  ;;  %v7226_v22 = vadd.f32 %v19878_v42, %v7187_v56  ;;  %v7185_v44 = vmul.f32 %v19873_v62, %v7089_v7  ;;  %15116 = vmatmul.mubr.msk.bf16.gmra.mxu0 %vm764_vm0, %v19994_v20  ;;  %v20023_v28 = vpack.c.bf16 %v7451_v40, %v7449_v0 }
 0x674   : > { %v15061_v27 = vpop.f32.mrf.mxu0  ;;  %15119 = vmatprep.mubr.msk.bf16.mxu0 %vm764_vm0, %v19999_v13  ;;  %v7444_v53 = vsel %vm1458_vm2, %v7442_v43, %v7443_v46  ;;  %v7446_v51 = vsel %vm1458_vm2, %v7443_v46, %v7445_v32  ;;  %v20021_v16 = vld [vmem:[#allocation2 + $0x78] sm:$0xff]  ;;  %v7457_v54 = vrot.slane %v20014_v59, 1 }
 0x675   : > { %7287 = vst.msk [vmem:[#allocation2 + $0xa9] sm:$0xff] %vm764_vm0, %v7255_v63  ;;  %v7258_v21 = vmax.f32 %v7226_v22, 0.0  ;;  %v7224_v29 = vadd.f32 %v19878_v42, %v7185_v44  ;;  %v7190_v61 = vmul.f32 %v15061_v27, %v19873_v62  ;;  %v20019_v8 = vpack.c.bf16 %v7446_v51, %v7444_v53  ;;  %23890 = vst [vmem:[#allocation49_spill] sm:$0xff] %v20023_v28 }
 0x676   : > { %v7102_v10 = vpop.f32.mrf.mxu0  ;;  %v20025_v17 = vld [vmem:[#allocation2 + $0x98] sm:$0xff]  ;;  %v20027_v52 = vld [vmem:[#allocation2 + $0xa0] sm:$0x3]  ;;  %v7452_v30 = vrot.slane %v20021_v16, 1 }
 0x677   : > { %23889 = vst [vmem:[#allocation34_spill] sm:$0xff] %v20019_v8  ;;  %7290 = vst.msk [vmem:[#allocation2 + $0xc9] sm:$0xff] %vm764_vm0, %v7258_v21  ;;  %v7256_v50 = vmax.f32 %v7224_v29, 0.0  ;;  %v7229_v2 = vadd.f32 %v19878_v42, %v7190_v61  ;;  %v7188_v6 = vmul.f32 %v19873_v62, %v7102_v10  ;;  %15082 = vmatmul.mubr.msk.bf16.gmra.mxu1 %vm764_vm0, %v20019_v8  ;;  %v7458_v18 = vrot.slane %v20025_v17, 1 }
 0x678   : > { %15085 = vmatprep.mubr.msk.bf16.mxu1 %vm764_vm0, %v20023_v28  ;;  %v15062_v5 = vpop.f32.mrf.mxu0  ;;  %v20037_v3 = vld [vmem:[#allocation2 + $0x80] sm:$0xff]  ;;  %v20039_v26 = vld [vmem:[#allocation2 + $0x88] sm:$0x3]  ;;  %v7460_v37 = vrot.slane %v20027_v52, 1  ;;  %v20053_v14 = vpack.c.bf16 %v20025_v17, %v20014_v59 }
 0x679   : > { %7288 = vst.msk [vmem:[#allocation2 + $0xb1] sm:$0xff] %vm764_vm0, %v7256_v50  ;;  %v7261_v58 = vmax.f32 %v7229_v2, 0.0  ;;  %v7227_v34 = vadd.f32 %v19878_v42, %v7188_v6  ;;  %v7191_v43 = vmul.f32 %v15062_v5, %v19873_v62  ;;  %v20049_v35 = vpack.c.bf16 %v20037_v3, %v20021_v16 }
 0x67a   : > { %v7105_v39 = vpop.f32.mrf.mxu0  ;;  %v7453_v57 = vrot.slane %v20037_v3, 1  ;;  %v7455_v56 = vrot.slane %v20039_v26, 1  ;;  %v7459_v7 = vsel %vm1458_vm2, %v7457_v54, %v7458_v18  ;;  %v7461_v63 = vsel %vm1458_vm2, %v7458_v18, %v7460_v37  ;;  %v20068_v27 = vld [vmem:[#allocation2 + $0xc0] sm:$0xff] }
 0x67b   : > { %7293 = vst.msk [vmem:[#allocation2 + $0xf1] sm:$0xff] %vm764_vm0, %v7261_v58  ;;  %v7259_v46 = vmax.f32 %v7227_v34, 0.0  ;;  %v7230_v32 = vadd.f32 %v19878_v42, %v7191_v43  ;;  %v7189_v0 = vmul.f32 %v19873_v62, %v7105_v39  ;;  %15120 = vmatmul.mubr.msk.bf16.gmra.mxu0 %vm764_vm0, %v20049_v35  ;;  %v20077_v50 = vpack.c.bf16 %v7461_v63, %v7459_v7 }
 0x67c   : > { %v15065_v22 = vpop.f32.mrf.mxu0  ;;  %15123 = vmatprep.mubr.msk.bf16.mxu0 %vm764_vm0, %v20053_v14  ;;  %v7454_v44 = vsel %vm1458_vm2, %v7452_v30, %v7453_v57  ;;  %v7456_v40 = vsel %vm1458_vm2, %v7453_v57, %v7455_v56  ;;  %v20075_v61 = vld [vmem:[#allocation2 + $0xa8] sm:$0xff]  ;;  %v7467_v18 = vrot.slane %v20068_v27, 1 }
 0x67d   : > { %7291 = vst.msk [vmem:[#allocation2 + $0xd9] sm:$0xff] %vm764_vm0, %v7259_v46  ;;  %v7262_v53 = vmax.f32 %v7230_v32, 0.0  ;;  %v7228_v51 = vadd.f32 %v19878_v42, %v7189_v0  ;;  %v7194_v21 = vmul.f32 %v15065_v22, %v19873_v62  ;;  %v20073_v29 = vpack.c.bf16 %v7456_v40, %v7454_v44  ;;  %23892 = vst [vmem:[#allocation45_spill] sm:$0xff] %v20077_v50 }
 0x67e   : > { %v7118_v10 = vpop.f32.mrf.mxu0  ;;  %v20079_v2 = vld [vmem:[#allocation2 + $0xc8] sm:$0xff]  ;;  %v20081_v6 = vld [vmem:[#allocation2 + $0xd0] sm:$0x3]  ;;  %v7462_v43 = vrot.slane %v20075_v61, 1 }
 0x67f   : > { %23891 = vst [vmem:[#allocation30_spill] sm:$0xff] %v20073_v29  ;;  %7294 = vst.msk [vmem:[#allocation2 + $0xf9] sm:$0xff] %vm764_vm0, %v7262_v53  ;;  %v7260_v54 = vmax.f32 %v7228_v51, 0.0  ;;  %v7233_v5 = vadd.f32 %v19878_v42, %v7194_v21  ;;  %v7192_v30 = vmul.f32 %v19873_v62, %v7118_v10  ;;  %15086 = vmatmul.mubr.msk.bf16.gmra.mxu1 %vm764_vm0, %v20073_v29  ;;  %v7468_v39 = vrot.slane %v20079_v2, 1 }
 0x680   : > { %15089 = vmatprep.mubr.msk.bf16.mxu1 %vm764_vm0, %v20077_v50  ;;  %v15066_v37 = vpop.f32.mrf.mxu0  ;;  %v20091_v58 = vld [vmem:[#allocation2 + $0xb0] sm:$0xff]  ;;  %v20093_v34 = vld [vmem:[#allocation2 + $0xb8] sm:$0x3]  ;;  %v7470_v57 = vrot.slane %v20081_v6, 1  ;;  %v20107_v63 = vpack.c.bf16 %v20079_v2, %v20068_v27 }
 0x681   : > { %7292 = vst.msk [vmem:[#allocation2 + $0xe1] sm:$0xff] %vm764_vm0, %v7260_v54  ;;  %v7265_v56 = vmax.f32 %v7233_v5, 0.0  ;;  %v7231_v7 = vadd.f32 %v19878_v42, %v7192_v30  ;;  %v7195_v46 = vmul.f32 %v15066_v37, %v19873_v62  ;;  %v20103_v32 = vpack.c.bf16 %v20091_v58, %v20075_v61 }
 0x682   : > { %v7121_v0 = vpop.f32.mrf.mxu0  ;;  %v7463_v22 = vrot.slane %v20091_v58, 1  ;;  %v7465_v44 = vrot.slane %v20093_v34, 1  ;;  %v7469_v40 = vsel %vm1458_vm2, %v7467_v18, %v7468_v39  ;;  %v7471_v10 = vsel %vm1458_vm2, %v7468_v39, %v7470_v57  ;;  %v20122_v18 = vld [vmem:[#allocation2 + $0xf0] sm:$0xff] }
 0x683   : > { %7297 = vst.msk [vmem:[#allocation2 + $0x121] sm:$0xff] %vm764_vm0, %v7265_v56  ;;  %v7263_v53 = vmax.f32 %v7231_v7, 0.0  ;;  %v7234_v51 = vadd.f32 %v19878_v42, %v7195_v46  ;;  %v7193_v21 = vmul.f32 %v19873_v62, %v7121_v0  ;;  %15124 = vmatmul.mubr.msk.bf16.gmra.mxu0 %vm764_vm0, %v20103_v32  ;;  %23893 = vst [vmem:[#allocation61_spill] sm:$0xff] %v20122_v18 }
 0x684   : > { %v15069_v54 = vpop.f32.mrf.mxu0  ;;  %15127 = vmatprep.mubr.msk.bf16.mxu0 %vm764_vm0, %v20107_v63  ;;  %v7464_v5 = vsel %vm1458_vm2, %v7462_v43, %v7463_v22  ;;  %v7466_v30 = vsel %vm1458_vm2, %v7463_v22, %v7465_v44  ;;  %v20129_v39 = vld [vmem:[#allocation2 + $0xd8] sm:$0xff]  ;;  %v20131_v0 = vpack.c.bf16 %v7471_v10, %v7469_v40 }
 0x685   : > { %7295 = vst.msk [vmem:[#allocation2 + $0x109] sm:$0xff] %vm764_vm0, %v7263_v53  ;;  %v7266_v37 = vmax.f32 %v7234_v51, 0.0  ;;  %v7232_v56 = vadd.f32 %v19878_v42, %v7193_v21  ;;  %v7198_v7 = vmul.f32 %v15069_v54, %v19873_v62  ;;  %v20127_v46 = vpack.c.bf16 %v7466_v30, %v7464_v5  ;;  %23895 = vst [vmem:[#allocation35_spill] sm:$0xff] %v20129_v39 }
 0x686   : > { %v7134_v57 = vpop.f32.mrf.mxu0  ;;  %23896 = vst [vmem:[#allocation31_spill] sm:$0xff] %v20131_v0  ;;  %v20133_v36 = vld [vmem:[#allocation2 + $0xf8] sm:$0xff]  ;;  %v20135_v43 = vld [vmem:[#allocation2 + $0x100] sm:$0x3]  ;;  %v7477_v51 = vrot.slane %v20122_v18, 1  ;;  %v7472_v54 = vrot.slane %v20129_v39, 1 }
 0x687   : > { %23894 = vst [vmem:[#allocation52_spill] sm:$0xff] %v20127_v46  ;;  %7298 = vst.msk [vmem:[#allocation2 + $0x129] sm:$0xff] %vm764_vm0, %v7266_v37  ;;  %v7264_v22 = vmax.f32 %v7232_v56, 0.0  ;;  %v7237_v44 = vadd.f32 %v19878_v42, %v7198_v7  ;;  %v7196_v53 = vmul.f32 %v19873_v62, %v7134_v57  ;;  %15090 = vmatmul.mubr.msk.bf16.gmra.mxu1 %vm764_vm0, %v20127_v46  ;;  %v7478_v5 = vrot.slane %v20133_v36, 1 }
 0x688   : > { %15093 = vmatprep.mubr.msk.bf16.mxu1 %vm764_vm0, %v20131_v0  ;;  %v15070_v40 = vpop.f32.mrf.mxu0  ;;  %v20145_v21 = vld [vmem:[#allocation2 + $0xe0] sm:$0xff]  ;;  %v20147_v10 = vld [vmem:[#allocation2 + $0xe8] sm:$0x3]  ;;  %v7480_v30 = vrot.slane %v20135_v43, 1  ;;  %v20161_v46 = vpack.c.bf16 %v20133_v36, %v20122_v18 }
 0x689   : > { %7296 = vst.msk [vmem:[#allocation2 + $0x111] sm:$0xff] %vm764_vm0, %v7264_v22  ;;  %v7269_v37 = vmax.f32 %v7237_v44, 0.0  ;;  %v7235_v56 = vadd.f32 %v19878_v42, %v7196_v53  ;;  %v7199_v7 = vmul.f32 %v15070_v40, %v19873_v62  ;;  %v20157_v57 = vpack.c.bf16 %v20145_v21, %v20129_v39 }
 0x68a   : > { %v7137_v0 = vpop.f32.mrf.mxu0  ;;  %23897 = vst [vmem:[#allocation48_spill] sm:$0xff] %v20161_v46  ;;  %v7473_v50 = vrot.slane %v20145_v21, 1  ;;  %v7475_v29 = vrot.slane %v20147_v10, 1  ;;  %v7479_v22 = vsel %vm1458_vm2, %v7477_v51, %v7478_v5  ;;  %v7481_v28 = vsel %vm1458_vm2, %v7478_v5, %v7480_v30  ;;  %v20176_v60 = vld [vmem:[#allocation2 + $0x120] sm:$0xff] }
 0x68b   : > { %7301 = vst.msk [vmem:[#allocation2 + $0x151] sm:$0xff] %vm764_vm0, %v7269_v37  ;;  %v7267_v44 = vmax.f32 %v7235_v56, 0.0  ;;  %v7238_v53 = vadd.f32 %v19878_v42, %v7199_v7  ;;  %v7197_v40 = vmul.f32 %v19873_v62, %v7137_v0  ;;  %15128 = vmatmul.mubr.msk.bf16.gmra.mxu0 %vm764_vm0, %v20157_v57  ;;  %23898 = vst [vmem:[#allocation47_spill] sm:$0xff] %v20176_v60 }
 0x68c   : > { %v15073_v8 = vpop.f32.mrf.mxu0  ;;  %15131 = vmatprep.mubr.msk.bf16.mxu0 %vm764_vm0, %v20161_v46  ;;  %v7474_v25 = vsel %vm1458_vm2, %v7472_v54, %v7473_v50  ;;  %v7476_v51 = vsel %vm1458_vm2, %v7473_v50, %v7475_v29  ;;  %v20183_v5 = vld [vmem:[#allocation2 + $0x108] sm:$0xff]  ;;  %v20185_v18 = vpack.c.bf16 %v7481_v28, %v7479_v22 }
 0x68d   : > { %7299 = vst.msk [vmem:[#allocation2 + $0x139] sm:$0xff] %vm764_vm0, %v7267_v44  ;;  %v7270_v37 = vmax.f32 %v7238_v53, 0.0  ;;  %v7236_v0 = vadd.f32 %v19878_v42, %v7197_v40  ;;  %v7202_v56 = vmul.f32 %v15073_v8, %v19873_v62  ;;  %v20181_v7 = vpack.c.bf16 %v7476_v51, %v7474_v25  ;;  %23900 = vst [vmem:[#allocation50_spill] sm:$0xff] %v20183_v5 }
 0x68e   : > { %v7150_v30 = vpop.f32.mrf.mxu0  ;;  %23901 = vst [vmem:[#allocation58_spill] sm:$0xff] %v20185_v18  ;;  %v20187_v46 = vld [vmem:[#allocation2 + $0x128] sm:$0xff]  ;;  %v20189_v54 = vld [vmem:[#allocation2 + $0x130] sm:$0x3]  ;;  %v7487_v25 = vrot.slane %v20176_v60, 1  ;;  %v7482_v53 = vrot.slane %v20183_v5, 1 }
 0x68f   : > { %23899 = vst [vmem:[#allocation55_spill] sm:$0xff] %v20181_v7  ;;  %23902 = vst [vmem:[#allocation62_spill] sm:$0xff] %v20187_v46  ;;  %v7268_v29 = vmax.f32 %v7236_v0, 0.0  ;;  %v7241_v50 = vadd.f32 %v19878_v42, %v7202_v56  ;;  %v7200_v44 = vmul.f32 %v19873_v62, %v7150_v30  ;;  %15094 = vmatmul.mubr.msk.bf16.gmra.mxu1 %vm764_vm0, %v20181_v7  ;;  %v7488_v40 = vrot.slane %v20187_v46, 1 }
 0x690   : > { %23903 = vst [vmem:[#allocation33_spill] sm:$0xff] %v20189_v54  ;;  %7302 = vst.msk [vmem:[#allocation2 + $0x159] sm:$0xff] %vm764_vm0, %v7270_v37  ;;  %15097 = vmatprep.mubr.msk.bf16.mxu1 %vm764_vm0, %v20185_v18  ;;  %v15074_v8 = vpop.f32.mrf.mxu0  ;;  %v20199_v28 = vld [vmem:[#allocation2 + $0x110] sm:$0xff]  ;;  %v20201_v22 = vld [vmem:[#allocation2 + $0x118] sm:$0x3]  ;;  %v7490_v51 = vrot.slane %v20189_v54, 1  ;;  %v20215_v7 = vpack.c.bf16 %v20187_v46, %v20176_v60 }
 0x691   : > { %7300 = vst.msk [vmem:[#allocation2 + $0x141] sm:$0xff] %vm764_vm0, %v7268_v29  ;;  %v7273_v37 = vmax.f32 %v7241_v50, 0.0  ;;  %v7239_v0 = vadd.f32 %v19878_v42, %v7200_v44  ;;  %v7203_v56 = vmul.f32 %v15074_v8, %v19873_v62  ;;  %v20211_v30 = vpack.c.bf16 %v20199_v28, %v20183_v5 }
 0x692   : > { %v7153_v18 = vpop.f32.mrf.mxu0  ;;  %v7483_v39 = vrot.slane %v20199_v28, 1  ;;  %v7485_v54 = vrot.slane %v20201_v22, 1  ;;  %v7489_v29 = vsel %vm1458_vm2, %v7487_v25, %v7488_v40  ;;  %v7491_v5 = vsel %vm1458_vm2, %v7488_v40, %v7490_v51 }
 0x693   : > { %7305 = vst.msk [vmem:[#allocation2 + $0x181] sm:$0xff] %vm764_vm0, %v7273_v37  ;;  %v7271_v50 = vmax.f32 %v7239_v0, 0.0  ;;  %v7242_v44 = vadd.f32 %v19878_v42, %v7203_v56  ;;  %v7201_v8 = vmul.f32 %v19873_v62, %v7153_v18  ;;  %15132 = vmatmul.mubr.msk.bf16.gmra.mxu0 %vm764_vm0, %v20211_v30  ;;  %v20234_v62 = vld [vmem:[#allocation2 + $0x150] sm:$0xff]  ;;  %v20236_v18 = vpack.c.bf16 %v7491_v5, %v7489_v29 }
 0x694   : > { %15135 = vmatprep.mubr.msk.bf16.mxu0 %vm764_vm0, %v20215_v7  ;;  %v7484_v60 = vsel %vm1458_vm2, %v7482_v53, %v7483_v39  ;;  %v7486_v46 = vsel %vm1458_vm2, %v7483_v39, %v7485_v54  ;;  %23905 = vst [vmem:[#allocation70_spill] sm:$0xff] %v20234_v62  ;;  %v20238_v56 = vld [vmem:[#allocation2 + $0x138] sm:$0xff]  ;;  %v7497_v54 = vrot.slane %v20234_v62, 1 }
 0x695   : > { %7303 = vst.msk [vmem:[#allocation2 + $0x169] sm:$0xff] %vm764_vm0, %v7271_v50  ;;  %v7274_v25 = vmax.f32 %v7242_v44, 0.0  ;;  %v7240_v37 = vadd.f32 %v19878_v42, %v7201_v8  ;;  %v20232_v0 = vpack.c.bf16 %v7486_v46, %v7484_v60  ;;  %23906 = vst [vmem:[#allocation68_spill] sm:$0xff] %v20236_v18  ;;  %v7492_v29 = vrot.slane %v20238_v56, 1 }
 0x696   : > { %23907 = vst [vmem:[#allocation65_spill] sm:$0xff] %v20238_v56 }
 0x697   : > { %23904 = vst [vmem:[#allocation51_spill] sm:$0xff] %v20232_v0  ;;  %v20240_v40 = vld [vmem:[#allocation2 + $0x158] sm:$0xff]  ;;  %v20242_v51 = vld [vmem:[#allocation2 + $0x160] sm:$0x3]  ;;  %7306 = vst.msk [vmem:[#allocation2 + $0x189] sm:$0xff] %vm764_vm0, %v7274_v25  ;;  %v7272_v39 = vmax.f32 %v7240_v37, 0.0  ;;  %15098 = vmatmul.mubr.msk.bf16.gmra.mxu1 %vm764_vm0, %v20232_v0 }
 0x698   : > { %v7498_v42 = vrot.slane %v20240_v40, 1  ;;  %v7500_v60 = vrot.slane %v20242_v51, 1  ;;  %15101 = vmatprep.mubr.msk.bf16.mxu1 %vm764_vm0, %v20236_v18  ;;  %v20251_v46 = vld [vmem:[#allocation2 + $0x140] sm:$0xff]  ;;  %v20253_v5 = vld [vmem:[#allocation2 + $0x148] sm:$0x3]  ;;  %v20266_v8 = vpack.c.bf16 %v20240_v40, %v20234_v62 }
 0x699   : > { %7304 = vst.msk [vmem:[#allocation2 + $0x171] sm:$0xff] %vm764_vm0, %v7272_v39  ;;  %v20259_v53 = vpack.c.bf16 %v20251_v46, %v20238_v56  ;;  %v7493_v50 = vrot.slane %v20251_v46, 1  ;;  %v7495_v44 = vrot.slane %v20253_v5, 1 }
 0x69a   : > { %v7499_v39 = vsel %vm1458_vm2, %v7497_v54, %v7498_v42  ;;  %v7501_v18 = vsel %vm1458_vm2, %v7498_v42, %v7500_v60 }
 0x69b   : > { %15136 = vmatmul.mubr.msk.bf16.gmra.mxu0 %vm764_vm0, %v20259_v53  ;;  %v7494_v25 = vsel %vm1458_vm2, %v7492_v29, %v7493_v50  ;;  %v7496_v37 = vsel %vm1458_vm2, %v7493_v50, %v7495_v44  ;;  %v20278_v56 = vpack.c.bf16 %v7501_v18, %v7499_v39  ;;  %v7994_v39 = vrot.slane %v19915_v33, 2  ;;  %v20320_v33 = vld [vmem:[%s23301_s18 + $0x38] sm:$0xff]  }
 0x69c   : > { %15139 = vmatprep.mubr.msk.bf16.mxu0 %vm764_vm0, %v20266_v8  ;;  %v20276_v0 = vpack.c.bf16 %v7496_v37, %v7494_v25  ;;  %v20280_v62 = vld [vmem:[#allocation2 + $0x168] sm:$0xff] }
 0x69d   : > { %23909 = vst [vmem:[#allocation67_spill] sm:$0xff] %v20278_v56  ;;  %23910 = vst [vmem:[#allocation64_spill] sm:$0xff] %v20280_v62  ;;  %v7502_v60 = vrot.slane %v20280_v62, 1 }
 0x69e   : > { %23908 = vst [vmem:[#allocation54_spill] sm:$0xff] %v20276_v0 }
 0x69f   : > { %15102 = vmatmul.mubr.msk.bf16.gmra.mxu1 %vm764_vm0, %v20276_v0  ;;  %v7999_v0 = vrot.slane %v19907_v49, 2 }
 0x6a0   : > { %15105 = vmatprep.mubr.msk.bf16.mxu1 %vm764_vm0, %v20278_v56  ;;  %v20286_v29 = vld [vmem:[#allocation2 + $0x170] sm:$0xff]  ;;  %v20288_v54 = vld [vmem:[#allocation2 + $0x178] sm:$0x3]  ;;  %v7996_v56 = vrot.slane %v19917_v24, 2 }
 0x6a1   : > { %v20292_v42 = vpack.c.bf16 %v20286_v29, %v20280_v62  ;;  %v7503_v18 = vrot.slane %v20286_v29, 1  ;;  %v7505_v50 = vrot.slane %v20288_v54, 1  ;;  %v8001_v62 = vrot.slane %v19909_v23, 2 }
 0x6a2   : > { %v7997_v49 = vsel %vm2020_vm3, %v7994_v39, %v7996_v56  ;;  %v8004_v56 = vrot.slane %v19982_v4, 2 }
 0x6a3   : > { %15140 = vmatmul.mubr.msk.bf16.gmra.mxu0 %vm764_vm0, %v20292_v42  ;;  %v7504_v44 = vsel %vm1458_vm2, %v7502_v60, %v7503_v18  ;;  %v7506_v25 = vsel %vm1458_vm2, %v7503_v18, %v7505_v50  ;;  %v23911_v60 = vpack.c.bf16 %v19866_v38, %v19863_v11  ;;  %v7998_v18 = vrot.slane %v19900_v31, 2 }
 0x6a4   : > { %15179 = vmatprep.mubr.msk.bf16.mxu0 %vm764_vm0, %v19927_v15  ;;  %v20303_v37 = vpack.c.bf16 %v7506_v25, %v7504_v44  ;;  %v7993_v15 = vrot.slane %v19905_v9, 2  ;;  %v8002_v38 = vsel %vm2020_vm3, %v7999_v0, %v8001_v62  ;;  %v20336_v9 = vld [vmem:[%s23301_s18 + $0x30] sm:$0xff]   ;;  %v8011_v62 = vrot.slane %v19971_v55, 2 }
 0x6a5   : > { %v8000_v11 = vsel %vm2020_vm3, %v7998_v18, %v7999_v0  ;;  %v8006_v0 = vrot.slane %v19984_v45, 2  ;;  %v8003_v50 = vrot.slane %v19959_v41, 2  ;;  %v8008_v44 = vrot.slane %v19951_v1, 2 }
 0x6a6   : > { %v7995_v24 = vsel %vm2020_vm3, %v7993_v15, %v7994_v39  ;;  %v20339_v23 = vpack.c.bf16 %v8002_v38, %v8000_v11  ;;  %v8014_v1 = vrot.slane %v20037_v3, 2  ;;  %v8016_v25 = vrot.slane %v20039_v26, 2 }
 0x6a7   : > { %15106 = vmatmul.mubr.msk.bf16.gmra.mxu1 %vm764_vm0, %v20303_v37  ;;  %v20331_v31 = vpack.c.bf16 %v7997_v49, %v7995_v24  ;;  %v8005_v4 = vsel %vm2020_vm3, %v8003_v50, %v8004_v56  ;;  %v8007_v45 = vsel %vm2020_vm3, %v8004_v56, %v8006_v0  ;;  %v8019_v39 = vrot.slane %v20025_v17, 2 }
 0x6a8   : > { %15145 = vmatprep.mubr.msk.bf16.mxu1 %vm764_vm0, %v23911_v60  ;;  %v20361_v55 = vpack.c.bf16 %v8007_v45, %v8005_v4  ;;  %v8021_v60 = vrot.slane %v20027_v52, 2  ;;  %v8013_v15 = vrot.slane %v20021_v16, 2  ;;  %v8018_v18 = vrot.slane %v20014_v59, 2  ;;  %v23912_v4 = vld [vmem:[#allocation35_spill] sm:$0xff] }
 0x6a9   : > { %v8017_v3 = vsel %vm2020_vm3, %v8014_v1, %v8016_v25  ;;  %v8024_v59 = vrot.slane %v20091_v58, 2  ;;  %v8026_v16 = vrot.slane %v20093_v34, 2  ;;  %v8029_v11 = vrot.slane %v20079_v2, 2  ;;  %v23914_v25 = vld [vmem:[#allocation48_spill] sm:$0xff] }
 0x6aa   : > { %v8015_v24 = vsel %vm2020_vm3, %v8013_v15, %v8014_v1  ;;  %v8020_v26 = vsel %vm2020_vm3, %v8018_v18, %v8019_v39  ;;  %v8022_v17 = vsel %vm2020_vm3, %v8019_v39, %v8021_v60  ;;  %v8031_v38 = vrot.slane %v20081_v6, 2  ;;  %v23915_v18 = vld [vmem:[#allocation62_spill] sm:$0xff] }
 0x6ab   : > { %15180 = vmatmul.mubr.msk.bf16.vlgmr.msra.gmra.mxu0 %vm764_vm0, %v19936_v19  ;;  %v20383_v52 = vpack.c.bf16 %v8017_v3, %v8015_v24  ;;  %v20385_v49 = vpack.c.bf16 %v8022_v17, %v8020_v26  ;;  %v8023_v56 = vrot.slane %v20075_v61, 2  ;;  %v8028_v0 = vrot.slane %v20068_v27, 2  ;;  %v23916_v3 = vld [vmem:[#allocation33_spill] sm:$0xff]  ;;  %v23917_v17 = vld [vmem:[#allocation50_spill] sm:$0xff] }
 0x6ac   : > { %15183 = vmatprep.mubr.msk.bf16.mxu0 %vm764_vm0, %v19994_v20  ;;  %15246 = vmatpush3.bf16.msra.mxu0 %v19932_v47  ;;  %v8009_v47 = vrot.slane %v19969_v48, 2  ;;  %v8027_v58 = vsel %vm2020_vm3, %v8024_v59, %v8026_v16  ;;  %v8032_v2 = vsel %vm2020_vm3, %v8029_v11, %v8031_v38  ;;  %v8034_v27 = vrot.slane %v20145_v21, 2  ;;  %v23918_v16 = vld [vmem:[#allocation47_spill] sm:$0xff] }
 0x6ad   : > { %15313 = vmatprep.subr.bf16.mxu0 %v20320_v33  ;;  %v8030_v34 = vsel %vm2020_vm3, %v8028_v0, %v8029_v11  ;;  %v8036_v61 = vrot.slane %v20147_v10, 2  ;;  %v8039_v50 = vrot.slane %v20133_v36, 2  ;;  %v8033_v45 = vrot.slane %v23912_v4, 2 }
 0x6ae   : > { %v8010_v48 = vsel %vm2020_vm3, %v8008_v44, %v8009_v47  ;;  %v8041_v44 = vrot.slane %v20135_v43, 2  ;;  %v8044_v60 = vrot.slane %v20199_v28, 2  ;;  %v8046_v15 = vrot.slane %v20201_v22, 2 }
 0x6af   : > { %15146 = vmatmul.mubr.msk.bf16.vlgmr.msra.gmra.mxu1 %vm764_vm0, %v20331_v31  ;;  %v8035_v1 = vsel %vm2020_vm3, %v8033_v45, %v8034_v27  ;;  %v8037_v21 = vsel %vm2020_vm3, %v8034_v27, %v8036_v61  ;;  %v8049_v24 = vrot.slane %v23915_v18, 2  ;;  %v8051_v26 = vrot.slane %v23916_v3, 2  ;;  %v23919_v61 = vld [vmem:[#allocation65_spill] sm:$0xff]  ;;  %v23923_v3 = vld [vmem:[#allocation46_spill] sm:$0xff] }
 0x6b0   : > { %15212 = vmatpush3.bf16.msra.mxu1 %v19964_v12  ;;  %15149 = vmatprep.mubr.msk.bf16.mxu1 %vm764_vm0, %v20339_v23  ;;  %v8012_v12 = vsel %vm2020_vm3, %v8009_v47, %v8011_v62  ;;  %v8025_v47 = vsel %vm2020_vm3, %v8023_v56, %v8024_v59  ;;  %v20407_v62 = vpack.c.bf16 %v8032_v2, %v8030_v34  ;;  %v8043_v59 = vrot.slane %v23917_v17, 2  ;;  %v23926_v17 = vld [vmem:[#allocation30_spill] sm:$0xff] }
 0x6b1   : > { %15279 = vmatprep.subr.bf16.mxu1 %v20336_v9  ;;  %v20363_v41 = vpack.c.bf16 %v8012_v12, %v8010_v48  ;;  %v20405_v6 = vpack.c.bf16 %v8027_v58, %v8025_v47  ;;  %v23913_v48 = vld [vmem:[#allocation61_spill] sm:$0xff]  ;;  %v8042_v36 = vsel %vm2020_vm3, %v8039_v50, %v8041_v44  ;;  %v20427_v43 = vpack.c.bf16 %v8037_v21, %v8035_v1  ;;  %v23920_v44 = vld [vmem:[#allocation70_spill] sm:$0xff] }
 0x6b2   : > { %v8038_v12 = vrot.slane %v23913_v48, 2  ;;  %v8048_v11 = vrot.slane %v23918_v16, 2  ;;  %v8045_v38 = vsel %vm2020_vm3, %v8043_v59, %v8044_v60  ;;  %v8047_v28 = vsel %vm2020_vm3, %v8044_v60, %v8046_v15  ;;  %v23928_v59 = vld [vmem:[#allocation52_spill] sm:$0xff]  ;;  %v23929_v16 = vld [vmem:[#allocation31_spill] sm:$0xff] }
 0x6b3   : > { %15184 = vmatmul.mubr.msk.bf16.gmra.mxu0 %vm764_vm0, %v19999_v13  ;;  %v8052_v56 = vsel %vm2020_vm3, %v8049_v24, %v8051_v26  ;;  %v20449_v0 = vpack.c.bf16 %v8047_v28, %v8045_v38  ;;  %v8054_v58 = vrot.slane %v20251_v46, 2  ;;  %v8056_v34 = vrot.slane %v20253_v5, 2  ;;  %v23924_v26 = vld [vmem:[#allocation34_spill] sm:$0xff]  ;;  %v23932_v28 = vld [vmem:[#allocation51_spill] sm:$0xff] }
 0x6b4   : > { %15187 = vmatprep.mubr.msk.bf16.mxu0 %vm764_vm0, %v20049_v35  ;;  %v8040_v10 = vsel %vm2020_vm3, %v8038_v12, %v8039_v50  ;;  %v8050_v22 = vsel %vm2020_vm3, %v8048_v11, %v8049_v24  ;;  %v8059_v2 = vrot.slane %v20240_v40, 2  ;;  %v8061_v27 = vrot.slane %v20242_v51, 2  ;;  %v7356_v12 = vld [vmem:[#allocation2 + $0x188] sm:$0xff]  ;;  %v23930_v11 = vld [vmem:[#allocation55_spill] sm:$0xff]  ;;  %v23931_v38 = vld [vmem:[#allocation58_spill] sm:$0xff] }
 0x6b5   : > { %v20429_v39 = vpack.c.bf16 %v8042_v36, %v8040_v10  ;;  %v20451_v47 = vpack.c.bf16 %v8052_v56, %v8050_v22  ;;  %v8053_v50 = vrot.slane %v23919_v61, 2  ;;  %v8058_v4 = vrot.slane %v23920_v44, 2  ;;  %v7355_v10 = vld [vmem:[#allocation2 + $0x180] sm:$0xff]  ;;  %v23921_v36 = vld [vmem:[#allocation64_spill] sm:$0xff]  ;;  %v7357_v56 = vld [vmem:[#allocation2 + $0x190] sm:$0x3] }
 0x6b6   : > { %v8057_v46 = vsel %vm2020_vm3, %v8054_v58, %v8056_v34  ;;  %v8062_v40 = vsel %vm2020_vm3, %v8059_v2, %v8061_v27  ;;  %v8064_v1 = vrot.slane %v20286_v29, 2  ;;  %v8066_v21 = vrot.slane %v20288_v54, 2  ;;  %v23922_v54 = vld [vmem:[#allocation36_spill] sm:$0xff] }
 0x6b7   : > { %15150 = vmatmul.mubr.msk.bf16.gmra.mxu1 %vm764_vm0, %v20361_v55  ;;  %v8055_v45 = vsel %vm2020_vm3, %v8053_v50, %v8054_v58  ;;  %v8060_v5 = vsel %vm2020_vm3, %v8058_v4, %v8059_v2  ;;  %v8063_v60 = vrot.slane %v23921_v36, 2  ;;  %v20482_v15 = vpack.c.bf16 %v7356_v12, %v7355_v10  ;;  %v23933_v22 = vld [vmem:[#allocation68_spill] sm:$0xff]  ;;  %v23934_v58 = vld [vmem:[#allocation54_spill] sm:$0xff] }
 0x6b8   : > { %15153 = vmatprep.mubr.msk.bf16.mxu1 %vm764_vm0, %v20363_v41  ;;  %v20471_v51 = vpack.c.bf16 %v8057_v46, %v8055_v45  ;;  %v20473_v48 = vpack.c.bf16 %v8062_v40, %v8060_v5  ;;  %v8067_v24 = vsel %vm2020_vm3, %v8064_v1, %v8066_v21  ;;  %v8789_v34 = vrot.slane %v7356_v12, 2  ;;  %v23935_v45 = vld [vmem:[#allocation67_spill] sm:$0xff]  ;;  %v20568_v21 = vld [vmem:[#allocation2 + $0x198] sm:$0xff] }
 0x6b9   : > { %v8065_v18 = vsel %vm2020_vm3, %v8063_v60, %v8064_v1  ;;  %v8791_v2 = vrot.slane %v7357_v56, 2  ;;  %v8788_v27 = vrot.slane %v7355_v10, 2  ;;  %v8576_v44 = vrot.slane %v7356_v12, 1  ;;  %v20570_v12 = vld [vmem:[#allocation2 + $0x1a0] sm:$0xff] }
 0x6ba   : > { %v20490_v29 = vpack.c.bf16 %v8067_v24, %v8065_v18  ;;  %v8578_v4 = vrot.slane %v7357_v56, 1  ;;  %v8575_v46 = vrot.slane %v7355_v10, 1  ;;  %v9423_v36 = vrot.slane %v20568_v21, 2  ;;  %v20580_v18 = vld [vmem:[#allocation2 + $0x1a8] sm:$0x3] }
 0x6bb   : > { %15188 = vmatmul.mubr.msk.bf16.gmra.mxu0 %vm764_vm0, %v20053_v14  ;;  %v8790_v61 = vsel %vm2020_vm3, %v8788_v27, %v8789_v34  ;;  %v8792_v50 = vsel %vm2020_vm3, %v8789_v34, %v8791_v2  ;;  %v9424_v10 = vrot.slane %v20570_v12, 2 }
 0x6bc   : > { %15191 = vmatprep.mubr.msk.bf16.mxu0 %vm764_vm0, %v20103_v32  ;;  %v20562_v5 = vpack.c.bf16 %v8792_v50, %v8790_v61  ;;  %v8577_v40 = vsel %vm1458_vm2, %v8575_v46, %v8576_v44  ;;  %v8579_v1 = vsel %vm1458_vm2, %v8576_v44, %v8578_v4 }
 0x6bd   : > { %v20576_v60 = vpack.c.bf16 %v8579_v1, %v8577_v40  ;;  %v20585_v24 = vsel %vm2020_vm3, %v9423_v36, %v9424_v10 }
 0x6bf   : > { %15154 = vmatmul.mubr.msk.bf16.gmra.mxu1 %vm764_vm0, %v20383_v52 }
 0x6c0   : > { %15157 = vmatprep.mubr.msk.bf16.mxu1 %vm764_vm0, %v20385_v49 }
 0x6c3   : > { %15192 = vmatmul.mubr.msk.bf16.gmra.mxu0 %vm764_vm0, %v20107_v63 }
 0x6c4   : > { %15195 = vmatprep.mubr.msk.bf16.mxu0 %vm764_vm0, %v20157_v57 }
 0x6c7   : > { %15158 = vmatmul.mubr.msk.bf16.gmra.mxu1 %vm764_vm0, %v20405_v6 }
 0x6c8   : > { %15161 = vmatprep.mubr.msk.bf16.mxu1 %vm764_vm0, %v20407_v62 }
 0x6cb   : > { %15196 = vmatmul.mubr.msk.bf16.gmra.mxu0 %vm764_vm0, %v23914_v25 }
 0x6cc   : > { %15199 = vmatprep.mubr.msk.bf16.mxu0 %vm764_vm0, %v20211_v30 }
 0x6cf   : > { %15162 = vmatmul.mubr.msk.bf16.gmra.mxu1 %vm764_vm0, %v20427_v43 }
 0x6d0   : > { %15165 = vmatprep.mubr.msk.bf16.mxu1 %vm764_vm0, %v20429_v39 }
 0x6d3   : > { %15200 = vmatmul.mubr.msk.bf16.gmra.mxu0 %vm764_vm0, %v20215_v7 }
 0x6d4   : > { %15203 = vmatprep.mubr.msk.bf16.mxu0 %vm764_vm0, %v20259_v53 }
 0x6d7   : > { %15166 = vmatmul.mubr.msk.bf16.gmra.mxu1 %vm764_vm0, %v20449_v0 }
 0x6d8   : > { %15169 = vmatprep.mubr.msk.bf16.mxu1 %vm764_vm0, %v20451_v47 }
 0x6db   : > { %15204 = vmatmul.mubr.msk.bf16.gmra.mxu0 %vm764_vm0, %v20266_v8 }
 0x6dc   : > { %15207 = vmatprep.mubr.msk.bf16.mxu0 %vm764_vm0, %v20292_v42 }
 0x6df   : > { %15170 = vmatmul.mubr.msk.bf16.gmra.mxu1 %vm764_vm0, %v20471_v51 }
 0x6e0   : > { %15173 = vmatprep.mubr.msk.bf16.mxu1 %vm764_vm0, %v20473_v48 }
 0x6e3   : > { %15208 = vmatmul.mubr.msk.bf16.gmra.mxu0 %vm764_vm0, %v20482_v15 }
 0x6e4   : > { %15247 = vmatprep.mubr.msk.bf16.mxu0 %vm764_vm0, %v20331_v31  ;;  %v20504_v31 = vld [vmem:[%s23301_s18 + $0x40] sm:$0xff]  }
 0x6e7   : > { %15174 = vmatmul.mubr.msk.bf16.gmra.mxu1 %vm764_vm0, %v20490_v29 }
 0x6e8   : > { %15213 = vmatprep.mubr.msk.bf16.mxu1 %vm764_vm0, %v23922_v54  ;;  %v9426_v54 = vrot.slane %v20580_v18, 2 }
 0x6eb   : > { %15248 = vmatmul.mubr.msk.bf16.vlgmr.msra.gmra.mxu0 %vm764_vm0, %v20339_v23 }
 0x6ec   : > { %15251 = vmatprep.mubr.msk.bf16.mxu0 %vm764_vm0, %v20361_v55  ;;  %15314 = vmatpush3.bf16.msra.mxu0 %v20320_v33  ;;  %v23925_v33 = vld [vmem:[#allocation49_spill] sm:$0xff] }
 0x6ef   : > { %15214 = vmatmul.mubr.msk.bf16.vlgmr.msra.gmra.mxu1 %vm764_vm0, %v23923_v3 }
 0x6f0   : > { %15280 = vmatpush3.bf16.msra.mxu1 %v20336_v9  ;;  %15217 = vmatprep.mubr.msk.bf16.mxu1 %vm764_vm0, %v23924_v26  ;;  %v23927_v9 = vld [vmem:[#allocation45_spill] sm:$0xff] }
 0x6f1   : > { %15347 = vmatprep.subr.bf16.mxu1 %v20504_v31 }
 0x6f3   : > { %15252 = vmatmul.mubr.msk.bf16.gmra.mxu0 %vm764_vm0, %v20363_v41 }
 0x6f4   : > { %15255 = vmatprep.mubr.msk.bf16.mxu0 %vm764_vm0, %v20383_v52 }
 0x6f7   : > { %15218 = vmatmul.mubr.msk.bf16.gmra.mxu1 %vm764_vm0, %v23925_v33 }
 0x6f8   : > { %15221 = vmatprep.mubr.msk.bf16.mxu1 %vm764_vm0, %v23926_v17 }
 0x6fb   : > { %15256 = vmatmul.mubr.msk.bf16.gmra.mxu0 %vm764_vm0, %v20385_v49 }
 0x6fc   : > { %15259 = vmatprep.mubr.msk.bf16.mxu0 %vm764_vm0, %v20405_v6 }
 0x6ff   : > { %15222 = vmatmul.mubr.msk.bf16.gmra.mxu1 %vm764_vm0, %v23927_v9 }
 0x700   : > { %15225 = vmatprep.mubr.msk.bf16.mxu1 %vm764_vm0, %v23928_v59 }
 0x703   : > { %15260 = vmatmul.mubr.msk.bf16.gmra.mxu0 %vm764_vm0, %v20407_v62 }
 0x704   : > { %15263 = vmatprep.mubr.msk.bf16.mxu0 %vm764_vm0, %v20427_v43 }
 0x707   : > { %15226 = vmatmul.mubr.msk.bf16.gmra.mxu1 %vm764_vm0, %v23929_v16 }
 0x708   : > { %15229 = vmatprep.mubr.msk.bf16.mxu1 %vm764_vm0, %v23930_v11 }
 0x70b   : > { %15264 = vmatmul.mubr.msk.bf16.gmra.mxu0 %vm764_vm0, %v20429_v39 }
 0x70c   : > { %15267 = vmatprep.mubr.msk.bf16.mxu0 %vm764_vm0, %v20449_v0 }
 0x70f   : > { %15230 = vmatmul.mubr.msk.bf16.gmra.mxu1 %vm764_vm0, %v23931_v38 }
 0x710   : > { %15233 = vmatprep.mubr.msk.bf16.mxu1 %vm764_vm0, %v23932_v28 }
 0x713   : > { %15268 = vmatmul.mubr.msk.bf16.gmra.mxu0 %vm764_vm0, %v20451_v47 }
 0x714   : > { %15271 = vmatprep.mubr.msk.bf16.mxu0 %vm764_vm0, %v20471_v51 }
 0x717   : > { %15234 = vmatmul.mubr.msk.bf16.gmra.mxu1 %vm764_vm0, %v23933_v22 }
 0x718   : > { %15237 = vmatprep.mubr.msk.bf16.mxu1 %vm764_vm0, %v23934_v58 }
 0x71b   : > { %15272 = vmatmul.mubr.msk.bf16.gmra.mxu0 %vm764_vm0, %v20473_v48 }
 0x71c   : > { %15275 = vmatprep.mubr.msk.bf16.mxu0 %vm764_vm0, %v20490_v29 }
 0x71f   : > { %15238 = vmatmul.mubr.msk.bf16.gmra.mxu1 %vm764_vm0, %v23935_v45 }
 0x720   : > { %15241 = vmatprep.mubr.msk.bf16.mxu1 %vm764_vm0, %v20303_v37 }
 0x723   : > { %15276 = vmatmul.mubr.msk.bf16.gmra.mxu0 %vm764_vm0, %v20562_v5 }
 0x724   : > { %15315 = vmatprep.mubr.msk.bf16.mxu0 %vm764_vm0, %v23923_v3  ;;  %v20589_v3 = vsel %vm2020_vm3, %v9424_v10, %v9426_v54 }
 0x727   : > { %15242 = vmatmul.mubr.msk.bf16.gmra.mxu1 %vm764_vm0, %v20576_v60 }
 0x728   : > { %15281 = vmatprep.mubr.msk.bf16.mxu1 %vm764_vm0, %v19936_v19 }
 0x72b   : > { %v15113_v56 = vpop.f32.mrf.mxu0  ;;  %15316 = vmatmul.mubr.msk.bf16.vlgmr.msra.gmra.mxu0 %vm764_vm0, %v23924_v26 }
 0x72c   : > { %15319 = vmatprep.mubr.msk.bf16.mxu0 %vm764_vm0, %v23925_v33 }
 0x72d   : > { %v7861_v2 = vpop.f32.mrf.mxu0 }
 0x72f   : > { %v15079_v19 = vpop.f32.mrf.mxu1  ;;  %15282 = vmatmul.mubr.msk.bf16.vlgmr.msra.gmra.mxu1 %vm764_vm0, %v19994_v20  ;;  %v15114_v27 = vpop.f32.mrf.mxu0 }
 0x730   : > { %v20599_v61 = vadd.f32 %v15113_v56, %v15079_v19  ;;  %15348 = vmatpush3.bf16.msra.mxu1 %v20504_v31  ;;  %15285 = vmatprep.mubr.msk.bf16.mxu1 %vm764_vm0, %v19999_v13 }
 0x731   : > { %v7646_v26 = vpop.f32.mrf.mxu1  ;;  %v7864_v50 = vpop.f32.mrf.mxu0 }
 0x732   : > { %v20604_v44 = vadd.f32 %v7861_v2, %v7646_v26 }
 0x733   : > { %v15080_v4 = vpop.f32.mrf.mxu1  ;;  %v15117_v46 = vpop.f32.mrf.mxu0  ;;  %15320 = vmatmul.mubr.msk.bf16.gmra.mxu0 %vm764_vm0, %v23926_v17 }
 0x734   : > { %v20608_v33 = vadd.f32 %v15114_v27, %v15080_v4  ;;  %15323 = vmatprep.mubr.msk.bf16.mxu0 %vm764_vm0, %v23927_v9 }
 0x735   : > { %v7649_v20 = vpop.f32.mrf.mxu1  ;;  %v7877_v40 = vpop.f32.mrf.mxu0 }
 0x736   : > { %v20612_v31 = vadd.f32 %v7864_v50, %v7649_v20 }
 0x737   : > { %v15083_v1 = vpop.f32.mrf.mxu1  ;;  %15286 = vmatmul.mubr.msk.bf16.gmra.mxu1 %vm764_vm0, %v20049_v35  ;;  %v15118_v13 = vpop.f32.mrf.mxu0 }
 0x738   : > { %v20616_v36 = vadd.f32 %v15117_v46, %v15083_v1  ;;  %15289 = vmatprep.mubr.msk.bf16.mxu1 %vm764_vm0, %v20053_v14 }
 0x739   : > { %v7662_v17 = vpop.f32.mrf.mxu1  ;;  %v7880_v10 = vpop.f32.mrf.mxu0 }
 0x73a   : > { %v20620_v54 = vadd.f32 %v7877_v40, %v7662_v17 }
 0x73b   : > { %v15084_v56 = vpop.f32.mrf.mxu1  ;;  %v15121_v9 = vpop.f32.mrf.mxu0  ;;  %15324 = vmatmul.mubr.msk.bf16.gmra.mxu0 %vm764_vm0, %v23928_v59 }
 0x73c   : > { %v20624_v2 = vadd.f32 %v15118_v13, %v15084_v56  ;;  %15327 = vmatprep.mubr.msk.bf16.mxu0 %vm764_vm0, %v23929_v16 }
 0x73d   : > { %v7665_v35 = vpop.f32.mrf.mxu1  ;;  %v7893_v19 = vpop.f32.mrf.mxu0 }
 0x73e   : > { %v20628_v27 = vadd.f32 %v7880_v10, %v7665_v35 }
 0x73f   : > { %v15087_v26 = vpop.f32.mrf.mxu1  ;;  %15290 = vmatmul.mubr.msk.bf16.gmra.mxu1 %vm764_vm0, %v20103_v32  ;;  %v15122_v14 = vpop.f32.mrf.mxu0 }
 0x740   : > { %v20632_v50 = vadd.f32 %v15121_v9, %v15087_v26  ;;  %15293 = vmatprep.mubr.msk.bf16.mxu1 %vm764_vm0, %v20107_v63 }
 0x741   : > { %v7678_v59 = vpop.f32.mrf.mxu1  ;;  %v7896_v4 = vpop.f32.mrf.mxu0 }
 0x742   : > { %v20636_v46 = vadd.f32 %v7893_v19, %v7678_v59 }
 0x743   : > { %v15088_v20 = vpop.f32.mrf.mxu1  ;;  %v15125_v16 = vpop.f32.mrf.mxu0  ;;  %15328 = vmatmul.mubr.msk.bf16.gmra.mxu0 %vm764_vm0, %v23930_v11 }
 0x744   : > { %v20640_v40 = vadd.f32 %v15122_v14, %v15088_v20  ;;  %15331 = vmatprep.mubr.msk.bf16.mxu0 %vm764_vm0, %v23931_v38 }
 0x745   : > { %v7681_v32 = vpop.f32.mrf.mxu1  ;;  %v7909_v1 = vpop.f32.mrf.mxu0 }
 0x746   : > { %v20644_v13 = vadd.f32 %v7896_v4, %v7681_v32 }
 0x747   : > { %v15091_v17 = vpop.f32.mrf.mxu1  ;;  %15294 = vmatmul.mubr.msk.bf16.gmra.mxu1 %vm764_vm0, %v20157_v57  ;;  %v15126_v63 = vpop.f32.mrf.mxu0 }
 0x748   : > { %v20648_v10 = vadd.f32 %v15125_v16, %v15091_v17  ;;  %15297 = vmatprep.mubr.msk.bf16.mxu1 %vm764_vm0, %v23914_v25 }
 0x749   : > { %v7694_v11 = vpop.f32.mrf.mxu1  ;;  %v7912_v56 = vpop.f32.mrf.mxu0 }
 0x74a   : > { %v20652_v9 = vadd.f32 %v7909_v1, %v7694_v11 }
 0x74b   : > { %v15092_v35 = vpop.f32.mrf.mxu1  ;;  %v15129_v38 = vpop.f32.mrf.mxu0  ;;  %15332 = vmatmul.mubr.msk.bf16.gmra.mxu0 %vm764_vm0, %v23932_v28 }
 0x74c   : > { %v20656_v19 = vadd.f32 %v15126_v63, %v15092_v35  ;;  %15335 = vmatprep.mubr.msk.bf16.mxu0 %vm764_vm0, %v23933_v22  ;;  %v9213_v35 = vrot.slane %v20580_v18, 1 }
 0x74d   : > { %v7697_v57 = vpop.f32.mrf.mxu1  ;;  %v7925_v26 = vpop.f32.mrf.mxu0 }
 0x74e   : > { %v20660_v14 = vadd.f32 %v7912_v56, %v7697_v57  ;;  %v9211_v56 = vrot.slane %v20570_v12, 1 }
 0x74f   : > { %v15095_v59 = vpop.f32.mrf.mxu1  ;;  %15298 = vmatmul.mubr.msk.bf16.gmra.mxu1 %vm764_vm0, %v20211_v30  ;;  %v15130_v25 = vpop.f32.mrf.mxu0 }
 0x750   : > { %v20664_v4 = vadd.f32 %v15129_v38, %v15095_v59  ;;  %15301 = vmatprep.mubr.msk.bf16.mxu1 %vm764_vm0, %v20215_v7 }
 0x751   : > { %v7710_v28 = vpop.f32.mrf.mxu1  ;;  %v20668_v20 = vpop.f32.mrf.mxu0 }
 0x752   : > { %v20670_v16 = vadd.f32 %v7925_v26, %v7710_v28 }
 0x753   : > { %v15096_v22 = vpop.f32.mrf.mxu1  ;;  %v15133_v32 = vpop.f32.mrf.mxu0  ;;  %15336 = vmatmul.mubr.msk.bf16.gmra.mxu0 %vm764_vm0, %v23934_v58  ;;  %v9210_v58 = vrot.slane %v20568_v21, 1 }
 0x754   : > { %v20674_v1 = vadd.f32 %v15130_v25, %v15096_v22  ;;  %15339 = vmatprep.mubr.msk.bf16.mxu0 %vm764_vm0, %v23935_v45  ;;  %v9214_v25 = vsel %vm1458_vm2, %v9211_v56, %v9213_v35  ;;  %v9001_v35 = vpack.c.bf16 %v20570_v12, %v20568_v21 }
 0x755   : > { %v20678_v30 = vpop.f32.mrf.mxu1  ;;  %v7941_v17 = vpop.f32.mrf.mxu0 }
 0x757   : > { %v15099_v63 = vpop.f32.mrf.mxu1  ;;  %15302 = vmatmul.mubr.msk.bf16.gmra.mxu1 %vm764_vm0, %v20259_v53  ;;  %v15134_v7 = vpop.f32.mrf.mxu0 }
 0x758   : > { %v20682_v11 = vadd.f32 %v15133_v32, %v15099_v63  ;;  %15305 = vmatprep.mubr.msk.bf16.mxu1 %vm764_vm0, %v20266_v8  ;;  %v9212_v8 = vsel %vm1458_vm2, %v9210_v58, %v9211_v56 }
 0x759   : > { %v7726_v45 = vpop.f32.mrf.mxu1  ;;  %v20689_v38 = vpop.f32.mrf.mxu0 }
 0x75a   : > { %v20691_v57 = vadd.f32 %v7941_v17, %v7726_v45  ;;  %v9217_v17 = vpack.c.bf16 %v9214_v25, %v9212_v8 }
 0x75b   : > { %v15100_v26 = vpop.f32.mrf.mxu1  ;;  %v15137_v59 = vpop.f32.mrf.mxu0  ;;  %15340 = vmatmul.mubr.msk.bf16.gmra.mxu0 %vm764_vm0, %v20303_v37 }
 0x75c   : > { %v20695_v53 = vadd.f32 %v15134_v7, %v15100_v26  ;;  %15343 = vmatprep.mubr.msk.bf16.mxu0 %vm764_vm0, %v20576_v60 }
 0x75d   : > { %v20701_v18 = vpop.f32.mrf.mxu1  ;;  %v7957_v28 = vpop.f32.mrf.mxu0 }
 0x75f   : > { %v15103_v22 = vpop.f32.mrf.mxu1  ;;  %15306 = vmatmul.mubr.msk.bf16.gmra.mxu1 %vm764_vm0, %v20292_v42  ;;  %v15138_v32 = vpop.f32.mrf.mxu0 }
 0x760   : > { %v20705_v63 = vadd.f32 %v15137_v59, %v15103_v22  ;;  %15309 = vmatprep.mubr.msk.bf16.mxu1 %vm764_vm0, %v20482_v15 }
 0x761   : > { %v7742_v37 = vpop.f32.mrf.mxu1  ;;  %v20709_v60 = vpop.f32.mrf.mxu0 }
 0x762   : > { %v20711_v7 = vadd.f32 %v7957_v28, %v7742_v37 }
 0x763   : > { %v15104_v58 = vpop.f32.mrf.mxu1  ;;  %v15141_v56 = vpop.f32.mrf.mxu0  ;;  %15344 = vmatmul.mubr.msk.bf16.gmra.mxu0 %vm764_vm0, %v9217_v17 }
 0x764   : > { %v20716_v42 = vadd.f32 %v15138_v32, %v15104_v58 }
 0x765   : > { %v20718_v45 = vpop.f32.mrf.mxu1  ;;  %v7973_v26 = vpop.f32.mrf.mxu0 }
 0x767   : > { %v15107_v59 = vpop.f32.mrf.mxu1  ;;  %15310 = vmatmul.mubr.msk.bf16.gmra.mxu1 %vm764_vm0, %v9001_v35  ;;  %v15142_v15 = vpop.f32.mrf.mxu0 }
 0x768   : > { %v20721_v8 = vadd.f32 %v15141_v56, %v15107_v59  ;;  %15349 = vmatprep.mubr.msk.bf16.mxu1 %vm764_vm0, %v20339_v23 }
 0x769   : > { %v7758_v25 = vpop.f32.mrf.mxu1  ;;  %v20725_v28 = vpop.f32.mrf.mxu0 }
 0x76a   : > { %23936 = vst [vmem:[#allocation66_spill] sm:$0xff] %v20725_v28  ;;  %v20727_v21 = vadd.f32 %v7973_v26, %v7758_v25 }
 0x76b   : > { %v15108_v12 = vpop.f32.mrf.mxu1  ;;  %v15181_v22 = vpop.f32.mrf.mxu0 }
 0x76c   : > { %v20729_v32 = vadd.f32 %v15142_v15, %v15108_v12 }
 0x76d   : > { %v20731_v17 = vpop.f32.mrf.mxu1  ;;  %v8413_v37 = vpop.f32.mrf.mxu0 }
 0x76e   : > { %23937 = vst [vmem:[#allocation37_spill] sm:$0xff] %v20731_v17 }
 0x76f   : > { %v15147_v58 = vpop.f32.mrf.mxu1  ;;  %15350 = vmatmul.mubr.msk.bf16.vlgmr.msra.gmra.mxu1 %vm764_vm0, %v20361_v55  ;;  %v15182_v56 = vpop.f32.mrf.mxu0 }
 0x770   : > { %v8336_v35 = vadd.f32 %v15147_v58, %v20599_v61  ;;  %15353 = vmatprep.mubr.msk.bf16.mxu1 %vm764_vm0, %v20363_v41 }
 0x771   : > { %v8207_v23 = vpop.f32.mrf.mxu1  ;;  %v20738_v26 = vpop.f32.mrf.mxu0 }
 0x772   : > { %v8334_v59 = vadd.f32 %v8207_v23, %v20604_v44  ;;  %v20741_v15 = vadd.f32 %v15181_v22, %v8336_v35 }
 0x773   : > { %v15148_v25 = vpop.f32.mrf.mxu1  ;;  %v15185_v12 = vpop.f32.mrf.mxu0 }
 0x774   : > { %v8337_v34 = vadd.f32 %v15148_v25, %v20608_v33  ;;  %v20744_v28 = vadd.f32 %v8413_v37, %v8334_v59 }
 0x775   : > { %v8210_v55 = vpop.f32.mrf.mxu1  ;;  %v8429_v17 = vpop.f32.mrf.mxu0 }
 0x776   : > { %v20747_v61 = vadd.f32 %v8210_v55, %v20612_v31  ;;  %v20749_v58 = vadd.f32 %v15182_v56, %v8337_v34 }
 0x777   : > { %v15151_v41 = vpop.f32.mrf.mxu1  ;;  %15354 = vmatmul.mubr.msk.bf16.gmra.mxu1 %vm764_vm0, %v20383_v52  ;;  %v15186_v44 = vpop.f32.mrf.mxu0 }
 0x778   : > { %v8340_v22 = vadd.f32 %v15151_v41, %v20616_v36  ;;  %15357 = vmatprep.mubr.msk.bf16.mxu1 %vm764_vm0, %v20385_v49 }
 0x779   : > { %v8223_v33 = vpop.f32.mrf.mxu1  ;;  %v20756_v37 = vpop.f32.mrf.mxu0 }
 0x77a   : > { %v8338_v35 = vadd.f32 %v8223_v33, %v20620_v54  ;;  %v20759_v23 = vadd.f32 %v15185_v12, %v8340_v22 }
 0x77b   : > { %v15152_v31 = vpop.f32.mrf.mxu1  ;;  %v15189_v34 = vpop.f32.mrf.mxu0 }
 0x77c   : > { %v8341_v56 = vadd.f32 %v15152_v31, %v20624_v2  ;;  %v20762_v59 = vadd.f32 %v8429_v17, %v8338_v35 }
 0x77d   : > { %v8226_v52 = vpop.f32.mrf.mxu1  ;;  %v8445_v25 = vpop.f32.mrf.mxu0 }
 0x77e   : > { %v20765_v36 = vadd.f32 %v8226_v52, %v20628_v27  ;;  %v20767_v55 = vadd.f32 %v15186_v44, %v8341_v56  ;;  %v15801_v27 = vld [vmem:[%s23304_s21 + $0x10] ss:$0 sps:$4 sm:$0xff]  }
 0x77f   : > { %v15155_v49 = vpop.f32.mrf.mxu1  ;;  %15358 = vmatmul.mubr.msk.bf16.gmra.mxu1 %vm764_vm0, %v20405_v6  ;;  %v15190_v54 = vpop.f32.mrf.mxu0  ;;  %15726 = vmatprep.subr.msk.bf16.mxu0 %vm4017_vm4, %v15801_v27 }
 0x780   : > { %v8344_v12 = vadd.f32 %v15155_v49, %v20632_v50  ;;  %15361 = vmatprep.mubr.msk.bf16.mxu1 %vm764_vm0, %v20407_v62  ;;  %v9992_v62 = vsel %vm4017_vm4, %v15801_v27, 0 }
 0x781   : > { %v8239_v2 = vpop.f32.mrf.mxu1  ;;  %v20774_v17 = vpop.f32.mrf.mxu0  ;;  %15382 = vmatpush3.bf16.msra.mxu0 %v9992_v62 }
 0x782   : > { %v8342_v41 = vadd.f32 %v8239_v2, %v20636_v46  ;;  %v20777_v22 = vadd.f32 %v15189_v34, %v8344_v12 }
 0x783   : > { %v15156_v44 = vpop.f32.mrf.mxu1  ;;  %v15193_v33 = vpop.f32.mrf.mxu0 }
 0x784   : > { %v8345_v6 = vadd.f32 %v15156_v44, %v20640_v40  ;;  %v20783_v35 = vadd.f32 %v8445_v25, %v8342_v41 }
 0x785   : > { %v8242_v50 = vpop.f32.mrf.mxu1  ;;  %v8461_v31 = vpop.f32.mrf.mxu0 }
 0x786   : > { %v20788_v46 = vadd.f32 %v8242_v50, %v20644_v13  ;;  %v20790_v34 = vadd.f32 %v15190_v54, %v8345_v6 }
 0x787   : > { %v15159_v56 = vpop.f32.mrf.mxu1  ;;  %15362 = vmatmul.mubr.msk.bf16.gmra.mxu1 %vm764_vm0, %v20427_v43  ;;  %v15194_v52 = vpop.f32.mrf.mxu0 }
 0x788   : > { %v8348_v40 = vadd.f32 %v15159_v56, %v20648_v10  ;;  %15365 = vmatprep.mubr.msk.bf16.mxu1 %vm764_vm0, %v20429_v39 }
 0x789   : > { %v8255_v25 = vpop.f32.mrf.mxu1  ;;  %v20797_v49 = vpop.f32.mrf.mxu0 }
 0x78a   : > { %v8346_v12 = vadd.f32 %v8255_v25, %v20652_v9  ;;  %v20800_v2 = vadd.f32 %v15193_v33, %v8348_v40 }
 0x78b   : > { %v15160_v13 = vpop.f32.mrf.mxu1  ;;  %v15197_v54 = vpop.f32.mrf.mxu0 }
 0x78c   : > { %v8349_v41 = vadd.f32 %v15160_v13, %v20656_v19  ;;  %v20803_v27 = vadd.f32 %v8461_v31, %v8346_v12 }
 0x78d   : > { %v8258_v43 = vpop.f32.mrf.mxu1  ;;  %v8477_v44 = vpop.f32.mrf.mxu0 }
 0x78e   : > { %v20806_v10 = vadd.f32 %v8258_v43, %v20660_v14  ;;  %v20808_v6 = vadd.f32 %v15194_v52, %v8349_v41 }
 0x78f   : > { %v15163_v39 = vpop.f32.mrf.mxu1  ;;  %15366 = vmatmul.mubr.msk.bf16.gmra.mxu1 %vm764_vm0, %v20449_v0  ;;  %v15198_v9 = vpop.f32.mrf.mxu0 }
 0x790   : > { %v8352_v33 = vadd.f32 %v15163_v39, %v20664_v4  ;;  %15369 = vmatprep.mubr.msk.bf16.mxu1 %vm764_vm0, %v20451_v47 }
 0x791   : > { %v8271_v19 = vpop.f32.mrf.mxu1  ;;  %v20815_v62 = vpop.f32.mrf.mxu0 }
 0x792   : > { %v8350_v50 = vadd.f32 %v8271_v19, %v20670_v16  ;;  %v20818_v31 = vadd.f32 %v15197_v54, %v8352_v33 }
 0x793   : > { %v15164_v14 = vpop.f32.mrf.mxu1  ;;  %v15201_v56 = vpop.f32.mrf.mxu0 }
 0x794   : > { %v8353_v52 = vadd.f32 %v15164_v14, %v20674_v1  ;;  %v20821_v40 = vadd.f32 %v8477_v44, %v8350_v50  ;;  %v15802_v1 = vld [vmem:[%s23304_s21 + $0x8] sm:$0xff]  }
 0x795   : > { %v20823_v0 = vpop.f32.mrf.mxu1  ;;  %v8493_v25 = vpop.f32.mrf.mxu0  ;;  %15383 = vmatprep.subr.bf16.mxu0 %v15802_v1 }
 0x796   : > { %v20825_v4 = vadd.f32 %v15198_v9, %v8353_v52  ;;  %15384 = vmatpush3.bf16.msra.mxu0 %v15802_v1 }
 0x797   : > { %v15167_v12 = vpop.f32.mrf.mxu1  ;;  %15370 = vmatmul.mubr.msk.bf16.gmra.mxu1 %vm764_vm0, %v20471_v51  ;;  %v15202_v47 = vpop.f32.mrf.mxu0 }
 0x798   : > { %v8356_v16 = vadd.f32 %v15167_v12, %v20682_v11  ;;  %15373 = vmatprep.mubr.msk.bf16.mxu1 %vm764_vm0, %v20473_v48 }
 0x799   : > { %v8287_v13 = vpop.f32.mrf.mxu1  ;;  %v20835_v54 = vpop.f32.mrf.mxu0 }
 0x79a   : > { %v8354_v41 = vadd.f32 %v8287_v13, %v20691_v57  ;;  %v20838_v43 = vadd.f32 %v15201_v56, %v8356_v16 }
 0x79b   : > { %v15168_v44 = vpop.f32.mrf.mxu1  ;;  %v15205_v51 = vpop.f32.mrf.mxu0 }
 0x79c   : > { %v8357_v11 = vadd.f32 %v15168_v44, %v20695_v53  ;;  %v20841_v39 = vadd.f32 %v8493_v25, %v8354_v41 }
 0x79d   : > { %v20843_v48 = vpop.f32.mrf.mxu1  ;;  %v8509_v9 = vpop.f32.mrf.mxu0 }
 0x79e   : > { %v20845_v33 = vadd.f32 %v15202_v47, %v8357_v11 }
 0x79f   : > { %v15171_v19 = vpop.f32.mrf.mxu1  ;;  %15374 = vmatmul.mubr.msk.bf16.gmra.mxu1 %vm764_vm0, %v20490_v29  ;;  %v15206_v57 = vpop.f32.mrf.mxu0 }
 0x7a0   : > { %v8360_v50 = vadd.f32 %v15171_v19, %v20705_v63  ;;  %15377 = vmatprep.mubr.msk.bf16.mxu1 %vm764_vm0, %v20562_v5  ;;  %v23938_v5 = vpack.c.bf16 %v20589_v3, %v20585_v24  ;;  %v15803_v24 = vld [vmem:[%s23304_s21] sm:$0xff]  }
 0x7a1   : > { %v8303_v14 = vpop.f32.mrf.mxu1  ;;  %v20852_v56 = vpop.f32.mrf.mxu0  ;;  %15385 = vmatprep.subr.bf16.mxu0 %v15803_v24 }
 0x7a2   : > { %v8358_v53 = vadd.f32 %v8303_v14, %v20711_v7  ;;  %v20855_v52 = vadd.f32 %v15205_v51, %v8360_v50  ;;  %15386 = vmatpush3.bf16.msra.mxu0 %v15803_v24 }
 0x7a3   : > { %v15172_v25 = vpop.f32.mrf.mxu1  ;;  %v15209_v12 = vpop.f32.mrf.mxu0 }
 0x7a4   : > { %v8361_v47 = vadd.f32 %v15172_v25, %v20716_v42  ;;  %v20858_v16 = vadd.f32 %v8509_v9, %v8358_v53 }
 0x7a5   : > { %v20860_v29 = vpop.f32.mrf.mxu1  ;;  %v8525_v1 = vpop.f32.mrf.mxu0 }
 0x7a6   : > { %v20862_v63 = vadd.f32 %v15206_v57, %v8361_v47 }
 0x7a7   : > { %v15175_v13 = vpop.f32.mrf.mxu1  ;;  %15378 = vmatmul.mubr.msk.bf16.gmra.mxu1 %vm764_vm0, %v23938_v5  ;;  %v15210_v7 = vpop.f32.mrf.mxu0 }
 0x7a8   : > { %v8364_v41 = vadd.f32 %v15175_v13, %v20721_v8 }
 0x7a9   : > { %v8319_v44 = vpop.f32.mrf.mxu1  ;;  %v20869_v51 = vpop.f32.mrf.mxu0 }
 0x7aa   : > { %v8362_v42 = vadd.f32 %v8319_v44, %v20727_v21  ;;  %v20872_v11 = vadd.f32 %v15209_v12, %v8364_v41 }
 0x7ab   : > { %v15176_v9 = vpop.f32.mrf.mxu1  ;;  %v20874_v19 = vpop.f32.mrf.mxu0 }
 0x7ac   : > { %v8365_v57 = vadd.f32 %v15176_v9, %v20729_v32  ;;  %v20877_v50 = vadd.f32 %v8525_v1, %v8362_v42 }
 0x7ad   : > { %v20882_v3 = vpop.f32.mrf.mxu1  ;;  %v20884_v8 = vpop.f32.mrf.mxu0 }
 0x7ae   : > { %v20886_v14 = vadd.f32 %v15210_v7, %v8365_v57 }
 0x7af   : > { %v15215_v21 = vpop.f32.mrf.mxu1  ;;  %v20888_v53 = vpop.f32.mrf.mxu0 }
 0x7b0   : > { %v20891_v25 = vadd.f32 %v15215_v21, %v20741_v15 }
 0x7b1   : > { %v8629_v32 = vpop.f32.mrf.mxu1  ;;  %v20893_v12 = vpop.f32.mrf.mxu0 }
 0x7b2   : > { %v20896_v47 = vadd.f32 %v8629_v32, %v20744_v28 }
 0x7b3   : > { %v15216_v1 = vpop.f32.mrf.mxu1  ;;  %v20898_v13 = vpop.f32.mrf.mxu0 }
 0x7b4   : > { %v20901_v5 = vadd.f32 %v15216_v1, %v20749_v58 }
 0x7b5   : > { %v20903_v7 = vpop.f32.mrf.mxu1  ;;  %v20905_v41 = vpop.f32.mrf.mxu0 }
 0x7b6   : > { %23939 = vst [vmem:[#allocation72_spill] sm:$0xff] %v20905_v41 }
 0x7b7   : > { %v15219_v44 = vpop.f32.mrf.mxu1  ;;  %v20907_v42 = vpop.f32.mrf.mxu0 }
 0x7b8   : > { %23940 = vst [vmem:[#allocation77_spill] sm:$0xff] %v20907_v42  ;;  %v20910_v15 = vadd.f32 %v15219_v44, %v20759_v23 }
 0x7b9   : > { %v8645_v9 = vpop.f32.mrf.mxu1  ;;  %v20912_v57 = vpop.f32.mrf.mxu0 }
 0x7ba   : > { %23941 = vst [vmem:[#allocation69_spill] sm:$0xff] %v20912_v57  ;;  %v20915_v28 = vadd.f32 %v8645_v9, %v20762_v59 }
 0x7bb   : > { %v15220_v24 = vpop.f32.mrf.mxu1  ;;  %v20917_v21 = vpop.f32.mrf.mxu0 }
 0x7bc   : > { %23942 = vst [vmem:[#allocation71_spill] sm:$0xff] %v20917_v21  ;;  %v20920_v58 = vadd.f32 %v15220_v24, %v20767_v55 }
 0x7bd   : > { %v20922_v32 = vpop.f32.mrf.mxu1  ;;  %v20924_v1 = vpop.f32.mrf.mxu0 }
 0x7be   : > { %23943 = vst [vmem:[#allocation23_spill] sm:$0xff] %v20920_v58  ;;  %23944 = vst [vmem:[#allocation39_spill] sm:$0xff] %v20924_v1 }
 0x7bf   : > { %v15223_v42 = vpop.f32.mrf.mxu1  ;;  %v20926_v41 = vpop.f32.mrf.mxu0 }
 0x7c0   : > { %23945 = vst [vmem:[#allocation56_spill] sm:$0xff] %v20926_v41  ;;  %v20929_v23 = vadd.f32 %v15223_v42, %v20777_v22 }
 0x7c1   : > { %v8661_v44 = vpop.f32.mrf.mxu1  ;;  %v20931_v57 = vpop.f32.mrf.mxu0 }
 0x7c2   : > { %23946 = vst [vmem:[#allocation73_spill] sm:$0xff] %v20931_v57  ;;  %v20934_v59 = vadd.f32 %v8661_v44, %v20783_v35 }
 0x7c3   : > { %v15224_v9 = vpop.f32.mrf.mxu1  ;;  %v20936_v21 = vpop.f32.mrf.mxu0 }
 0x7c4   : > { %23947 = vst [vmem:[#allocation38_spill] sm:$0xff] %v20936_v21  ;;  %v20939_v55 = vadd.f32 %v15224_v9, %v20790_v34 }
 0x7c5   : > { %v20941_v24 = vpop.f32.mrf.mxu1  ;;  %v20943_v1 = vpop.f32.mrf.mxu0 }
 0x7c6   : > { %23948 = vst [vmem:[#allocation20_spill] sm:$0xff] %v20939_v55  ;;  %23949 = vst [vmem:[#allocation74_spill] sm:$0xff] %v20943_v1 }
 0x7c7   : > { %v15227_v41 = vpop.f32.mrf.mxu1  ;;  %v20945_v58 = vpop.f32.mrf.mxu0 }
 0x7c8   : > { %23950 = vst [vmem:[#allocation41_spill] sm:$0xff] %v20945_v58  ;;  %v20948_v22 = vadd.f32 %v15227_v41, %v20800_v2 }
 0x7c9   : > { %v8677_v42 = vpop.f32.mrf.mxu1  ;;  %v20950_v57 = vpop.f32.mrf.mxu0 }
 0x7ca   : > { %23951 = vst [vmem:[#allocation14_spill] sm:$0xff] %v20950_v57  ;;  %v20953_v35 = vadd.f32 %v8677_v42, %v20803_v27 }
 0x7cb   : > { %v15228_v44 = vpop.f32.mrf.mxu1  ;;  %v20955_v21 = vpop.f32.mrf.mxu0 }
 0x7cc   : > { %23952 = vst [vmem:[#allocation44_spill] sm:$0xff] %v20955_v21  ;;  %v20958_v34 = vadd.f32 %v15228_v44, %v20808_v6 }
 0x7cd   : > { %v20960_v9 = vpop.f32.mrf.mxu1  ;;  %v20962_v1 = vpop.f32.mrf.mxu0 }
 0x7ce   : > { %23953 = vst [vmem:[#allocation53_spill] sm:$0xff] %v20958_v34  ;;  %23954 = vst [vmem:[#allocation76_spill] sm:$0xff] %v20962_v1 }
 0x7cf   : > { %v15231_v58 = vpop.f32.mrf.mxu1  ;;  %v20964_v55 = vpop.f32.mrf.mxu0 }
 0x7d0   : > { %23955 = vst [vmem:[#allocation21_spill] sm:$0xff] %v20964_v55  ;;  %v20967_v2 = vadd.f32 %v15231_v58, %v20818_v31 }
 0x7d1   : > { %v8693_v41 = vpop.f32.mrf.mxu1  ;;  %v20969_v57 = vpop.f32.mrf.mxu0 }
 0x7d2   : > { %23956 = vst [vmem:[#allocation27_spill] sm:$0xff] %v20969_v57  ;;  %v20972_v27 = vadd.f32 %v8693_v41, %v20821_v40 }
 0x7d3   : > { %v15232_v42 = vpop.f32.mrf.mxu1  ;;  %v20974_v21 = vpop.f32.mrf.mxu0 }
 0x7d4   : > { %23957 = vst [vmem:[#allocation15_spill] sm:$0xff] %v20974_v21  ;;  %v20977_v6 = vadd.f32 %v15232_v42, %v20825_v4 }
 0x7d5   : > { %v20979_v44 = vpop.f32.mrf.mxu1  ;;  %v20981_v1 = vpop.f32.mrf.mxu0 }
 0x7d6   : > { %23958 = vst [vmem:[#allocation29_spill] sm:$0xff] %v20977_v6  ;;  %23959 = vst [vmem:[#allocation24_spill] sm:$0xff] %v20981_v1 }
 0x7d7   : > { %v15235_v55 = vpop.f32.mrf.mxu1  ;;  %v20983_v34 = vpop.f32.mrf.mxu0 }
 0x7d8   : > { %23960 = vst [vmem:[#allocation79_spill] sm:$0xff] %v20983_v34  ;;  %v20986_v31 = vadd.f32 %v15235_v55, %v20838_v43 }
 0x7d9   : > { %v8709_v58 = vpop.f32.mrf.mxu1  ;;  %v20988_v57 = vpop.f32.mrf.mxu0 }
 0x7da   : > { %23961 = vst [vmem:[#allocation9_spill] sm:$0xff] %v20986_v31  ;;  %23962 = vst [vmem:[#allocation40_spill] sm:$0xff] %v20988_v57  ;;  %v20991_v40 = vadd.f32 %v8709_v58, %v20841_v39 }
 0x7db   : > { %v15236_v41 = vpop.f32.mrf.mxu1  ;;  %v20993_v21 = vpop.f32.mrf.mxu0 }
 0x7dc   : > { %23963 = vst [vmem:[#allocation10_spill] sm:$0xff] %v20991_v40  ;;  %23964 = vst [vmem:[#allocation60_spill] sm:$0xff] %v20993_v21  ;;  %v20996_v4 = vadd.f32 %v15236_v41, %v20845_v33 }
 0x7dd   : > { %v20998_v42 = vpop.f32.mrf.mxu1  ;;  %v21000_v1 = vpop.f32.mrf.mxu0 }
 0x7de   : > { %23965 = vst [vmem:[#allocation57_spill] sm:$0xff] %v20996_v4  ;;  %23966 = vst [vmem:[#allocation18_spill] sm:$0xff] %v21000_v1 }
 0x7df   : > { %v15239_v34 = vpop.f32.mrf.mxu1  ;;  %v21002_v6 = vpop.f32.mrf.mxu0 }
 0x7e0   : > { %23967 = vst [vmem:[#allocation28_spill] sm:$0xff] %v21002_v6  ;;  %v21005_v43 = vadd.f32 %v15239_v34, %v20855_v52 }
 0x7e1   : > { %v8725_v55 = vpop.f32.mrf.mxu1  ;;  %v21007_v57 = vpop.f32.mrf.mxu0 }
 0x7e2   : > { %23968 = vst [vmem:[#allocation12_spill] sm:$0xff] %v21005_v43  ;;  %23969 = vst [vmem:[#allocation43_spill] sm:$0xff] %v21007_v57  ;;  %v21010_v39 = vadd.f32 %v8725_v55, %v20858_v16 }
 0x7e3   : > { %v15240_v58 = vpop.f32.mrf.mxu1  ;;  %v15277_v21 = vpop.f32.mrf.mxu0 }
 0x7e4   : > { %23970 = vst [vmem:[#allocation11_spill] sm:$0xff] %v21010_v39  ;;  %v21013_v33 = vadd.f32 %v15240_v58, %v20862_v63 }
 0x7e5   : > { %v21015_v41 = vpop.f32.mrf.mxu1  ;;  %v21017_v1 = vpop.f32.mrf.mxu0 }
 0x7e6   : > { %23971 = vst [vmem:[#allocation42_spill] sm:$0xff] %v21013_v33  ;;  %23972 = vst [vmem:[#allocation17_spill] sm:$0xff] %v21015_v41 }
 0x7e7   : > { %23973 = vst [vmem:[#allocation22_spill] sm:$0xff] %v21017_v1  ;;  %v15243_v4 = vpop.f32.mrf.mxu1  ;;  %v21019_v6 = vpop.f32.mrf.mxu0 }
 0x7e8   : > { %23974 = vst [vmem:[#allocation25_spill] sm:$0xff] %v21019_v6  ;;  %v8786_v52 = vadd.f32 %v15243_v4, %v20872_v11 }
 0x7e9   : > { %v8741_v34 = vpop.f32.mrf.mxu1  ;;  %v21027_v55 = vpop.f32.mrf.mxu0 }
 0x7ea   : > { %v21023_v57 = vadd.f32 %v8741_v34, %v20877_v50  ;;  %v21025_v16 = vadd.f32 %v15277_v21, %v8786_v52  ;;  %23976 = vst [vmem:[#allocation59_spill] sm:$0xff] %v21027_v55 }
 0x7eb   : > { %v15244_v39 = vpop.f32.mrf.mxu1  ;;  %v21034_v1 = vpop.f32.mrf.mxu0 }
 0x7ec   : > { %23975 = vst [vmem:[#allocation19_spill] sm:$0xff] %v21023_v57  ;;  %v21030_v63 = vadd.f32 %v15244_v39, %v20886_v14 }
 0x7ed   : > { %v21032_v58 = vpop.f32.mrf.mxu1  ;;  %v21040_v11 = vpop.f32.mrf.mxu0 }
 0x7ee   : > { %23977 = vst [vmem:[#allocation75_spill] sm:$0xff] %v21030_v63  ;;  %23978 = vst [vmem:[#allocation32_spill] sm:$0xff] %v21032_v58 }
 0x7ef   : > { %v21036_v33 = vpop.f32.mrf.mxu1  ;;  %v21046_v4 = vpop.f32.mrf.mxu0 }
 0x7f1   : > { %v21038_v6 = vpop.f32.mrf.mxu1  ;;  %v21052_v39 = vpop.f32.mrf.mxu0 }
 0x7f2   : > { %23980 = vst [vmem:[#allocation26_spill] sm:$0xff] %v21052_v39 }
 0x7f3   : > { %v21042_v50 = vpop.f32.mrf.mxu1  ;;  %v21058_v63 = vpop.f32.mrf.mxu0 }
 0x7f4   : > { %23983 = vst [vmem:[#allocation78_spill] sm:$0xff] %v21058_v63 }
 0x7f5   : > { %v21044_v21 = vpop.f32.mrf.mxu1  ;;  %v21064_v41 = vpop.f32.mrf.mxu0 }
 0x7f6   : > { %23986 = vst [vmem:[#allocation48_spill] sm:$0xff] %v21064_v41 }
 0x7f7   : > { %v21048_v52 = vpop.f32.mrf.mxu1  ;;  %v21070_v31 = vpop.f32.mrf.mxu0 }
 0x7f8   : > { %23989 = vst [vmem:[#allocation50_spill] sm:$0xff] %v21070_v31 }
 0x7f9   : > { %v21050_v14 = vpop.f32.mrf.mxu1 }
 0x7fa   : > { %23979 = vst [vmem:[#allocation16_spill] sm:$0xff] %v21050_v14 }
 0x7fb   : > { %v21054_v34 = vpop.f32.mrf.mxu1 }
 0x7fc   : > { %23981 = vst [vmem:[#allocation13_spill] sm:$0xff] %v21054_v34  ;;  %v21076_v34 = vpop.f32.mrf.mxu0 }
 0x7fd   : > { %v21056_v55 = vpop.f32.mrf.mxu1  ;;  %23992 = vst [vmem:[#allocation70_spill] sm:$0xff] %v21076_v34 }
 0x7fe   : > { %23982 = vst [vmem:[#allocation63_spill] sm:$0xff] %v21056_v55 }
 0x7ff   : > { %v21060_v58 = vpop.f32.mrf.mxu1 }
 0x800   : > { %23984 = vst [vmem:[#allocation35_spill] sm:$0xff] %v21060_v58  ;;  %v21082_v58 = vpop.permute.xlu0 %9668 }
 0x801   : > { %v21062_v57 = vpop.f32.mrf.mxu1  ;;  %23995 = vst [vmem:[#allocation46_spill] sm:$0xff] %v21082_v58 }
 0x802   : > { %23985 = vst [vmem:[#allocation61_spill] sm:$0xff] %v21062_v57  ;;  %v21084_v57 = vpop.f32.mrf.mxu0 }
 0x803   : > { %v21066_v43 = vpop.f32.mrf.mxu1  ;;  %23996 = vst [vmem:[#allocation34_spill] sm:$0xff] %v21084_v57 }
 0x804   : > { %23987 = vst [vmem:[#allocation62_spill] sm:$0xff] %v21066_v43  ;;  %v21092_v31 = vpop.f32.mrf.mxu0 }
 0x805   : > { %v21068_v40 = vpop.f32.mrf.mxu1  ;;  %24000 = vst [vmem:[#allocation52_spill] sm:$0xff] %v21092_v31 }
 0x806   : > { %23988 = vst [vmem:[#allocation33_spill] sm:$0xff] %v21068_v40  ;;  %v21090_v40 = vpop.permute.xlu1 %9670 }
 0x807   : > { %v21072_v14 = vpop.f32.mrf.mxu1  ;;  %23999 = vst [vmem:[#allocation45_spill] sm:$0xff] %v21090_v40 }
 0x808   : > { %23990 = vst [vmem:[#allocation47_spill] sm:$0xff] %v21072_v14 }
 0x809   : > { %v21074_v39 = vpop.f32.mrf.mxu1 }
 0x80a   : > { %23991 = vst [vmem:[#allocation65_spill] sm:$0xff] %v21074_v39  ;;  %v21096_v39 = vpop.permute.xlu0 %9672  ;;  %v21104_v58 = vpop.permute.xlu1 %9674 }
 0x80b   : > { %v21078_v55 = vpop.f32.mrf.mxu1  ;;  %24002 = vst [vmem:[#allocation55_spill] sm:$0xff] %v21096_v39 }
 0x80c   : > { %23993 = vst [vmem:[#allocation64_spill] sm:$0xff] %v21078_v55  ;;  %v21100_v55 = vpop.f32.mrf.mxu0 }
 0x80d   : > { %v21080_v63 = vpop.f32.mrf.mxu1  ;;  %24004 = vst [vmem:[#allocation51_spill] sm:$0xff] %v21100_v55 }
 0x80e   : > { %23994 = vst [vmem:[#allocation36_spill] sm:$0xff] %v21080_v63 }
 0x80f   : > { %v21086_v41 = vpop.f32.mrf.mxu1 }
 0x810   : > { %23997 = vst [vmem:[#allocation49_spill] sm:$0xff] %v21086_v41  ;;  %v21108_v41 = vpop.permute.xlu0 %9676 }
 0x811   : > { %v21088_v43 = vpop.f32.mrf.mxu1  ;;  %24007 = vst [vmem:[#allocation67_spill] sm:$0xff] %v21108_v41 }
 0x812   : > { %23998 = vst [vmem:[#allocation30_spill] sm:$0xff] %v21088_v43  ;;  %v21110_v43 = vpop.f32.mrf.mxu0 }
 0x813   : > { %v21094_v14 = vpop.f32.mrf.mxu1  ;;  %24008 = vst [vmem:[#allocation80_spill] sm:$0xff] %v21110_v43 }
 0x814   : > { %24001 = vst [vmem:[#allocation31_spill] sm:$0xff] %v21094_v14  ;;  %v21116_v14 = vpop.permute.xlu1 %9678  ;;  %v21118_v39 = vpop.f32.mrf.mxu0 }
 0x815   : > { %v21098_v34 = vpop.f32.mrf.mxu1  ;;  %24011 = vst [vmem:[#allocation83_spill] sm:$0xff] %v21116_v14  ;;  %24012 = vst [vmem:[#allocation84_spill] sm:$0xff] %v21118_v39  ;;  %v21122_v55 = vpop.permute.xlu0 %9680  ;;  %v7961_v39 = vadd.f32 %v20709_v60, %v20718_v45  ;;  %v24020_v14 = vld [vmem:[#allocation66_spill] sm:$0xff]  ;;  %v8545_v60 = vadd.f32 %v20756_v37, %v20765_v36 }
 0x816   : > { %24003 = vst [vmem:[#allocation58_spill] sm:$0xff] %v21098_v34  ;;  %24014 = vst [vmem:[#allocation86_spill] sm:$0xff] %v21122_v55  ;;  %v21128_v41 = vpop.f32.mrf.mxu0 }
 0x817   : > { %v21102_v63 = vpop.f32.mrf.mxu1  ;;  %24016 = vst [vmem:[#allocation88_spill] sm:$0xff] %v21128_v41 }
 0x818   : > { %24005 = vst [vmem:[#allocation68_spill] sm:$0xff] %v21102_v63  ;;  %v21153_v45 = vpop.f32.mrf.mxu0 }
 0x819   : > { %v21106_v57 = vpop.f32.mrf.mxu1  ;;  %v21145_v41 = vpop.permute.xlu0 %9684 }
 0x81a   : > { %24006 = vst [vmem:[#allocation54_spill] sm:$0xff] %v21106_v57  ;;  %v7929_v57 = vadd.f32 %v20668_v20, %v20678_v30  ;;  %v8541_v20 = vadd.f32 %v20738_v26, %v20747_v61  ;;  %v8549_v26 = vadd.f32 %v20774_v17, %v20788_v46  ;;  %v8971_v61 = vadd.f32 %v20874_v19, %v20891_v25 }
 0x81b   : > { %v21112_v40 = vpop.f32.mrf.mxu1  ;;  %v8969_v19 = vadd.f32 %v20884_v8, %v20896_v47 }
 0x81c   : > { %24009 = vst [vmem:[#allocation81_spill] sm:$0xff] %v21112_v40  ;;  %v21132_v40 = vpop.permute.xlu1 %9682  ;;  %v9177_v46 = vadd.f32 %v21036_v33, %v8971_v61  ;;  %v24027_v33 = vld [vmem:[#allocation71_spill] sm:$0xff] }
 0x81d   : > { %v21114_v31 = vpop.f32.mrf.mxu1  ;;  %24018 = vst [vmem:[#allocation90_spill] sm:$0xff] %v21132_v40  ;;  %v8359_v40 = vadd.f32 %v20860_v29, %v7961_v39  ;;  %v8761_v29 = vadd.f32 %v20922_v32, %v8545_v60  ;;  %v21184_v32 = vpop.f32.mrf.mxu0  ;;  %v9175_v8 = vadd.f32 %v21038_v6, %v8969_v19  ;;  %v24036_v60 = vld [vmem:[#allocation41_spill] sm:$0xff] }
 0x81e   : > { %24010 = vst [vmem:[#allocation82_spill] sm:$0xff] %v21114_v31  ;;  %v7945_v31 = vadd.f32 %v20689_v38, %v20701_v18  ;;  %v8757_v18 = vadd.f32 %v20903_v7, %v8541_v20  ;;  %v24033_v20 = vld [vmem:[#allocation38_spill] sm:$0xff] }
 0x81f   : > { %v21120_v34 = vpop.f32.mrf.mxu1  ;;  %v21176_v25 = vadd.f32 %v20852_v56, %v8359_v40  ;;  %v8975_v56 = vadd.f32 %v20898_v13, %v20910_v15  ;;  %v24024_v40 = vld [vmem:[#allocation23_spill] sm:$0xff]  ;;  %v24030_v15 = vld [vmem:[#allocation20_spill] sm:$0xff] }
 0x820   : > { %24013 = vst [vmem:[#allocation85_spill] sm:$0xff] %v21120_v34  ;;  %v24019_v34 = vld [vmem:[#allocation37_spill] sm:$0xff]  ;;  %v21168_v36 = vpop.permute.xlu1 %9686 }
 0x821   : > { %v21124_v63 = vpop.f32.mrf.mxu1  ;;  %v7977_v55 = vadd.f32 %v24020_v14, %v24019_v34  ;;  %v24032_v14 = vld [vmem:[#allocation73_spill] sm:$0xff]  ;;  %v9393_v34 = vadd.f32 %v21034_v1, %v9177_v46  ;;  %v24038_v46 = vld [vmem:[#allocation44_spill] sm:$0xff] }
 0x822   : > { %24015 = vst [vmem:[#allocation87_spill] sm:$0xff] %v21124_v63  ;;  %v8351_v63 = vadd.f32 %v20823_v0, %v7929_v57  ;;  %v8765_v57 = vadd.f32 %v20941_v24, %v8549_v26  ;;  %v21231_v26 = vpop.f32.mrf.mxu0  ;;  %v21248_v19 = vadd.f32 %v24038_v46, %v20967_v2 }
 0x823   : > { %v21130_v43 = vpop.f32.mrf.mxu1  ;;  %v8363_v38 = vadd.f32 %v20882_v3, %v7977_v55  ;;  %v8553_v3 = vadd.f32 %v20797_v49, %v20806_v10  ;;  %v8972_v10 = vadd.f32 %v20888_v53, %v20901_v5  ;;  %v24025_v53 = vld [vmem:[#allocation77_spill] sm:$0xff]  ;;  %v24028_v55 = vld [vmem:[#allocation39_spill] sm:$0xff] }
 0x824   : > { %24017 = vst [vmem:[#allocation89_spill] sm:$0xff] %v21130_v43  ;;  %v8355_v43 = vadd.f32 %v20843_v48, %v7945_v31  ;;  %v8557_v7 = vadd.f32 %v20815_v62, %v8351_v63  ;;  %v8970_v62 = vadd.f32 %v20893_v12, %v8757_v18  ;;  %v8976_v5 = vadd.f32 %v24025_v53, %v24024_v40  ;;  %v24026_v12 = vld [vmem:[#allocation69_spill] sm:$0xff]  ;;  %v24031_v63 = vld [vmem:[#allocation56_spill] sm:$0xff] }
 0x825   : > { %v21143_v30 = vpop.f32.mrf.mxu1  ;;  %v21179_v49 = vadd.f32 %v20869_v51, %v8363_v38  ;;  %v8769_v31 = vadd.f32 %v20960_v9, %v8553_v3  ;;  %v24023_v51 = vld [vmem:[#allocation72_spill] sm:$0xff]  ;;  %v21205_v9 = vadd.f32 %v24028_v55, %v20934_v59  ;;  %v9178_v13 = vadd.f32 %v21042_v50, %v8972_v10  ;;  %v24034_v59 = vld [vmem:[#allocation74_spill] sm:$0xff]  ;;  %v24035_v50 = vld [vmem:[#allocation53_spill] sm:$0xff] }
 0x826   : > { %v8561_v17 = vadd.f32 %v20835_v54, %v8355_v43  ;;  %v21188_v54 = vpop.permute.xlu0 %9688  ;;  %v8973_v47 = vadd.f32 %v24023_v51, %v20915_v28  ;;  %v8974_v43 = vadd.f32 %v24026_v12, %v8761_v29  ;;  %v21212_v28 = vadd.f32 %v24031_v63, %v24030_v15  ;;  %v21233_v29 = vpop.permute.xlu1 %9690  ;;  %v24039_v10 = vld [vmem:[#allocation76_spill] sm:$0xff]  ;;  %v24044_v55 = vld [vmem:[#allocation9_spill] sm:$0xff]  ;;  %v24045_v15 = vld [vmem:[#allocation15_spill] sm:$0xff] }
 0x827   : > { %v15311_v0 = vpop.f32.mrf.mxu1  ;;  %v21215_v39 = vadd.f32 %v24032_v14, %v8765_v57  ;;  %v21221_v38 = vadd.f32 %v24033_v20, %v20948_v22  ;;  %v21225_v18 = vadd.f32 %v24034_v59, %v20953_v35  ;;  %v9176_v1 = vadd.f32 %v21044_v21, %v8970_v62  ;;  %v21243_v35 = vld [vmem:[%s23302_s19] ss:$0 sm:$0xff]  ;;  %v24040_v62 = vld [vmem:[#allocation29_spill] sm:$0xff]  ;;  %v21264_v12 = vpop.f32.mrf.mxu0  ;;  %v24046_v14 = vld [vmem:[#allocation10_spill] sm:$0xff] }
 0x828   : > { %v21160_v48 = vadd.f32 %v15311_v0, %v21025_v16  ;;  %v21201_v16 = vadd.f32 %v24027_v33, %v20929_v23  ;;  %v8773_v23 = vadd.f32 %v20979_v44, %v8557_v7  ;;  %v21229_v0 = vadd.f32 %v24036_v60, %v24035_v50  ;;  %v24037_v44 = vld [vmem:[#allocation14_spill] sm:$0xff]  ;;  %v24043_v33 = vld [vmem:[#allocation27_spill] sm:$0xff] }
 0x829   : > { %v21166_v37 = vpop.f32.mrf.mxu1  ;;  %v21237_v3 = vadd.f32 %v24037_v44, %v8769_v31  ;;  %v9391_v7 = vadd.f32 %v21040_v11, %v9175_v8  ;;  %v8777_v57 = vadd.f32 %v20998_v42, %v8561_v17  ;;  %v21252_v21 = vadd.f32 %v24039_v10, %v20972_v27  ;;  %v24041_v31 = vld [vmem:[#allocation21_spill] sm:$0xff]  ;;  %v24042_v17 = vld [vmem:[#allocation55_spill] sm:$0xff]  ;;  %v24049_v50 = vld [vmem:[#allocation26_spill] sm:$0xff] }
 0x82a   : > { %24021 = vst [vmem:[#allocation37_spill] sm:$0xff] %v21160_v48  ;;  %v21256_v51 = vadd.f32 %v24041_v31, %v24040_v62  ;;  %v21258_v8 = vpop.permute.xlu0 %9692  ;;  %v9181_v40 = vadd.f32 %v21048_v52, %v8975_v56  ;;  %v9394_v42 = vadd.f32 %v21046_v4, %v9178_v13  ;;  %v21267_v27 = vadd.f32 %v24043_v33, %v8773_v23  ;;  %v24048_v56 = vld [vmem:[#allocation16_spill] sm:$0xff]  ;;  %v21283_v23 = vld [vmem:[%s23303_s20] ss:$0 sm:$0xff]  ;;  %v24071_v48 = vld [vmem:[#allocation34_spill] sm:$0xff] }
 0x82b   : > { %v21186_v24 = vpop.f32.mrf.mxu1  ;;  %v21271_v63 = vadd.f32 %v24045_v15, %v24044_v55  ;;  %v9179_v13 = vadd.f32 %v24048_v56, %v8973_v47  ;;  %v9392_v60 = vadd.f32 %v24049_v50, %v9176_v1  ;;  %v24053_v10 = vld [vmem:[#allocation40_spill] sm:$0xff]  ;;  %v24056_v1 = vld [vmem:[#allocation13_spill] sm:$0xff] }
 0x82c   : > { %24022 = vst [vmem:[#allocation66_spill] sm:$0xff] %v21186_v24  ;;  %v21293_v62 = vadd.f32 %v24053_v10, %v8777_v57  ;;  %v24054_v31 = vld [vmem:[#allocation12_spill] sm:$0xff]  ;;  %v9182_v33 = vadd.f32 %v24056_v1, %v8976_v5  ;;  %v24058_v57 = vld [vmem:[#allocation11_spill] sm:$0xff]  ;;  %v24062_v10 = vld [vmem:[#allocation45_spill] sm:$0xff] }
 0x82d   : > { %v21207_v6 = vpop.f32.mrf.mxu1  ;;  %v24055_v47 = vld [vmem:[#allocation60_spill] sm:$0xff] }
 0x82e   : > { %24029 = vst [vmem:[#allocation72_spill] sm:$0xff] %v21207_v6 }
 0x82f   : > { %v15351_v61 = vpop.f32.mrf.mxu1 }
 0x830   : > { %v9606_v22 = vadd.f32 %v15351_v61, %v9393_v34  ;;  %v24047_v34 = vld [vmem:[#allocation24_spill] sm:$0xff]  ;;  %v24050_v61 = vld [vmem:[#allocation46_spill] sm:$0xff] }
 0x831   : > { %v9477_v11 = vpop.f32.mrf.mxu1  ;;  %v21275_v20 = vadd.f32 %v24047_v34, %v24046_v14  ;;  %v21306_v34 = vpop.f32.mrf.mxu0 }
 0x832   : > { %v9604_v53 = vadd.f32 %v9477_v11, %v9391_v7  ;;  %v9766_v2 = vsel %vm3797_vm5, %v9606_v22, %v24042_v17  ;;  %v24051_v22 = vld [vmem:[#allocation57_spill] sm:$0xff]  ;;  %v24052_v7 = vld [vmem:[#allocation79_spill] sm:$0xff]  ;;  %v21297_v11 = vadd.f32 %v24055_v47, %v24054_v31 }
 0x833   : > { %v15352_v52 = vpop.f32.mrf.mxu1  ;;  %12662 = vrot.lane.b32.xlu0 %v9766_v2, %s23474_s5  ;;  %v9805_v4 = vmul.f32 %v21243_v35, %v9766_v2  ;;  %v21290_v46 = vadd.f32 %v24052_v7, %v24051_v22  ;;  %v21300_v2 = vpop.permute.xlu1 %9694  ;;  %v24061_v22 = vld [vmem:[#allocation48_spill] sm:$0xff] }
 0x834   : > { %v9607_v59 = vadd.f32 %v15352_v52, %v9394_v42  ;;  %v9764_v44 = vsel %vm3797_vm5, %v9604_v53, %v24050_v61  ;;  %v24057_v53 = vld [vmem:[#allocation78_spill] sm:$0xff]  ;;  %v9395_v7 = vadd.f32 %v24061_v22, %v9179_v13 }
 0x835   : > { %v9480_v42 = vpop.f32.mrf.mxu1  ;;  %v9803_v17 = vmul.f32 %v21243_v35, %v9764_v44  ;;  %v9397_v15 = vadd.f32 %v24057_v53, %v9181_v40  ;;  %v24059_v52 = vld [vmem:[#allocation18_spill] sm:$0xff]  ;;  %v9844_v50 = vadd.f32 %v21283_v23, %v9805_v4  ;;  %v21316_v40 = vpop.permute.xlu0 %9696  ;;  %v24063_v4 = vld [vmem:[#allocation17_spill] sm:$0xff] }
 0x836   : > { %v9605_v55 = vadd.f32 %v9480_v42, %v9392_v60  ;;  %v9767_v14 = vsel %vm3797_vm5, %v9607_v59, %v21104_v58  ;;  %v21310_v56 = vadd.f32 %v24059_v52, %v24058_v57  ;;  %v24060_v60 = vld [vmem:[#allocation63_spill] sm:$0xff]  ;;  %v21324_v47 = vadd.f32 %v24063_v4, %v21176_v25  ;;  %v24065_v57 = vld [vmem:[#allocation50_spill] sm:$0xff] }
 0x837   : > { %v15355_v61 = vpop.f32.mrf.mxu1  ;;  %12658 = vrot.lane.b32.xlu0 %v9764_v44, %s23474_s5  ;;  %12664 = vrot.lane.b32.xlu1 %v9767_v14, %s23474_s5  ;;  %v9806_v5 = vmul.f32 %v21243_v35, %v9767_v14  ;;  %v9180_v58 = vadd.f32 %v24060_v60, %v8974_v43  ;;  %v9842_v44 = vadd.f32 %v21283_v23, %v9803_v17  ;;  %v24064_v14 = vld [vmem:[#allocation35_spill] sm:$0xff]  ;;  %v24066_v52 = vld [vmem:[#allocation86_spill] sm:$0xff]  ;;  %v9876_v25 = vmax.f32 %v9844_v50, 0.0 }
 0x838   : > { %v9610_v59 = vadd.f32 %v15355_v61, %v9397_v15  ;;  %v9765_v31 = vsel %vm3797_vm5, %v9605_v55, %v24062_v10  ;;  %v9185_v43 = vadd.f32 %v24064_v14, %v21201_v16  ;;  %v9398_v13 = vadd.f32 %v24065_v57, %v9182_v33  ;;  %v21334_v61 = vpop.f32.mrf.mxu0  ;;  %v21340_v16 = vpop.permute.xlu1 %9698  ;;  %v24067_v33 = vld [vmem:[#allocation61_spill] sm:$0xff] }
 0x839   : > { %v9845_v42 = vadd.f32 %v21283_v23, %v9806_v5  ;;  %v9493_v1 = vpop.f32.mrf.mxu1  ;;  %v9804_v53 = vmul.f32 %v21243_v35, %v9765_v31 }
 0x83a   : > { %v9608_v15 = vadd.f32 %v9493_v1, %v9395_v7  ;;  %v9770_v55 = vsel %vm3797_vm5, %v9610_v59, %v24066_v52  ;;  %v9183_v7 = vadd.f32 %v24067_v33, %v21205_v9  ;;  %v24068_v59 = vld [vmem:[#allocation70_spill] sm:$0xff]  ;;  %v24069_v1 = vld [vmem:[#allocation67_spill] sm:$0xff]  ;;  %v21348_v52 = vpop.permute.xlu0 %9700  ;;  %v9401_v9 = vadd.f32 %v24071_v48, %v9185_v43  ;;  %v24074_v48 = vld [vmem:[#allocation52_spill] sm:$0xff] }
 0x83b   : > { %v9877_v60 = vmax.f32 %v9845_v42, 0.0  ;;  %v15356_v22 = vpop.f32.mrf.mxu1  ;;  %12660 = vrot.lane.b32.xlu1 %v9765_v31, %s23474_s5  ;;  %v9843_v17 = vadd.f32 %v21283_v23, %v9804_v53  ;;  %12670 = vrot.lane.b32.xlu0 %v9770_v55, %s23474_s5  ;;  %v9809_v5 = vmul.f32 %v21243_v35, %v9770_v55  ;;  %v9396_v4 = vadd.f32 %v24068_v59, %v9180_v58  ;;  %v24070_v55 = vld [vmem:[#allocation62_spill] sm:$0xff]  ;;  %v24075_v59 = vld [vmem:[#allocation83_spill] sm:$0xff] }
 0x83c   : > { %v9611_v10 = vadd.f32 %v15356_v22, %v9398_v13  ;;  %v9768_v50 = vsel %vm3797_vm5, %v9608_v15, %v24069_v1  ;;  %v9874_v42 = vmax.f32 %v9842_v44, 0.0  ;;  %v9186_v6 = vadd.f32 %v24070_v55, %v21212_v28  ;;  %v24072_v13 = vld [vmem:[#allocation90_spill] sm:$0xff]  ;;  %v21355_v22 = vpop.f32.mrf.mxu0  ;;  %v24073_v28 = vld [vmem:[#allocation33_spill] sm:$0xff]  ;;  %v24077_v1 = vld [vmem:[#allocation28_spill] sm:$0xff] }
 0x83d   : > { %v9907_v14 = vpack.c.bf16 %v9877_v60, %v9876_v25  ;;  %v9875_v31 = vmax.f32 %v9843_v17, 0.0  ;;  %v9496_v57 = vpop.f32.mrf.mxu1  ;;  %v9807_v53 = vmul.f32 %v21243_v35, %v9768_v50  ;;  %v9848_v44 = vadd.f32 %v21283_v23, %v9809_v5 }
 0x83e   : > { %v9609_v24 = vadd.f32 %v9496_v57, %v9396_v4  ;;  %v9771_v58 = vsel %vm3797_vm5, %v9611_v10, %v24072_v13  ;;  %v9184_v17 = vadd.f32 %v24073_v28, %v21215_v39  ;;  %v9399_v43 = vadd.f32 %v24074_v48, %v9183_v7  ;;  %v24076_v4 = vld [vmem:[#allocation42_spill] sm:$0xff]  ;;  %v21374_v39 = vpop.permute.xlu1 %9702  ;;  %v24078_v7 = vld [vmem:[#allocation47_spill] sm:$0xff]  ;;  %v21388_v48 = vpop.permute.xlu0 %9704 }
 0x83f   : > { %v15359_v15 = vpop.f32.mrf.mxu1  ;;  %12666 = vrot.lane.b32.xlu0 %v9768_v50, %s23474_s5  ;;  %12672 = vrot.lane.b32.xlu1 %v9771_v58, %s23474_s5  ;;  %v9810_v25 = vmul.f32 %v21243_v35, %v9771_v58  ;;  %v9906_v60 = vpack.c.bf16 %v9875_v31, %v9874_v42  ;;  %v21368_v5 = vadd.f32 %v24077_v1, %v24076_v4  ;;  %v21382_v58 = vpop.f32.mrf.mxu0 }
 0x840   : > { %v9614_v33 = vadd.f32 %v15359_v15, %v9401_v9  ;;  %v9769_v10 = vsel %vm3797_vm5, %v9609_v24, %v24075_v59  ;;  %v9846_v50 = vadd.f32 %v21283_v23, %v9807_v53  ;;  %v9189_v31 = vadd.f32 %v24078_v7, %v21221_v38  ;;  %v24079_v24 = vld [vmem:[#allocation51_spill] sm:$0xff] }
 0x841   : > { %v9849_v57 = vadd.f32 %v21283_v23, %v9810_v25  ;;  %v9509_v55 = vpop.f32.mrf.mxu1  ;;  %15387 = vmatprep.mubr.msk.bf16.mxu0 %vm9942_vm8, %v9906_v60  ;;  %v9808_v42 = vmul.f32 %v21243_v35, %v9769_v10  ;;  %v9402_v13 = vadd.f32 %v24079_v24, %v9186_v6  ;;  %v9880_v15 = vmax.f32 %v9848_v44, 0.0  ;;  %v24080_v6 = vld [vmem:[#allocation65_spill] sm:$0xff]  ;;  %v24083_v24 = vld [vmem:[#allocation84_spill] sm:$0xff] }
 0x842   : > { %v9612_v9 = vadd.f32 %v9509_v55, %v9399_v43  ;;  %15388 = vmatmul.mubr.msk.bf16.vlgmr.msra.gmra.mxu0 %vm9942_vm8, %v9907_v14  ;;  %v9774_v53 = vsel %vm3797_vm5, %v9614_v33, %v21188_v54  ;;  %v9187_v14 = vadd.f32 %v24080_v6, %v21225_v18  ;;  %v24081_v54 = vld [vmem:[#allocation80_spill] sm:$0xff]  ;;  %v9878_v59 = vmax.f32 %v9846_v50, 0.0 }
 0x843   : > { %v9881_v25 = vmax.f32 %v9849_v57, 0.0  ;;  %v15360_v60 = vpop.f32.mrf.mxu1  ;;  %12668 = vrot.lane.b32.xlu1 %v9769_v10, %s23474_s5  ;;  %v9847_v28 = vadd.f32 %v21283_v23, %v9808_v42  ;;  %12678 = vrot.lane.b32.xlu0 %v9774_v53, %s23474_s5  ;;  %v9813_v38 = vmul.f32 %v21243_v35, %v9774_v53  ;;  %v9400_v33 = vadd.f32 %v24081_v54, %v9184_v17  ;;  %v24082_v55 = vld [vmem:[#allocation64_spill] sm:$0xff] }
 0x844   : > { %v9615_v43 = vadd.f32 %v15360_v60, %v9402_v13  ;;  %v9772_v44 = vsel %vm3797_vm5, %v9612_v9, %v21145_v41  ;;  %v9190_v42 = vadd.f32 %v24082_v55, %v21229_v0  ;;  %v9405_v53 = vadd.f32 %v24083_v24, %v9189_v31  ;;  %v21401_v13 = vpop.f32.mrf.mxu0  ;;  %v24084_v0 = vld [vmem:[#allocation36_spill] sm:$0xff] }
 0x845   : > { %v9909_v4 = vpack.c.bf16 %v9881_v25, %v9880_v15  ;;  %v9879_v10 = vmax.f32 %v9847_v28, 0.0  ;;  %v9512_v1 = vpop.f32.mrf.mxu1  ;;  %v9811_v57 = vmul.f32 %v21243_v35, %v9772_v44  ;;  %v9852_v17 = vadd.f32 %v21283_v23, %v9813_v38  ;;  %v21407_v15 = vpop.permute.xlu1 %9706  ;;  %v24085_v60 = vld [vmem:[#allocation88_spill] sm:$0xff]  ;;  %v24086_v38 = vld [vmem:[#allocation43_spill] sm:$0xff] }
 0x846   : > { %v9613_v7 = vadd.f32 %v9512_v1, %v9400_v33  ;;  %v9775_v18 = vsel %vm3797_vm5, %v9615_v43, %v21233_v29  ;;  %v9188_v31 = vadd.f32 %v24084_v0, %v21237_v3  ;;  %v9403_v29 = vadd.f32 %v24085_v60, %v9187_v14  ;;  %v21422_v3 = vpop.permute.xlu0 %9708  ;;  %v24087_v14 = vld [vmem:[#allocation49_spill] sm:$0xff]  ;;  %v21430_v1 = vpop.f32.mrf.mxu0 }
 0x847   : > { %v15363_v41 = vpop.f32.mrf.mxu1  ;;  %12674 = vrot.lane.b32.xlu0 %v9772_v44, %s23474_s5  ;;  %12680 = vrot.lane.b32.xlu1 %v9775_v18, %s23474_s5  ;;  %v9814_v50 = vmul.f32 %v21243_v35, %v9775_v18  ;;  %v9908_v9 = vpack.c.bf16 %v9879_v10, %v9878_v59  ;;  %v21416_v6 = vadd.f32 %v24086_v38, %v21324_v47 }
 0x848   : > { %v9618_v25 = vadd.f32 %v15363_v41, %v9405_v53  ;;  %v9773_v28 = vsel %vm3797_vm5, %v9613_v7, %v21168_v36  ;;  %v9850_v43 = vadd.f32 %v21283_v23, %v9811_v57  ;;  %v9193_v59 = vadd.f32 %v24087_v14, %v21248_v19  ;;  %v24091_v14 = vld [vmem:[#allocation19_spill] sm:$0xff] }
 0x849   : > { %v9853_v54 = vadd.f32 %v21283_v23, %v9814_v50  ;;  %v9525_v33 = vpop.f32.mrf.mxu1  ;;  %15391 = vmatprep.mubr.msk.bf16.mxu0 %vm9942_vm8, %v9908_v9  ;;  %v9812_v44 = vmul.f32 %v21243_v35, %v9773_v28  ;;  %v9406_v36 = vadd.f32 %v21153_v45, %v9190_v42  ;;  %v9884_v57 = vmax.f32 %v9852_v17, 0.0  ;;  %v21442_v0 = vpop.permute.xlu1 %9710 }
 0x84a   : > { %v9616_v10 = vadd.f32 %v9525_v33, %v9403_v29  ;;  %15392 = vmatmul.mubr.msk.bf16.gmra.mxu0 %vm9942_vm8, %v9909_v4  ;;  %v9778_v47 = vsel %vm3797_vm5, %v9618_v25, %v21316_v40  ;;  %v24088_v4 = vld [vmem:[#allocation30_spill] sm:$0xff]  ;;  %v9404_v42 = vadd.f32 %v21184_v32, %v9188_v31  ;;  %v9882_v18 = vmax.f32 %v9850_v43, 0.0  ;;  %v24089_v25 = vld [vmem:[#allocation31_spill] sm:$0xff]  ;;  %v21449_v31 = vpop.f32.mrf.mxu0 }
 0x84b   : > { %v9885_v55 = vmax.f32 %v9853_v54, 0.0  ;;  %v15364_v7 = vpop.f32.mrf.mxu1  ;;  %12676 = vrot.lane.b32.xlu1 %v9773_v28, %s23474_s5  ;;  %v9851_v24 = vadd.f32 %v21283_v23, %v9812_v44  ;;  %12686 = vrot.lane.b32.xlu0 %v9778_v47, %s23474_s5  ;;  %v9817_v19 = vmul.f32 %v21243_v35, %v9778_v47  ;;  %v9191_v53 = vadd.f32 %v24088_v4, %v21252_v21  ;;  %v21455_v54 = vpop.permute.xlu0 %9712 }
 0x84c   : > { %v9619_v45 = vadd.f32 %v15364_v7, %v9406_v36  ;;  %v9776_v40 = vsel %vm3797_vm5, %v9616_v10, %v21258_v8  ;;  %v9194_v60 = vadd.f32 %v24089_v25, %v21256_v51  ;;  %v9409_v21 = vadd.f32 %v21231_v26, %v9193_v59  ;;  %v24090_v51 = vld [vmem:[#allocation58_spill] sm:$0xff] }
 0x84d   : > { %v9911_v17 = vpack.c.bf16 %v9885_v55, %v9884_v57  ;;  %v9883_v41 = vmax.f32 %v9851_v24, 0.0  ;;  %v9528_v50 = vpop.f32.mrf.mxu1  ;;  %v9815_v9 = vmul.f32 %v21243_v35, %v9776_v40  ;;  %v9856_v8 = vadd.f32 %v21283_v23, %v9817_v19  ;;  %v24092_v59 = vld [vmem:[#allocation22_spill] sm:$0xff]  ;;  %v21476_v19 = vpop.f32.mrf.mxu0 }
 0x84e   : > { %v9617_v29 = vadd.f32 %v9528_v50, %v9404_v42  ;;  %v9779_v32 = vsel %vm3797_vm5, %v9619_v45, %v21340_v16  ;;  %v9192_v26 = vadd.f32 %v24090_v51, %v21267_v27  ;;  %v9407_v16 = vadd.f32 %v21264_v12, %v9191_v53  ;;  %v24093_v27 = vld [vmem:[#allocation68_spill] sm:$0xff] }
 0x84f   : > { %v15367_v28 = vpop.f32.mrf.mxu1  ;;  %12682 = vrot.lane.b32.xlu0 %v9776_v40, %s23474_s5  ;;  %12688 = vrot.lane.b32.xlu1 %v9779_v32, %s23474_s5  ;;  %v9818_v38 = vmul.f32 %v21243_v35, %v9779_v32  ;;  %v9910_v43 = vpack.c.bf16 %v9883_v41, %v9882_v18  ;;  %v21464_v10 = vadd.f32 %v24092_v59, %v24091_v14  ;;  %v9888_v4 = vmax.f32 %v9856_v8, 0.0  ;;  %v21482_v40 = vpop.permute.xlu1 %9714  ;;  %v24095_v32 = vld [vmem:[#allocation81_spill] sm:$0xff] }
 0x850   : > { %v9622_v33 = vadd.f32 %v15367_v28, %v9409_v21  ;;  %v9777_v44 = vsel %vm3797_vm5, %v9617_v29, %v21300_v2  ;;  %v9854_v36 = vadd.f32 %v21283_v23, %v9815_v9  ;;  %v9197_v7 = vadd.f32 %v24093_v27, %v21271_v63  ;;  %v21490_v21 = vpop.permute.xlu0 %9716 }
 0x851   : > { %v9857_v47 = vadd.f32 %v21283_v23, %v9818_v38  ;;  %v9541_v57 = vpop.f32.mrf.mxu1  ;;  %15395 = vmatprep.mubr.msk.bf16.mxu0 %vm9942_vm8, %v9910_v43  ;;  %v9816_v55 = vmul.f32 %v21243_v35, %v9777_v44  ;;  %v9410_v2 = vadd.f32 %v21306_v34, %v9194_v60  ;;  %v24094_v34 = vld [vmem:[#allocation54_spill] sm:$0xff]  ;;  %v9198_v8 = vadd.f32 %v24095_v32, %v21290_v46  ;;  %v21497_v38 = vpop.f32.mrf.mxu0 }
 0x852   : > { %v9620_v12 = vadd.f32 %v9541_v57, %v9407_v16  ;;  %15396 = vmatmul.mubr.msk.bf16.gmra.mxu0 %vm9942_vm8, %v9911_v17  ;;  %v9782_v24 = vsel %vm3797_vm5, %v9622_v33, %v21388_v48  ;;  %v9195_v18 = vadd.f32 %v24094_v34, %v21275_v20  ;;  %v9408_v48 = vadd.f32 %v21334_v61, %v9192_v26  ;;  %v24096_v46 = vld [vmem:[#allocation82_spill] sm:$0xff] }
 0x853   : > { %v9889_v53 = vmax.f32 %v9857_v47, 0.0  ;;  %v15368_v45 = vpop.f32.mrf.mxu1  ;;  %12684 = vrot.lane.b32.xlu1 %v9777_v44, %s23474_s5  ;;  %v9855_v42 = vadd.f32 %v21283_v23, %v9816_v55  ;;  %12694 = vrot.lane.b32.xlu0 %v9782_v24, %s23474_s5  ;;  %v9821_v63 = vmul.f32 %v21243_v35, %v9782_v24  ;;  %v9886_v50 = vmax.f32 %v9854_v36, 0.0  ;;  %v24097_v44 = vld [vmem:[#allocation32_spill] sm:$0xff] }
 0x854   : > { %v9623_v17 = vadd.f32 %v15368_v45, %v9410_v2  ;;  %v9780_v41 = vsel %vm3797_vm5, %v9620_v12, %v21348_v52  ;;  %v9413_v20 = vadd.f32 %v21355_v22, %v9197_v7  ;;  %v9196_v33 = vadd.f32 %v24096_v46, %v21293_v62  ;;  %v15804_v62 = vld [vmem:[%s23307_s24 + $0x8] sm:$0xff]   ;;  %v9363_v12 = vpop.f32.mrf.mxu0  ;;  %v9721_v45 = vpop.permute.xlu0 %9720 }
 0x855   : > { %v9913_v9 = vpack.c.bf16 %v9889_v53, %v9888_v4  ;;  %v9887_v25 = vmax.f32 %v9855_v42, 0.0  ;;  %v9544_v60 = vpop.f32.mrf.mxu1  ;;  %v9819_v29 = vmul.f32 %v21243_v35, %v9780_v41  ;;  %v9860_v52 = vadd.f32 %v21283_v23, %v9821_v63  ;;  %v24099_v42 = vld [vmem:[#allocation87_spill] sm:$0xff]  ;;  %15419 = vmatprep.subr.bf16.mxu1 %v15804_v62 }
 0x856   : > { %v9621_v28 = vadd.f32 %v9544_v60, %v9408_v48  ;;  %v9783_v61 = vsel %vm3797_vm5, %v9623_v17, %v21407_v15  ;;  %v9411_v22 = vadd.f32 %v21382_v58, %v9195_v18  ;;  %v8785_v14 = vadd.f32 %v24097_v44, %v21179_v49  ;;  %v21517_v58 = vpop.permute.xlu1 %9718  ;;  %v15345_v18 = vpop.f32.mrf.mxu0  ;;  %15420 = vmatpush3.bf16.msra.mxu1 %v15804_v62 }
 0x857   : > { %v15371_v43 = vpop.f32.mrf.mxu1  ;;  %12690 = vrot.lane.b32.xlu0 %v9780_v41, %s23474_s5  ;;  %12696 = vrot.lane.b32.xlu1 %v9783_v61, %s23474_s5  ;;  %v9822_v51 = vmul.f32 %v21243_v35, %v9783_v61  ;;  %v9912_v26 = vpack.c.bf16 %v9887_v25, %v9886_v50  ;;  %v9858_v59 = vadd.f32 %v21283_v23, %v9819_v29  ;;  %v9892_v2 = vmax.f32 %v9860_v52, 0.0  ;;  %v24100_v25 = vld [vmem:[#allocation89_spill] sm:$0xff]  ;;  %v24101_v52 = vld [vmem:[#allocation75_spill] sm:$0xff] }
 0x858   : > { %v9626_v16 = vadd.f32 %v15371_v43, %v9413_v20  ;;  %v9781_v15 = vsel %vm3797_vm5, %v9621_v28, %v21374_v39  ;;  %v24098_v39 = vld [vmem:[#allocation85_spill] sm:$0xff]  ;;  %v9414_v49 = vadd.f32 %v21401_v13, %v9198_v8  ;;  %v9199_v63 = vadd.f32 %v24099_v42, %v21310_v56 }
 0x859   : > { %v9861_v36 = vadd.f32 %v21283_v23, %v9822_v51  ;;  %v9557_v47 = vpop.f32.mrf.mxu1  ;;  %15399 = vmatprep.mubr.msk.bf16.mxu0 %vm9942_vm8, %v9912_v26  ;;  %v9820_v57 = vmul.f32 %v21243_v35, %v9781_v15  ;;  %v9201_v55 = vadd.f32 %v24098_v39, %v21297_v11  ;;  %v9412_v34 = vadd.f32 %v21430_v1, %v9196_v33  ;;  %v24102_v43 = vld [vmem:[#allocation25_spill] sm:$0xff]  ;;  %v9376_v26 = vpop.f32.mrf.mxu0 }
 0x85a   : > { %v9624_v27 = vadd.f32 %v9557_v47, %v9411_v22  ;;  %15400 = vmatmul.mubr.msk.bf16.gmra.mxu0 %vm9942_vm8, %v9913_v9  ;;  %v9786_v7 = vsel %vm3797_vm5, %v9626_v16, %v21455_v54  ;;  %v9890_v17 = vmax.f32 %v9858_v59, 0.0  ;;  %v9202_v60 = vadd.f32 %v24100_v25, %v21368_v5  ;;  %v9723_v20 = vpop.permute.xlu1 %9722 }
 0x85b   : > { %v9893_v24 = vmax.f32 %v9861_v36, 0.0  ;;  %v15372_v4 = vpop.f32.mrf.mxu1  ;;  %12692 = vrot.lane.b32.xlu1 %v9781_v15, %s23474_s5  ;;  %v9859_v53 = vadd.f32 %v21283_v23, %v9820_v57  ;;  %12702 = vrot.lane.b32.xlu0 %v9786_v7, %s23474_s5  ;;  %v9825_v11 = vmul.f32 %v21243_v35, %v9786_v7  ;;  %v9417_v56 = vadd.f32 %v21449_v31, %v9201_v55 }
 0x85c   : > { %v9627_v13 = vadd.f32 %v15372_v4, %v9414_v49  ;;  %v9784_v54 = vsel %vm3797_vm5, %v9624_v27, %v21422_v3  ;;  %v9200_v5 = vadd.f32 %v21143_v30, %v21416_v6  ;;  %v9415_v31 = vadd.f32 %v21476_v19, %v9199_v63  ;;  %v9725_v30 = vpop.permute.xlu0 %9724  ;;  %v24103_v6 = vld [vmem:[#allocation59_spill] sm:$0xff]  ;;  %v15346_v27 = vpop.f32.mrf.mxu0 }
 0x85d   : > { %v9915_v48 = vpack.c.bf16 %v9893_v24, %v9892_v2  ;;  %v9891_v41 = vmax.f32 %v9859_v53, 0.0  ;;  %v9560_v50 = vpop.f32.mrf.mxu1  ;;  %v9823_v9 = vmul.f32 %v21243_v35, %v9784_v54  ;;  %v9864_v3 = vadd.f32 %v21283_v23, %v9825_v11  ;;  %v24104_v53 = vld [vmem:[#allocation37_spill] sm:$0xff] }
 0x85e   : > { %v9625_v29 = vadd.f32 %v9560_v50, %v9412_v34  ;;  %v9787_v1 = vsel %vm3797_vm5, %v9627_v13, %v21482_v40  ;;  %v9000_v51 = vadd.f32 %v24102_v43, %v24101_v52  ;;  %v8998_v15 = vadd.f32 %v24103_v6, %v8785_v14 }
 0x85f   : > { %v15375_v32 = vpop.f32.mrf.mxu1  ;;  %12698 = vrot.lane.b32.xlu0 %v9784_v54, %s23474_s5  ;;  %12704 = vrot.lane.b32.xlu1 %v9787_v1, %s23474_s5  ;;  %v9826_v8 = vmul.f32 %v21243_v35, %v9787_v1  ;;  %v9914_v28 = vpack.c.bf16 %v9891_v41, %v9890_v17  ;;  %v9862_v46 = vadd.f32 %v21283_v23, %v9823_v9  ;;  %v9896_v59 = vmax.f32 %v9864_v3, 0.0  ;;  %v9379_v9 = vpop.f32.mrf.mxu0 }
 0x860   : > { %v9630_v61 = vadd.f32 %v15375_v32, %v9417_v56  ;;  %v9785_v40 = vsel %vm3797_vm5, %v9625_v29, %v21442_v0  ;;  %v9418_v0 = vadd.f32 %v21497_v38, %v9202_v60  ;;  %v9203_v14 = vadd.f32 %v21166_v37, %v21464_v10  ;;  %v9727_v37 = vpop.permute.xlu1 %9726  ;;  %v9729_v54 = vpop.permute.xlu0 %9728 }
 0x861   : > { %v9865_v33 = vadd.f32 %v21283_v23, %v9826_v8  ;;  %v9573_v16 = vpop.f32.mrf.mxu1  ;;  %15403 = vmatprep.mubr.msk.bf16.mxu0 %vm9942_vm8, %v9914_v28  ;;  %v9824_v22 = vmul.f32 %v21243_v35, %v9785_v40  ;;  %v9416_v55 = vadd.f32 %v9363_v12, %v9200_v5  ;;  %v9894_v49 = vmax.f32 %v9862_v46, 0.0 }
 0x862   : > { %v9628_v19 = vadd.f32 %v9573_v16, %v9415_v31  ;;  %15404 = vmatmul.mubr.msk.bf16.gmra.mxu0 %vm9942_vm8, %v9915_v48  ;;  %v9790_v44 = vsel %vm3797_vm5, %v9630_v61, %v9721_v45  ;;  %v9421_v11 = vadd.f32 %v15345_v18, %v24104_v53  ;;  %v24105_v45 = vld [vmem:[#allocation66_spill] sm:$0xff]  ;;  %v9419_v17 = vadd.f32 %v9376_v26, %v9203_v14  ;;  %v24106_v48 = vld [vmem:[#allocation72_spill] sm:$0xff] }
 0x863   : > { %v9897_v36 = vmax.f32 %v9865_v33, 0.0  ;;  %v15376_v47 = vpop.f32.mrf.mxu1  ;;  %12700 = vrot.lane.b32.xlu1 %v9785_v40, %s23474_s5  ;;  %v9863_v57 = vadd.f32 %v21283_v23, %v9824_v22  ;;  %12710 = vrot.lane.b32.xlu0 %v9790_v44, %s23474_s5  ;;  %v9829_v62 = vmul.f32 %v21243_v35, %v9790_v44  ;;  %v9206_v42 = vadd.f32 %v24105_v45, %v9000_v51 }
 0x864   : > { %v9631_v39 = vadd.f32 %v15376_v47, %v9418_v0  ;;  %v9788_v38 = vsel %vm3797_vm5, %v9628_v19, %v21490_v21  ;;  %v9204_v18 = vadd.f32 %v24106_v48, %v8998_v15  ;;  %v9731_v52 = vpop.permute.xlu1 %9730 }
 0x865   : > { %v9917_v7 = vpack.c.bf16 %v9897_v36, %v9896_v59  ;;  %v9895_v2 = vmax.f32 %v9863_v57, 0.0  ;;  %v9576_v24 = vpop.f32.mrf.mxu1  ;;  %v9827_v4 = vmul.f32 %v21243_v35, %v9788_v38  ;;  %v9868_v10 = vadd.f32 %v21283_v23, %v9829_v62 }
 0x866   : > { %v9629_v63 = vadd.f32 %v9576_v24, %v9416_v55  ;;  %v9791_v13 = vsel %vm3797_vm5, %v9631_v39, %v9723_v20  ;;  %v9422_v1 = vadd.f32 %v15346_v27, %v9206_v42  ;;  %v9420_v61 = vadd.f32 %v9379_v9, %v9204_v18  ;;  %v21611_v24 = vld [vmem:[%s23307_s24 + $0x10] sm:$0xff]   ;;  %v21621_v42 = vld [vmem:[%s23307_s24 + $0x18] sm:$0xff]  }
 0x867   : > { %v15379_v12 = vpop.f32.mrf.mxu1  ;;  %12706 = vrot.lane.b32.xlu0 %v9788_v38, %s23474_s5  ;;  %12712 = vrot.lane.b32.xlu1 %v9791_v13, %s23474_s5  ;;  %v9830_v21 = vmul.f32 %v21243_v35, %v9791_v13  ;;  %v9916_v34 = vpack.c.bf16 %v9895_v2, %v9894_v49  ;;  %v9866_v25 = vadd.f32 %v21283_v23, %v9827_v4  ;;  %v9900_v8 = vmax.f32 %v9868_v10, 0.0  ;;  %v10297_v38 = vld [vmem:[#allocation2] sm:$0xff]  ;;  %v10299_v2 = vld [vmem:[#allocation2 + $0x10] sm:$0x3] }
 0x868   : > { %v9634_v41 = vadd.f32 %v15379_v12, %v9421_v11  ;;  %v9789_v50 = vsel %vm3797_vm5, %v9629_v63, %v21517_v58  ;;  %v10417_v49 = vrot.slane %v10297_v38, 1  ;;  %v10420_v53 = vrot.slane %v10299_v2, 1  ;;  %15487 = vmatprep.subr.bf16.mxu1 %v21611_v24 }
 0x869   : > { %v9869_v60 = vadd.f32 %v21283_v23, %v9830_v21  ;;  %v9589_v29 = vpop.f32.mrf.mxu1  ;;  %15407 = vmatprep.mubr.msk.bf16.mxu0 %vm9942_vm8, %v9916_v34  ;;  %v9828_v56 = vmul.f32 %v21243_v35, %v9789_v50  ;;  %v9898_v43 = vmax.f32 %v9866_v25, 0.0  ;;  %v10978_v63 = vrot.slane %v10297_v38, 2  ;;  %v21635_v34 = vld [vmem:[%s23305_s22] ss:$0 sm:$0xff] }
 0x86a   : > { %v9632_v3 = vadd.f32 %v9589_v29, %v9419_v17  ;;  %15408 = vmatmul.mubr.msk.bf16.gmra.mxu0 %vm9942_vm8, %v9917_v7  ;;  %v9794_v32 = vsel %vm3797_vm5, %v9634_v41, %v9729_v54  ;;  %v10981_v10 = vrot.slane %v10299_v2, 2  ;;  %v21640_v17 = vld [vmem:[%s23306_s23] ss:$0 sm:$0xff] }
 0x86b   : > { %v9901_v28 = vmax.f32 %v9869_v60, 0.0  ;;  %v15380_v20 = vpop.f32.mrf.mxu1  ;;  %12708 = vrot.lane.b32.xlu1 %v9789_v50, %s23474_s5  ;;  %v9867_v58 = vadd.f32 %v21283_v23, %v9828_v56  ;;  %v9833_v5 = vmul.f32 %v21243_v35, %v9794_v32 }
 0x86c   : > { %v9635_v31 = vadd.f32 %v15380_v20, %v9422_v1  ;;  %v9792_v40 = vsel %vm3797_vm5, %v9632_v3, %v9725_v30 }
 0x86d   : > { %v9919_v51 = vpack.c.bf16 %v9901_v28, %v9900_v8  ;;  %v9899_v26 = vmax.f32 %v9867_v58, 0.0  ;;  %v9592_v46 = vpop.f32.mrf.mxu1  ;;  %12714 = vrot.lane.b32.xlu0 %v9792_v40, %s23474_s5  ;;  %v9831_v33 = vmul.f32 %v21243_v35, %v9792_v40  ;;  %v9872_v15 = vadd.f32 %v21283_v23, %v9833_v5 }
 0x86e   : > { %v9633_v16 = vadd.f32 %v9592_v46, %v9420_v61  ;;  %v9795_v22 = vsel %vm3797_vm5, %v9635_v31, %v9731_v52 }
 0x86f   : > { %v9918_v6 = vpack.c.bf16 %v9899_v26, %v9898_v43  ;;  %v9834_v19 = vmul.f32 %v21243_v35, %v9795_v22  ;;  %v9870_v30 = vadd.f32 %v21283_v23, %v9831_v33  ;;  %v9904_v47 = vmax.f32 %v9872_v15, 0.0 }
 0x870   : > { %v9793_v0 = vsel %vm3797_vm5, %v9633_v16, %v9727_v37 }
 0x871   : > { %15411 = vmatprep.mubr.msk.bf16.mxu0 %vm9942_vm8, %v9918_v6  ;;  %12716 = vrot.lane.b32.xlu1 %v9793_v0, %s23474_s5  ;;  %v9832_v44 = vmul.f32 %v21243_v35, %v9793_v0  ;;  %v9873_v59 = vadd.f32 %v21283_v23, %v9834_v19  ;;  %v9902_v62 = vmax.f32 %v9870_v30, 0.0  ;;  %v15805_v35 = vld [vmem:[%s23307_s24] sm:$0xff]  }
 0x872   : > { %12718 = vrot.lane.b32.xlu0 %v9794_v32, %s23474_s5  ;;  %15412 = vmatmul.mubr.msk.bf16.gmra.mxu0 %vm9942_vm8, %v9919_v51 }
 0x873   : > { %v9871_v36 = vadd.f32 %v21283_v23, %v9832_v44  ;;  %v9905_v57 = vmax.f32 %v9873_v59, 0.0  ;;  %15453 = vmatprep.subr.bf16.mxu0 %v15805_v35  ;;  %v10298_v23 = vld [vmem:[#allocation2 + $0x8] sm:$0xff] }
 0x874   : > { %15454 = vmatpush3.bf16.msra.mxu0 %v15805_v35  ;;  %v10351_v27 = vpack.c.bf16 %v10298_v23, %v10297_v38  ;;  %v10418_v7 = vrot.slane %v10298_v23, 1  ;;  %v10979_v13 = vrot.slane %v10298_v23, 2 }
 0x875   : > { %v9903_v14 = vmax.f32 %v9871_v36, 0.0  ;;  %v9921_v39 = vpack.c.bf16 %v9905_v57, %v9904_v47  ;;  %12720 = vrot.lane.b32.xlu1 %v9795_v22, %s23474_s5  ;;  %15521 = vmatprep.subr.bf16.mxu0 %v21621_v42  ;;  %s23231_s5 = scalar_lea.hbm %s23308_s25, %s13672_s0  ;;  %s15909_s0 = smov [#allocation3]  }
 0x876   : > { %v10419_v4 = vsel %vm1458_vm2, %v10417_v49, %v10418_v7  ;;  %v10421_v11 = vsel %vm1458_vm2, %v10418_v7, %v10420_v53  ;;  %v21625_v37 = vsel %vm2020_vm3, %v10978_v63, %v10979_v13  ;;  %v21628_v12 = vsel %vm2020_vm3, %v10979_v13, %v10981_v10  ;;  %v21700_v13 = vld [vmem:[%s23307_s24 + $0x28] sm:$0xff]   ;;  %s15849_s6 = sshll.u32 %s15909_s0, 4  ;;  %s15850_s6 = int_to_ptr.vmem [resolvable:$false] %s15849_s6 }
 0x877   : > { %v9920_v55 = vpack.c.bf16 %v9903_v14, %v9902_v62  ;;  %v10529_v45 = vpack.c.bf16 %v10421_v11, %v10419_v4  ;;  %s15851_s9 = scalar_lea.vmem %s15850_s6, 8192  ;;  %p15852_p0 = scmp.lt.s32.totalorder %s23235_s8, %s15850_s6 }
 0x878   : > { %p15853_p1 = scmp.lt.s32.totalorder %s15851_s9, %s15845_s1 }
 0x879   : > { %15415 = vmatprep.mubr.msk.bf16.mxu0 %vm9942_vm8, %v9920_v55  ;;  %15421 = vmatprep.mubr.msk.bf16.mxu1 %vm764_vm0, %v10529_v45 }
 0x87a   : > { %15416 = vmatmul.mubr.msk.bf16.gmra.mxu0 %vm9942_vm8, %v9921_v39  ;;  %p15854_p2 = por %p15853_p1, %p15852_p0 }
 0x87b   : > { %15455 = vmatprep.mubr.msk.bf16.mxu0 %vm764_vm0, %v10351_v27 }
 0x87c   : > { %p15855_p3 = pnand %p15854_p2, %p15848_p13 }
 0x902   : > { %v15389_v54 = vpop.f32.mrf.mxu0 }
 0x903   : > { %v10164_v48 = vmul.f32 %v15389_v54, %v21635_v34 }
 0x904   : > { %v10028_v18 = vpop.f32.mrf.mxu0 }
 0x905   : > { %v10203_v41 = vadd.f32 %v21640_v17, %v10164_v48  ;;  %v10162_v50 = vmul.f32 %v21635_v34, %v10028_v18 }
 0x906   : > { %v15390_v9 = vpop.f32.mrf.mxu0 }
 0x907   : > { %v10235_v25 = vmax.f32 %v10203_v41, 0.0  ;;  %v10201_v60 = vadd.f32 %v21640_v17, %v10162_v50  ;;  %v10165_v29 = vmul.f32 %v15390_v9, %v21635_v34 }
 0x908   : > { %v10031_v56 = vpop.f32.mrf.mxu0 }
 0x909   : > { %10267 = vst.msk [vmem:[#allocation2 + $0x31] sm:$0xff] %vm764_vm0, %v10235_v25  ;;  %v10233_v1 = vmax.f32 %v10201_v60, 0.0  ;;  %v10204_v3 = vadd.f32 %v21640_v17, %v10165_v29  ;;  %v10163_v32 = vmul.f32 %v21635_v34, %v10031_v56 }
 0x90a   : > { %v15393_v8 = vpop.f32.mrf.mxu0 }
 0x90b   : > { %10265 = vst.msk [vmem:[#allocation2 + $0x19] sm:$0xff] %vm764_vm0, %v10233_v1  ;;  %v10236_v28 = vmax.f32 %v10204_v3, 0.0  ;;  %v10202_v20 = vadd.f32 %v21640_v17, %v10163_v32  ;;  %v10168_v58 = vmul.f32 %v15393_v8, %v21635_v34 }
 0x90c   : > { %v10044_v5 = vpop.f32.mrf.mxu0 }
 0x90d   : > { %10268 = vst.msk [vmem:[#allocation2 + $0x39] sm:$0xff] %vm764_vm0, %v10236_v28  ;;  %v10234_v61 = vmax.f32 %v10202_v20, 0.0  ;;  %v10207_v31 = vadd.f32 %v21640_v17, %v10168_v58  ;;  %v10166_v40 = vmul.f32 %v21635_v34, %v10044_v5 }
 0x90e   : > { %v15394_v52 = vpop.f32.mrf.mxu0 }
 0x90f   : > { %10266 = vst.msk [vmem:[#allocation2 + $0x21] sm:$0xff] %vm764_vm0, %v10234_v61  ;;  %v10239_v43 = vmax.f32 %v10207_v31, 0.0  ;;  %v10205_v51 = vadd.f32 %v21640_v17, %v10166_v40  ;;  %v10169_v26 = vmul.f32 %v15394_v52, %v21635_v34  ;;  %v21732_v31 = vld [vmem:[%s23307_s24 + $0x20] sm:$0xff]  }
 0x910   : > { %v10047_v46 = vpop.f32.mrf.mxu0  ;;  %v21662_v6 = vld [vmem:[#allocation2 + $0x30] sm:$0xff]  ;;  %24109 = vst [vmem:[#allocation69_spill] sm:$0xff] %v21732_v31 }
 0x911   : > { %10271 = vst.msk [vmem:[#allocation2 + $0x61] sm:$0xff] %vm764_vm0, %v10239_v43  ;;  %v10237_v33 = vmax.f32 %v10205_v51, 0.0  ;;  %v10208_v16 = vadd.f32 %v21640_v17, %v10169_v26  ;;  %v10167_v22 = vmul.f32 %v21635_v34, %v10047_v46  ;;  %v10427_v47 = vrot.slane %v21662_v6, 1 }
 0x912   : > { %v15397_v15 = vpop.f32.mrf.mxu0  ;;  %v21664_v19 = vld [vmem:[#allocation2 + $0x18] sm:$0xff]  ;;  %v10988_v57 = vrot.slane %v21662_v6, 2 }
 0x913   : > { %10269 = vst.msk [vmem:[#allocation2 + $0x49] sm:$0xff] %vm764_vm0, %v10237_v33  ;;  %v10240_v0 = vmax.f32 %v10208_v16, 0.0  ;;  %v10206_v30 = vadd.f32 %v21640_v17, %v10167_v22  ;;  %v10172_v44 = vmul.f32 %v15397_v15, %v21635_v34  ;;  %v10422_v35 = vrot.slane %v21664_v19, 1 }
 0x914   : > { %v10060_v59 = vpop.f32.mrf.mxu0  ;;  %v21669_v36 = vld [vmem:[#allocation2 + $0x38] sm:$0xff]  ;;  %v21673_v62 = vld [vmem:[#allocation2 + $0x40] sm:$0x3]  ;;  %v10983_v27 = vrot.slane %v21664_v19, 2 }
 0x915   : > { %10272 = vst.msk [vmem:[#allocation2 + $0x69] sm:$0xff] %vm764_vm0, %v10240_v0  ;;  %v10238_v14 = vmax.f32 %v10206_v30, 0.0  ;;  %v10211_v39 = vadd.f32 %v21640_v17, %v10172_v44  ;;  %v10170_v55 = vmul.f32 %v21635_v34, %v10060_v59  ;;  %v21684_v49 = vpack.c.bf16 %v21669_v36, %v21662_v6 }
 0x916   : > { %v15398_v38 = vpop.f32.mrf.mxu0  ;;  %v21679_v23 = vld [vmem:[#allocation2 + $0x20] sm:$0xff]  ;;  %v10428_v7 = vrot.slane %v21669_v36, 1  ;;  %v21687_v2 = vld [vmem:[#allocation2 + $0x28] sm:$0x3]  ;;  %v10430_v4 = vrot.slane %v21673_v62, 1  ;;  %v23432_v1 = vrot.slane %v21669_v36, 2 }
 0x917   : > { %10270 = vst.msk [vmem:[#allocation2 + $0x51] sm:$0xff] %vm764_vm0, %v10238_v14  ;;  %v10243_v53 = vmax.f32 %v10211_v39, 0.0  ;;  %v10209_v11 = vadd.f32 %v21640_v17, %v10170_v55  ;;  %v10173_v45 = vmul.f32 %v15398_v38, %v21635_v34  ;;  %v21695_v63 = vpack.c.bf16 %v21679_v23, %v21664_v19 }
 0x918   : > { %v10063_v10 = vpop.f32.mrf.mxu0  ;;  %v10423_v54 = vrot.slane %v21679_v23, 1  ;;  %v23433_v48 = vrot.slane %v21679_v23, 2  ;;  %v10425_v18 = vrot.slane %v21687_v2, 1  ;;  %v10429_v41 = vsel %vm1458_vm2, %v10427_v47, %v10428_v7  ;;  %v21712_v29 = vld [vmem:[#allocation2 + $0x60] sm:$0xff] }
 0x919   : > { %10275 = vst.msk [vmem:[#allocation2 + $0x91] sm:$0xff] %vm764_vm0, %v10243_v53  ;;  %v10241_v50 = vmax.f32 %v10209_v11, 0.0  ;;  %v10212_v9 = vadd.f32 %v21640_v17, %v10173_v45  ;;  %v10171_v25 = vmul.f32 %v21635_v34, %v10063_v10  ;;  %15456 = vmatmul.mubr.msk.bf16.vlgmr.msra.gmra.mxu0 %vm764_vm0, %v21695_v63  ;;  %v10431_v60 = vsel %vm1458_vm2, %v10428_v7, %v10430_v4 }
 0x91a   : > { %v15401_v56 = vpop.f32.mrf.mxu0  ;;  %15459 = vmatprep.mubr.msk.bf16.mxu0 %vm764_vm0, %v21684_v49  ;;  %v10424_v3 = vsel %vm1458_vm2, %v10422_v35, %v10423_v54  ;;  %v10426_v32 = vsel %vm1458_vm2, %v10423_v54, %v10425_v18  ;;  %v21719_v8 = vpack.c.bf16 %v10431_v60, %v10429_v41  ;;  %v21721_v28 = vld [vmem:[#allocation2 + $0x48] sm:$0xff]  ;;  %15522 = vmatpush3.bf16.msra.mxu0 %v21621_v42  ;;  %v10437_v51 = vrot.slane %v21712_v29, 1 }
 0x91b   : > { %10273 = vst.msk [vmem:[#allocation2 + $0x79] sm:$0xff] %vm764_vm0, %v10241_v50  ;;  %v10244_v20 = vmax.f32 %v10212_v9, 0.0  ;;  %v10210_v58 = vadd.f32 %v21640_v17, %v10171_v25  ;;  %v10176_v5 = vmul.f32 %v15401_v56, %v21635_v34  ;;  %v21727_v61 = vpack.c.bf16 %v10426_v32, %v10424_v3  ;;  %15589 = vmatprep.subr.bf16.mxu0 %v21700_v13 }
 0x91c   : > { %24107 = vst [vmem:[#allocation23_spill] sm:$0xff] %v21719_v8  ;;  %v10076_v40 = vpop.f32.mrf.mxu0  ;;  %v10432_v52 = vrot.slane %v21721_v28, 1  ;;  %v10993_v42 = vrot.slane %v21721_v28, 2  ;;  %v21737_v43 = vld [vmem:[#allocation2 + $0x68] sm:$0xff]  ;;  %v21740_v26 = vld [vmem:[#allocation2 + $0x70] sm:$0x3]  ;;  %v21745_v46 = vsel %vm2020_vm3, %v10983_v27, %v23433_v48 }
 0x91d   : > { %24108 = vst [vmem:[#allocation77_spill] sm:$0xff] %v21727_v61  ;;  %10276 = vst.msk [vmem:[#allocation2 + $0x99] sm:$0xff] %vm764_vm0, %v10244_v20  ;;  %v10242_v33 = vmax.f32 %v10210_v58, 0.0  ;;  %v10215_v16 = vadd.f32 %v21640_v17, %v10176_v5  ;;  %v10174_v22 = vmul.f32 %v21635_v34, %v10076_v40  ;;  %15422 = vmatmul.mubr.msk.bf16.vlgmr.msra.gmra.mxu1 %vm764_vm0, %v21727_v61  ;;  %v10998_v15 = vrot.slane %v21712_v29, 2 }
 0x91e   : > { %15488 = vmatpush3.bf16.msra.mxu1 %v21611_v24  ;;  %15425 = vmatprep.mubr.msk.bf16.mxu1 %vm764_vm0, %v21719_v8  ;;  %v15402_v19 = vpop.f32.mrf.mxu0  ;;  %v21756_v0 = vld [vmem:[#allocation2 + $0x50] sm:$0xff]  ;;  %v21760_v30 = vpack.c.bf16 %v21737_v43, %v21712_v29  ;;  %v10438_v44 = vrot.slane %v21737_v43, 1  ;;  %v21763_v59 = vld [vmem:[#allocation2 + $0x58] sm:$0x3]  ;;  %v10440_v47 = vrot.slane %v21740_v26, 1  ;;  %v21771_v24 = vsel %vm2020_vm3, %v10988_v57, %v23432_v1 }
 0x91f   : > { %10274 = vst.msk [vmem:[#allocation2 + $0x81] sm:$0xff] %vm764_vm0, %v10242_v33  ;;  %v10247_v14 = vmax.f32 %v10215_v16, 0.0  ;;  %v10213_v39 = vadd.f32 %v21640_v17, %v10174_v22  ;;  %v10177_v55 = vmul.f32 %v15402_v19, %v21635_v34  ;;  %v21778_v35 = vpack.c.bf16 %v21756_v0, %v21721_v28  ;;  %15555 = vmatprep.subr.bf16.mxu1 %v21732_v31 }
 0x920   : > { %24110 = vst [vmem:[#allocation71_spill] sm:$0xff] %v21760_v30  ;;  %v10079_v38 = vpop.f32.mrf.mxu0  ;;  %v10433_v27 = vrot.slane %v21756_v0, 1  ;;  %v23430_v6 = vrot.slane %v21756_v0, 2  ;;  %v10435_v57 = vrot.slane %v21763_v59, 1  ;;  %v10439_v7 = vsel %vm1458_vm2, %v10437_v51, %v10438_v44  ;;  %v21791_v10 = vld [vmem:[#allocation2 + $0x90] sm:$0xff] }
 0x921   : > { %10279 = vst.msk [vmem:[#allocation2 + $0xc1] sm:$0xff] %vm764_vm0, %v10247_v14  ;;  %v10245_v4 = vmax.f32 %v10213_v39, 0.0  ;;  %v10216_v53 = vadd.f32 %v21640_v17, %v10177_v55  ;;  %v10175_v11 = vmul.f32 %v21635_v34, %v10079_v38  ;;  %15460 = vmatmul.mubr.msk.bf16.gmra.mxu0 %vm764_vm0, %v21778_v35  ;;  %v10441_v45 = vsel %vm1458_vm2, %v10438_v44, %v10440_v47 }
 0x922   : > { %v15405_v54 = vpop.f32.mrf.mxu0  ;;  %15463 = vmatprep.mubr.msk.bf16.mxu0 %vm764_vm0, %v21760_v30  ;;  %v23429_v18 = vrot.slane %v21737_v43, 2  ;;  %v10434_v41 = vsel %vm1458_vm2, %v10432_v52, %v10433_v27  ;;  %v10436_v50 = vsel %vm1458_vm2, %v10433_v27, %v10435_v57  ;;  %v21798_v9 = vpack.c.bf16 %v10441_v45, %v10439_v7  ;;  %v21800_v25 = vld [vmem:[#allocation2 + $0x78] sm:$0xff] }
 0x923   : > { %10277 = vst.msk [vmem:[#allocation2 + $0xa9] sm:$0xff] %vm764_vm0, %v10245_v4  ;;  %v10248_v60 = vmax.f32 %v10216_v53, 0.0  ;;  %v10214_v29 = vadd.f32 %v21640_v17, %v10175_v11  ;;  %v10180_v56 = vmul.f32 %v15405_v54, %v21635_v34  ;;  %v21805_v3 = vpack.c.bf16 %v10436_v50, %v10434_v41 }
 0x924   : > { %24111 = vst [vmem:[#allocation39_spill] sm:$0xff] %v21798_v9  ;;  %v10092_v32 = vpop.f32.mrf.mxu0  ;;  %v10442_v28 = vrot.slane %v21800_v25, 1  ;;  %v11003_v20 = vrot.slane %v21800_v25, 2  ;;  %v21809_v58 = vld [vmem:[#allocation2 + $0x98] sm:$0xff]  ;;  %v10447_v5 = vrot.slane %v21791_v10, 1  ;;  %v21817_v52 = vsel %vm2020_vm3, %v10993_v42, %v23430_v6 }
 0x925   : > { %24112 = vst [vmem:[#allocation20_spill] sm:$0xff] %v21805_v3  ;;  %v21812_v40 = vld [vmem:[#allocation2 + $0xa0] sm:$0x3]  ;;  %10280 = vst.msk [vmem:[#allocation2 + $0xc9] sm:$0xff] %vm764_vm0, %v10248_v60  ;;  %v10246_v51 = vmax.f32 %v10214_v29, 0.0  ;;  %v10219_v33 = vadd.f32 %v21640_v17, %v10180_v56  ;;  %v10178_v16 = vmul.f32 %v21635_v34, %v10092_v32  ;;  %15426 = vmatmul.mubr.msk.bf16.gmra.mxu1 %vm764_vm0, %v21805_v3  ;;  %v11008_v22 = vrot.slane %v21791_v10, 2 }
 0x926   : > { %15429 = vmatprep.mubr.msk.bf16.mxu1 %vm764_vm0, %v21798_v9  ;;  %v15406_v19 = vpop.f32.mrf.mxu0  ;;  %v21827_v44 = vld [vmem:[#allocation2 + $0x80] sm:$0xff]  ;;  %v21831_v42 = vpack.c.bf16 %v21809_v58, %v21791_v10  ;;  %v10448_v47 = vrot.slane %v21809_v58, 1  ;;  %v21834_v14 = vld [vmem:[#allocation2 + $0x88] sm:$0x3]  ;;  %v10450_v39 = vrot.slane %v21812_v40, 1  ;;  %v21840_v55 = vsel %vm2020_vm3, %v10998_v15, %v23429_v18 }
 0x927   : > { %10278 = vst.msk [vmem:[#allocation2 + $0xb1] sm:$0xff] %vm764_vm0, %v10246_v51  ;;  %v10251_v38 = vmax.f32 %v10219_v33, 0.0  ;;  %v10217_v27 = vadd.f32 %v21640_v17, %v10178_v16  ;;  %v10181_v57 = vmul.f32 %v15406_v19, %v21635_v34  ;;  %v21847_v7 = vpack.c.bf16 %v21827_v44, %v21800_v25 }
 0x928   : > { %24113 = vst [vmem:[#allocation56_spill] sm:$0xff] %v21831_v42  ;;  %v10095_v4 = vpop.f32.mrf.mxu0  ;;  %v10443_v53 = vrot.slane %v21827_v44, 1  ;;  %v23428_v11 = vrot.slane %v21827_v44, 2  ;;  %v10445_v45 = vrot.slane %v21834_v14, 1  ;;  %v10449_v15 = vsel %vm1458_vm2, %v10447_v5, %v10448_v47  ;;  %v21859_v25 = vld [vmem:[#allocation2 + $0xc0] sm:$0xff] }
 0x929   : > { %24114 = vst [vmem:[#allocation73_spill] sm:$0xff] %v21847_v7  ;;  %10283 = vst.msk [vmem:[#allocation2 + $0xf1] sm:$0xff] %vm764_vm0, %v10251_v38  ;;  %v10249_v10 = vmax.f32 %v10217_v27, 0.0  ;;  %v10220_v54 = vadd.f32 %v21640_v17, %v10181_v57  ;;  %v10179_v41 = vmul.f32 %v21635_v34, %v10095_v4  ;;  %15464 = vmatmul.mubr.msk.bf16.gmra.mxu0 %vm764_vm0, %v21847_v7  ;;  %v23431_v29 = vrot.slane %v21809_v58, 2 }
 0x92a   : > { %v10451_v50 = vsel %vm1458_vm2, %v10448_v47, %v10450_v39  ;;  %v15409_v60 = vpop.f32.mrf.mxu0  ;;  %15467 = vmatprep.mubr.msk.bf16.mxu0 %vm764_vm0, %v21831_v42  ;;  %v10444_v56 = vsel %vm1458_vm2, %v10442_v28, %v10443_v53  ;;  %v10446_v32 = vsel %vm1458_vm2, %v10443_v53, %v10445_v45  ;;  %v21868_v51 = vld [vmem:[#allocation2 + $0xa8] sm:$0xff]  ;;  %v10457_v57 = vrot.slane %v21859_v25, 1 }
 0x92b   : > { %v21866_v5 = vpack.c.bf16 %v10451_v50, %v10449_v15  ;;  %10281 = vst.msk [vmem:[#allocation2 + $0xd9] sm:$0xff] %vm764_vm0, %v10249_v10  ;;  %v10252_v33 = vmax.f32 %v10220_v54, 0.0  ;;  %v10218_v16 = vadd.f32 %v21640_v17, %v10179_v41  ;;  %v10184_v19 = vmul.f32 %v15409_v60, %v21635_v34 }
 0x92c   : > { %v21873_v47 = vpack.c.bf16 %v10446_v32, %v10444_v56  ;;  %v10108_v39 = vpop.f32.mrf.mxu0  ;;  %v10452_v38 = vrot.slane %v21868_v51, 1  ;;  %v11013_v28 = vrot.slane %v21868_v51, 2  ;;  %v21877_v27 = vld [vmem:[#allocation2 + $0xc8] sm:$0xff]  ;;  %v21880_v4 = vld [vmem:[#allocation2 + $0xd0] sm:$0x3]  ;;  %v21885_v53 = vsel %vm2020_vm3, %v11003_v20, %v23428_v11 }
 0x92d   : > { %24115 = vst [vmem:[#allocation38_spill] sm:$0xff] %v21866_v5  ;;  %10284 = vst.msk [vmem:[#allocation2 + $0xf9] sm:$0xff] %vm764_vm0, %v10252_v33  ;;  %v10250_v45 = vmax.f32 %v10218_v16, 0.0  ;;  %v10223_v15 = vadd.f32 %v21640_v17, %v10184_v19  ;;  %v10182_v10 = vmul.f32 %v21635_v34, %v10108_v39  ;;  %v11018_v54 = vrot.slane %v21859_v25, 2 }
 0x92e   : > { %24116 = vst [vmem:[#allocation74_spill] sm:$0xff] %v21873_v47  ;;  %15430 = vmatmul.mubr.msk.bf16.gmra.mxu1 %vm764_vm0, %v21873_v47  ;;  %v15410_v41 = vpop.f32.mrf.mxu0  ;;  %v21895_v50 = vld [vmem:[#allocation2 + $0xb0] sm:$0xff]  ;;  %v21899_v20 = vpack.c.bf16 %v21877_v27, %v21859_v25  ;;  %v10458_v60 = vrot.slane %v21877_v27, 1  ;;  %v21902_v56 = vld [vmem:[#allocation2 + $0xb8] sm:$0x3]  ;;  %v10460_v32 = vrot.slane %v21880_v4, 1  ;;  %v21908_v33 = vsel %vm2020_vm3, %v11008_v22, %v23431_v29 }
 0x92f   : > { %15433 = vmatprep.mubr.msk.bf16.mxu1 %vm764_vm0, %v21866_v5  ;;  %10282 = vst.msk [vmem:[#allocation2 + $0xe1] sm:$0xff] %vm764_vm0, %v10250_v45  ;;  %v10255_v16 = vmax.f32 %v10223_v15, 0.0  ;;  %v10221_v19 = vadd.f32 %v21640_v17, %v10182_v10  ;;  %v10185_v39 = vmul.f32 %v15410_v41, %v21635_v34  ;;  %v21915_v25 = vpack.c.bf16 %v21895_v50, %v21868_v51 }
 0x930   : > { %24117 = vst [vmem:[#allocation53_spill] sm:$0xff] %v21899_v20  ;;  %v10111_v21 = vpop.f32.mrf.mxu0  ;;  %v10453_v11 = vrot.slane %v21895_v50, 1  ;;  %v10455_v6 = vrot.slane %v21902_v56, 1  ;;  %v10459_v22 = vsel %vm1458_vm2, %v10457_v57, %v10458_v60  ;;  %v10461_v51 = vsel %vm1458_vm2, %v10458_v60, %v10460_v32  ;;  %v21927_v41 = vld [vmem:[#allocation2 + $0xf0] sm:$0xff] }
 0x931   : > { %24118 = vst [vmem:[#allocation41_spill] sm:$0xff] %v21915_v25  ;;  %10287 = vst.msk [vmem:[#allocation2 + $0x121] sm:$0xff] %vm764_vm0, %v10255_v16  ;;  %v10253_v45 = vmax.f32 %v10221_v19, 0.0  ;;  %v10224_v15 = vadd.f32 %v21640_v17, %v10185_v39  ;;  %v10183_v10 = vmul.f32 %v21635_v34, %v10111_v21  ;;  %15468 = vmatmul.mubr.msk.bf16.gmra.mxu0 %vm764_vm0, %v21915_v25 }
 0x932   : > { %v15413_v29 = vpop.f32.mrf.mxu0  ;;  %15471 = vmatprep.mubr.msk.bf16.mxu0 %vm764_vm0, %v21899_v20  ;;  %v10454_v16 = vsel %vm1458_vm2, %v10452_v38, %v10453_v11  ;;  %v10456_v19 = vsel %vm1458_vm2, %v10453_v11, %v10455_v6  ;;  %v21934_v39 = vpack.c.bf16 %v10461_v51, %v10459_v22  ;;  %v21936_v21 = vld [vmem:[#allocation2 + $0xd8] sm:$0xff]  ;;  %v10467_v6 = vrot.slane %v21927_v41, 1 }
 0x933   : > { %10285 = vst.msk [vmem:[#allocation2 + $0x109] sm:$0xff] %vm764_vm0, %v10253_v45  ;;  %v10256_v1 = vmax.f32 %v10224_v15, 0.0  ;;  %v10222_v60 = vadd.f32 %v21640_v17, %v10183_v10  ;;  %v10188_v32 = vmul.f32 %v15413_v29, %v21635_v34  ;;  %v21941_v48 = vpack.c.bf16 %v10456_v19, %v10454_v16 }
 0x934   : > { %24119 = vst [vmem:[#allocation14_spill] sm:$0xff] %v21934_v39  ;;  %v10124_v18 = vpop.f32.mrf.mxu0  ;;  %v10462_v57 = vrot.slane %v21936_v21, 1  ;;  %v11023_v38 = vrot.slane %v21936_v21, 2  ;;  %v21945_v5 = vld [vmem:[#allocation2 + $0xf8] sm:$0xff]  ;;  %v21948_v11 = vld [vmem:[#allocation2 + $0x100] sm:$0x3] }
 0x935   : > { %24120 = vst [vmem:[#allocation44_spill] sm:$0xff] %v21941_v48  ;;  %v24121_v22 = vrot.slane %v21895_v50, 2  ;;  %10288 = vst.msk [vmem:[#allocation2 + $0x129] sm:$0xff] %vm764_vm0, %v10256_v1  ;;  %v10254_v29 = vmax.f32 %v10222_v60, 0.0  ;;  %v10227_v15 = vadd.f32 %v21640_v17, %v10188_v32  ;;  %v10186_v10 = vmul.f32 %v21635_v34, %v10124_v18 }
 0x936   : > { %15434 = vmatmul.mubr.msk.bf16.gmra.mxu1 %vm764_vm0, %v21941_v48  ;;  %v11028_v51 = vrot.slane %v21927_v41, 2  ;;  %v15414_v16 = vpop.f32.mrf.mxu0  ;;  %v21963_v19 = vld [vmem:[#allocation2 + $0xe0] sm:$0xff]  ;;  %v10468_v1 = vrot.slane %v21945_v5, 1  ;;  %v21970_v60 = vld [vmem:[#allocation2 + $0xe8] sm:$0x3]  ;;  %v10470_v18 = vrot.slane %v21948_v11, 1 }
 0x937   : > { %v21953_v45 = vsel %vm2020_vm3, %v11013_v28, %v24121_v22  ;;  %15437 = vmatprep.mubr.msk.bf16.mxu1 %vm764_vm0, %v21934_v39  ;;  %v21967_v28 = vpack.c.bf16 %v21945_v5, %v21927_v41  ;;  %v24123_v32 = vrot.slane %v21877_v27, 2  ;;  %10286 = vst.msk [vmem:[#allocation2 + $0x111] sm:$0xff] %vm764_vm0, %v10254_v29  ;;  %v10259_v39 = vmax.f32 %v10227_v15, 0.0 }
 0x938   : > { %v10225_v48 = vadd.f32 %v21640_v17, %v10186_v10  ;;  %v10189_v47 = vmul.f32 %v15414_v16, %v21635_v34  ;;  %v21983_v41 = vpack.c.bf16 %v21963_v19, %v21936_v21  ;;  %v10127_v9 = vpop.f32.mrf.mxu0  ;;  %v10463_v3 = vrot.slane %v21963_v19, 1  ;;  %v21995_v16 = vld [vmem:[#allocation2 + $0x120] sm:$0xff] }
 0x939   : > { %24122 = vst [vmem:[#allocation76_spill] sm:$0xff] %v21967_v28  ;;  %v21976_v22 = vsel %vm2020_vm3, %v11018_v54, %v24123_v32  ;;  %v10465_v61 = vrot.slane %v21970_v60, 1  ;;  %v10469_v54 = vsel %vm1458_vm2, %v10467_v6, %v10468_v1  ;;  %10291 = vst.msk [vmem:[#allocation2 + $0x151] sm:$0xff] %vm764_vm0, %v10259_v39  ;;  %v10187_v10 = vmul.f32 %v21635_v34, %v10127_v9 }
 0x93a   : > { %24124 = vst [vmem:[#allocation29_spill] sm:$0xff] %v21983_v41  ;;  %v10257_v29 = vmax.f32 %v10225_v48, 0.0  ;;  %v10228_v15 = vadd.f32 %v21640_v17, %v10189_v47  ;;  %15472 = vmatmul.mubr.msk.bf16.gmra.mxu0 %vm764_vm0, %v21983_v41  ;;  %v10471_v21 = vsel %vm1458_vm2, %v10468_v1, %v10470_v18  ;;  %v15417_v32 = vpop.f32.mrf.mxu0  ;;  %v10464_v39 = vsel %vm1458_vm2, %v10462_v57, %v10463_v3  ;;  %v10330_v9 = vld [vmem:[#allocation2 + $0x108] sm:$0xff] }
 0x93b   : > { %15475 = vmatprep.mubr.msk.bf16.mxu0 %vm764_vm0, %v21967_v28  ;;  %v10466_v48 = vsel %vm1458_vm2, %v10463_v3, %v10465_v61  ;;  %v22002_v47 = vpack.c.bf16 %v10471_v21, %v10469_v54  ;;  %v10226_v1 = vadd.f32 %v21640_v17, %v10187_v10  ;;  %v10192_v18 = vmul.f32 %v15417_v32, %v21635_v34 }
 0x93c   : > { %10289 = vst.msk [vmem:[#allocation2 + $0x139] sm:$0xff] %vm764_vm0, %v10257_v29  ;;  %v10260_v8 = vmax.f32 %v10228_v15, 0.0  ;;  %v22007_v41 = vpack.c.bf16 %v10466_v48, %v10464_v39  ;;  %v10140_v20 = vpop.f32.mrf.mxu0  ;;  %v10472_v28 = vrot.slane %v10330_v9, 1  ;;  %v11033_v25 = vrot.slane %v10330_v9, 2  ;;  %v22009_v6 = vld [vmem:[#allocation2 + $0x128] sm:$0xff] }
 0x93d   : > { %24125 = vst [vmem:[#allocation21_spill] sm:$0xff] %v22002_v47  ;;  %v10477_v57 = vrot.slane %v21995_v16, 1  ;;  %v22012_v61 = vld [vmem:[#allocation2 + $0x130] sm:$0x3]  ;;  %v24127_v3 = vrot.slane %v21963_v19, 2  ;;  %v10258_v29 = vmax.f32 %v10226_v1, 0.0  ;;  %v10231_v15 = vadd.f32 %v21640_v17, %v10192_v18 }
 0x93e   : > { %24126 = vst [vmem:[#allocation55_spill] sm:$0xff] %v22007_v41  ;;  %10292 = vst.msk [vmem:[#allocation2 + $0x159] sm:$0xff] %vm764_vm0, %v10260_v8  ;;  %v10190_v10 = vmul.f32 %v21635_v34, %v10140_v20  ;;  %15438 = vmatmul.mubr.msk.bf16.gmra.mxu1 %vm764_vm0, %v22007_v41  ;;  %v15418_v32 = vpop.f32.mrf.mxu0  ;;  %v22027_v39 = vld [vmem:[#allocation2 + $0x110] sm:$0xff]  ;;  %v10478_v8 = vrot.slane %v22009_v6, 1  ;;  %v22034_v48 = vld [vmem:[#allocation2 + $0x118] sm:$0x3] }
 0x93f   : > { %v22017_v54 = vsel %vm2020_vm3, %v11023_v38, %v24127_v3  ;;  %15441 = vmatprep.mubr.msk.bf16.mxu1 %vm764_vm0, %v22002_v47  ;;  %v22031_v38 = vpack.c.bf16 %v22009_v6, %v21995_v16  ;;  %v10480_v20 = vrot.slane %v22012_v61, 1  ;;  %v24129_v1 = vrot.slane %v21945_v5, 2  ;;  %10290 = vst.msk [vmem:[#allocation2 + $0x141] sm:$0xff] %vm764_vm0, %v10258_v29 }
 0x940   : > { %v10263_v3 = vmax.f32 %v10231_v15, 0.0  ;;  %v10229_v21 = vadd.f32 %v21640_v17, %v10190_v10  ;;  %v10193_v47 = vmul.f32 %v15418_v32, %v21635_v34  ;;  %v22046_v41 = vpack.c.bf16 %v22027_v39, %v10330_v9  ;;  %v10143_v42 = vpop.f32.mrf.mxu0 }
 0x941   : > { %24128 = vst [vmem:[#allocation27_spill] sm:$0xff] %v22031_v38  ;;  %v22040_v18 = vsel %vm2020_vm3, %v11028_v51, %v24129_v1  ;;  %v10473_v7 = vrot.slane %v22027_v39, 1  ;;  %v10475_v31 = vrot.slane %v22034_v48, 1  ;;  %v10479_v51 = vsel %vm1458_vm2, %v10477_v57, %v10478_v8  ;;  %v22052_v1 = vld [vmem:[#allocation2 + $0x150] sm:$0xff] }
 0x942   : > { %10295 = vst.msk [vmem:[#allocation2 + $0x181] sm:$0xff] %vm764_vm0, %v10263_v3  ;;  %v10261_v29 = vmax.f32 %v10229_v21, 0.0  ;;  %v10232_v15 = vadd.f32 %v21640_v17, %v10193_v47  ;;  %v10191_v10 = vmul.f32 %v21635_v34, %v10143_v42  ;;  %15476 = vmatmul.mubr.msk.bf16.gmra.mxu0 %vm764_vm0, %v22046_v41  ;;  %v10481_v9 = vsel %vm1458_vm2, %v10478_v8, %v10480_v20 }
 0x943   : > { %15479 = vmatprep.mubr.msk.bf16.mxu0 %vm764_vm0, %v22031_v38  ;;  %v10474_v57 = vsel %vm1458_vm2, %v10472_v28, %v10473_v7  ;;  %v10476_v30 = vsel %vm1458_vm2, %v10473_v7, %v10475_v31  ;;  %v22065_v3 = vpack.c.bf16 %v10481_v9, %v10479_v51  ;;  %v22067_v21 = vld [vmem:[#allocation2 + $0x138] sm:$0xff]  ;;  %v10487_v8 = vrot.slane %v22052_v1, 1 }
 0x944   : > { %10293 = vst.msk [vmem:[#allocation2 + $0x169] sm:$0xff] %vm764_vm0, %v10261_v29  ;;  %v10264_v34 = vmax.f32 %v10232_v15, 0.0  ;;  %v10230_v42 = vadd.f32 %v21640_v17, %v10191_v10  ;;  %v22071_v47 = vpack.c.bf16 %v10476_v30, %v10474_v57  ;;  %v10482_v20 = vrot.slane %v22067_v21, 1 }
 0x945   : > { %24130 = vst [vmem:[#allocation9_spill] sm:$0xff] %v22065_v3  ;;  %v22076_v28 = vld [vmem:[#allocation2 + $0x158] sm:$0xff]  ;;  %v22078_v31 = vld [vmem:[#allocation2 + $0x160] sm:$0x3]  ;;  %v10986_v7 = vrot.slane %v21687_v2, 2  ;;  %v24132_v51 = vrot.slane %v22027_v39, 2 }
 0x946   : > { %24131 = vst [vmem:[#allocation15_spill] sm:$0xff] %v22071_v47  ;;  %10296 = vst.msk [vmem:[#allocation2 + $0x189] sm:$0xff] %vm764_vm0, %v10264_v34  ;;  %v10262_v17 = vmax.f32 %v10230_v42, 0.0  ;;  %15442 = vmatmul.mubr.msk.bf16.gmra.mxu1 %vm764_vm0, %v22071_v47  ;;  %v22091_v30 = vpack.c.bf16 %v22076_v28, %v22052_v1  ;;  %v10488_v15 = vrot.slane %v22076_v28, 1  ;;  %v22097_v2 = vld [vmem:[#allocation2 + $0x140] sm:$0xff]  ;;  %v10490_v9 = vrot.slane %v22078_v31, 1 }
 0x947   : > { %v22084_v29 = vsel %vm2020_vm3, %v11033_v25, %v24132_v51  ;;  %15445 = vmatprep.mubr.msk.bf16.mxu1 %vm764_vm0, %v22065_v3  ;;  %v22099_v25 = vld [vmem:[#allocation2 + $0x148] sm:$0x3]  ;;  %v24133_v57 = vrot.slane %v21679_v23, 2  ;;  %v10991_v42 = vrot.slane %v21673_v62, 2  ;;  %v10996_v51 = vrot.slane %v21763_v59, 2 }
 0x948   : > { %10294 = vst.msk [vmem:[#allocation2 + $0x171] sm:$0xff] %vm764_vm0, %v10262_v17  ;;  %v22110_v10 = vpack.c.bf16 %v22097_v2, %v22067_v21  ;;  %v10483_v32 = vrot.slane %v22097_v2, 1  ;;  %v10485_v47 = vrot.slane %v22099_v25, 1  ;;  %v10489_v23 = vsel %vm1458_vm2, %v10487_v8, %v10488_v15 }
 0x949   : > { %v10987_v34 = vsel %vm2020_vm3, %v24133_v57, %v10986_v7  ;;  %v10491_v7 = vsel %vm1458_vm2, %v10488_v15, %v10490_v9  ;;  %v24134_v59 = vrot.slane %v21669_v36, 2  ;;  %v11044_v57 = vrot.slane %v22097_v2, 2 }
 0x94a   : > { %v22118_v62 = vpack.c.bf16 %v10987_v34, %v21745_v46  ;;  %15480 = vmatmul.mubr.msk.bf16.gmra.mxu0 %vm764_vm0, %v22110_v10  ;;  %v10484_v3 = vsel %vm1458_vm2, %v10482_v20, %v10483_v32  ;;  %v10486_v38 = vsel %vm1458_vm2, %v10483_v32, %v10485_v47  ;;  %v24135_v15 = vrot.slane %v21756_v0, 2 }
 0x94b   : > { %v10992_v17 = vsel %vm2020_vm3, %v24134_v59, %v10991_v42  ;;  %15483 = vmatprep.mubr.msk.bf16.mxu0 %vm764_vm0, %v22091_v30  ;;  %v22133_v46 = vpack.c.bf16 %v10486_v38, %v10484_v3  ;;  %v22135_v36 = vld [vmem:[#allocation2 + $0x168] sm:$0xff]  ;;  %v11001_v2 = vrot.slane %v21740_v26, 2  ;;  %v11006_v20 = vrot.slane %v21834_v14, 2 }
 0x94c   : > { %v22129_v8 = vpack.c.bf16 %v10992_v17, %v21771_v24  ;;  %v10997_v9 = vsel %vm2020_vm3, %v24135_v15, %v10996_v51  ;;  %v22142_v34 = vpack.c.bf16 %v10491_v7, %v10489_v23  ;;  %v10492_v24 = vrot.slane %v22135_v36, 1 }
 0x94d   : > { %v22146_v32 = vpack.c.bf16 %v10997_v9, %v21817_v52  ;;  %v11011_v38 = vrot.slane %v21812_v40, 2  ;;  %v24136_v3 = vrot.slane %v21737_v43, 2  ;;  %v24137_v0 = vrot.slane %v21827_v44, 2 }
 0x94e   : > { %v11016_v26 = vrot.slane %v21902_v56, 2  ;;  %v11021_v14 = vrot.slane %v21880_v4, 2  ;;  %15446 = vmatmul.mubr.msk.bf16.gmra.mxu1 %vm764_vm0, %v22133_v46  ;;  %v24138_v43 = vrot.slane %v21809_v58, 2  ;;  %v11026_v44 = vrot.slane %v21970_v60, 2 }
 0x94f   : > { %v11002_v47 = vsel %vm2020_vm3, %v24136_v3, %v11001_v2  ;;  %v11007_v42 = vsel %vm2020_vm3, %v24137_v0, %v11006_v20  ;;  %15449 = vmatprep.mubr.msk.bf16.mxu1 %vm764_vm0, %v22142_v34  ;;  %v10343_v56 = vld [vmem:[#allocation2 + $0x170] sm:$0xff]  ;;  %v10344_v4 = vld [vmem:[#allocation2 + $0x178] sm:$0x3]  ;;  %v11031_v59 = vrot.slane %v21948_v11, 2  ;;  %v24142_v20 = vrot.slane %v21945_v5, 2 }
 0x950   : > { %v22160_v52 = vpack.c.bf16 %v11002_v47, %v21840_v55  ;;  %v22163_v40 = vpack.c.bf16 %v11007_v42, %v21885_v53  ;;  %v11012_v51 = vsel %vm2020_vm3, %v24138_v43, %v11011_v38  ;;  %v24139_v55 = vrot.slane %v21895_v50, 2 }
 0x951   : > { %v22172_v23 = vpack.c.bf16 %v11012_v51, %v21908_v33  ;;  %v24140_v53 = vrot.slane %v21877_v27, 2  ;;  %v22182_v60 = vpack.c.bf16 %v10343_v56, %v22135_v36  ;;  %v10493_v17 = vrot.slane %v10343_v56, 1  ;;  %v22227_v51 = vld [vmem:[#allocation2 + $0x180] sm:$0xff] }
 0x952   : > { %v11017_v7 = vsel %vm2020_vm3, %v24139_v55, %v11016_v26  ;;  %v11054_v15 = vrot.slane %v10343_v56, 2  ;;  %v10495_v9 = vrot.slane %v10344_v4, 1  ;;  %v24141_v50 = vrot.slane %v21963_v19, 2 }
 0x953   : > { %v11022_v58 = vsel %vm2020_vm3, %v24140_v53, %v11021_v14  ;;  %v22185_v2 = vpack.c.bf16 %v11017_v7, %v21953_v45  ;;  %v11032_v11 = vsel %vm2020_vm3, %v24142_v20, %v11031_v59  ;;  %15484 = vmatmul.mubr.msk.bf16.gmra.mxu0 %vm764_vm0, %v22182_v60  ;;  %v10494_v38 = vsel %vm1458_vm2, %v10492_v24, %v10493_v17  ;;  %v22249_v7 = vld [vmem:[#allocation2 + $0x190] sm:$0x3] }
 0x954   : > { %v22188_v33 = vpack.c.bf16 %v11022_v58, %v21976_v22  ;;  %v11027_v27 = vsel %vm2020_vm3, %v24141_v50, %v11026_v44  ;;  %v10496_v3 = vsel %vm1458_vm2, %v10493_v17, %v10495_v9  ;;  %v22204_v22 = vpack.c.bf16 %v11032_v11, %v22040_v18  ;;  %15523 = vmatprep.mubr.msk.bf16.mxu0 %vm764_vm0, %v21695_v63  ;;  %v15811_v17 = vld [vmem:[%s23307_s24 + $0x38] sm:$0xff]   ;;  %v24153_v11 = vld [vmem:[#allocation71_spill] sm:$0xff] }
 0x955   : > { %v22201_v45 = vpack.c.bf16 %v11027_v27, %v22017_v54  ;;  %v22208_v19 = vpack.c.bf16 %v10496_v3, %v10494_v38  ;;  %v11036_v5 = vrot.slane %v22034_v48, 2  ;;  %v24143_v47 = vrot.slane %v22009_v6, 2  ;;  %v15810_v27 = vld [vmem:[%s23307_s24 + $0x30] sm:$0xff]   ;;  %v24155_v38 = vld [vmem:[#allocation56_spill] sm:$0xff] }
 0x956   : > { %v24144_v0 = vrot.slane %v21995_v16, 2  ;;  %v11041_v42 = vrot.slane %v22012_v61, 2  ;;  %v24145_v54 = vrot.slane %v22067_v21, 2  ;;  %v11046_v26 = vrot.slane %v22099_v25, 2  ;;  %v22229_v16 = vld [vmem:[#allocation2 + $0x188] sm:$0xff]  ;;  %v24156_v3 = vld [vmem:[#allocation41_spill] sm:$0xff] }
 0x957   : > { %v24146_v63 = vrot.slane %v22076_v28, 2  ;;  %v24147_v14 = vrot.slane %v22052_v1, 2  ;;  %v11051_v43 = vrot.slane %v22078_v31, 2  ;;  %v11053_v61 = vrot.slane %v22135_v36, 2  ;;  %15450 = vmatmul.mubr.msk.bf16.gmra.mxu1 %vm764_vm0, %v22208_v19 }
 0x958   : > { %v11040_v24 = vsel %vm2020_vm3, %v24144_v0, %v24143_v47  ;;  %v11045_v18 = vsel %vm2020_vm3, %v24145_v54, %v11044_v57  ;;  %v24148_v21 = vrot.slane %v22027_v39, 2  ;;  %v24149_v25 = vmov %v24143_v47  ;;  %v24158_v47 = vld [vmem:[#allocation29_spill] sm:$0xff]  ;;  %v24159_v0 = vld [vmem:[#allocation76_spill] sm:$0xff] }
 0x959   : > { %v11050_v48 = vsel %vm2020_vm3, %v24147_v14, %v24146_v63  ;;  %v11042_v56 = vsel %vm2020_vm3, %v24149_v25, %v11041_v42  ;;  %v11047_v55 = vsel %vm2020_vm3, %v11044_v57, %v11046_v26  ;;  %v24150_v36 = vmov %v24146_v63  ;;  %v24161_v54 = vld [vmem:[#allocation77_spill] sm:$0xff]  ;;  %v24162_v26 = vld [vmem:[#allocation23_spill] sm:$0xff]  ;;  %v24165_v14 = vld [vmem:[#allocation74_spill] sm:$0xff] }
 0x95a   : > { %v11037_v44 = vsel %vm2020_vm3, %v24148_v21, %v11036_v5  ;;  %v22243_v31 = vpack.c.bf16 %v11042_v56, %v11040_v24  ;;  %v11052_v39 = vsel %vm2020_vm3, %v24150_v36, %v11051_v43  ;;  %v24151_v6 = vpack.c.bf16 %v21628_v12, %v21625_v37  ;;  %v24157_v5 = vld [vmem:[#allocation53_spill] sm:$0xff]  ;;  %v24160_v24 = vld [vmem:[#allocation27_spill] sm:$0xff]  ;;  %v24167_v43 = vld [vmem:[#allocation44_spill] sm:$0xff] }
 0x95b   : > { %v22241_v1 = vpack.c.bf16 %v11037_v44, %v22084_v29  ;;  %v22255_v53 = vpack.c.bf16 %v11047_v55, %v11045_v18  ;;  %v22257_v58 = vpack.c.bf16 %v11052_v39, %v11050_v48  ;;  %v11565_v29 = vrot.slane %v22227_v51, 1  ;;  %15524 = vmatmul.mubr.msk.bf16.vlgmr.msra.gmra.mxu0 %vm764_vm0, %v21684_v49  ;;  %v15812_v18 = vld [vmem:[%s23307_s24 + $0x40] sm:$0xff]   ;;  %v24166_v48 = vld [vmem:[#allocation38_spill] sm:$0xff]  ;;  %v24170_v44 = vld [vmem:[#allocation21_spill] sm:$0xff] }
 0x95c   : > { %15489 = vmatprep.mubr.msk.bf16.mxu1 %vm764_vm0, %v24151_v6  ;;  %v11566_v59 = vrot.slane %v22229_v16, 1  ;;  %v11055_v57 = vsel %vm2020_vm3, %v11053_v61, %v11054_v15  ;;  %v11056_v28 = vrot.slane %v10344_v4, 2  ;;  %v11568_v37 = vrot.slane %v22249_v7, 1  ;;  %15527 = vmatprep.mubr.msk.bf16.mxu0 %vm764_vm0, %v21778_v35  ;;  %v24164_v63 = vld [vmem:[#allocation39_spill] sm:$0xff]  ;;  %v24168_v61 = vld [vmem:[#allocation14_spill] sm:$0xff]  ;;  %v24172_v56 = vld [vmem:[#allocation9_spill] sm:$0xff] }
 0x95d   : > { %15590 = vmatpush3.bf16.msra.mxu0 %v21700_v13  ;;  %v24154_v13 = vld [vmem:[#allocation73_spill] sm:$0xff]  ;;  %v22336_v42 = vpack.c.bf16 %v22229_v16, %v22227_v51  ;;  %v24169_v21 = vld [vmem:[#allocation55_spill] sm:$0xff]  ;;  %v11779_v55 = vrot.slane %v22229_v16, 2  ;;  %v11781_v36 = vrot.slane %v22249_v7, 2  ;;  %v11778_v39 = vrot.slane %v22227_v51, 2  ;;  %v22414_v7 = vld [vmem:[#allocation2 + $0x198] sm:$0xff] }
 0x95e   : > { %v11567_v9 = vsel %vm1458_vm2, %v11565_v29, %v11566_v59  ;;  %v11057_v12 = vsel %vm2020_vm3, %v11054_v15, %v11056_v28  ;;  %v11569_v4 = vsel %vm1458_vm2, %v11566_v59, %v11568_v37  ;;  %15657 = vmatprep.subr.bf16.mxu0 %v15811_v17  ;;  %v24152_v15 = vld [vmem:[#allocation69_spill] sm:$0xff]  ;;  %v24171_v25 = vld [vmem:[#allocation15_spill] sm:$0xff]  ;;  %v12413_v59 = vrot.slane %v22414_v7, 2  ;;  %v22424_v28 = vld [vmem:[#allocation2 + $0x1a8] sm:$0x3] }
 0x95f   : > { %v22272_v50 = vpack.c.bf16 %v11057_v12, %v11055_v57  ;;  %v22279_v20 = vpack.c.bf16 %v11569_v4, %v11567_v9  ;;  %15490 = vmatmul.mubr.msk.bf16.vlgmr.msra.gmra.mxu1 %vm764_vm0, %v22118_v62  ;;  %v11780_v6 = vsel %vm2020_vm3, %v11778_v39, %v11779_v55  ;;  %v11782_v29 = vsel %vm2020_vm3, %v11779_v55, %v11781_v36  ;;  %v22416_v51 = vld [vmem:[#allocation2 + $0x1a0] sm:$0xff] }
 0x960   : > { %15556 = vmatpush3.bf16.msra.mxu1 %v24152_v15  ;;  %15493 = vmatprep.mubr.msk.bf16.mxu1 %vm764_vm0, %v22129_v8  ;;  %v22410_v16 = vpack.c.bf16 %v11782_v29, %v11780_v6  ;;  %v12414_v57 = vrot.slane %v22416_v51, 2  ;;  %v12416_v9 = vrot.slane %v22424_v28, 2 }
 0x961   : > { %15623 = vmatprep.subr.bf16.mxu1 %v15810_v27 }
 0x962   : > { %v22433_v37 = vsel %vm2020_vm3, %v12414_v57, %v12416_v9 }
 0x963   : > { %15528 = vmatmul.mubr.msk.bf16.gmra.mxu0 %vm764_vm0, %v24153_v11 }
 0x964   : > { %15531 = vmatprep.mubr.msk.bf16.mxu0 %vm764_vm0, %v24154_v13 }
 0x967   : > { %15494 = vmatmul.mubr.msk.bf16.gmra.mxu1 %vm764_vm0, %v22146_v32 }
 0x968   : > { %15497 = vmatprep.mubr.msk.bf16.mxu1 %vm764_vm0, %v22160_v52 }
 0x96b   : > { %15532 = vmatmul.mubr.msk.bf16.gmra.mxu0 %vm764_vm0, %v24155_v38 }
 0x96c   : > { %15535 = vmatprep.mubr.msk.bf16.mxu0 %vm764_vm0, %v24156_v3 }
 0x96f   : > { %15498 = vmatmul.mubr.msk.bf16.gmra.mxu1 %vm764_vm0, %v22163_v40 }
 0x970   : > { %15501 = vmatprep.mubr.msk.bf16.mxu1 %vm764_vm0, %v22172_v23 }
 0x973   : > { %15536 = vmatmul.mubr.msk.bf16.gmra.mxu0 %vm764_vm0, %v24157_v5 }
 0x974   : > { %15539 = vmatprep.mubr.msk.bf16.mxu0 %vm764_vm0, %v24158_v47 }
 0x977   : > { %15502 = vmatmul.mubr.msk.bf16.gmra.mxu1 %vm764_vm0, %v22185_v2 }
 0x978   : > { %15505 = vmatprep.mubr.msk.bf16.mxu1 %vm764_vm0, %v22188_v33 }
 0x97b   : > { %15540 = vmatmul.mubr.msk.bf16.gmra.mxu0 %vm764_vm0, %v24159_v0 }
 0x97c   : > { %15543 = vmatprep.mubr.msk.bf16.mxu0 %vm764_vm0, %v22046_v41 }
 0x97f   : > { %15506 = vmatmul.mubr.msk.bf16.gmra.mxu1 %vm764_vm0, %v22201_v45 }
 0x980   : > { %15509 = vmatprep.mubr.msk.bf16.mxu1 %vm764_vm0, %v22204_v22 }
 0x983   : > { %15544 = vmatmul.mubr.msk.bf16.gmra.mxu0 %vm764_vm0, %v24160_v24 }
 0x984   : > { %15547 = vmatprep.mubr.msk.bf16.mxu0 %vm764_vm0, %v22110_v10 }
 0x987   : > { %15510 = vmatmul.mubr.msk.bf16.gmra.mxu1 %vm764_vm0, %v22241_v1 }
 0x988   : > { %15513 = vmatprep.mubr.msk.bf16.mxu1 %vm764_vm0, %v22243_v31 }
 0x98b   : > { %15548 = vmatmul.mubr.msk.bf16.gmra.mxu0 %vm764_vm0, %v22091_v30 }
 0x98c   : > { %15551 = vmatprep.mubr.msk.bf16.mxu0 %vm764_vm0, %v22182_v60 }
 0x98f   : > { %15514 = vmatmul.mubr.msk.bf16.gmra.mxu1 %vm764_vm0, %v22255_v53 }
 0x990   : > { %15517 = vmatprep.mubr.msk.bf16.mxu1 %vm764_vm0, %v22257_v58 }
 0x993   : > { %15552 = vmatmul.mubr.msk.bf16.gmra.mxu0 %vm764_vm0, %v22336_v42 }
 0x994   : > { %15591 = vmatprep.mubr.msk.bf16.mxu0 %vm764_vm0, %v22118_v62  ;;  %v24163_v62 = vld [vmem:[#allocation20_spill] sm:$0xff] }
 0x997   : > { %15518 = vmatmul.mubr.msk.bf16.gmra.mxu1 %vm764_vm0, %v22272_v50 }
 0x998   : > { %15557 = vmatprep.mubr.msk.bf16.mxu1 %vm764_vm0, %v24161_v54 }
 0x99b   : > { %15592 = vmatmul.mubr.msk.bf16.vlgmr.msra.gmra.mxu0 %vm764_vm0, %v22129_v8 }
 0x99c   : > { %15595 = vmatprep.mubr.msk.bf16.mxu0 %vm764_vm0, %v22146_v32  ;;  %15658 = vmatpush3.bf16.msra.mxu0 %v15811_v17  ;;  %v22429_v17 = vsel %vm2020_vm3, %v12413_v59, %v12414_v57 }
 0x99d   : > { %v12420_v4 = vpack.c.bf16 %v22433_v37, %v22429_v17 }
 0x99f   : > { %15558 = vmatmul.mubr.msk.bf16.vlgmr.msra.gmra.mxu1 %vm764_vm0, %v24162_v26 }
 0x9a0   : > { %15624 = vmatpush3.bf16.msra.mxu1 %v15810_v27  ;;  %15561 = vmatprep.mubr.msk.bf16.mxu1 %vm764_vm0, %v24163_v62 }
 0x9a1   : > { %15691 = vmatprep.subr.bf16.mxu1 %v15812_v18 }
 0x9a3   : > { %15596 = vmatmul.mubr.msk.bf16.gmra.mxu0 %vm764_vm0, %v22160_v52 }
 0x9a4   : > { %15599 = vmatprep.mubr.msk.bf16.mxu0 %vm764_vm0, %v22163_v40 }
 0x9a7   : > { %15562 = vmatmul.mubr.msk.bf16.gmra.mxu1 %vm764_vm0, %v24164_v63 }
 0x9a8   : > { %15565 = vmatprep.mubr.msk.bf16.mxu1 %vm764_vm0, %v24165_v14 }
 0x9ab   : > { %15600 = vmatmul.mubr.msk.bf16.gmra.mxu0 %vm764_vm0, %v22172_v23 }
 0x9ac   : > { %15603 = vmatprep.mubr.msk.bf16.mxu0 %vm764_vm0, %v22185_v2 }
 0x9af   : > { %15566 = vmatmul.mubr.msk.bf16.gmra.mxu1 %vm764_vm0, %v24166_v48 }
 0x9b0   : > { %15569 = vmatprep.mubr.msk.bf16.mxu1 %vm764_vm0, %v24167_v43 }
 0x9b3   : > { %15604 = vmatmul.mubr.msk.bf16.gmra.mxu0 %vm764_vm0, %v22188_v33 }
 0x9b4   : > { %15607 = vmatprep.mubr.msk.bf16.mxu0 %vm764_vm0, %v22201_v45 }
 0x9b7   : > { %15570 = vmatmul.mubr.msk.bf16.gmra.mxu1 %vm764_vm0, %v24168_v61 }
 0x9b8   : > { %15573 = vmatprep.mubr.msk.bf16.mxu1 %vm764_vm0, %v24169_v21 }
 0x9bb   : > { %15608 = vmatmul.mubr.msk.bf16.gmra.mxu0 %vm764_vm0, %v22204_v22 }
 0x9bc   : > { %15611 = vmatprep.mubr.msk.bf16.mxu0 %vm764_vm0, %v22241_v1 }
 0x9bf   : > { %15574 = vmatmul.mubr.msk.bf16.gmra.mxu1 %vm764_vm0, %v24170_v44 }
 0x9c0   : > { %15577 = vmatprep.mubr.msk.bf16.mxu1 %vm764_vm0, %v24171_v25 }
 0x9c3   : > { %15612 = vmatmul.mubr.msk.bf16.gmra.mxu0 %vm764_vm0, %v22243_v31 }
 0x9c4   : > { %15615 = vmatprep.mubr.msk.bf16.mxu0 %vm764_vm0, %v22255_v53 }
 0x9c7   : > { %15578 = vmatmul.mubr.msk.bf16.gmra.mxu1 %vm764_vm0, %v24172_v56 }
 0x9c8   : > { %15581 = vmatprep.mubr.msk.bf16.mxu1 %vm764_vm0, %v22133_v46 }
 0x9cb   : > { %15616 = vmatmul.mubr.msk.bf16.gmra.mxu0 %vm764_vm0, %v22257_v58 }
 0x9cc   : > { %15619 = vmatprep.mubr.msk.bf16.mxu0 %vm764_vm0, %v22272_v50 }
 0x9cf   : > { %15582 = vmatmul.mubr.msk.bf16.gmra.mxu1 %vm764_vm0, %v22142_v34 }
 0x9d0   : > { %15585 = vmatprep.mubr.msk.bf16.mxu1 %vm764_vm0, %v22208_v19 }
 0x9d3   : > { %15620 = vmatmul.mubr.msk.bf16.gmra.mxu0 %vm764_vm0, %v22410_v16 }
 0x9d4   : > { %15659 = vmatprep.mubr.msk.bf16.mxu0 %vm764_vm0, %v24162_v26 }
 0x9d7   : > { %15586 = vmatmul.mubr.msk.bf16.gmra.mxu1 %vm764_vm0, %v22279_v20 }
 0x9d8   : > { %15625 = vmatprep.mubr.msk.bf16.mxu1 %vm764_vm0, %v21684_v49 }
 0x9d9   : > { %v15457_v12 = vpop.f32.mrf.mxu0 }
 0x9db   : > { %15660 = vmatmul.mubr.msk.bf16.vlgmr.msra.gmra.mxu0 %vm764_vm0, %v24163_v62  ;;  %v10851_v27 = vpop.f32.mrf.mxu0 }
 0x9dc   : > { %15663 = vmatprep.mubr.msk.bf16.mxu0 %vm764_vm0, %v24164_v63 }
 0x9dd   : > { %v15423_v49 = vpop.f32.mrf.mxu1  ;;  %v15458_v15 = vpop.f32.mrf.mxu0 }
 0x9de   : > { %v22443_v54 = vadd.f32 %v15457_v12, %v15423_v49 }
 0x9df   : > { %15626 = vmatmul.mubr.msk.bf16.vlgmr.msra.gmra.mxu1 %vm764_vm0, %v21778_v35  ;;  %v10636_v26 = vpop.f32.mrf.mxu1  ;;  %v10854_v62 = vpop.f32.mrf.mxu0 }
 0x9e0   : > { %15692 = vmatpush3.bf16.msra.mxu1 %v15812_v18  ;;  %15629 = vmatprep.mubr.msk.bf16.mxu1 %vm764_vm0, %v24153_v11  ;;  %v22447_v55 = vadd.f32 %v10851_v27, %v10636_v26 }
 0x9e1   : > { %v15424_v36 = vpop.f32.mrf.mxu1  ;;  %v15461_v39 = vpop.f32.mrf.mxu0 }
 0x9e2   : > { %v22451_v63 = vadd.f32 %v15458_v15, %v15424_v36 }
 0x9e3   : > { %15664 = vmatmul.mubr.msk.bf16.gmra.mxu0 %vm764_vm0, %v24165_v14  ;;  %v10639_v35 = vpop.f32.mrf.mxu1  ;;  %v10867_v6 = vpop.f32.mrf.mxu0 }
 0x9e4   : > { %15667 = vmatprep.mubr.msk.bf16.mxu0 %vm764_vm0, %v24166_v48  ;;  %v22455_v18 = vadd.f32 %v10854_v62, %v10639_v35 }
 0x9e5   : > { %v15427_v29 = vpop.f32.mrf.mxu1  ;;  %v15462_v11 = vpop.f32.mrf.mxu0 }
 0x9e6   : > { %v22459_v59 = vadd.f32 %v15461_v39, %v15427_v29 }
 0x9e7   : > { %15630 = vmatmul.mubr.msk.bf16.gmra.mxu1 %vm764_vm0, %v24154_v13  ;;  %v10652_v14 = vpop.f32.mrf.mxu1  ;;  %v10870_v57 = vpop.f32.mrf.mxu0 }
 0x9e8   : > { %15633 = vmatprep.mubr.msk.bf16.mxu1 %vm764_vm0, %v24155_v38  ;;  %v22463_v9 = vadd.f32 %v10867_v6, %v10652_v14 }
 0x9e9   : > { %v15428_v12 = vpop.f32.mrf.mxu1  ;;  %v15465_v48 = vpop.f32.mrf.mxu0 }
 0x9ea   : > { %v22467_v27 = vadd.f32 %v15462_v11, %v15428_v12 }
 0x9eb   : > { %15668 = vmatmul.mubr.msk.bf16.gmra.mxu0 %vm764_vm0, %v24167_v43  ;;  %v10655_v13 = vpop.f32.mrf.mxu1  ;;  %v10883_v49 = vpop.f32.mrf.mxu0 }
 0x9ec   : > { %15671 = vmatprep.mubr.msk.bf16.mxu0 %vm764_vm0, %v24168_v61  ;;  %v22471_v15 = vadd.f32 %v10870_v57, %v10655_v13 }
 0x9ed   : > { %v15466_v38 = vpop.f32.mrf.mxu0 }
 0x9ee   : > { %v15431_v26 = vpop.f32.mrf.mxu1 }
 0x9ef   : > { %15634 = vmatmul.mubr.msk.bf16.gmra.mxu1 %vm764_vm0, %v24156_v3  ;;  %v22475_v62 = vadd.f32 %v15465_v48, %v15431_v26  ;;  %v10886_v36 = vpop.f32.mrf.mxu0 }
 0x9f0   : > { %15637 = vmatprep.mubr.msk.bf16.mxu1 %vm764_vm0, %v24157_v5  ;;  %v10668_v43 = vpop.f32.mrf.mxu1 }
 0x9f1   : > { %v22479_v39 = vadd.f32 %v10883_v49, %v10668_v43  ;;  %v15469_v61 = vpop.f32.mrf.mxu0 }
 0x9f2   : > { %v15432_v35 = vpop.f32.mrf.mxu1 }
 0x9f3   : > { %15672 = vmatmul.mubr.msk.bf16.gmra.mxu0 %vm764_vm0, %v24169_v21  ;;  %v22483_v6 = vadd.f32 %v15466_v38, %v15432_v35  ;;  %v10899_v29 = vpop.f32.mrf.mxu0 }
 0x9f4   : > { %15675 = vmatprep.mubr.msk.bf16.mxu0 %vm764_vm0, %v24170_v44  ;;  %v10671_v3 = vpop.f32.mrf.mxu1 }
 0x9f5   : > { %v22487_v11 = vadd.f32 %v10886_v36, %v10671_v3  ;;  %v15470_v5 = vpop.f32.mrf.mxu0 }
 0x9f6   : > { %v15435_v14 = vpop.f32.mrf.mxu1 }
 0x9f7   : > { %15638 = vmatmul.mubr.msk.bf16.gmra.mxu1 %vm764_vm0, %v24158_v47  ;;  %v22491_v57 = vadd.f32 %v15469_v61, %v15435_v14  ;;  %v10902_v12 = vpop.f32.mrf.mxu0 }
 0x9f8   : > { %15641 = vmatprep.mubr.msk.bf16.mxu1 %vm764_vm0, %v24159_v0  ;;  %v10684_v21 = vpop.f32.mrf.mxu1 }
 0x9f9   : > { %v22495_v48 = vadd.f32 %v10899_v29, %v10684_v21 }
 0x9fa   : > { %v15436_v13 = vpop.f32.mrf.mxu1  ;;  %v15473_v44 = vpop.f32.mrf.mxu0 }
 0x9fb   : > { %15676 = vmatmul.mubr.msk.bf16.gmra.mxu0 %vm764_vm0, %v24171_v25  ;;  %v22499_v49 = vadd.f32 %v15470_v5, %v15436_v13  ;;  %v12201_v13 = vrot.slane %v22416_v51, 1 }
 0x9fc   : > { %15679 = vmatprep.mubr.msk.bf16.mxu0 %vm764_vm0, %v24172_v56  ;;  %v10687_v47 = vpop.f32.mrf.mxu1  ;;  %v10915_v26 = vpop.f32.mrf.mxu0 }
 0x9fd   : > { %v22503_v38 = vadd.f32 %v10902_v12, %v10687_v47 }
 0x9fe   : > { %v15439_v43 = vpop.f32.mrf.mxu1  ;;  %v15474_v0 = vpop.f32.mrf.mxu0 }
 0x9ff   : > { %15642 = vmatmul.mubr.msk.bf16.gmra.mxu1 %vm764_vm0, %v22046_v41  ;;  %v22507_v36 = vadd.f32 %v15473_v44, %v15439_v43 }
 0xa00   : > { %15645 = vmatprep.mubr.msk.bf16.mxu1 %vm764_vm0, %v24160_v24  ;;  %v10700_v25 = vpop.f32.mrf.mxu1  ;;  %v10918_v35 = vpop.f32.mrf.mxu0 }
 0xa01   : > { %v22511_v61 = vadd.f32 %v10915_v26, %v10700_v25 }
 0xa02   : > { %v15440_v3 = vpop.f32.mrf.mxu1  ;;  %v15477_v56 = vpop.f32.mrf.mxu0 }
 0xa03   : > { %15680 = vmatmul.mubr.msk.bf16.gmra.mxu0 %vm764_vm0, %v22133_v46  ;;  %v22515_v29 = vadd.f32 %v15474_v0, %v15440_v3  ;;  %v12200_v46 = vrot.slane %v22414_v7, 1 }
 0xa04   : > { %15683 = vmatprep.mubr.msk.bf16.mxu0 %vm764_vm0, %v22142_v34  ;;  %v10703_v41 = vpop.f32.mrf.mxu1  ;;  %v10931_v14 = vpop.f32.mrf.mxu0  ;;  %v12203_v34 = vrot.slane %v22424_v28, 1 }
 0xa05   : > { %v22519_v5 = vadd.f32 %v10918_v35, %v10703_v41 }
 0xa06   : > { %v15443_v21 = vpop.f32.mrf.mxu1  ;;  %v15478_v24 = vpop.f32.mrf.mxu0  ;;  %v12204_v25 = vsel %vm1458_vm2, %v12201_v13, %v12203_v34  ;;  %v11991_v34 = vpack.c.bf16 %v22416_v51, %v22414_v7 }
 0xa07   : > { %15646 = vmatmul.mubr.msk.bf16.gmra.mxu1 %vm764_vm0, %v22110_v10  ;;  %v22523_v12 = vadd.f32 %v15477_v56, %v15443_v21 }
 0xa08   : > { %15649 = vmatprep.mubr.msk.bf16.mxu1 %vm764_vm0, %v22091_v30  ;;  %v10716_v44 = vpop.f32.mrf.mxu1  ;;  %v10934_v47 = vpop.f32.mrf.mxu0  ;;  %v12202_v30 = vsel %vm1458_vm2, %v12200_v46, %v12201_v13 }
 0xa09   : > { %v22530_v26 = vadd.f32 %v10931_v14, %v10716_v44  ;;  %v12207_v14 = vpack.c.bf16 %v12204_v25, %v12202_v30 }
 0xa0a   : > { %v15444_v43 = vpop.f32.mrf.mxu1  ;;  %v15481_v0 = vpop.f32.mrf.mxu0 }
 0xa0b   : > { %15684 = vmatmul.mubr.msk.bf16.gmra.mxu0 %vm764_vm0, %v22208_v19  ;;  %v22534_v10 = vadd.f32 %v15478_v24, %v15444_v43 }
 0xa0c   : > { %15687 = vmatprep.mubr.msk.bf16.mxu0 %vm764_vm0, %v22279_v20  ;;  %v10719_v35 = vpop.f32.mrf.mxu1  ;;  %v10947_v28 = vpop.f32.mrf.mxu0 }
 0xa0d   : > { %v22540_v3 = vadd.f32 %v10934_v47, %v10719_v35 }
 0xa0e   : > { %v15447_v56 = vpop.f32.mrf.mxu1  ;;  %v15482_v41 = vpop.f32.mrf.mxu0 }
 0xa0f   : > { %15650 = vmatmul.mubr.msk.bf16.gmra.mxu1 %vm764_vm0, %v22182_v60  ;;  %v22544_v19 = vadd.f32 %v15481_v0, %v15447_v56 }
 0xa10   : > { %15653 = vmatprep.mubr.msk.bf16.mxu1 %vm764_vm0, %v22336_v42  ;;  %v10732_v20 = vpop.f32.mrf.mxu1  ;;  %v10950_v21 = vpop.f32.mrf.mxu0 }
 0xa11   : > { %v22548_v24 = vadd.f32 %v10947_v28, %v10732_v20 }
 0xa12   : > { %v15448_v46 = vpop.f32.mrf.mxu1 }
 0xa13   : > { %v15485_v13 = vpop.f32.mrf.mxu0  ;;  %15688 = vmatmul.mubr.msk.bf16.gmra.mxu0 %vm764_vm0, %v12207_v14  ;;  %v22553_v44 = vadd.f32 %v15482_v41, %v15448_v46 }
 0xa14   : > { %v10735_v60 = vpop.f32.mrf.mxu1 }
 0xa15   : > { %v10963_v47 = vpop.f32.mrf.mxu0  ;;  %v22555_v43 = vadd.f32 %v10950_v21, %v10735_v60 }
 0xa17   : > { %v15451_v0 = vpop.f32.mrf.mxu1  ;;  %15654 = vmatmul.mubr.msk.bf16.gmra.mxu1 %vm764_vm0, %v11991_v34  ;;  %v15486_v42 = vpop.f32.mrf.mxu0 }
 0xa18   : > { %v22558_v30 = vadd.f32 %v15485_v13, %v15451_v0  ;;  %15693 = vmatprep.mubr.msk.bf16.mxu1 %vm764_vm0, %v22129_v8 }
 0xa19   : > { %v10748_v25 = vpop.f32.mrf.mxu1  ;;  %v10966_v35 = vpop.f32.mrf.mxu0 }
 0xa1a   : > { %v22562_v7 = vadd.f32 %v10963_v47, %v10748_v25 }
 0xa1b   : > { %v15452_v51 = vpop.f32.mrf.mxu1  ;;  %v15525_v28 = vpop.f32.mrf.mxu0 }
 0xa1c   : > { %v22564_v56 = vadd.f32 %v15486_v42, %v15452_v51 }
 0xa1d   : > { %v10751_v41 = vpop.f32.mrf.mxu1  ;;  %v11403_v14 = vpop.f32.mrf.mxu0 }
 0xa1e   : > { %v22566_v20 = vadd.f32 %v10966_v35, %v10751_v41 }
 0xa1f   : > { %v15491_v21 = vpop.f32.mrf.mxu1  ;;  %15694 = vmatmul.mubr.msk.bf16.vlgmr.msra.gmra.mxu1 %vm764_vm0, %v22146_v32  ;;  %v15526_v46 = vpop.f32.mrf.mxu0 }
 0xa20   : > { %v11326_v13 = vadd.f32 %v15491_v21, %v22443_v54  ;;  %15697 = vmatprep.mubr.msk.bf16.mxu1 %vm764_vm0, %v22160_v52 }
 0xa21   : > { %v11197_v8 = vpop.f32.mrf.mxu1  ;;  %v11406_v34 = vpop.f32.mrf.mxu0 }
 0xa22   : > { %v11324_v60 = vadd.f32 %v11197_v8, %v22447_v55  ;;  %v22574_v47 = vadd.f32 %v15525_v28, %v11326_v13 }
 0xa23   : > { %v15492_v0 = vpop.f32.mrf.mxu1  ;;  %v15529_v42 = vpop.f32.mrf.mxu0 }
 0xa24   : > { %v11327_v25 = vadd.f32 %v15492_v0, %v22451_v63  ;;  %v22577_v35 = vadd.f32 %v11403_v14, %v11324_v60 }
 0xa25   : > { %v11200_v51 = vpop.f32.mrf.mxu1  ;;  %v11419_v32 = vpop.f32.mrf.mxu0 }
 0xa26   : > { %v11325_v41 = vadd.f32 %v11200_v51, %v22455_v18  ;;  %v22580_v54 = vadd.f32 %v15526_v46, %v11327_v25 }
 0xa27   : > { %v15495_v21 = vpop.f32.mrf.mxu1  ;;  %15698 = vmatmul.mubr.msk.bf16.gmra.mxu1 %vm764_vm0, %v22163_v40  ;;  %v15530_v52 = vpop.f32.mrf.mxu0 }
 0xa28   : > { %v11330_v55 = vadd.f32 %v15495_v21, %v22459_v59  ;;  %15701 = vmatprep.mubr.msk.bf16.mxu1 %vm764_vm0, %v22172_v23  ;;  %v22587_v28 = vadd.f32 %v11406_v34, %v11325_v41 }
 0xa29   : > { %v11213_v63 = vpop.f32.mrf.mxu1  ;;  %v11422_v14 = vpop.f32.mrf.mxu0 }
 0xa2a   : > { %v11328_v13 = vadd.f32 %v11213_v63, %v22463_v9  ;;  %v22590_v8 = vadd.f32 %v15529_v42, %v11330_v55 }
 0xa2b   : > { %v15496_v18 = vpop.f32.mrf.mxu1  ;;  %v15533_v46 = vpop.f32.mrf.mxu0 }
 0xa2c   : > { %v11331_v60 = vadd.f32 %v15496_v18, %v22467_v27  ;;  %v22593_v0 = vadd.f32 %v11419_v32, %v11328_v13 }
 0xa2d   : > { %v11216_v40 = vpop.f32.mrf.mxu1  ;;  %v11435_v25 = vpop.f32.mrf.mxu0 }
 0xa2e   : > { %v11329_v59 = vadd.f32 %v11216_v40, %v22471_v15  ;;  %v22596_v51 = vadd.f32 %v15530_v52, %v11331_v60 }
 0xa2f   : > { %v15499_v23 = vpop.f32.mrf.mxu1  ;;  %15702 = vmatmul.mubr.msk.bf16.gmra.mxu1 %vm764_vm0, %v22185_v2  ;;  %v15534_v34 = vpop.f32.mrf.mxu0 }
 0xa30   : > { %v11334_v9 = vadd.f32 %v15499_v23, %v22475_v62  ;;  %15705 = vmatprep.mubr.msk.bf16.mxu1 %vm764_vm0, %v22188_v33  ;;  %v22603_v42 = vadd.f32 %v11422_v14, %v11329_v59 }
 0xa31   : > { %v11229_v27 = vpop.f32.mrf.mxu1  ;;  %v11438_v32 = vpop.f32.mrf.mxu0 }
 0xa32   : > { %v11332_v41 = vadd.f32 %v11229_v27, %v22479_v39  ;;  %v22606_v21 = vadd.f32 %v15533_v46, %v11334_v9 }
 0xa33   : > { %v15500_v15 = vpop.f32.mrf.mxu1  ;;  %v15537_v52 = vpop.f32.mrf.mxu0 }
 0xa34   : > { %v11335_v55 = vadd.f32 %v15500_v15, %v22483_v6  ;;  %v22609_v63 = vadd.f32 %v11435_v25, %v11332_v41 }
 0xa35   : > { %v11232_v2 = vpop.f32.mrf.mxu1  ;;  %v11451_v13 = vpop.f32.mrf.mxu0 }
 0xa36   : > { %v11333_v62 = vadd.f32 %v11232_v2, %v22487_v11  ;;  %v22612_v18 = vadd.f32 %v15534_v34, %v11335_v55 }
 0xa37   : > { %v15503_v33 = vpop.f32.mrf.mxu1  ;;  %15706 = vmatmul.mubr.msk.bf16.gmra.mxu1 %vm764_vm0, %v22201_v45  ;;  %v15538_v14 = vpop.f32.mrf.mxu0 }
 0xa38   : > { %v11338_v39 = vadd.f32 %v15503_v33, %v22491_v57  ;;  %15709 = vmatprep.mubr.msk.bf16.mxu1 %vm764_vm0, %v22204_v22  ;;  %v22619_v46 = vadd.f32 %v11438_v32, %v11333_v62 }
 0xa39   : > { %v11245_v6 = vpop.f32.mrf.mxu1  ;;  %v11454_v60 = vpop.f32.mrf.mxu0 }
 0xa3a   : > { %v11336_v40 = vadd.f32 %v11245_v6, %v22495_v48  ;;  %v22622_v25 = vadd.f32 %v15537_v52, %v11338_v39 }
 0xa3b   : > { %v15504_v11 = vpop.f32.mrf.mxu1  ;;  %v15541_v59 = vpop.f32.mrf.mxu0 }
 0xa3c   : > { %v11339_v23 = vadd.f32 %v15504_v11, %v22499_v49  ;;  %v22625_v34 = vadd.f32 %v11451_v13, %v11336_v40 }
 0xa3d   : > { %v11248_v45 = vpop.f32.mrf.mxu1  ;;  %v11467_v9 = vpop.f32.mrf.mxu0 }
 0xa3e   : > { %v11337_v57 = vadd.f32 %v11248_v45, %v22503_v38  ;;  %v22628_v27 = vadd.f32 %v15538_v14, %v11339_v23 }
 0xa3f   : > { %v15507_v22 = vpop.f32.mrf.mxu1  ;;  %15710 = vmatmul.mubr.msk.bf16.gmra.mxu1 %vm764_vm0, %v22241_v1  ;;  %v15542_v32 = vpop.f32.mrf.mxu0 }
 0xa40   : > { %v11342_v48 = vadd.f32 %v15507_v22, %v22507_v36  ;;  %15713 = vmatprep.mubr.msk.bf16.mxu1 %vm764_vm0, %v22243_v31  ;;  %v22635_v41 = vadd.f32 %v11454_v60, %v11337_v57 }
 0xa41   : > { %v11261_v49 = vpop.f32.mrf.mxu1  ;;  %v11470_v15 = vpop.f32.mrf.mxu0 }
 0xa42   : > { %v11340_v52 = vadd.f32 %v11261_v49, %v22511_v61  ;;  %v22638_v55 = vadd.f32 %v15541_v59, %v11342_v48 }
 0xa43   : > { %v15508_v38 = vpop.f32.mrf.mxu1  ;;  %v15545_v2 = vpop.f32.mrf.mxu0 }
 0xa44   : > { %v11343_v13 = vadd.f32 %v15508_v38, %v22515_v29  ;;  %v22641_v62 = vadd.f32 %v11467_v9, %v11340_v52 }
 0xa45   : > { %v11264_v1 = vpop.f32.mrf.mxu1  ;;  %v11483_v33 = vpop.f32.mrf.mxu0 }
 0xa46   : > { %v11341_v36 = vadd.f32 %v11264_v1, %v22519_v5  ;;  %v22644_v14 = vadd.f32 %v15542_v32, %v11343_v13 }
 0xa47   : > { %v15511_v31 = vpop.f32.mrf.mxu1  ;;  %15714 = vmatmul.mubr.msk.bf16.gmra.mxu1 %vm764_vm0, %v22255_v53  ;;  %v15546_v39 = vpop.f32.mrf.mxu0 }
 0xa48   : > { %v11346_v61 = vadd.f32 %v15511_v31, %v22523_v12  ;;  %15717 = vmatprep.mubr.msk.bf16.mxu1 %vm764_vm0, %v22257_v58  ;;  %v22651_v6 = vadd.f32 %v11470_v15, %v11341_v36 }
 0xa49   : > { %v11277_v29 = vpop.f32.mrf.mxu1  ;;  %v11486_v60 = vpop.f32.mrf.mxu0 }
 0xa4a   : > { %v11344_v40 = vadd.f32 %v11277_v29, %v22530_v26  ;;  %v22654_v11 = vadd.f32 %v15545_v2, %v11346_v61 }
 0xa4b   : > { %v15512_v5 = vpop.f32.mrf.mxu1  ;;  %v15549_v59 = vpop.f32.mrf.mxu0 }
 0xa4c   : > { %v11347_v23 = vadd.f32 %v15512_v5, %v22534_v10  ;;  %v22657_v45 = vadd.f32 %v11483_v33, %v11344_v40 }
 0xa4d   : > { %v11280_v53 = vpop.f32.mrf.mxu1  ;;  %v11499_v9 = vpop.f32.mrf.mxu0 }
 0xa4e   : > { %v11345_v12 = vadd.f32 %v11280_v53, %v22540_v3  ;;  %v22660_v57 = vadd.f32 %v15546_v39, %v11347_v23 }
 0xa4f   : > { %v15515_v58 = vpop.f32.mrf.mxu1  ;;  %15718 = vmatmul.mubr.msk.bf16.gmra.mxu1 %vm764_vm0, %v22272_v50  ;;  %v15550_v22 = vpop.f32.mrf.mxu0 }
 0xa50   : > { %v11350_v26 = vadd.f32 %v15515_v58, %v22544_v19  ;;  %15721 = vmatprep.mubr.msk.bf16.mxu1 %vm764_vm0, %v22410_v16  ;;  %v22667_v32 = vadd.f32 %v11486_v60, %v11345_v12 }
 0xa51   : > { %v11293_v10 = vpop.f32.mrf.mxu1  ;;  %v11502_v48 = vpop.f32.mrf.mxu0 }
 0xa52   : > { %v11348_v49 = vadd.f32 %v11293_v10, %v22548_v24  ;;  %v22670_v15 = vadd.f32 %v15549_v59, %v11350_v26 }
 0xa53   : > { %v15516_v3 = vpop.f32.mrf.mxu1  ;;  %v15553_v52 = vpop.f32.mrf.mxu0 }
 0xa54   : > { %v11351_v38 = vadd.f32 %v15516_v3, %v22553_v44  ;;  %v22673_v2 = vadd.f32 %v11499_v9, %v11348_v49 }
 0xa55   : > { %v11296_v50 = vpop.f32.mrf.mxu1  ;;  %v11515_v13 = vpop.f32.mrf.mxu0 }
 0xa56   : > { %v11349_v19 = vadd.f32 %v11296_v50, %v22555_v43  ;;  %v22676_v1 = vadd.f32 %v15550_v22, %v11351_v38 }
 0xa57   : > { %v15519_v16 = vpop.f32.mrf.mxu1  ;;  %15722 = vmatmul.mubr.msk.bf16.gmra.mxu1 %vm764_vm0, %v12420_v4  ;;  %v15554_v24 = vpop.f32.mrf.mxu0 }
 0xa58   : > { %v11354_v33 = vadd.f32 %v15519_v16, %v22558_v30  ;;  %v22683_v36 = vadd.f32 %v11502_v48, %v11349_v19 }
 0xa59   : > { %v11309_v44 = vpop.f32.mrf.mxu1  ;;  %v11518_v31 = vpop.f32.mrf.mxu0 }
 0xa5a   : > { %v11352_v39 = vadd.f32 %v11309_v44, %v22562_v7  ;;  %v22686_v61 = vadd.f32 %v15553_v52, %v11354_v33 }
 0xa5b   : > { %v15520_v43 = vpop.f32.mrf.mxu1  ;;  %v22688_v29 = vpop.f32.mrf.mxu0 }
 0xa5c   : > { %v11355_v60 = vadd.f32 %v15520_v43, %v22564_v56  ;;  %v22691_v40 = vadd.f32 %v11515_v13, %v11352_v39 }
 0xa5d   : > { %v11312_v17 = vpop.f32.mrf.mxu1  ;;  %v22693_v37 = vpop.f32.mrf.mxu0 }
 0xa5e   : > { %v11353_v4 = vadd.f32 %v11312_v17, %v22566_v20  ;;  %v22696_v30 = vadd.f32 %v15554_v24, %v11355_v60 }
 0xa5f   : > { %v15559_v5 = vpop.f32.mrf.mxu1  ;;  %v22698_v59 = vpop.f32.mrf.mxu0 }
 0xa60   : > { %v22701_v7 = vadd.f32 %v15559_v5, %v22574_v47  ;;  %v22703_v23 = vadd.f32 %v11518_v31, %v11353_v4 }
 0xa61   : > { %v11619_v53 = vpop.f32.mrf.mxu1  ;;  %v22705_v9 = vpop.f32.mrf.mxu0 }
 0xa62   : > { %v22708_v56 = vadd.f32 %v11619_v53, %v22577_v35 }
 0xa63   : > { %v15560_v12 = vpop.f32.mrf.mxu1  ;;  %v22710_v58 = vpop.f32.mrf.mxu0 }
 0xa64   : > { %v22713_v20 = vadd.f32 %v15560_v12, %v22580_v54 }
 0xa65   : > { %v11622_v22 = vpop.f32.mrf.mxu1  ;;  %v22715_v26 = vpop.f32.mrf.mxu0 }
 0xa66   : > { %v22718_v47 = vadd.f32 %v11622_v22, %v22587_v28 }
 0xa67   : > { %v15563_v10 = vpop.f32.mrf.mxu1  ;;  %v22720_v48 = vpop.f32.mrf.mxu0 }
 0xa68   : > { %v22723_v49 = vadd.f32 %v15563_v10, %v22590_v8 }
 0xa69   : > { %v11635_v35 = vpop.f32.mrf.mxu1  ;;  %v22725_v3 = vpop.f32.mrf.mxu0 }
 0xa6a   : > { %v22728_v52 = vadd.f32 %v11635_v35, %v22593_v0 }
 0xa6b   : > { %v15564_v54 = vpop.f32.mrf.mxu1  ;;  %v22730_v38 = vpop.f32.mrf.mxu0 }
 0xa6c   : > { %v22733_v50 = vadd.f32 %v15564_v54, %v22596_v51 }
 0xa6d   : > { %v11638_v28 = vpop.f32.mrf.mxu1  ;;  %v22735_v13 = vpop.f32.mrf.mxu0 }
 0xa6e   : > { %v22738_v19 = vadd.f32 %v11638_v28, %v22603_v42 }
 0xa6f   : > { %v15567_v8 = vpop.f32.mrf.mxu1  ;;  %v22740_v16 = vpop.f32.mrf.mxu0 }
 0xa70   : > { %v22743_v24 = vadd.f32 %v15567_v8, %v22606_v21 }
 0xa71   : > { %v11651_v0 = vpop.f32.mrf.mxu1  ;;  %v22745_v33 = vpop.f32.mrf.mxu0 }
 0xa72   : > { %v22748_v44 = vadd.f32 %v11651_v0, %v22609_v63 }
 0xa73   : > { %v15568_v51 = vpop.f32.mrf.mxu1  ;;  %v22750_v31 = vpop.f32.mrf.mxu0 }
 0xa74   : > { %v22753_v39 = vadd.f32 %v15568_v51, %v22612_v18 }
 0xa75   : > { %v11654_v42 = vpop.f32.mrf.mxu1  ;;  %v22755_v43 = vpop.f32.mrf.mxu0 }
 0xa76   : > { %24173 = vst [vmem:[#allocation10_spill] sm:$0xff] %v22755_v43  ;;  %v22758_v60 = vadd.f32 %v11654_v42, %v22619_v46 }
 0xa77   : > { %v15571_v21 = vpop.f32.mrf.mxu1  ;;  %v22760_v17 = vpop.f32.mrf.mxu0 }
 0xa78   : > { %24174 = vst [vmem:[#allocation24_spill] sm:$0xff] %v22760_v17  ;;  %v22763_v4 = vadd.f32 %v15571_v21, %v22622_v25 }
 0xa79   : > { %v11667_v63 = vpop.f32.mrf.mxu1  ;;  %v22765_v5 = vpop.f32.mrf.mxu0 }
 0xa7a   : > { %24175 = vst [vmem:[#allocation16_spill] sm:$0xff] %v22765_v5  ;;  %v22768_v53 = vadd.f32 %v11667_v63, %v22625_v34 }
 0xa7b   : > { %v15572_v18 = vpop.f32.mrf.mxu1  ;;  %v22770_v12 = vpop.f32.mrf.mxu0 }
 0xa7c   : > { %24176 = vst [vmem:[#allocation26_spill] sm:$0xff] %v22768_v53  ;;  %24177 = vst [vmem:[#allocation46_spill] sm:$0xff] %v22770_v12  ;;  %v22773_v22 = vadd.f32 %v15572_v18, %v22628_v27  ;;  %v22908_v12 = vpop.permute.xlu1 %12664 }
 0xa7d   : > { %v11670_v46 = vpop.f32.mrf.mxu1  ;;  %v22775_v10 = vpop.f32.mrf.mxu0 }
 0xa7e   : > { %24178 = vst [vmem:[#allocation57_spill] sm:$0xff] %v22773_v22  ;;  %24179 = vst [vmem:[#allocation79_spill] sm:$0xff] %v22775_v10  ;;  %v22778_v35 = vadd.f32 %v11670_v46, %v22635_v41 }
 0xa7f   : > { %v15575_v25 = vpop.f32.mrf.mxu1  ;;  %v22780_v54 = vpop.f32.mrf.mxu0 }
 0xa80   : > { %24180 = vst [vmem:[#allocation40_spill] sm:$0xff] %v22778_v35  ;;  %24181 = vst [vmem:[#allocation12_spill] sm:$0xff] %v22780_v54  ;;  %v22783_v28 = vadd.f32 %v15575_v25, %v22638_v55  ;;  %v12663_v54 = vpop.permute.xlu0 %12662 }
 0xa81   : > { %v11683_v34 = vpop.f32.mrf.mxu1  ;;  %v22785_v8 = vpop.f32.mrf.mxu0 }
 0xa82   : > { %24182 = vst [vmem:[#allocation60_spill] sm:$0xff] %v22783_v28  ;;  %24183 = vst [vmem:[#allocation13_spill] sm:$0xff] %v22785_v8  ;;  %v22788_v0 = vadd.f32 %v11683_v34, %v22641_v62 }
 0xa83   : > { %v15576_v27 = vpop.f32.mrf.mxu1  ;;  %v22790_v51 = vpop.f32.mrf.mxu0 }
 0xa84   : > { %24184 = vst [vmem:[#allocation78_spill] sm:$0xff] %v22788_v0  ;;  %24185 = vst [vmem:[#allocation11_spill] sm:$0xff] %v22790_v51  ;;  %v22793_v42 = vadd.f32 %v15576_v27, %v22644_v14  ;;  %v12659_v5 = vpop.permute.xlu0 %12658 }
 0xa85   : > { %v11686_v41 = vpop.f32.mrf.mxu1  ;;  %v22795_v21 = vpop.f32.mrf.mxu0 }
 0xa86   : > { %24186 = vst [vmem:[#allocation18_spill] sm:$0xff] %v22793_v42  ;;  %24187 = vst [vmem:[#allocation63_spill] sm:$0xff] %v22795_v21  ;;  %v22798_v63 = vadd.f32 %v11686_v41, %v22651_v6 }
 0xa87   : > { %v15579_v55 = vpop.f32.mrf.mxu1  ;;  %v22800_v18 = vpop.f32.mrf.mxu0 }
 0xa88   : > { %24188 = vst [vmem:[#allocation48_spill] sm:$0xff] %v22798_v63  ;;  %24189 = vst [vmem:[#allocation45_spill] sm:$0xff] %v22800_v18  ;;  %v22803_v46 = vadd.f32 %v15579_v55, %v22654_v11  ;;  %v22924_v17 = vpop.permute.xlu0 %12670 }
 0xa89   : > { %v11699_v62 = vpop.f32.mrf.mxu1  ;;  %v22805_v25 = vpop.f32.mrf.mxu0 }
 0xa8a   : > { %24190 = vst [vmem:[#allocation17_spill] sm:$0xff] %v22803_v46  ;;  %24191 = vst [vmem:[#allocation35_spill] sm:$0xff] %v22805_v25  ;;  %v22808_v34 = vadd.f32 %v11699_v62, %v22657_v45 }
 0xa8b   : > { %v15580_v14 = vpop.f32.mrf.mxu1  ;;  %v22810_v27 = vpop.f32.mrf.mxu0 }
 0xa8c   : > { %24192 = vst [vmem:[#allocation50_spill] sm:$0xff] %v22808_v34  ;;  %24193 = vst [vmem:[#allocation86_spill] sm:$0xff] %v22810_v27  ;;  %v22813_v21 = vadd.f32 %v15580_v14, %v22660_v57 }
 0xa8d   : > { %v11702_v6 = vpop.f32.mrf.mxu1  ;;  %v22815_v41 = vpop.f32.mrf.mxu0 }
 0xa8e   : > { %24194 = vst [vmem:[#allocation61_spill] sm:$0xff] %v22813_v21  ;;  %24195 = vst [vmem:[#allocation70_spill] sm:$0xff] %v22815_v41  ;;  %v22818_v18 = vadd.f32 %v11702_v6, %v22667_v32 }
 0xa8f   : > { %v15583_v11 = vpop.f32.mrf.mxu1  ;;  %v22820_v55 = vpop.f32.mrf.mxu0 }
 0xa90   : > { %24196 = vst [vmem:[#allocation67_spill] sm:$0xff] %v22818_v18  ;;  %24197 = vst [vmem:[#allocation62_spill] sm:$0xff] %v22820_v55  ;;  %v22823_v25 = vadd.f32 %v15583_v11, %v22670_v15 }
 0xa91   : > { %v11715_v45 = vpop.f32.mrf.mxu1  ;;  %v22825_v62 = vpop.f32.mrf.mxu0 }
 0xa92   : > { %24198 = vst [vmem:[#allocation34_spill] sm:$0xff] %v22823_v25  ;;  %24199 = vst [vmem:[#allocation90_spill] sm:$0xff] %v22825_v62  ;;  %v22828_v27 = vadd.f32 %v11715_v45, %v22673_v2 }
 0xa93   : > { %v15584_v57 = vpop.f32.mrf.mxu1  ;;  %v22830_v14 = vpop.f32.mrf.mxu0 }
 0xa94   : > { %24200 = vst [vmem:[#allocation33_spill] sm:$0xff] %v22828_v27  ;;  %24201 = vst [vmem:[#allocation52_spill] sm:$0xff] %v22830_v14  ;;  %v22833_v41 = vadd.f32 %v15584_v57, %v22676_v1 }
 0xa95   : > { %v11718_v32 = vpop.f32.mrf.mxu1  ;;  %v22835_v6 = vpop.f32.mrf.mxu0 }
 0xa96   : > { %24202 = vst [vmem:[#allocation83_spill] sm:$0xff] %v22833_v41  ;;  %24203 = vst [vmem:[#allocation42_spill] sm:$0xff] %v22835_v6  ;;  %v22838_v55 = vadd.f32 %v11718_v32, %v22683_v36 }
 0xa97   : > { %v15587_v15 = vpop.f32.mrf.mxu1  ;;  %v22840_v11 = vpop.f32.mrf.mxu0 }
 0xa98   : > { %24204 = vst [vmem:[#allocation28_spill] sm:$0xff] %v22838_v55  ;;  %24205 = vst [vmem:[#allocation47_spill] sm:$0xff] %v22840_v11  ;;  %v22843_v62 = vadd.f32 %v15587_v15, %v22686_v61 }
 0xa99   : > { %v11731_v2 = vpop.f32.mrf.mxu1  ;;  %v22848_v14 = vpop.f32.mrf.mxu0 }
 0xa9a   : > { %24206 = vst [vmem:[#allocation51_spill] sm:$0xff] %v22843_v62  ;;  %v22846_v45 = vadd.f32 %v11731_v2, %v22691_v40  ;;  %24208 = vst [vmem:[#allocation80_spill] sm:$0xff] %v22848_v14 }
 0xa9b   : > { %v15588_v1 = vpop.f32.mrf.mxu1  ;;  %v22856_v32 = vpop.f32.mrf.mxu0 }
 0xa9c   : > { %24207 = vst [vmem:[#allocation65_spill] sm:$0xff] %v22846_v45  ;;  %v22851_v57 = vadd.f32 %v15588_v1, %v22696_v30 }
 0xa9d   : > { %v11734_v6 = vpop.f32.mrf.mxu1  ;;  %v22858_v61 = vpop.f32.mrf.mxu0 }
 0xa9e   : > { %24209 = vst [vmem:[#allocation64_spill] sm:$0xff] %v22851_v57  ;;  %v22854_v36 = vadd.f32 %v11734_v6, %v22703_v23 }
 0xa9f   : > { %v15627_v11 = vpop.f32.mrf.mxu1  ;;  %v22862_v40 = vpop.f32.mrf.mxu0 }
 0xaa0   : > { %24210 = vst [vmem:[#allocation84_spill] sm:$0xff] %v22854_v36 }
 0xaa1   : > { %v12038_v55 = vpop.f32.mrf.mxu1  ;;  %v22868_v30 = vpop.f32.mrf.mxu0 }
 0xaa3   : > { %v15628_v15 = vpop.f32.mrf.mxu1  ;;  %v22874_v6 = vpop.f32.mrf.mxu0 }
 0xaa5   : > { %v22860_v62 = vpop.f32.mrf.mxu1  ;;  %v22880_v45 = vpop.f32.mrf.mxu0 }
 0xaa7   : > { %v22864_v2 = vpop.f32.mrf.mxu1  ;;  %v22886_v25 = vpop.f32.mrf.mxu0 }
 0xaa9   : > { %v22866_v14 = vpop.f32.mrf.mxu1  ;;  %v22892_v34 = vpop.f32.mrf.mxu0 }
 0xaab   : > { %v22870_v1 = vpop.f32.mrf.mxu1  ;;  %v22898_v8 = vpop.f32.mrf.mxu0 }
 0xaad   : > { %v22872_v23 = vpop.f32.mrf.mxu1  ;;  %v22904_v10 = vpop.f32.mrf.mxu0 }
 0xaae   : > { %24217 = vst [vmem:[#allocation58_spill] sm:$0xff] %v22904_v10 }
 0xaaf   : > { %v22876_v36 = vpop.f32.mrf.mxu1  ;;  %v22912_v35 = vpop.f32.mrf.mxu0 }
 0xab0   : > { %24220 = vst [vmem:[#allocation68_spill] sm:$0xff] %v22912_v35 }
 0xab1   : > { %v22878_v57 = vpop.f32.mrf.mxu1 }
 0xab3   : > { %v22882_v41 = vpop.f32.mrf.mxu1 }
 0xab5   : > { %v22884_v27 = vpop.f32.mrf.mxu1 }
 0xab7   : > { %v22888_v18 = vpop.f32.mrf.mxu1 }
 0xab8   : > { %24211 = vst [vmem:[#allocation36_spill] sm:$0xff] %v22888_v18 }
 0xab9   : > { %v22890_v21 = vpop.f32.mrf.mxu1 }
 0xaba   : > { %24212 = vst [vmem:[#allocation88_spill] sm:$0xff] %v22890_v21  ;;  %v22918_v21 = vpop.permute.xlu1 %12660 }
 0xabb   : > { %v22894_v51 = vpop.f32.mrf.mxu1 }
 0xabc   : > { %24213 = vst [vmem:[#allocation43_spill] sm:$0xff] %v22894_v51 }
 0xabd   : > { %v22896_v46 = vpop.f32.mrf.mxu1 }
 0xabe   : > { %24214 = vst [vmem:[#allocation49_spill] sm:$0xff] %v22896_v46  ;;  %v22932_v35 = vpop.permute.xlu1 %12672 }
 0xabf   : > { %v22900_v63 = vpop.f32.mrf.mxu1 }
 0xac0   : > { %24215 = vst [vmem:[#allocation30_spill] sm:$0xff] %v22900_v63  ;;  %v22920_v63 = vpop.f32.mrf.mxu0 }
 0xac1   : > { %v22902_v42 = vpop.f32.mrf.mxu1  ;;  %24223 = vst [vmem:[#allocation82_spill] sm:$0xff] %v22920_v63 }
 0xac2   : > { %24216 = vst [vmem:[#allocation31_spill] sm:$0xff] %v22902_v42  ;;  %v22928_v22 = vpop.f32.mrf.mxu0  ;;  %v22944_v43 = vpop.permute.xlu1 %12668 }
 0xac3   : > { %v22906_v0 = vpop.f32.mrf.mxu1  ;;  %24226 = vst [vmem:[#allocation87_spill] sm:$0xff] %v22928_v22  ;;  %24232 = vst [vmem:[#allocation66_spill] sm:$0xff] %v22944_v43 }
 0xac4   : > { %24218 = vst [vmem:[#allocation19_spill] sm:$0xff] %v22906_v0  ;;  %v22938_v18 = vpop.f32.mrf.mxu0 }
 0xac5   : > { %v22910_v28 = vpop.f32.mrf.mxu1  ;;  %24229 = vst [vmem:[#allocation25_spill] sm:$0xff] %v22938_v18 }
 0xac6   : > { %24219 = vst [vmem:[#allocation22_spill] sm:$0xff] %v22910_v28  ;;  %v22963_v43 = vpop.permute.xlu1 %12680 }
 0xac7   : > { %v22914_v51 = vpop.f32.mrf.mxu1 }
 0xac8   : > { %24221 = vst [vmem:[#allocation54_spill] sm:$0xff] %v22914_v51 }
 0xac9   : > { %v22916_v46 = vpop.f32.mrf.mxu1 }
 0xaca   : > { %24222 = vst [vmem:[#allocation81_spill] sm:$0xff] %v22916_v46  ;;  %v22936_v46 = vpop.permute.xlu0 %12666 }
 0xacb   : > { %v22922_v42 = vpop.f32.mrf.mxu1 }
 0xacc   : > { %24224 = vst [vmem:[#allocation32_spill] sm:$0xff] %v22922_v42 }
 0xacd   : > { %v22926_v0 = vpop.f32.mrf.mxu1 }
 0xace   : > { %24225 = vst [vmem:[#allocation85_spill] sm:$0xff] %v22926_v0  ;;  %v22946_v0 = vpop.f32.mrf.mxu0 }
 0xacf   : > { %v22930_v28 = vpop.f32.mrf.mxu1  ;;  %24233 = vst [vmem:[#allocation72_spill] sm:$0xff] %v22946_v0 }
 0xad0   : > { %24227 = vst [vmem:[#allocation89_spill] sm:$0xff] %v22930_v28  ;;  %v22950_v28 = vpop.permute.xlu0 %12678 }
 0xad1   : > { %v22934_v51 = vpop.f32.mrf.mxu1  ;;  %24235 = vst [vmem:[#allocation71_spill] sm:$0xff] %v22950_v28 }
 0xad2   : > { %24228 = vst [vmem:[#allocation75_spill] sm:$0xff] %v22934_v51  ;;  %v11961_v51 = vadd.f32 %v22688_v29, %v22701_v7 }
 0xad3   : > { %v22940_v63 = vpop.f32.mrf.mxu1 }
 0xad4   : > { %24230 = vst [vmem:[#allocation59_spill] sm:$0xff] %v22940_v63  ;;  %v12167_v10 = vadd.f32 %v15627_v11, %v11961_v51  ;;  %v11959_v63 = vadd.f32 %v22693_v37, %v22708_v56  ;;  %v22971_v29 = vpop.permute.xlu0 %12674  ;;  %v11960_v37 = vadd.f32 %v22705_v9, %v22718_v47 }
 0xad5   : > { %v22942_v42 = vpop.f32.mrf.mxu1 }
 0xad6   : > { %24231 = vst [vmem:[#allocation37_spill] sm:$0xff] %v22942_v42  ;;  %v22959_v42 = vpop.f32.mrf.mxu0  ;;  %v12165_v0 = vadd.f32 %v12038_v55, %v11959_v63  ;;  %v12383_v56 = vadd.f32 %v22856_v32, %v12167_v10  ;;  %v12166_v63 = vadd.f32 %v22860_v62, %v11960_v37  ;;  %v11966_v62 = vadd.f32 %v22720_v48, %v22733_v50 }
 0xad7   : > { %v22948_v22 = vpop.f32.mrf.mxu1  ;;  %v11964_v48 = vadd.f32 %v22725_v3, %v22738_v19 }
 0xad8   : > { %24234 = vst [vmem:[#allocation69_spill] sm:$0xff] %v22948_v22  ;;  %v11962_v22 = vadd.f32 %v22698_v59, %v22713_v20  ;;  %v22976_v51 = vpop.f32.mrf.mxu0  ;;  %v11965_v59 = vadd.f32 %v22710_v58, %v22723_v49  ;;  %v12381_v55 = vadd.f32 %v22858_v61, %v12165_v0  ;;  %v22997_v49 = vpop.permute.xlu0 %12686  ;;  %v12382_v61 = vadd.f32 %v22868_v30, %v12166_v63 }
 0xad9   : > { %v22954_v53 = vpop.f32.mrf.mxu1  ;;  %v12170_v30 = vadd.f32 %v22872_v23, %v11964_v48 }
 0xada   : > { %v12168_v7 = vadd.f32 %v15628_v15, %v11962_v22  ;;  %v11963_v22 = vadd.f32 %v22715_v26, %v22728_v52  ;;  %v12171_v9 = vadd.f32 %v22864_v2, %v11965_v59  ;;  %v22991_v58 = vpop.f32.mrf.mxu0 }
 0xadb   : > { %v22961_v18 = vpop.f32.mrf.mxu1 }
 0xadc   : > { %v12384_v32 = vadd.f32 %v22862_v40, %v12168_v7  ;;  %v12169_v52 = vadd.f32 %v22866_v14, %v11963_v22  ;;  %v12172_v40 = vadd.f32 %v22870_v1, %v11966_v62  ;;  %v12387_v14 = vadd.f32 %v22874_v6, %v12171_v9  ;;  %v23012_v37 = vpop.f32.mrf.mxu0  ;;  %v24240_v62 = vld [vmem:[#allocation10_spill] sm:$0xff] }
 0xadd   : > { %v22967_v28 = vpop.f32.mrf.mxu1  ;;  %v11967_v6 = vadd.f32 %v22735_v13, %v22748_v44 }
 0xade   : > { %24236 = vst [vmem:[#allocation73_spill] sm:$0xff] %v22967_v28  ;;  %v22984_v28 = vpop.permute.xlu1 %12676  ;;  %v23034_v59 = vpop.f32.mrf.mxu0 }
 0xadf   : > { %v15695_v11 = vpop.f32.mrf.mxu1  ;;  %v12173_v44 = vadd.f32 %v22878_v57, %v11967_v6 }
 0xae0   : > { %v12596_v20 = vadd.f32 %v15695_v11, %v12383_v56  ;;  %v12385_v56 = vadd.f32 %v22880_v45, %v12169_v52  ;;  %v11970_v45 = vadd.f32 %v22740_v16, %v22753_v39 }
 0xae1   : > { %v12467_v15 = vpop.f32.mrf.mxu1 }
 0xae2   : > { %v12756_v47 = vsel %vm3797_vm5, %v12596_v20, %v12663_v54  ;;  %v12594_v10 = vadd.f32 %v12467_v15, %v12381_v55  ;;  %v23016_v19 = vpop.permute.xlu1 %12688  ;;  %v12176_v55 = vadd.f32 %v22882_v41, %v11970_v45  ;;  %v23054_v15 = vpop.f32.mrf.mxu0  ;;  %v24237_v41 = vld [vmem:[#allocation66_spill] sm:$0xff]  ;;  %v24250_v45 = vld [vmem:[#allocation43_spill] sm:$0xff] }
 0xae3   : > { %12789 = vst.msk [vmem:[%s22993_s26 + $0x10] sm:$0xff] %vm12786_vm9, %v12756_v47  ;;  %v15696_v26 = vpop.f32.mrf.mxu1 }
 0xae4   : > { %v12754_v54 = vsel %vm3797_vm5, %v12594_v10, %v12659_v5  ;;  %v12597_v0 = vadd.f32 %v15696_v26, %v12384_v32  ;;  %v11969_v5 = vadd.f32 %v22730_v38, %v22743_v24  ;;  %v23026_v24 = vpop.permute.xlu0 %12682  ;;  %v24238_v10 = vld [vmem:[#allocation58_spill] sm:$0xff] }
 0xae5   : > { %12787 = vst.msk [vmem:[%s22993_s26] sm:$0xff] %vm12786_vm9, %v12754_v54  ;;  %v12470_v50 = vpop.f32.mrf.mxu1  ;;  %v12389_v32 = vadd.f32 %v24238_v10, %v12173_v44  ;;  %v24242_v54 = vld [vmem:[#allocation71_spill] sm:$0xff] }
 0xae6   : > { %v12757_v2 = vsel %vm3797_vm5, %v12597_v0, %v22908_v12  ;;  %v12595_v7 = vadd.f32 %v12470_v50, %v12382_v61  ;;  %v12175_v11 = vadd.f32 %v22876_v36, %v11969_v5  ;;  %v23046_v39 = vpop.permute.xlu1 %12684  ;;  %v24244_v50 = vld [vmem:[#allocation57_spill] sm:$0xff] }
 0xae7   : > { %12790 = vst.msk [vmem:[%s22993_s26 + $0x18] sm:$0xff] %vm12786_vm9, %v12757_v2  ;;  %v15699_v3 = vpop.f32.mrf.mxu1 }
 0xae8   : > { %v12755_v1 = vsel %vm3797_vm5, %v12595_v7, %v22918_v21  ;;  %v12600_v12 = vadd.f32 %v15699_v3, %v12387_v14  ;;  %v12388_v21 = vadd.f32 %v22886_v25, %v12172_v40  ;;  %v11968_v25 = vadd.f32 %v22745_v33, %v22758_v60  ;;  %v23058_v60 = vpop.permute.xlu0 %12694  ;;  %v24245_v40 = vld [vmem:[#allocation24_spill] sm:$0xff]  ;;  %v23074_v7 = vpop.f32.mrf.mxu0 }
 0xae9   : > { %12788 = vst.msk [vmem:[%s22993_s26 + $0x8] sm:$0xff] %vm12786_vm9, %v12755_v1  ;;  %v12483_v38 = vpop.f32.mrf.mxu1  ;;  %v11974_v2 = vadd.f32 %v24245_v40, %v24244_v50  ;;  %v24246_v3 = vld [vmem:[#allocation88_spill] sm:$0xff]  ;;  %v24262_v50 = vld [vmem:[#allocation31_spill] sm:$0xff] }
 0xaea   : > { %v12760_v23 = vsel %vm3797_vm5, %v12600_v12, %v22924_v17  ;;  %v12598_v63 = vadd.f32 %v12483_v38, %v12385_v56  ;;  %v12386_v17 = vadd.f32 %v22892_v34, %v12170_v30  ;;  %v11973_v34 = vadd.f32 %v22750_v31, %v22763_v4  ;;  %v24241_v4 = vld [vmem:[#allocation36_spill] sm:$0xff]  ;;  %v23078_v5 = vpop.permute.xlu1 %12696  ;;  %v24247_v56 = vld [vmem:[#allocation82_spill] sm:$0xff] }
 0xaeb   : > { %12793 = vst.msk [vmem:[%s22993_s26 + $0x30] sm:$0xff] %vm12786_vm9, %v12760_v23  ;;  %v15700_v13 = vpop.f32.mrf.mxu1  ;;  %v12174_v9 = vadd.f32 %v22884_v27, %v11968_v25  ;;  %v24243_v27 = vld [vmem:[#allocation68_spill] sm:$0xff]  ;;  %v24253_v25 = vld [vmem:[#allocation46_spill] sm:$0xff] }
 0xaec   : > { %v12758_v36 = vsel %vm3797_vm5, %v12598_v63, %v22936_v46  ;;  %v12601_v20 = vadd.f32 %v15700_v13, %v12388_v21  ;;  %v12391_v46 = vadd.f32 %v22898_v8, %v12175_v11  ;;  %v24239_v8 = vld [vmem:[#allocation26_spill] sm:$0xff]  ;;  %v12179_v52 = vadd.f32 %v24241_v4, %v11973_v34  ;;  %v24248_v38 = vld [vmem:[#allocation40_spill] sm:$0xff]  ;;  %v12691_v21 = vpop.permute.xlu0 %12690 }
 0xaed   : > { %12791 = vst.msk [vmem:[%s22993_s26 + $0x20] sm:$0xff] %vm12786_vm9, %v12758_v36  ;;  %v12486_v16 = vpop.f32.mrf.mxu1  ;;  %v11971_v26 = vadd.f32 %v24240_v62, %v24239_v8  ;;  %v12392_v48 = vadd.f32 %v24243_v27, %v12176_v55  ;;  %v12390_v6 = vadd.f32 %v24247_v56, %v12174_v9  ;;  %v24249_v11 = vld [vmem:[#allocation16_spill] sm:$0xff]  ;;  %v12180_v13 = vadd.f32 %v24250_v45, %v11974_v2  ;;  %v23094_v55 = vpop.f32.mrf.mxu0  ;;  %v24255_v9 = vld [vmem:[#allocation25_spill] sm:$0xff]  ;;  %v24258_v8 = vld [vmem:[#allocation30_spill] sm:$0xff] }
 0xaee   : > { %v12761_v57 = vsel %vm3797_vm5, %v12601_v20, %v22932_v35  ;;  %v12599_v22 = vadd.f32 %v12486_v16, %v12386_v17  ;;  %v11972_v23 = vadd.f32 %v24249_v11, %v24248_v38  ;;  %v24251_v20 = vld [vmem:[#allocation87_spill] sm:$0xff]  ;;  %v24259_v4 = vld [vmem:[#allocation72_spill] sm:$0xff] }
 0xaef   : > { %12794 = vst.msk [vmem:[%s22993_s26 + $0x38] sm:$0xff] %vm12786_vm9, %v12761_v57  ;;  %v15703_v33 = vpop.f32.mrf.mxu1  ;;  %v12177_v30 = vadd.f32 %v24246_v3, %v11971_v26  ;;  %v12395_v17 = vadd.f32 %v24251_v20, %v12179_v52  ;;  %v12396_v52 = vadd.f32 %v24259_v4, %v12180_v13  ;;  %v24263_v3 = vld [vmem:[#allocation48_spill] sm:$0xff]  ;;  %v24265_v56 = vld [vmem:[#allocation19_spill] sm:$0xff] }
 0xaf0   : > { %v12759_v47 = vsel %vm3797_vm5, %v12599_v22, %v24237_v41  ;;  %v12604_v35 = vadd.f32 %v15703_v33, %v12391_v46  ;;  %v24254_v22 = vld [vmem:[#allocation49_spill] sm:$0xff]  ;;  %v24256_v41 = vld [vmem:[#allocation78_spill] sm:$0xff]  ;;  %v24275_v4 = vld [vmem:[#allocation67_spill] sm:$0xff] }
 0xaf1   : > { %12792 = vst.msk [vmem:[%s22993_s26 + $0x28] sm:$0xff] %vm12786_vm9, %v12759_v47  ;;  %v12499_v31 = vpop.f32.mrf.mxu1  ;;  %v12178_v46 = vadd.f32 %v24254_v22, %v11972_v23  ;;  %v24257_v47 = vld [vmem:[#allocation79_spill] sm:$0xff] }
 0xaf2   : > { %v12764_v0 = vsel %vm3797_vm5, %v12604_v35, %v24242_v54  ;;  %v12602_v61 = vadd.f32 %v12499_v31, %v12389_v32  ;;  %v11975_v35 = vadd.f32 %v24257_v47, %v24256_v41  ;;  %v12693_v32 = vpop.permute.xlu1 %12692  ;;  %v24261_v54 = vld [vmem:[#allocation12_spill] sm:$0xff]  ;;  %v24273_v41 = vld [vmem:[#allocation45_spill] sm:$0xff] }
 0xaf3   : > { %12797 = vst.msk [vmem:[%s22993_s26 + $0x50] sm:$0xff] %vm12786_vm9, %v12764_v0  ;;  %v15704_v14 = vpop.f32.mrf.mxu1 }
 0xaf4   : > { %v12762_v1 = vsel %vm3797_vm5, %v12602_v61, %v22971_v29  ;;  %v12605_v12 = vadd.f32 %v15704_v14, %v12392_v48  ;;  %v24252_v29 = vld [vmem:[#allocation60_spill] sm:$0xff]  ;;  %v23112_v61 = vpop.f32.mrf.mxu0  ;;  %v12703_v48 = vpop.permute.xlu0 %12702  ;;  %v12181_v40 = vadd.f32 %v24262_v50, %v11975_v35 }
 0xaf5   : > { %12795 = vst.msk [vmem:[%s22993_s26 + $0x40] sm:$0xff] %vm12786_vm9, %v12762_v1  ;;  %v12502_v63 = vpop.f32.mrf.mxu1  ;;  %v11977_v16 = vadd.f32 %v24253_v25, %v24252_v29  ;;  %v24269_v25 = vld [vmem:[#allocation50_spill] sm:$0xff] }
 0xaf6   : > { %v12765_v44 = vsel %vm3797_vm5, %v12605_v12, %v22963_v43  ;;  %v12603_v36 = vadd.f32 %v12502_v63, %v12390_v6  ;;  %v12393_v43 = vadd.f32 %v24255_v9, %v12177_v30  ;;  %v24264_v30 = vld [vmem:[#allocation13_spill] sm:$0xff]  ;;  %v23130_v13 = vpop.f32.mrf.mxu0 }
 0xaf7   : > { %12798 = vst.msk [vmem:[%s22993_s26 + $0x58] sm:$0xff] %vm12786_vm9, %v12765_v44  ;;  %v15707_v57 = vpop.f32.mrf.mxu1  ;;  %v12183_v62 = vadd.f32 %v24258_v8, %v11977_v16  ;;  %v11976_v1 = vadd.f32 %v24264_v30, %v24263_v3  ;;  %v24266_v63 = vld [vmem:[#allocation17_spill] sm:$0xff]  ;;  %v12705_v44 = vpop.permute.xlu1 %12704 }
 0xaf8   : > { %v12763_v34 = vsel %vm3797_vm5, %v12603_v36, %v22984_v28  ;;  %v12608_v33 = vadd.f32 %v15707_v57, %v12395_v17  ;;  %v24260_v28 = vld [vmem:[#allocation18_spill] sm:$0xff]  ;;  %v12699_v22 = vpop.permute.xlu0 %12698  ;;  %v24280_v30 = vld [vmem:[#allocation85_spill] sm:$0xff] }
 0xaf9   : > { %12796 = vst.msk [vmem:[%s22993_s26 + $0x48] sm:$0xff] %vm12786_vm9, %v12763_v34  ;;  %v12515_v10 = vpop.f32.mrf.mxu1  ;;  %v11978_v0 = vadd.f32 %v24261_v54, %v24260_v28  ;;  %v12399_v23 = vadd.f32 %v22976_v51, %v12183_v62  ;;  %v24268_v36 = vld [vmem:[#allocation22_spill] sm:$0xff]  ;;  %v24270_v51 = vld [vmem:[#allocation63_spill] sm:$0xff]  ;;  %v24277_v54 = vld [vmem:[#allocation32_spill] sm:$0xff] }
 0xafa   : > { %v12768_v26 = vsel %vm3797_vm5, %v12608_v33, %v22997_v49  ;;  %v12606_v31 = vadd.f32 %v12515_v10, %v12393_v43  ;;  %v12394_v49 = vadd.f32 %v22959_v42, %v12178_v46  ;;  %v12182_v20 = vadd.f32 %v24268_v36, %v11976_v1  ;;  %v24271_v46 = vld [vmem:[#allocation54_spill] sm:$0xff]  ;;  %v24274_v10 = vld [vmem:[#allocation81_spill] sm:$0xff] }
 0xafb   : > { %12801 = vst.msk [vmem:[%s22993_s26 + $0x70] sm:$0xff] %vm12786_vm9, %v12768_v26  ;;  %v15708_v27 = vpop.f32.mrf.mxu1  ;;  %v12184_v6 = vadd.f32 %v24265_v56, %v11978_v0  ;;  %v11979_v16 = vadd.f32 %v24270_v51, %v24269_v25  ;;  %v12701_v28 = vpop.permute.xlu1 %12700 }
 0xafc   : > { %v12766_v2 = vsel %vm3797_vm5, %v12606_v31, %v23026_v24  ;;  %v12609_v14 = vadd.f32 %v15708_v27, %v12396_v52  ;;  %v24267_v24 = vld [vmem:[#allocation11_spill] sm:$0xff]  ;;  %v12398_v31 = vadd.f32 %v23034_v59, %v12182_v20  ;;  %v12711_v3 = vpop.permute.xlu0 %12710 }
 0xafd   : > { %12799 = vst.msk [vmem:[%s22993_s26 + $0x60] sm:$0xff] %vm12786_vm9, %v12766_v2  ;;  %v12518_v12 = vpop.f32.mrf.mxu1  ;;  %v11981_v45 = vadd.f32 %v24267_v24, %v24266_v63  ;;  %v12400_v43 = vadd.f32 %v23012_v37, %v12184_v6  ;;  %v12185_v8 = vadd.f32 %v24274_v10, %v11979_v16  ;;  %v24279_v2 = vld [vmem:[#allocation86_spill] sm:$0xff]  ;;  %v24284_v20 = vld [vmem:[#allocation83_spill] sm:$0xff]  ;;  %v24291_v10 = vld [vmem:[#allocation52_spill] sm:$0xff] }
 0xafe   : > { %v12769_v38 = vsel %vm3797_vm5, %v12609_v14, %v23016_v19  ;;  %v12607_v11 = vadd.f32 %v12518_v12, %v12394_v49  ;;  %v12397_v19 = vadd.f32 %v22991_v58, %v12181_v40  ;;  %v12350_v58 = vpop.f32.mrf.mxu0 }
 0xaff   : > { %12802 = vst.msk [vmem:[%s22993_s26 + $0x78] sm:$0xff] %vm12786_vm9, %v12769_v38  ;;  %v15711_v42 = vpop.f32.mrf.mxu1  ;;  %v12187_v34 = vadd.f32 %v24271_v46, %v11981_v45  ;;  %v12401_v6 = vadd.f32 %v23074_v7, %v12185_v8  ;;  %v24282_v38 = vld [vmem:[#allocation70_spill] sm:$0xff] }
 0xb00   : > { %v12767_v17 = vsel %vm3797_vm5, %v12607_v11, %v23046_v39  ;;  %v12612_v29 = vadd.f32 %v15711_v42, %v12399_v23  ;;  %v24272_v39 = vld [vmem:[#allocation61_spill] sm:$0xff]  ;;  %v15686_v59 = vpop.f32.mrf.mxu0  ;;  %v24288_v46 = vld [vmem:[#allocation90_spill] sm:$0xff] }
 0xb01   : > { %12800 = vst.msk [vmem:[%s22993_s26 + $0x68] sm:$0xff] %vm12786_vm9, %v12767_v17  ;;  %v12531_v57 = vpop.f32.mrf.mxu1  ;;  %v11982_v47 = vadd.f32 %v24273_v41, %v24272_v39  ;;  %v12403_v40 = vadd.f32 %v23054_v15, %v12187_v34  ;;  %v24283_v23 = vld [vmem:[#allocation89_spill] sm:$0xff] }
 0xb02   : > { %v12772_v33 = vsel %vm3797_vm5, %v12612_v29, %v23058_v60  ;;  %v12610_v9 = vadd.f32 %v12531_v57, %v12397_v19  ;;  %v24276_v60 = vld [vmem:[#allocation35_spill] sm:$0xff]  ;;  %v12353_v36 = vpop.f32.mrf.mxu0  ;;  %v12713_v29 = vpop.permute.xlu1 %12712 }
 0xb03   : > { %12805 = vst.msk [vmem:[%s22993_s26 + $0x90] sm:$0xff] %vm12786_vm9, %v12772_v33  ;;  %v15712_v35 = vpop.f32.mrf.mxu1  ;;  %v11980_v52 = vadd.f32 %v24276_v60, %v24275_v4  ;;  %v12188_v0 = vadd.f32 %v24277_v54, %v11982_v47  ;;  %v24286_v19 = vld [vmem:[#allocation75_spill] sm:$0xff] }
 0xb04   : > { %v12770_v62 = vsel %vm3797_vm5, %v12610_v9, %v12691_v21  ;;  %v12613_v26 = vadd.f32 %v15712_v35, %v12400_v43  ;;  %v24278_v21 = vld [vmem:[#allocation34_spill] sm:$0xff]  ;;  %v12707_v9 = vpop.permute.xlu0 %12706  ;;  %v24289_v43 = vld [vmem:[#allocation59_spill] sm:$0xff] }
 0xb05   : > { %12803 = vst.msk [vmem:[%s22993_s26 + $0x80] sm:$0xff] %vm12786_vm9, %v12770_v62  ;;  %v12534_v37 = vpop.f32.mrf.mxu1  ;;  %v11985_v14 = vadd.f32 %v24279_v2, %v24278_v21  ;;  %v12186_v1 = vadd.f32 %v24280_v30, %v11980_v52  ;;  %v12404_v42 = vadd.f32 %v23094_v55, %v12188_v0  ;;  %v15689_v55 = vpop.f32.mrf.mxu0  ;;  %v24292_v62 = vld [vmem:[#allocation37_spill] sm:$0xff] }
 0xb06   : > { %v12773_v27 = vsel %vm3797_vm5, %v12613_v26, %v23078_v5  ;;  %v12611_v50 = vadd.f32 %v12534_v37, %v12398_v31  ;;  %v24281_v5 = vld [vmem:[#allocation33_spill] sm:$0xff]  ;;  %v24294_v37 = vld [vmem:[#allocation42_spill] sm:$0xff] }
 0xb07   : > { %12806 = vst.msk [vmem:[%s22993_s26 + $0x98] sm:$0xff] %vm12786_vm9, %v12773_v27  ;;  %v15715_v49 = vpop.f32.mrf.mxu1  ;;  %v11983_v11 = vadd.f32 %v24282_v38, %v24281_v5  ;;  %v12191_v63 = vadd.f32 %v24283_v23, %v11985_v14  ;;  %v12402_v57 = vadd.f32 %v23112_v61, %v12186_v1  ;;  %v24293_v52 = vld [vmem:[#allocation65_spill] sm:$0xff]  ;;  %v12709_v14 = vpop.permute.xlu1 %12708  ;;  %v24298_v5 = vld [vmem:[#allocation84_spill] sm:$0xff] }
 0xb08   : > { %v12771_v12 = vsel %vm3797_vm5, %v12611_v50, %v12693_v32  ;;  %v12616_v56 = vadd.f32 %v15715_v49, %v12403_v40  ;;  %v24285_v32 = vld [vmem:[#allocation62_spill] sm:$0xff]  ;;  %v11987_v54 = vadd.f32 %v24294_v37, %v24293_v52  ;;  %v12715_v0 = vpop.permute.xlu0 %12714  ;;  %v24295_v27 = vld [vmem:[#allocation69_spill] sm:$0xff]  ;;  %v24296_v49 = vld [vmem:[#allocation64_spill] sm:$0xff] }
 0xb09   : > { %12804 = vst.msk [vmem:[%s22993_s26 + $0x88] sm:$0xff] %vm12786_vm9, %v12771_v12  ;;  %v12547_v15 = vpop.f32.mrf.mxu1  ;;  %v11986_v17 = vadd.f32 %v24285_v32, %v24284_v20  ;;  %v12189_v25 = vadd.f32 %v24286_v19, %v11983_v11  ;;  %v12407_v35 = vadd.f32 %v23130_v13, %v12191_v63  ;;  %v24299_v38 = vld [vmem:[#allocation80_spill] sm:$0xff]  ;;  %v24300_v20 = vld [vmem:[#allocation73_spill] sm:$0xff] }
 0xb0a   : > { %v12776_v24 = vsel %vm3797_vm5, %v12616_v56, %v12703_v48  ;;  %v12614_v45 = vadd.f32 %v12547_v15, %v12401_v6  ;;  %v24287_v48 = vld [vmem:[#allocation28_spill] sm:$0xff]  ;;  %v12193_v1 = vadd.f32 %v22954_v53, %v11987_v54  ;;  %v11988_v11 = vadd.f32 %v24299_v38, %v24298_v5 }
 0xb0b   : > { %12809 = vst.msk [vmem:[%s22993_s26 + $0xb0] sm:$0xff] %vm12786_vm9, %v12776_v24  ;;  %v15716_v7 = vpop.f32.mrf.mxu1  ;;  %v11984_v34 = vadd.f32 %v24288_v46, %v24287_v48  ;;  %v12192_v39 = vadd.f32 %v24289_v43, %v11986_v17  ;;  %v12405_v60 = vadd.f32 %v12350_v58, %v12189_v25  ;;  %v12717_v53 = vpop.permute.xlu1 %12716 }
 0xb0c   : > { %v12774_v51 = vsel %vm3797_vm5, %v12614_v45, %v12699_v22  ;;  %v12617_v16 = vadd.f32 %v15716_v7, %v12404_v42  ;;  %v24290_v22 = vld [vmem:[#allocation51_spill] sm:$0xff]  ;;  %v12719_v42 = vpop.permute.xlu0 %12718  ;;  %v12194_v32 = vadd.f32 %v24300_v20, %v11988_v11 }
 0xb0d   : > { %12807 = vst.msk [vmem:[%s22993_s26 + $0xa0] sm:$0xff] %vm12786_vm9, %v12774_v51  ;;  %v12550_v33 = vpop.f32.mrf.mxu1  ;;  %v11989_v8 = vadd.f32 %v24291_v10, %v24290_v22  ;;  %v12190_v26 = vadd.f32 %v24292_v62, %v11984_v34  ;;  %v12408_v2 = vadd.f32 %v15686_v59, %v12192_v39 }
 0xb0e   : > { %v12777_v41 = vsel %vm3797_vm5, %v12617_v16, %v12705_v44  ;;  %v12615_v47 = vadd.f32 %v12550_v33, %v12402_v57  ;;  %v12366_v44 = vpop.f32.mrf.mxu0 }
 0xb0f   : > { %12810 = vst.msk [vmem:[%s22993_s26 + $0xb8] sm:$0xff] %vm12786_vm9, %v12777_v41  ;;  %v15719_v61 = vpop.f32.mrf.mxu1  ;;  %v12195_v50 = vadd.f32 %v24295_v27, %v11989_v8  ;;  %v12406_v6 = vadd.f32 %v12353_v36, %v12190_v26  ;;  %v12409_v36 = vadd.f32 %v12366_v44, %v12193_v1  ;;  %v12721_v34 = vpop.permute.xlu1 %12720 }
 0xb10   : > { %v12775_v31 = vsel %vm3797_vm5, %v12615_v47, %v12701_v28  ;;  %v12620_v4 = vadd.f32 %v15719_v61, %v12407_v35  ;;  %v24297_v28 = vld [vmem:[#allocation47_spill] sm:$0xff] }
 0xb11   : > { %12808 = vst.msk [vmem:[%s22993_s26 + $0xa8] sm:$0xff] %vm12786_vm9, %v12775_v31  ;;  %v12563_v13 = vpop.f32.mrf.mxu1  ;;  %v11990_v30 = vadd.f32 %v24297_v28, %v24296_v49  ;;  %v12411_v15 = vadd.f32 %v15689_v55, %v12195_v50 }
 0xb12   : > { %v12780_v40 = vsel %vm3797_vm5, %v12620_v4, %v12711_v3  ;;  %v12618_v21 = vadd.f32 %v12563_v13, %v12405_v60  ;;  %v15690_v3 = vpop.f32.mrf.mxu0 }
 0xb13   : > { %12813 = vst.msk [vmem:[%s22993_s26 + $0xd0] sm:$0xff] %vm12786_vm9, %v12780_v40  ;;  %v15720_v58 = vpop.f32.mrf.mxu1  ;;  %v12196_v23 = vadd.f32 %v22961_v18, %v11990_v30 }
 0xb14   : > { %v12778_v12 = vsel %vm3797_vm5, %v12618_v21, %v12707_v9  ;;  %v12621_v56 = vadd.f32 %v15720_v58, %v12408_v2  ;;  %v12369_v19 = vpop.f32.mrf.mxu0 }
 0xb15   : > { %12811 = vst.msk [vmem:[%s22993_s26 + $0xc0] sm:$0xff] %vm12786_vm9, %v12778_v12  ;;  %v12566_v59 = vpop.f32.mrf.mxu1  ;;  %v12410_v57 = vadd.f32 %v12369_v19, %v12194_v32 }
 0xb16   : > { %v12781_v63 = vsel %vm3797_vm5, %v12621_v56, %v12713_v29  ;;  %v12619_v24 = vadd.f32 %v12566_v59, %v12406_v6  ;;  %v12412_v29 = vadd.f32 %v15690_v3, %v12196_v23 }
 0xb17   : > { %12814 = vst.msk [vmem:[%s22993_s26 + $0xd8] sm:$0xff] %vm12786_vm9, %v12781_v63  ;;  %v15723_v45 = vpop.f32.mrf.mxu1 }
 0xb18   : > { %v12779_v17 = vsel %vm3797_vm5, %v12619_v24, %v12709_v14  ;;  %v12624_v7 = vadd.f32 %v15723_v45, %v12411_v15 }
 0xb19   : > { %12812 = vst.msk [vmem:[%s22993_s26 + $0xc8] sm:$0xff] %vm12786_vm9, %v12779_v17  ;;  %v12579_v18 = vpop.f32.mrf.mxu1 }
 0xb1a   : > { %v12784_v25 = vsel %vm3797_vm5, %v12624_v7, %v12719_v42  ;;  %v12622_v51 = vadd.f32 %v12579_v18, %v12409_v36 }
 0xb1b   : > { %12817 = vst.msk [vmem:[%s22993_s26 + $0xf0] sm:$0xff] %vm12786_vm9, %v12784_v25  ;;  %v15724_v16 = vpop.f32.mrf.mxu1 }
 0xb1c   : > { %v12782_v48 = vsel %vm3797_vm5, %v12622_v51, %v12715_v0  ;;  %v12625_v46 = vadd.f32 %v15724_v16, %v12412_v29 }
 0xb1d   : > { %12815 = vst.msk [vmem:[%s22993_s26 + $0xe0] sm:$0xff] %vm12786_vm9, %v12782_v48  ;;  %v12582_v55 = vpop.f32.mrf.mxu1 }
 0xb1e   : > { %v12785_v33 = vsel %vm3797_vm5, %v12625_v46, %v12721_v34  ;;  %v12623_v9 = vadd.f32 %v12582_v55, %v12410_v57 }
 0xb1f   : > { %12818 = vst.msk [vmem:[%s22993_s26 + $0xf8] sm:$0xff] %vm12786_vm9, %v12785_v33 }
 0xb20   : > { %v12783_v43 = vsel %vm3797_vm5, %v12623_v9, %v12717_v53 }
 0xb21   : > { %12816 = vst.msk [vmem:[%s22993_s26 + $0xe8] sm:$0xff] %vm12786_vm9, %v12783_v43 }
 0xb22   : > { %15858 = shalt.err (!%p15855_p3)
}
 0xb23   : > { %s15859_s3 = scalar_lea.hbm %s23231_s5, 4096  ;;  %s15863_s0 = scalar_lea.hbm %s23308_s25, 8192 }
 0xb24   : > { %p15860_p4 = scmp.ne.s32.totalorder %s23231_s5, %s15859_s3  ;;  %p15864_p9 = scmp.lt.s32.totalorder %s23231_s5, %s23308_s25 }
 0xb25   : > { %p15865_p10 = scmp.lt.s32.totalorder %s15863_s0, %s15859_s3 }
 0xb26   : > { %p15861_p7 = pnand %p15860_p4, %p16079_p5 }
 0xb27   : > { %p15866_p11 = por %p15865_p10, %p15864_p9 }
 0xb28   : > { %p15862_p8 = pneg %p15861_p7 }
 0xb2a   : > { %p15867_p12 = pnand %p15866_p11, %p15862_p8 }
 0xb2c   : > { %15870 = shalt.err (!%p15867_p12)
}
 0xb2d   : > { %s15910_s1 = smov 128   ;;  %s24301_s6 = smov 8  }
 0xb2e   : > { %15727 = dma.vmem_to_hbm [thread:$0]  (%p16079_p5), %s23235_s8, 4096, %s23231_s5, %s23242_s7, %s15910_s1, %s15910_s1, %s24301_s6  }
 0xb2f PF: > { %p15733_p13 = scmp.ge.s32.totalorder %s15905_s30, 2  ;;  %s12848_s10 = sand.u32 1, %s15893_s29  }
 0xb30   : > { %s12849_s11 = scalar_lea.sflag [#allocation4], %s12848_s10 }
 0xb31   : > { %p15730_p0 = pnand %p15733_p13, %p16083_p6 }
 0xb33   : > { %p15731_p1 = pneg %p15730_p0 }
 0xb35   : > { %15888 = dma.done.wait (%p15731_p1), %s12849_s11, 4096  }
 0xb36   : > { %15890 = vsyncadd (%p15731_p1), %s12849_s11, 4294963200  ;;  %s24302_s30 = sld [smem:[#allocation7_spill]]  ;;  %s24305_s29 = smov %s15897_s2 }
 0xb37   : > { %s24303_s12 = sld [smem:[#allocation6_spill]] }
 0xb38   : > { %s24304_s6 = sld [smem:[#allocation8_spill]] }
 0xb3c   : > { %p35_p2 = scmp.ge.s32.totalorder %s24302_s30, 4  }
 0xb3d   : > { %s24306_s2 = smov %s24303_s12 }
 0xb3e   :  { %37 = sbr.rel (!%p35_p2) target bundleno = 17 (0x11), region = 188 }
 0xb43   :  { %12854 = vsyncpa [#allocation4], 1 }
 0xb44   :  { %12856 = vsyncpa [#allocation4 + $0x1], 1 }

</bundles_post_ra>
